<compile_context>
chip_gen: v5e
topology: v5e:2x2
jax: 0.10.0
libtpu: 0.0.40
codegen_flags: <defaults>
</compile_context>

<pallas_src>
import jax
import jax.numpy as jnp
from jax.experimental import pallas as pl
from jax.experimental.pallas import tpu as pltpu

D_IN = 7 * 7 * 1024    # 50176
D_HID = 2048
D_OUT = 7 * 7 * 30     # 1470
D_OUT_PAD = 1536       # lane-dense (multiple of 128) padded output width


def _pick_config():
    """Pick kernel-1 tiles + VMEM cap per TPU generation.

    v5e/v6e: 128 MiB VMEM, 1 TensorCore  -> biggest tiles (grid 1x14,
             28 MiB weight tile, 56 MiB double-buffered).
    v7x:      64 MiB VMEM, 2 TensorCores -> keep the parallel j axis >= 2
             blocks for megacore and a 7 MiB weight tile (14 MiB 2x-buffered).
    """
    vmem_bytes = 64 << 20
    try:
        info = pltpu.get_tpu_info()
        vmem_bytes = int(getattr(info, "vmem_capacity_bytes", vmem_bytes))
    except Exception:
        pass
    if vmem_bytes >= (100 << 20):           # v5e / v6e
        return 3584, 2048, 100 << 20
    return 1792, 1024, 48 << 20             # v7x (and conservative fallback)


# ---------------- Kernel 1: Linear(50176 -> 2048) + LeakyReLU(0.1) -----------
# Output block is VMEM-resident across the k (reduction) axis, so we
# accumulate directly into o_ref (f32) — no scratch accumulator needed.
def linear_lrelu_kernel(x_ref, w_ref, b_ref, o_ref):
    k = pl.program_id(1)

    @pl.when(k == 0)
    def _():
        o_ref[...] = jnp.zeros_like(o_ref)

    o_ref[...] += jnp.dot(x_ref[...], w_ref[...],
                          preferred_element_type=jnp.float32)

    @pl.when(k == pl.num_programs(1) - 1)
    def _():
        h = o_ref[...] + b_ref[...]
        o_ref[...] = jnp.where(h > 0, h, 0.1 * h)


# ---------------- Kernel 2: Linear(2048 -> 1536 padded) + sigmoid ------------
def linear_sigmoid_kernel(x_ref, w_ref, b_ref, o_ref):
    k = pl.program_id(0)

    @pl.when(k == 0)
    def _():
        o_ref[...] = jnp.zeros_like(o_ref)

    o_ref[...] += jnp.dot(x_ref[...], w_ref[...],
                          preferred_element_type=jnp.float32)

    @pl.when(k == pl.num_programs(0) - 1)
    def _():
        o_ref[...] = jax.nn.sigmoid(o_ref[...] + b_ref[...])


def yolo_head(x, w1, b1, w2, b2):
    """x: (B, 50176) f32 -> (B, 7, 7, 30) f32 (sigmoid activated)."""
    B = x.shape[0]
    tk, tn, vmem_cap = _pick_config()

    # ----- Linear 1 + LeakyReLU: tiled over hidden (parallel) and K (reduce) --
    h = pl.pallas_call(
        linear_lrelu_kernel,
        out_shape=jax.ShapeDtypeStruct((B, D_HID), jnp.float32),
        grid_spec=pltpu.PrefetchScalarGridSpec(
            num_scalar_prefetch=0,
            grid=(D_HID // tn, D_IN // tk),
            in_specs=[
                pl.BlockSpec((B, tk), lambda j, k: (0, k)),
                pl.BlockSpec((tk, tn), lambda j, k: (k, j)),
                pl.BlockSpec((1, tn), lambda j, k: (0, j)),
            ],
            out_specs=pl.BlockSpec((B, tn), lambda j, k: (0, j)),
        ),
        compiler_params=pltpu.CompilerParams(
            dimension_semantics=("parallel", "arbitrary"),
            vmem_limit_bytes=vmem_cap),
        cost_estimate=pl.CostEstimate(
            flops=2 * B * D_IN * D_HID,
            transcendentals=0,
            bytes_accessed=4 * (D_IN * D_HID + B * D_IN + B * D_HID + D_HID)),
    )(x, w1, b1.reshape(1, D_HID))

    # Dropout(0.5): identity in eval mode.

    # ----- Linear 2 + sigmoid: reduction pipelined over D_HID, lane-dense out -
    # Zero-pad the 1470-wide output to 1536 so stores are unmasked, slice after.
    w2p = jnp.pad(w2, ((0, 0), (0, D_OUT_PAD - D_OUT)))
    b2p = jnp.pad(b2, (0, D_OUT_PAD - D_OUT)).reshape(1, D_OUT_PAD)
    tk2 = 512

    out = pl.pallas_call(
        linear_sigmoid_kernel,
        out_shape=jax.ShapeDtypeStruct((B, D_OUT_PAD), jnp.float32),
        grid_spec=pltpu.PrefetchScalarGridSpec(
            num_scalar_prefetch=0,
            grid=(D_HID // tk2,),
            in_specs=[
                pl.BlockSpec((B, tk2), lambda k: (0, k)),
                pl.BlockSpec((tk2, D_OUT_PAD), lambda k: (k, 0)),
                pl.BlockSpec((1, D_OUT_PAD), lambda k: (0, 0)),
            ],
            out_specs=pl.BlockSpec((B, D_OUT_PAD), lambda k: (0, 0)),
        ),
        compiler_params=pltpu.CompilerParams(
            dimension_semantics=("arbitrary",),
            vmem_limit_bytes=32 << 20),
        cost_estimate=pl.CostEstimate(
            flops=2 * B * D_HID * D_OUT_PAD,
            transcendentals=B * D_OUT_PAD,
            bytes_accessed=4 * (D_HID * D_OUT_PAD + B * D_HID
                                + B * D_OUT_PAD + D_OUT_PAD)),
    )(h, w2p, b2p)

    return out[:, :D_OUT].reshape(B, 7, 7, 30)


def _reference(x, w1, b1, w2, b2):
    h = x @ w1 + b1
    h = jnp.where(h > 0, h, 0.1 * h)
    z = h @ w2 + b2
    return jax.nn.sigmoid(z).reshape(x.shape[0], 7, 7, 30)


if __name__ == "__main__":
    key = jax.random.PRNGKey(0)
    k_x, k_w1, k_b1, k_w2, k_b2 = jax.random.split(key, 5)

    B = 2
    # Deterministic params; PyTorch Linear-style uniform(-1/sqrt(in), 1/sqrt(in)).
    s1 = 1.0 / (D_IN ** 0.5)
    s2 = 1.0 / (D_HID ** 0.5)
    x = jax.random.normal(k_x, (B, D_IN), dtype=jnp.float32)
    w1 = jax.random.uniform(k_w1, (D_IN, D_HID), jnp.float32, -s1, s1)
    b1 = jax.random.uniform(k_b1, (D_HID,), jnp.float32, -s1, s1)
    w2 = jax.random.uniform(k_w2, (D_HID, D_OUT), jnp.float32, -s2, s2)
    b2 = jax.random.uniform(k_b2, (D_OUT,), jnp.float32, -s2, s2)

    out = jax.block_until_ready(yolo_head(x, w1, b1, w2, b2))
    ref = jax.block_until_ready(_reference(x, w1, b1, w2, b2))

    assert out.shape == (B, 7, 7, 30), out.shape
    assert jnp.allclose(out, ref, rtol=2e-4, atol=2e-5), "mismatch vs reference"
    print("KERNEL_OK")
</pallas_src>

<mosaic_0001>
module attributes {stable_mosaic.version = 11 : i64} {
  func.func @linear_lrelu_kernel(%arg0: i32, %arg1: i32, %arg2: memref<2x1792xf32, #tpu.memory_space<vmem>>, %arg3: memref<1792x1024xf32, #tpu.memory_space<vmem>>, %arg4: memref<1x1024xf32, #tpu.memory_space<vmem>>, %arg5: memref<2x1024xf32, #tpu.memory_space<vmem>>) attributes {dimension_semantics = [#tpu.dimension_semantics<parallel>, #tpu.dimension_semantics<arbitrary>], iteration_bounds = array<i64: 2, 28>, scalar_prefetch = 0 : i64, scratch_operands = 0 : i64, tpu.core_type = #tpu.core_type<tc>, window_params = [{transform_indices = @transform_0, window_bounds = array<i64: 2, 1792>}, {transform_indices = @transform_1, window_bounds = array<i64: 1792, 1024>}, {transform_indices = @transform_2, window_bounds = array<i64: 1, 1024>}, {transform_indices = @transform_3, window_bounds = array<i64: 2, 1024>}]} {
    %c0_i32 = arith.constant 0 : i32
    %0 = arith.cmpi eq, %arg1, %c0_i32 : i32
    %1 = arith.extui %0 : i1 to i32
    %c0_i32_0 = arith.constant 0 : i32
    %2 = arith.cmpi ne, %1, %c0_i32_0 : i32
    scf.if %2 {
      %cst_9 = arith.constant 0.000000e+00 : f32
      %12 = vector.broadcast %cst_9 : f32 to vector<2x1024xf32>
      %c0_10 = arith.constant 0 : index
      %c0_11 = arith.constant 0 : index
      %13 = vector.load %arg5[%c0_10, %c0_11] : memref<2x1024xf32, #tpu.memory_space<vmem>>, vector<2x1024xf32>
      tpu.vector_store %arg5[%c0_10, %c0_11], %12 {strides = array<i32>} : memref<2x1024xf32, #tpu.memory_space<vmem>>, vector<2x1024xf32>,
    } else {
    }
    %c0 = arith.constant 0 : index
    %c0_1 = arith.constant 0 : index
    %3 = vector.load %arg5[%c0, %c0_1] : memref<2x1024xf32, #tpu.memory_space<vmem>>, vector<2x1024xf32>
    %c0_2 = arith.constant 0 : index
    %c0_3 = arith.constant 0 : index
    %4 = vector.load %arg2[%c0_2, %c0_3] : memref<2x1792xf32, #tpu.memory_space<vmem>>, vector<2x1792xf32>
    %c0_4 = arith.constant 0 : index
    %c0_5 = arith.constant 0 : index
    %5 = vector.load %arg3[%c0_4, %c0_5] : memref<1792x1024xf32, #tpu.memory_space<vmem>>, vector<1792x1024xf32>
    %cst = arith.constant dense<0.000000e+00> : vector<2x1024xf32>
    %6 = tpu.matmul %4, %5, %cst {dimension_numbers = #tpu.dot_dimension_numbers<[1], [0], [0], [1], [0, 0, 1, 1], [], []>} : vector<2x1792xf32>, vector<1792x1024xf32>, vector<2x1024xf32> -> vector<2x1024xf32>
    %7 = arith.addf %3, %6 : vector<2x1024xf32>
    %c0_6 = arith.constant 0 : index
    %c0_7 = arith.constant 0 : index
    %8 = vector.load %arg5[%c0_6, %c0_7] : memref<2x1024xf32, #tpu.memory_space<vmem>>, vector<2x1024xf32>
    tpu.vector_store %arg5[%c0_6, %c0_7], %7 {strides = array<i32>} : memref<2x1024xf32, #tpu.memory_space<vmem>>, vector<2x1024xf32>,
    %c27_i32 = arith.constant 27 : i32
    %9 = arith.cmpi eq, %arg1, %c27_i32 : i32
    %10 = arith.extui %9 : i1 to i32
    %c0_i32_8 = arith.constant 0 : i32
    %11 = arith.cmpi ne, %10, %c0_i32_8 : i32
    scf.if %11 {
      %c0_9 = arith.constant 0 : index
      %c0_10 = arith.constant 0 : index
      %12 = vector.load %arg5[%c0_9, %c0_10] : memref<2x1024xf32, #tpu.memory_space<vmem>>, vector<2x1024xf32>
      %c0_11 = arith.constant 0 : index
      %c0_12 = arith.constant 0 : index
      %13 = vector.load %arg4[%c0_11, %c0_12] : memref<1x1024xf32, #tpu.memory_space<vmem>>, vector<1x1024xf32>
      %14 = vector.broadcast %13 : vector<1x1024xf32> to vector<2x1024xf32>
      %15 = arith.addf %12, %14 : vector<2x1024xf32>
      %cst_13 = arith.constant 0.000000e+00 : f32
      %16 = vector.broadcast %cst_13 : f32 to vector<2x1024xf32>
      %17 = arith.cmpf ogt, %15, %16 : vector<2x1024xf32>
      %cst_14 = arith.constant 1.000000e-01 : f32
      %18 = vector.broadcast %cst_14 : f32 to vector<2x1024xf32>
      %19 = arith.mulf %18, %15 : vector<2x1024xf32>
      %20 = arith.select %17, %15, %19 : vector<2x1024xi1>, vector<2x1024xf32>
      %c0_15 = arith.constant 0 : index
      %c0_16 = arith.constant 0 : index
      %21 = vector.load %arg5[%c0_15, %c0_16] : memref<2x1024xf32, #tpu.memory_space<vmem>>, vector<2x1024xf32>
      tpu.vector_store %arg5[%c0_15, %c0_16], %20 {strides = array<i32>} : memref<2x1024xf32, #tpu.memory_space<vmem>>, vector<2x1024xf32>,
    } else {
    }
    return
  }
  func.func @transform_0(%arg0: i32, %arg1: i32) -> (i32, i32) {
    %c0_i32 = arith.constant 0 : i32
    %c0_i32_0 = arith.constant 0 : i32
    return %c0_i32, %arg1 : i32, i32
  }
  func.func @transform_1(%arg0: i32, %arg1: i32) -> (i32, i32) {
    %c0_i32 = arith.constant 0 : i32
    return %arg1, %arg0 : i32, i32
  }
  func.func @transform_2(%arg0: i32, %arg1: i32) -> (i32, i32) {
    %c0_i32 = arith.constant 0 : i32
    %c0_i32_0 = arith.constant 0 : i32
    return %c0_i32, %arg0 : i32, i32
  }
  func.func @transform_3(%arg0: i32, %arg1: i32) -> (i32, i32) {
    %c0_i32 = arith.constant 0 : i32
    %c0_i32_0 = arith.constant 0 : i32
    return %c0_i32, %arg0 : i32, i32
  }
}

</mosaic_0001>

<bundles_post_ra>
// kernel: tpu_custom_call.1
= control target key start
LH: loop header
LB: loop body
LE: loop exit
PB: predicated region body
PF: predicated region fallthrough
CT: control target
= control target key end

     0   :  { %s7468_s0 = inlined_call_operand.hbm [shape: f32[2,50176], index: 0, kind: input, shape index: {}]   ;;  %s7469_s1 = inlined_call_operand.hbm [shape: f32[50176,2048], index: 1, kind: input, shape index: {}]   ;;  %s7470_s2 = inlined_call_operand.hbm [shape: f32[1,2048], index: 2, kind: input, shape index: {}]   ;;  %s7471_s3 = inlined_call_operand.hbm [shape: f32[2,2048], index: 3, kind: output, shape index: {}]  }
   0x1   :  { %7486 = sst [smem:[#allocation24_spill]] %s7468_s0 }
   0x2   :  { %7487 = sst [smem:[#allocation25_spill]] %s7469_s1 }
   0x3   :  { %7488 = sst [smem:[#allocation26_spill]] %s7471_s3 }
   0x4   :  { %8 = vsyncpa [#allocation3], 0 }
   0x5   :  { %10 = vsyncpa [#allocation3 + $0x1], 0 }
   0x6   :  { %11 = vsyncpa [#allocation6], 0 }
   0x7   :  { %13 = vsyncpa [#allocation6 + $0x1], 0 }
   0x8   :  { %14 = vsyncpa [#allocation4], 0 }
   0x9   :  { %16 = vsyncpa [#allocation4 + $0x1], 0  ;;  %s5040_s12 = smov 0   ;;  %s5042_s13 = smov 0  }
   0xa   :  { %s5044_s14 = smov 0   ;;  %s5046_s15 = smov 0  }
   0xb   :  { %s5048_s16 = smov 0   ;;  %s5050_s17 = smov 0  }
   0xc   :  { %s5052_s18 = smov 0   ;;  %s5054_s19 = smov 0  }
   0xd   :  { %s5056_s20 = smov 0   ;;  %s5058_s21 = smov 0  }
   0xe   :  { %s5060_s22 = smov 0   ;;  %s5062_s23 = smov 0  }
   0xf   :  { %s5064_s24 = smov 0   ;;  %s5066_s25 = smov 0  }
  0x10 LB: > { %7489 = sst [smem:[#allocation13_spill]] %s4982_s17  ;;  %p49_p0 = scmp.eq.s32.totalorder %s5014_s25, 0  ;;  %s5014_s25 = sphi %s5066_s25, %s22_s25   ;;  %s5010_s24 = sphi %s5064_s24, %s7536_s24   ;;  %s5006_s23 = sphi %s5062_s23, %s7535_s23   ;;  %s5002_s22 = sphi %s5060_s22, %s7524_s22   ;;  %s4998_s21 = sphi %s5058_s21, %s7523_s21   ;;  %s4994_s20 = sphi %s5056_s20, %s7522_s20   ;;  %s4990_s19 = sphi %s5054_s19, %s7534_s19   ;;  %s4986_s18 = sphi %s5052_s18, %s7533_s18   ;;  %s4982_s17 = sphi %s5050_s17, %s7520_s17   ;;  %s4978_s16 = sphi %s5048_s16, %s7532_s16   ;;  %s4974_s15 = sphi %s5046_s15, %s7531_s15   ;;  %s4970_s14 = sphi %s5044_s14, %s7530_s14   ;;  %s4966_s13 = sphi %s5042_s13, %s7529_s13   ;;  %s4962_s12 = sphi %s5040_s12, %s7528_s12  }
  0x11   : > { %7490 = sst [smem:[#allocation14_spill]] %s4994_s20  ;;  %p76_p1 = scmp.ne.s32.totalorder %s4982_s17, %s4978_s16 }
  0x12   : > { %7491 = sst [smem:[#allocation15_spill]] %s5006_s23  ;;  %p82_p2 = scmp.ne.s32.totalorder %s4978_s16, %s4974_s15 }
  0x13   : > { %7492 = sst [smem:[#allocation16_spill]] %s5010_s24  ;;  %p78_p3 = por %p76_p1, %p49_p0 }
  0x14   : > { %p4632_p4 = scmp.lt.s32.totalorder %s5014_s25, 56  ;;  %s178_s28 = sand.u32 1, %s5014_s25  }
  0x15   : > { %s180_s29 = sand.u32 1, %s4982_s17   ;;  %s7472_s4 = sshll.u32 %s5010_s24, 3 }
  0x16   : > { %s4607_s30 = smul.u32 14336, %s180_s29  ;;  %p5126_p5 = pnand %p4632_p4, %p78_p3 }
  0x17   : > { %s4604_s5 = smul.u32 3584, %s5006_s23  ;;  %s7494_s1 = sld [smem:[#allocation25_spill]] }
  0x18   : > { %s182_s8 = scalar_lea.vmem [#allocation5], %s4607_s30  ;;  %p4593_p6 = scmp.ge.s32.totalorder %s5014_s25, 1 }
  0x19   : > { %s188_s7 = sadd.s32 %s4604_s5, %s7472_s4  ;;  %s193_s9 = sshll.u32 %s182_s8, 4  ;;  %s194_s9 = int_to_ptr.vmem [resolvable:$true] %s193_s9 }
  0x1a   : > { %s4590_s10 = sshll.u32 %s188_s7, 3  ;;  %s5136_s30 = scalar_lea.sflag [#allocation6], %s178_s28 }
  0x1b   : > { %s5016_s5 = smov 2048   ;;  %s5017_s7 = smov 1024  }
  0x1c   : > { %s5018_s8 = smov 64   ;;  %p220_p7 = scmp.lt.s32.totalorder %s5014_s25, 57 }
  0x1d   : > { %s190_s27 = scalar_lea.hbm %s7494_s1, %s4590_s10  ;;  %s31_s28 = sadd.s32 1, %s5006_s23 }
  0x1e   : > { %s191_s26 = sshll.u32 %s190_s27, 4  ;;  %p5142_p8 = pnand %p4593_p6, %p220_p7  ;;  %s192_s26 = int_to_ptr.hbm [resolvable:$true] %s191_s26 }
  0x1f   : > { %4624 = dma.hbm_to_vmem [thread:$0]  (!%p5126_p5), %s192_s26, 229376, %s194_s9, %s5136_s30, %s5016_s5, %s5017_s7, %s5018_s8  }
  0x20   : > { %s5147_s27 = sadd.s32 4294967295, %s5014_s25   ;;  %p32_p9 = scmp.ge.s32.totalorder %s31_s28, 28 }
  0x21   : > { %s41_s11 = sadd.s32 1, %s4994_s20  ;;  %p48_p10 = scmp.ne.s32.totalorder %s4994_s20, %s4990_s19 }
  0x22   : > { %p54_p11 = scmp.ne.s32.totalorder %s4990_s19, %s4986_s18  ;;  %s7538_s28 = smov (%p32_p9, %s31_s28), 0 }
  0x23   : > { %7496 = sst [smem:[#allocation17_spill]] %s7538_s28  ;;  %s7497_s26 = sadd.s32 1, %s5010_s24 }
  0x24   : > { %s7540_s26 = smov (!%p32_p9, %s7497_s26), %s5010_s24  ;;  %s38_s6 = ssub.s32 %s5006_s23, %s7538_s28 }
  0x25   : > { %p5164_p12 = por %p49_p0, %p48_p10  ;;  %p36_p13 = scmp.ge.s32.totalorder %s7540_s26, 2 }
  0x26   : > { %p39_p1 = scmp.eq.s32.totalorder %s38_s6, 0  ;;  %p55_p3 = scmp.eq.s32.totalorder %s5147_s27, 0 }
  0x27   : > { %s158_s18 = sand.u32 1, %s4994_s20   ;;  %s7542_s26 = smov (%p36_p13, %s7540_s26), 0 }
  0x28   : > { %7499 = sst [smem:[#allocation18_spill]] %s7542_s26  ;;  %p5177_p5 = por %p55_p3, %p54_p11 }
  0x29   : > { %s5173_s29 = scalar_select %p39_p1, %s4994_s20, %s41_s11  }
  0x2a   : > { %s65_s7 = ssub.s32 %s5010_s24, %s7542_s26  ;;  %p5188_p6 = por %p82_p2, %p55_p3 }
  0x2b   : > { %7500 = sst [smem:[#allocation19_spill]] %s5173_s29  ;;  %s66_s8 = sor.u32 %s65_s7, %s38_s6 }
  0x2c   : > { %p67_p7 = scmp.eq.s32.totalorder %s66_s8, 0  ;;  %s4606_s11 = smul.u32 28, %s158_s18 }
  0x2d   : > { %p4619_p9 = pnand %p4632_p4, %p5164_p12  ;;  %s7503_s1 = sadd.s32 1, %s4982_s17 }
  0x2e   : > { %s5199_s26 = scalar_select %p67_p7, %s4982_s17, %s7503_s1  }
  0x2f   : > { %s4603_s15 = smul.u32 28, %s5006_s23  ;;  %s162_s6 = scalar_lea.vmem [#allocation2], %s4606_s11 }
  0x30   : > { %7504 = sst [smem:[#allocation20_spill]] %s5199_s26  ;;  %s171_s28 = sshll.u32 %s162_s6, 4  ;;  %s172_s28 = int_to_ptr.vmem [resolvable:$true] %s171_s28 }
  0x31   : > { %s7505_s0 = sld [smem:[#allocation24_spill]]  ;;  %s159_s3 = scalar_lea.sflag [#allocation3], %s158_s18 }
  0x32   : > { %s4584_s1 = sadd.s32 4294967294, %s5014_s25   ;;  %p93_p2 = scmp.eq.s32.totalorder %s65_s7, 0 }
  0x33   : > { %s95_s26 = sadd.s32 1, %s4970_s14  ;;  %p102_p10 = scmp.ne.s32.totalorder %s4970_s14, %s4966_s13 }
  0x34   : > { %s5210_s23 = scalar_select %p93_p2, %s4970_s14, %s95_s26  }
  0x35   : > { %p5214_p11 = por %p102_p10, %p49_p0  ;;  %p108_p12 = scmp.ne.s32.totalorder %s4966_s13, %s4962_s12 }
  0x36   : > { %p132_p13 = scmp.eq.s32.totalorder %s5147_s27, 55  ;;  %p138_p1 = scmp.eq.s32.totalorder %s4584_s1, 55 }
  0x37   : > { %s167_s8 = scalar_lea.hbm %s7505_s0, %s4603_s15  ;;  %p5223_p7 = por %p108_p12, %p55_p3 }
  0x38   : > { %s169_s9 = sshll.u32 %s167_s8, 4  ;;  %s205_s20 = sand.u32 1, %s4970_s14   ;;  %s170_s9 = int_to_ptr.hbm [resolvable:$true] %s169_s9 }
  0x39   : > { %4621 = dma.hbm_to_vmem [thread:$0]  (!%p4619_p9), %s170_s9, 448, %s172_s28, %s159_s3  }
  0x3a   : > { %p5228_p9 = por %p132_p13, %p102_p10  ;;  %p5232_p2 = por %p138_p1, %p108_p12 }
  0x3b   : > { %s4591_s18 = sshll.u32 %s205_s20, 3  ;;  %s7510_s29 = sshll.u32 %s5010_s24, 3 }
  0x3c   : > { %s211_s6 = scalar_lea.hbm %s7470_s2, %s7510_s29  ;;  %s207_s9 = scalar_lea.vmem [#allocation7], %s4591_s18 }
  0x3d   : > { %s213_s8 = sshll.u32 %s211_s6, 4  ;;  %s215_s1 = sshll.u32 %s207_s9, 4  ;;  %s214_s8 = int_to_ptr.hbm [resolvable:$true] %s213_s8  ;;  %s216_s1 = int_to_ptr.vmem [resolvable:$true] %s215_s1 }
  0x3e   : > { %p4625_p0 = pnand %p4632_p4, %p5214_p11  ;;  %224 = sbr.rel (%p5142_p8) target bundleno = 1708 (0x6ac), region = 32 }
  0x40   : > { %4627 = dma.hbm_to_vmem [thread:$0]  (!%p4625_p0), %s214_s8, 128, %s216_s1, %s5136_s30  }
  0x43   : > { %s226_s20 = sand.u32 1, %s4990_s19  }
  0x44   : > { %s4608_s0 = smul.u32 28, %s226_s20  ;;  %s227_s24 = scalar_lea.sflag [#allocation3], %s226_s20 }
  0x46   : > { %s5249_s17 = scalar_lea.vmem [#allocation2], %s4608_s0 }
  0x47   : > { %4945 = dma.done.wait (%p5177_p5), %s227_s24, 448  }
  0x48   : > { %4947 = vsyncadd (%p5177_p5), %s227_s24, 4294966848  ;;  %s236_s11 = sand.u32 1, %s5147_s27   ;;  %s238_s30 = sand.u32 1, %s4978_s16  }
  0x49   : > { %s4609_s18 = smul.u32 14336, %s238_s30  ;;  %s237_s10 = scalar_lea.sflag [#allocation6], %s236_s11 }
  0x4b   : > { %s5257_s29 = scalar_lea.vmem [#allocation5], %s4609_s18 }
  0x4c   : > { %4949 = dma.done.wait (%p5188_p6), %s237_s10, 229376  }
  0x4d   : > { %4951 = vsyncadd (%p5188_p6), %s237_s10, 4294737920  ;;  %s5264_s0 = sand.u32 1, %s4966_s13  }
  0x4e   : > { %s4594_s24 = sshll.u32 %s5264_s0, 3 }
  0x4f   : > { %s5267_s5 = scalar_lea.vmem [#allocation7], %s4594_s24 }
  0x50   : > { %4953 = dma.done.wait (%p5223_p7), %s237_s10, 128  }
  0x51   : > { %4955 = vsyncadd (%p5223_p7), %s237_s10, 4294967168  ;;  %s4595_s27 = sshll.u32 %s5264_s0, 4  ;;  %p4596_p4 = scmp.ne.s32.totalorder %s4998_s21, 0 }
  0x52   : > { %s5274_s7 = scalar_lea.vmem [#allocation8], %s4595_s27 }
  0x53   : > { %292 = sbr.rel (%p4596_p4) target bundleno = 91 (0x5b), region = 48 }
  0x58   : > { %v5019_v0 = vmov 0.0  }
  0x59   : > { %293 = vst [vmem:[%s5274_s7] sm:$0xff] %v5019_v0 }
  0x5a   : > { %294 = vst [vmem:[%s5274_s7 + $0x8] sm:$0xff] %v5019_v0 }
  0x5b PF: > { %v421_v1 = vld [vmem:[%s5257_s29 + $0x3c0] sm:$0xff]  ;;  %vm4384_vm0 = vcmask 1041408   ;;  %vm4386_vm1 = vcmask 1045508   ;;  %vm4388_vm2 = vcmask 1043456   ;;  %p4597_p8 = scmp.ne.s32.totalorder %s4998_s21, 27 }
  0x5c   : > { %v677_v2 = vld [vmem:[%s5257_s29 + $0xbc0] sm:$0xff]  ;;  %2130 = vmatpush.msra.mxu0 %v421_v1 }
  0x5d   : > { %v413_v3 = vld [vmem:[%s5257_s29 + $0x380] sm:$0xff]  ;;  %2170 = vmatpush.msra.mxu2 %v677_v2 }
  0x5e   : > { %v549_v4 = vld [vmem:[%s5257_s29 + $0x7c0] sm:$0xff]  ;;  %2131 = vmatpush.msra.mxu0 %v413_v3 }
  0x5f   : > { %v669_v5 = vld [vmem:[%s5257_s29 + $0xb80] sm:$0xff]  ;;  %2150 = vmatpush.msra.mxu1 %v549_v4 }
  0x60   : > { %v805_v6 = vld [vmem:[%s5257_s29 + $0xfc0] sm:$0xff]  ;;  %2171 = vmatpush.msra.mxu2 %v669_v5 }
  0x61   : > { %2190 = vmatpush.msra.mxu3 %v805_v6  ;;  %v405_v7 = vld [vmem:[%s5257_s29 + $0x340] sm:$0xff] }
  0x62   : > { %v541_v8 = vld [vmem:[%s5257_s29 + $0x780] sm:$0xff]  ;;  %2132 = vmatpush.msra.mxu0 %v405_v7 }
  0x63   : > { %v661_v9 = vld [vmem:[%s5257_s29 + $0xb40] sm:$0xff]  ;;  %2151 = vmatpush.msra.mxu1 %v541_v8 }
  0x64   : > { %v797_v10 = vld [vmem:[%s5257_s29 + $0xf80] sm:$0xff]  ;;  %2172 = vmatpush.msra.mxu2 %v661_v9 }
  0x65   : > { %v533_v11 = vld [vmem:[%s5257_s29 + $0x740] sm:$0xff]  ;;  %2191 = vmatpush.msra.mxu3 %v797_v10 }
  0x66   : > { %v397_v12 = vld [vmem:[%s5257_s29 + $0x300] sm:$0xff]  ;;  %2152 = vmatpush.msra.mxu1 %v533_v11 }
  0x67   : > { %v653_v13 = vld [vmem:[%s5257_s29 + $0xb00] sm:$0xff]  ;;  %2133 = vmatpush.msra.mxu0 %v397_v12 }
  0x68   : > { %v789_v14 = vld [vmem:[%s5257_s29 + $0xf40] sm:$0xff]  ;;  %2173 = vmatpush.msra.mxu2 %v653_v13 }
  0x69   : > { %v525_v15 = vld [vmem:[%s5257_s29 + $0x700] sm:$0xff]  ;;  %2192 = vmatpush.msra.mxu3 %v789_v14 }
  0x6a   : > { %v781_v16 = vld [vmem:[%s5257_s29 + $0xf00] sm:$0xff]  ;;  %2153 = vmatpush.msra.mxu1 %v525_v15 }
  0x6b   : > { %v389_v17 = vld [vmem:[%s5257_s29 + $0x2c0] sm:$0xff]  ;;  %2193 = vmatpush.msra.mxu3 %v781_v16 }
  0x6c   : > { %v645_v18 = vld [vmem:[%s5257_s29 + $0xac0] sm:$0xff]  ;;  %2134 = vmatpush.msra.mxu0 %v389_v17 }
  0x6d   : > { %v517_v19 = vld [vmem:[%s5257_s29 + $0x6c0] sm:$0xff]  ;;  %2174 = vmatpush.msra.mxu2 %v645_v18 }
  0x6e   : > { %v773_v20 = vld [vmem:[%s5257_s29 + $0xec0] sm:$0xff]  ;;  %2154 = vmatpush.msra.mxu1 %v517_v19 }
  0x6f   : > { %v381_v21 = vld [vmem:[%s5257_s29 + $0x280] sm:$0xff]  ;;  %2194 = vmatpush.msra.mxu3 %v773_v20 }
  0x70   : > { %v637_v22 = vld [vmem:[%s5257_s29 + $0xa80] sm:$0xff]  ;;  %2135 = vmatpush.msra.mxu0 %v381_v21 }
  0x71   : > { %v509_v23 = vld [vmem:[%s5257_s29 + $0x680] sm:$0xff]  ;;  %2175 = vmatpush.msra.mxu2 %v637_v22 }
  0x72   : > { %v765_v24 = vld [vmem:[%s5257_s29 + $0xe80] sm:$0xff]  ;;  %2155 = vmatpush.msra.mxu1 %v509_v23 }
  0x73   : > { %v373_v25 = vld [vmem:[%s5257_s29 + $0x240] sm:$0xff]  ;;  %2195 = vmatpush.msra.mxu3 %v765_v24 }
  0x74   : > { %v629_v26 = vld [vmem:[%s5257_s29 + $0xa40] sm:$0xff]  ;;  %2136 = vmatpush.msra.mxu0 %v373_v25 }
  0x75   : > { %v501_v27 = vld [vmem:[%s5257_s29 + $0x640] sm:$0xff]  ;;  %2176 = vmatpush.msra.mxu2 %v629_v26 }
  0x76   : > { %v757_v28 = vld [vmem:[%s5257_s29 + $0xe40] sm:$0xff]  ;;  %2156 = vmatpush.msra.mxu1 %v501_v27 }
  0x77   : > { %v365_v29 = vld [vmem:[%s5257_s29 + $0x200] sm:$0xff]  ;;  %2196 = vmatpush.msra.mxu3 %v757_v28 }
  0x78   : > { %v621_v30 = vld [vmem:[%s5257_s29 + $0xa00] sm:$0xff]  ;;  %2137 = vmatpush.msra.mxu0 %v365_v29 }
  0x79   : > { %v493_v31 = vld [vmem:[%s5257_s29 + $0x600] sm:$0xff]  ;;  %2177 = vmatpush.msra.mxu2 %v621_v30 }
  0x7a   : > { %v749_v32 = vld [vmem:[%s5257_s29 + $0xe00] sm:$0xff]  ;;  %2157 = vmatpush.msra.mxu1 %v493_v31 }
  0x7b   : > { %v357_v33 = vld [vmem:[%s5257_s29 + $0x1c0] sm:$0xff]  ;;  %2197 = vmatpush.msra.mxu3 %v749_v32 }
  0x7c   : > { %v613_v34 = vld [vmem:[%s5257_s29 + $0x9c0] sm:$0xff]  ;;  %2138 = vmatpush.msra.mxu0 %v357_v33 }
  0x7d   : > { %v485_v35 = vld [vmem:[%s5257_s29 + $0x5c0] sm:$0xff]  ;;  %2178 = vmatpush.msra.mxu2 %v613_v34 }
  0x7e   : > { %v741_v36 = vld [vmem:[%s5257_s29 + $0xdc0] sm:$0xff]  ;;  %2158 = vmatpush.msra.mxu1 %v485_v35 }
  0x7f   : > { %v349_v37 = vld [vmem:[%s5257_s29 + $0x180] sm:$0xff]  ;;  %2198 = vmatpush.msra.mxu3 %v741_v36 }
  0x80   : > { %v605_v38 = vld [vmem:[%s5257_s29 + $0x980] sm:$0xff]  ;;  %2139 = vmatpush.msra.mxu0 %v349_v37 }
  0x81   : > { %v477_v39 = vld [vmem:[%s5257_s29 + $0x580] sm:$0xff]  ;;  %2179 = vmatpush.msra.mxu2 %v605_v38 }
  0x82   : > { %v733_v40 = vld [vmem:[%s5257_s29 + $0xd80] sm:$0xff]  ;;  %2159 = vmatpush.msra.mxu1 %v477_v39 }
  0x83   : > { %v341_v41 = vld [vmem:[%s5257_s29 + $0x140] sm:$0xff]  ;;  %2199 = vmatpush.msra.mxu3 %v733_v40  ;;  %v298_v40 = vld [vmem:[%s5249_s17 + $0x8] sm:$0xff] }
  0x84   : > { %v597_v42 = vld [vmem:[%s5257_s29 + $0x940] sm:$0xff]  ;;  %2140 = vmatpush.msra.mxu0 %v341_v41  ;;  %2099 = vst [vmem:[#allocation1 + $0x20] ss:$4 sm:$0xff] %v298_v40 }
  0x85   : > { %v469_v43 = vld [vmem:[%s5257_s29 + $0x540] sm:$0xff]  ;;  %2180 = vmatpush.msra.mxu2 %v597_v42 }
  0x86   : > { %v725_v44 = vld [vmem:[%s5257_s29 + $0xd40] sm:$0xff]  ;;  %2160 = vmatpush.msra.mxu1 %v469_v43  ;;  %v299_v43 = vld [vmem:[%s5249_s17 + $0x10] sm:$0xff] }
  0x87   : > { %v333_v45 = vld [vmem:[%s5257_s29 + $0x100] sm:$0xff]  ;;  %2200 = vmatpush.msra.mxu3 %v725_v44 }
  0x88   : > { %v589_v46 = vld [vmem:[%s5257_s29 + $0x900] sm:$0xff]  ;;  %2141 = vmatpush.msra.mxu0 %v333_v45 }
  0x89   : > { %v461_v47 = vld [vmem:[%s5257_s29 + $0x500] sm:$0xff]  ;;  %2181 = vmatpush.msra.mxu2 %v589_v46 }
  0x8a   : > { %v717_v48 = vld [vmem:[%s5257_s29 + $0xd00] sm:$0xff]  ;;  %2161 = vmatpush.msra.mxu1 %v461_v47 }
  0x8b   : > { %v325_v49 = vld [vmem:[%s5257_s29 + $0xc0] sm:$0xff]  ;;  %2201 = vmatpush.msra.mxu3 %v717_v48 }
  0x8c   : > { %v581_v50 = vld [vmem:[%s5257_s29 + $0x8c0] sm:$0xff]  ;;  %2142 = vmatpush.msra.mxu0 %v325_v49 }
  0x8d   : > { %v453_v51 = vld [vmem:[%s5257_s29 + $0x4c0] sm:$0xff]  ;;  %2182 = vmatpush.msra.mxu2 %v581_v50 }
  0x8e   : > { %v709_v52 = vld [vmem:[%s5257_s29 + $0xcc0] sm:$0xff]  ;;  %2162 = vmatpush.msra.mxu1 %v453_v51 }
  0x8f   : > { %v317_v53 = vld [vmem:[%s5257_s29 + $0x80] sm:$0xff]  ;;  %2202 = vmatpush.msra.mxu3 %v709_v52 }
  0x90   : > { %v573_v54 = vld [vmem:[%s5257_s29 + $0x880] sm:$0xff]  ;;  %2143 = vmatpush.msra.mxu0 %v317_v53 }
  0x91   : > { %v445_v55 = vld [vmem:[%s5257_s29 + $0x480] sm:$0xff]  ;;  %2183 = vmatpush.msra.mxu2 %v573_v54 }
  0x92   : > { %v701_v56 = vld [vmem:[%s5257_s29 + $0xc80] sm:$0xff]  ;;  %2163 = vmatpush.msra.mxu1 %v445_v55 }
  0x93   : > { %v309_v57 = vld [vmem:[%s5257_s29 + $0x40] sm:$0xff]  ;;  %2203 = vmatpush.msra.mxu3 %v701_v56 }
  0x94   : > { %v565_v58 = vld [vmem:[%s5257_s29 + $0x840] sm:$0xff]  ;;  %2144 = vmatpush.msra.mxu0 %v309_v57 }
  0x95   : > { %v437_v59 = vld [vmem:[%s5257_s29 + $0x440] sm:$0xff]  ;;  %2184 = vmatpush.msra.mxu2 %v565_v58 }
  0x96   : > { %v693_v60 = vld [vmem:[%s5257_s29 + $0xc40] sm:$0xff]  ;;  %2164 = vmatpush.msra.mxu1 %v437_v59 }
  0x97   : > { %v301_v61 = vld [vmem:[%s5257_s29] sm:$0xff]  ;;  %2204 = vmatpush.msra.mxu3 %v693_v60 }
  0x98   : > { %v557_v62 = vld [vmem:[%s5257_s29 + $0x800] sm:$0xff]  ;;  %2145 = vmatpush.msra.mxu0 %v301_v61  ;;  %v5407_v61 = vld.sshfl [vmem:[#allocation1 + $0x30] sm:$0xff pattern:$0x73625140] }
  0x99   : > { %v933_v63 = vld [vmem:[%s5257_s29 + $0x13c0] sm:$0xff]  ;;  %2185 = vmatpush.msra.mxu2 %v557_v62  ;;  %7512 = vst [vmem:[#allocation22_spill] sm:$0xff] %v5407_v61 }
  0x9a   : > { %v1189_v0 = vld [vmem:[%s5257_s29 + $0x1bc0] sm:$0xff]  ;;  %2210 = vmatpush.msrb.mxu0 %v933_v63  ;;  %v5411_v63 = vld.sshfl [vmem:[#allocation1 + $0x38] sm:$0xff pattern:$0x73625140] }
  0x9b   : > { %v429_v1 = vld [vmem:[%s5257_s29 + $0x400] sm:$0xff]  ;;  %2250 = vmatpush.msrb.mxu2 %v1189_v0  ;;  %7513 = vst [vmem:[#allocation23_spill] sm:$0xff] %v5411_v63  ;;  %v5413_v0 = vld.sshfl [vmem:[#allocation1 + $0x28] sm:$0xff pattern:$0x73625140] }
  0x9c   : > { %v685_v2 = vld [vmem:[%s5257_s29 + $0xc00] sm:$0xff]  ;;  %2165 = vmatpush.msra.mxu1 %v429_v1 }
  0x9d   : > { %v925_v3 = vld [vmem:[%s5257_s29 + $0x1380] sm:$0xff]  ;;  %2205 = vmatpush.msra.mxu3 %v685_v2 }
  0x9e   : > { %v1061_v4 = vld [vmem:[%s5257_s29 + $0x17c0] sm:$0xff]  ;;  %2211 = vmatpush.msrb.mxu0 %v925_v3 }
  0x9f   : > { %v1181_v5 = vld [vmem:[%s5257_s29 + $0x1b80] sm:$0xff]  ;;  %2230 = vmatpush.msrb.mxu1 %v1061_v4 }
  0xa0   : > { %v1317_v6 = vld [vmem:[%s5257_s29 + $0x1fc0] sm:$0xff]  ;;  %2251 = vmatpush.msrb.mxu2 %v1181_v5 }
  0xa1   : > { %v917_v7 = vld [vmem:[%s5257_s29 + $0x1340] sm:$0xff]  ;;  %2270 = vmatpush.msrb.mxu3 %v1317_v6 }
  0xa2   : > { %v1053_v8 = vld [vmem:[%s5257_s29 + $0x1780] sm:$0xff]  ;;  %2212 = vmatpush.msrb.mxu0 %v917_v7 }
  0xa3   : > { %v1173_v9 = vld [vmem:[%s5257_s29 + $0x1b40] sm:$0xff]  ;;  %2231 = vmatpush.msrb.mxu1 %v1053_v8 }
  0xa4   : > { %v1309_v10 = vld [vmem:[%s5257_s29 + $0x1f80] sm:$0xff]  ;;  %2252 = vmatpush.msrb.mxu2 %v1173_v9 }
  0xa5   : > { %v909_v11 = vld [vmem:[%s5257_s29 + $0x1300] sm:$0xff]  ;;  %2271 = vmatpush.msrb.mxu3 %v1309_v10 }
  0xa6   : > { %v1045_v12 = vld [vmem:[%s5257_s29 + $0x1740] sm:$0xff]  ;;  %2213 = vmatpush.msrb.mxu0 %v909_v11 }
  0xa7   : > { %v1165_v13 = vld [vmem:[%s5257_s29 + $0x1b00] sm:$0xff]  ;;  %2232 = vmatpush.msrb.mxu1 %v1045_v12 }
  0xa8   : > { %v1301_v14 = vld [vmem:[%s5257_s29 + $0x1f40] sm:$0xff]  ;;  %2253 = vmatpush.msrb.mxu2 %v1165_v13 }
  0xa9   : > { %v901_v15 = vld [vmem:[%s5257_s29 + $0x12c0] sm:$0xff]  ;;  %2272 = vmatpush.msrb.mxu3 %v1301_v14 }
  0xaa   : > { %v1037_v16 = vld [vmem:[%s5257_s29 + $0x1700] sm:$0xff]  ;;  %2214 = vmatpush.msrb.mxu0 %v901_v15 }
  0xab   : > { %v1157_v17 = vld [vmem:[%s5257_s29 + $0x1ac0] sm:$0xff]  ;;  %2233 = vmatpush.msrb.mxu1 %v1037_v16 }
  0xac   : > { %v1293_v18 = vld [vmem:[%s5257_s29 + $0x1f00] sm:$0xff]  ;;  %2254 = vmatpush.msrb.mxu2 %v1157_v17 }
  0xad   : > { %v893_v19 = vld [vmem:[%s5257_s29 + $0x1280] sm:$0xff]  ;;  %2273 = vmatpush.msrb.mxu3 %v1293_v18 }
  0xae   : > { %v1029_v20 = vld [vmem:[%s5257_s29 + $0x16c0] sm:$0xff]  ;;  %2215 = vmatpush.msrb.mxu0 %v893_v19 }
  0xaf   : > { %v1149_v21 = vld [vmem:[%s5257_s29 + $0x1a80] sm:$0xff]  ;;  %2234 = vmatpush.msrb.mxu1 %v1029_v20 }
  0xb0   : > { %v1285_v22 = vld [vmem:[%s5257_s29 + $0x1ec0] sm:$0xff]  ;;  %2255 = vmatpush.msrb.mxu2 %v1149_v21 }
  0xb1   : > { %v297_v23 = vld [vmem:[%s5249_s17] sm:$0xff]  ;;  %2274 = vmatpush.msrb.mxu3 %v1285_v22  ;;  %v300_v60 = vld [vmem:[%s5249_s17 + $0x18] sm:$0xf] }
  0xb2   : > { %v885_v24 = vld [vmem:[%s5257_s29 + $0x1240] sm:$0xff]  ;;  %2097 = vst [vmem:[#allocation1] ss:$4 sm:$0xff] %v297_v23 }
  0xb3   : > { %v1021_v25 = vld [vmem:[%s5257_s29 + $0x1680] sm:$0xff]  ;;  %2216 = vmatpush.msrb.mxu0 %v885_v24 }
  0xb4   : > { %v1141_v26 = vld [vmem:[%s5257_s29 + $0x1a40] sm:$0xff]  ;;  %2235 = vmatpush.msrb.mxu1 %v1021_v25 }
  0xb5   : > { %v1277_v27 = vld [vmem:[%s5257_s29 + $0x1e80] sm:$0xff]  ;;  %2256 = vmatpush.msrb.mxu2 %v1141_v26 }
  0xb6   : > { %v877_v28 = vld [vmem:[%s5257_s29 + $0x1200] sm:$0xff]  ;;  %2275 = vmatpush.msrb.mxu3 %v1277_v27 }
  0xb7   : > { %v1013_v29 = vld [vmem:[%s5257_s29 + $0x1640] sm:$0xff]  ;;  %2217 = vmatpush.msrb.mxu0 %v877_v28 }
  0xb8   : > { %v1133_v30 = vld [vmem:[%s5257_s29 + $0x1a00] sm:$0xff]  ;;  %2236 = vmatpush.msrb.mxu1 %v1013_v29 }
  0xb9   : > { %v1269_v31 = vld [vmem:[%s5257_s29 + $0x1e40] sm:$0xff]  ;;  %2257 = vmatpush.msrb.mxu2 %v1133_v30  ;;  %v5387_v45 = vld.sshfl [vmem:[#allocation1 + $0x10] sm:$0xff pattern:$0x73625140] }
  0xba   : > { %v869_v32 = vld [vmem:[%s5257_s29 + $0x11c0] sm:$0xff]  ;;  %2276 = vmatpush.msrb.mxu3 %v1269_v31  ;;  %v5391_v47 = vld.sshfl [vmem:[#allocation1 + $0x18] sm:$0xff pattern:$0x73625140]  ;;  %2186 = vmatmul.f32.vlgmr.msra.gmra.mxu2 %v5387_v45 }
  0xbb   : > { %v1005_v33 = vld [vmem:[%s5257_s29 + $0x1600] sm:$0xff]  ;;  %2218 = vmatpush.msrb.mxu0 %v869_v32  ;;  %7511 = vst [vmem:[#allocation21_spill] sm:$0xff] %v5391_v47  ;;  %v5393_v48 = vld.sshfl [vmem:[#allocation1 + $0x8] sm:$0xff pattern:$0x73625140]  ;;  %2206 = vmatmul.f32.vlgmr.msra.gmra.mxu3 %v5391_v47 }
  0xbc   : > { %v1125_v34 = vld [vmem:[%s5257_s29 + $0x19c0] sm:$0xff]  ;;  %2237 = vmatpush.msrb.mxu1 %v1005_v33 }
  0xbd   : > { %v1261_v35 = vld [vmem:[%s5257_s29 + $0x1e00] sm:$0xff]  ;;  %2258 = vmatpush.msrb.mxu2 %v1125_v34  ;;  %2166 = vmatmul.f32.vlgmr.msra.gmra.mxu1 %v5393_v48 }
  0xbe   : > { %v861_v36 = vld [vmem:[%s5257_s29 + $0x1180] sm:$0xff]  ;;  %2277 = vmatpush.msrb.mxu3 %v1261_v35 }
  0xbf   : > { %v997_v37 = vld [vmem:[%s5257_s29 + $0x15c0] sm:$0xff]  ;;  %2219 = vmatpush.msrb.mxu0 %v861_v36 }
  0xc0   : > { %v1117_v38 = vld [vmem:[%s5257_s29 + $0x1980] sm:$0xff]  ;;  %2238 = vmatpush.msrb.mxu1 %v997_v37 }
  0xc1   : > { %v1253_v39 = vld [vmem:[%s5257_s29 + $0x1dc0] sm:$0xff]  ;;  %2259 = vmatpush.msrb.mxu2 %v1117_v38 }
  0xc2   : > { %v853_v41 = vld [vmem:[%s5257_s29 + $0x1140] sm:$0xff]  ;;  %2278 = vmatpush.msrb.mxu3 %v1253_v39 }
  0xc3   : > { %v989_v42 = vld [vmem:[%s5257_s29 + $0x1580] sm:$0xff]  ;;  %2220 = vmatpush.msrb.mxu0 %v853_v41 }
  0xc4   : > { %v1109_v44 = vld [vmem:[%s5257_s29 + $0x1940] sm:$0xff]  ;;  %2239 = vmatpush.msrb.mxu1 %v989_v42 }
  0xc5   : > { %v5389_v46 = vld.sshfl [vmem:[#allocation1] sm:$0xff pattern:$0x73625140]  ;;  %2260 = vmatpush.msrb.mxu2 %v1109_v44 }
  0xc6   : > { %v1245_v49 = vld [vmem:[%s5257_s29 + $0x1d80] sm:$0xff]  ;;  %2108 = vst [vmem:[#allocation1] ss:$4 sm:$0xff] %v299_v43  ;;  %2146 = vmatmul.f32.vlgmr.msra.gmra.mxu0 %v5389_v46 }
  0xc7   : > { %v845_v50 = vld [vmem:[%s5257_s29 + $0x1100] sm:$0xff]  ;;  %2279 = vmatpush.msrb.mxu3 %v1245_v49 }
  0xc8   : > { %v981_v51 = vld [vmem:[%s5257_s29 + $0x1540] sm:$0xff]  ;;  %2221 = vmatpush.msrb.mxu0 %v845_v50 }
  0xc9   : > { %v1101_v52 = vld [vmem:[%s5257_s29 + $0x1900] sm:$0xff]  ;;  %2240 = vmatpush.msrb.mxu1 %v981_v51 }
  0xca   : > { %v1237_v53 = vld [vmem:[%s5257_s29 + $0x1d40] sm:$0xff]  ;;  %2261 = vmatpush.msrb.mxu2 %v1101_v52 }
  0xcb   : > { %v837_v54 = vld [vmem:[%s5257_s29 + $0x10c0] sm:$0xff]  ;;  %2280 = vmatpush.msrb.mxu3 %v1237_v53 }
  0xcc   : > { %v973_v55 = vld [vmem:[%s5257_s29 + $0x1500] sm:$0xff]  ;;  %2222 = vmatpush.msrb.mxu0 %v837_v54 }
  0xcd   : > { %v1093_v56 = vld [vmem:[%s5257_s29 + $0x18c0] sm:$0xff]  ;;  %2241 = vmatpush.msrb.mxu1 %v973_v55 }
  0xce   : > { %v1229_v57 = vld [vmem:[%s5257_s29 + $0x1d00] sm:$0xff]  ;;  %2262 = vmatpush.msrb.mxu2 %v1093_v56 }
  0xcf   : > { %v829_v58 = vld [vmem:[%s5257_s29 + $0x1080] sm:$0xff]  ;;  %2281 = vmatpush.msrb.mxu3 %v1229_v57 }
  0xd0   : > { %v965_v59 = vld [vmem:[%s5257_s29 + $0x14c0] sm:$0xff]  ;;  %2223 = vmatpush.msrb.mxu0 %v829_v58 }
  0xd1   : > { %v5409_v62 = vld.sshfl [vmem:[#allocation1 + $0x20] sm:$0xff pattern:$0x73625140]  ;;  %2242 = vmatpush.msrb.mxu1 %v965_v59 }
  0xd2   : > { %v1085_v1 = vld [vmem:[%s5257_s29 + $0x1880] sm:$0xff]  ;;  %2109 = vst [vmem:[#allocation1 + $0x20] ss:$4 sm:$0xff] %v300_v60 }
  0xd3   : > { %v1221_v2 = vld [vmem:[%s5257_s29 + $0x1cc0] sm:$0xff]  ;;  %2263 = vmatpush.msrb.mxu2 %v1085_v1 }
  0xd4   : > { %v821_v3 = vld [vmem:[%s5257_s29 + $0x1040] sm:$0xff]  ;;  %2282 = vmatpush.msrb.mxu3 %v1221_v2 }
  0xd5   : > { %v957_v4 = vld [vmem:[%s5257_s29 + $0x1480] sm:$0xff]  ;;  %2224 = vmatpush.msrb.mxu0 %v821_v3 }
  0xd6   : > { %v1077_v5 = vld [vmem:[%s5257_s29 + $0x1840] sm:$0xff]  ;;  %2243 = vmatpush.msrb.mxu1 %v957_v4 }
  0xd7   : > { %v1213_v6 = vld [vmem:[%s5257_s29 + $0x1c80] sm:$0xff]  ;;  %2264 = vmatpush.msrb.mxu2 %v1077_v5 }
  0xd8   : > { %v813_v7 = vld [vmem:[%s5257_s29 + $0x1000] sm:$0xff]  ;;  %2283 = vmatpush.msrb.mxu3 %v1213_v6 }
  0xd9   : > { %v949_v8 = vld [vmem:[%s5257_s29 + $0x1440] sm:$0xff]  ;;  %2225 = vmatpush.msrb.mxu0 %v813_v7 }
  0xda   : > { %v1069_v9 = vld [vmem:[%s5257_s29 + $0x1800] sm:$0xff]  ;;  %2244 = vmatpush.msrb.mxu1 %v949_v8  ;;  %2226 = vmatmul.f32.vlgmr.msrb.gmra.mxu0 %v5409_v62 }
  0xdb   : > { %v1205_v10 = vld [vmem:[%s5257_s29 + $0x1c40] sm:$0xff]  ;;  %2265 = vmatpush.msrb.mxu2 %v1069_v9 }
  0xdc   : > { %v1445_v11 = vld [vmem:[%s5257_s29 + $0x23c0] sm:$0xff]  ;;  %2284 = vmatpush.msrb.mxu3 %v1205_v10  ;;  %2266 = vmatmul.f32.vlgmr.msrb.gmra.mxu2 %v5407_v61 }
  0xdd   : > { %v1701_v12 = vld [vmem:[%s5257_s29 + $0x2bc0] sm:$0xff]  ;;  %2290 = vmatpush.msra.mxu0 %v1445_v11 }
  0xde   : > { %v941_v13 = vld [vmem:[%s5257_s29 + $0x1400] sm:$0xff]  ;;  %2330 = vmatpush.msra.mxu2 %v1701_v12 }
  0xdf   : > { %v1197_v14 = vld [vmem:[%s5257_s29 + $0x1c00] sm:$0xff]  ;;  %2245 = vmatpush.msrb.mxu1 %v941_v13 }
  0xe0   : > { %v1437_v15 = vld [vmem:[%s5257_s29 + $0x2380] sm:$0xff]  ;;  %2285 = vmatpush.msrb.mxu3 %v1197_v14  ;;  %2246 = vmatmul.f32.vlgmr.msrb.gmra.mxu1 %v5413_v0 }
  0xe1   : > { %v1573_v16 = vld [vmem:[%s5257_s29 + $0x27c0] sm:$0xff]  ;;  %2291 = vmatpush.msra.mxu0 %v1437_v15  ;;  %2286 = vmatmul.f32.vlgmr.msrb.gmra.mxu3 %v5411_v63 }
  0xe2   : > { %v1693_v17 = vld [vmem:[%s5257_s29 + $0x2b80] sm:$0xff]  ;;  %2310 = vmatpush.msra.mxu1 %v1573_v16 }
  0xe3   : > { %v1829_v18 = vld [vmem:[%s5257_s29 + $0x2fc0] sm:$0xff]  ;;  %2331 = vmatpush.msra.mxu2 %v1693_v17 }
  0xe4   : > { %v1429_v19 = vld [vmem:[%s5257_s29 + $0x2340] sm:$0xff]  ;;  %2350 = vmatpush.msra.mxu3 %v1829_v18 }
  0xe5   : > { %v1565_v20 = vld [vmem:[%s5257_s29 + $0x2780] sm:$0xff]  ;;  %2292 = vmatpush.msra.mxu0 %v1429_v19 }
  0xe6   : > { %v1685_v21 = vld [vmem:[%s5257_s29 + $0x2b40] sm:$0xff]  ;;  %2311 = vmatpush.msra.mxu1 %v1565_v20  ;;  %v2112_v20 = vld.sshfl [vmem:[#allocation1 + $0x10] sm:$0xff pattern:$0x73625140] }
  0xe7   : > { %v1821_v22 = vld [vmem:[%s5257_s29 + $0x2f80] sm:$0xff]  ;;  %2332 = vmatpush.msra.mxu2 %v1685_v21 }
  0xe8   : > { %v1421_v23 = vld [vmem:[%s5257_s29 + $0x2300] sm:$0xff]  ;;  %2351 = vmatpush.msra.mxu3 %v1821_v22  ;;  %v422_v22 = vld [vmem:[%s5257_s29 + $0x3c8] sm:$0xff] }
  0xe9   : > { %v1557_v24 = vld [vmem:[%s5257_s29 + $0x2740] sm:$0xff]  ;;  %2293 = vmatpush.msra.mxu0 %v1421_v23 }
  0xea   : > { %v1677_v25 = vld [vmem:[%s5257_s29 + $0x2b00] sm:$0xff]  ;;  %2312 = vmatpush.msra.mxu1 %v1557_v24 }
  0xeb   : > { %v1813_v26 = vld [vmem:[%s5257_s29 + $0x2f40] sm:$0xff]  ;;  %2333 = vmatpush.msra.mxu2 %v1677_v25  ;;  %v5504_v25 = vld.sshfl [vmem:[#allocation1 + $0x8] sm:$0xff pattern:$0x73625140] }
  0xec   : > { %v1413_v27 = vld [vmem:[%s5257_s29 + $0x22c0] sm:$0xff]  ;;  %2352 = vmatpush.msra.mxu3 %v1813_v26  ;;  %v2113_v26 = vld.sshfl [vmem:[#allocation1 + $0x18] sm:$0xff pattern:$0x73625140] }
  0xed   : > { %v1549_v28 = vld [vmem:[%s5257_s29 + $0x2700] sm:$0xff]  ;;  %2294 = vmatpush.msra.mxu0 %v1413_v27 }
  0xee   : > { %v1669_v29 = vld [vmem:[%s5257_s29 + $0x2ac0] sm:$0xff]  ;;  %2313 = vmatpush.msra.mxu1 %v1549_v28 }
  0xef   : > { %v1805_v30 = vld [vmem:[%s5257_s29 + $0x2f00] sm:$0xff]  ;;  %2334 = vmatpush.msra.mxu2 %v1669_v29  ;;  %v414_v29 = vld [vmem:[%s5257_s29 + $0x388] sm:$0xff] }
  0xf0   : > { %v1405_v31 = vld [vmem:[%s5257_s29 + $0x2280] sm:$0xff]  ;;  %2353 = vmatpush.msra.mxu3 %v1805_v30  ;;  %v550_v30 = vld [vmem:[%s5257_s29 + $0x7c8] sm:$0xff] }
  0xf1   : > { %v1541_v32 = vld [vmem:[%s5257_s29 + $0x26c0] sm:$0xff]  ;;  %2295 = vmatpush.msra.mxu0 %v1405_v31 }
  0xf2   : > { %v1661_v33 = vld [vmem:[%s5257_s29 + $0x2a80] sm:$0xff]  ;;  %2314 = vmatpush.msra.mxu1 %v1541_v32 }
  0xf3   : > { %v1797_v34 = vld [vmem:[%s5257_s29 + $0x2ec0] sm:$0xff]  ;;  %2335 = vmatpush.msra.mxu2 %v1661_v33  ;;  %v406_v33 = vld [vmem:[%s5257_s29 + $0x348] sm:$0xff] }
  0xf4   : > { %v1397_v35 = vld [vmem:[%s5257_s29 + $0x2240] sm:$0xff]  ;;  %2354 = vmatpush.msra.mxu3 %v1797_v34  ;;  %v542_v34 = vld [vmem:[%s5257_s29 + $0x788] sm:$0xff] }
  0xf5   : > { %v1533_v36 = vld [vmem:[%s5257_s29 + $0x2680] sm:$0xff]  ;;  %2296 = vmatpush.msra.mxu0 %v1397_v35 }
  0xf6   : > { %v1653_v37 = vld [vmem:[%s5257_s29 + $0x2a40] sm:$0xff]  ;;  %2315 = vmatpush.msra.mxu1 %v1533_v36 }
  0xf7   : > { %v1789_v38 = vld [vmem:[%s5257_s29 + $0x2e80] sm:$0xff]  ;;  %2336 = vmatpush.msra.mxu2 %v1653_v37  ;;  %v398_v37 = vld [vmem:[%s5257_s29 + $0x308] sm:$0xff] }
  0xf8   : > { %v1389_v39 = vld [vmem:[%s5257_s29 + $0x2200] sm:$0xff]  ;;  %2355 = vmatpush.msra.mxu3 %v1789_v38  ;;  %v534_v38 = vld [vmem:[%s5257_s29 + $0x748] sm:$0xff] }
  0xf9   : > { %v1525_v40 = vld [vmem:[%s5257_s29 + $0x2640] sm:$0xff]  ;;  %2297 = vmatpush.msra.mxu0 %v1389_v39 }
  0xfa   : > { %v1645_v41 = vld [vmem:[%s5257_s29 + $0x2a00] sm:$0xff]  ;;  %2316 = vmatpush.msra.mxu1 %v1525_v40 }
  0xfb   : > { %v1781_v42 = vld [vmem:[%s5257_s29 + $0x2e40] sm:$0xff]  ;;  %2337 = vmatpush.msra.mxu2 %v1645_v41  ;;  %v390_v41 = vld [vmem:[%s5257_s29 + $0x2c8] sm:$0xff] }
  0xfc   : > { %v1381_v43 = vld [vmem:[%s5257_s29 + $0x21c0] sm:$0xff]  ;;  %2356 = vmatpush.msra.mxu3 %v1781_v42  ;;  %v526_v42 = vld [vmem:[%s5257_s29 + $0x708] sm:$0xff] }
  0xfd   : > { %v1517_v44 = vld [vmem:[%s5257_s29 + $0x2600] sm:$0xff]  ;;  %2298 = vmatpush.msra.mxu0 %v1381_v43 }
  0xfe   : > { %v1637_v49 = vld [vmem:[%s5257_s29 + $0x29c0] sm:$0xff]  ;;  %2317 = vmatpush.msra.mxu1 %v1517_v44 }
  0xff   : > { %v1773_v50 = vld [vmem:[%s5257_s29 + $0x2e00] sm:$0xff]  ;;  %2338 = vmatpush.msra.mxu2 %v1637_v49  ;;  %v382_v49 = vld [vmem:[%s5257_s29 + $0x288] sm:$0xff] }
 0x100   : > { %v1373_v51 = vld [vmem:[%s5257_s29 + $0x2180] sm:$0xff]  ;;  %2357 = vmatpush.msra.mxu3 %v1773_v50  ;;  %v518_v50 = vld [vmem:[%s5257_s29 + $0x6c8] sm:$0xff] }
 0x101   : > { %v1509_v52 = vld [vmem:[%s5257_s29 + $0x25c0] sm:$0xff]  ;;  %2299 = vmatpush.msra.mxu0 %v1373_v51 }
 0x102   : > { %v1629_v53 = vld [vmem:[%s5257_s29 + $0x2980] sm:$0xff]  ;;  %2318 = vmatpush.msra.mxu1 %v1509_v52 }
 0x103   : > { %v1765_v54 = vld [vmem:[%s5257_s29 + $0x2dc0] sm:$0xff]  ;;  %2339 = vmatpush.msra.mxu2 %v1629_v53  ;;  %v374_v53 = vld [vmem:[%s5257_s29 + $0x248] sm:$0xff] }
 0x104   : > { %v1365_v55 = vld [vmem:[%s5257_s29 + $0x2140] sm:$0xff]  ;;  %2358 = vmatpush.msra.mxu3 %v1765_v54  ;;  %v510_v54 = vld [vmem:[%s5257_s29 + $0x688] sm:$0xff] }
 0x105   : > { %v1501_v56 = vld [vmem:[%s5257_s29 + $0x2580] sm:$0xff]  ;;  %2300 = vmatpush.msra.mxu0 %v1365_v55 }
 0x106   : > { %v1621_v57 = vld [vmem:[%s5257_s29 + $0x2940] sm:$0xff]  ;;  %2319 = vmatpush.msra.mxu1 %v1501_v56 }
 0x107   : > { %v1757_v58 = vld [vmem:[%s5257_s29 + $0x2d80] sm:$0xff]  ;;  %2340 = vmatpush.msra.mxu2 %v1621_v57  ;;  %v366_v57 = vld [vmem:[%s5257_s29 + $0x208] sm:$0xff] }
 0x108   : > { %v1357_v59 = vld [vmem:[%s5257_s29 + $0x2100] sm:$0xff]  ;;  %2359 = vmatpush.msra.mxu3 %v1757_v58  ;;  %v502_v58 = vld [vmem:[%s5257_s29 + $0x648] sm:$0xff] }
 0x109   : > { %v1493_v60 = vld [vmem:[%s5257_s29 + $0x2540] sm:$0xff]  ;;  %2301 = vmatpush.msra.mxu0 %v1357_v59 }
 0x10a   : > { %v1613_v1 = vld [vmem:[%s5257_s29 + $0x2900] sm:$0xff]  ;;  %2320 = vmatpush.msra.mxu1 %v1493_v60 }
 0x10b   : > { %v1749_v2 = vld [vmem:[%s5257_s29 + $0x2d40] sm:$0xff]  ;;  %2341 = vmatpush.msra.mxu2 %v1613_v1  ;;  %v358_v1 = vld [vmem:[%s5257_s29 + $0x1c8] sm:$0xff] }
 0x10c   : > { %v1349_v3 = vld [vmem:[%s5257_s29 + $0x20c0] sm:$0xff]  ;;  %2360 = vmatpush.msra.mxu3 %v1749_v2  ;;  %v494_v2 = vld [vmem:[%s5257_s29 + $0x608] sm:$0xff] }
 0x10d   : > { %v1485_v4 = vld [vmem:[%s5257_s29 + $0x2500] sm:$0xff]  ;;  %2302 = vmatpush.msra.mxu0 %v1349_v3 }
 0x10e   : > { %v1605_v5 = vld [vmem:[%s5257_s29 + $0x28c0] sm:$0xff]  ;;  %2321 = vmatpush.msra.mxu1 %v1485_v4 }
 0x10f   : > { %v1741_v6 = vld [vmem:[%s5257_s29 + $0x2d00] sm:$0xff]  ;;  %2342 = vmatpush.msra.mxu2 %v1605_v5  ;;  %v350_v5 = vld [vmem:[%s5257_s29 + $0x188] sm:$0xff] }
 0x110   : > { %v1341_v7 = vld [vmem:[%s5257_s29 + $0x2080] sm:$0xff]  ;;  %2361 = vmatpush.msra.mxu3 %v1741_v6  ;;  %v486_v6 = vld [vmem:[%s5257_s29 + $0x5c8] sm:$0xff] }
 0x111   : > { %v1477_v8 = vld [vmem:[%s5257_s29 + $0x24c0] sm:$0xff]  ;;  %2303 = vmatpush.msra.mxu0 %v1341_v7 }
 0x112   : > { %v1597_v9 = vld [vmem:[%s5257_s29 + $0x2880] sm:$0xff]  ;;  %2322 = vmatpush.msra.mxu1 %v1477_v8 }
 0x113   : > { %v1733_v10 = vld [vmem:[%s5257_s29 + $0x2cc0] sm:$0xff]  ;;  %2343 = vmatpush.msra.mxu2 %v1597_v9  ;;  %v342_v9 = vld [vmem:[%s5257_s29 + $0x148] sm:$0xff] }
 0x114   : > { %v1333_v11 = vld [vmem:[%s5257_s29 + $0x2040] sm:$0xff]  ;;  %2362 = vmatpush.msra.mxu3 %v1733_v10  ;;  %v478_v10 = vld [vmem:[%s5257_s29 + $0x588] sm:$0xff] }
 0x115   : > { %v1469_v12 = vld [vmem:[%s5257_s29 + $0x2480] sm:$0xff]  ;;  %2304 = vmatpush.msra.mxu0 %v1333_v11 }
 0x116   : > { %v1589_v13 = vld [vmem:[%s5257_s29 + $0x2840] sm:$0xff]  ;;  %2323 = vmatpush.msra.mxu1 %v1469_v12 }
 0x117   : > { %v1725_v14 = vld [vmem:[%s5257_s29 + $0x2c80] sm:$0xff]  ;;  %2344 = vmatpush.msra.mxu2 %v1589_v13  ;;  %v334_v13 = vld [vmem:[%s5257_s29 + $0x108] sm:$0xff] }
 0x118   : > { %v1325_v15 = vld [vmem:[%s5257_s29 + $0x2000] sm:$0xff]  ;;  %2363 = vmatpush.msra.mxu3 %v1725_v14  ;;  %v470_v14 = vld [vmem:[%s5257_s29 + $0x548] sm:$0xff] }
 0x119   : > { %v1461_v16 = vld [vmem:[%s5257_s29 + $0x2440] sm:$0xff]  ;;  %2305 = vmatpush.msra.mxu0 %v1325_v15 }
 0x11a   : > { %v1581_v17 = vld [vmem:[%s5257_s29 + $0x2800] sm:$0xff]  ;;  %2324 = vmatpush.msra.mxu1 %v1461_v16 }
 0x11b   : > { %v1717_v18 = vld [vmem:[%s5257_s29 + $0x2c40] sm:$0xff]  ;;  %2345 = vmatpush.msra.mxu2 %v1581_v17  ;;  %v326_v17 = vld [vmem:[%s5257_s29 + $0xc8] sm:$0xff] }
 0x11c   : > { %v5497_v19 = vld.sshfl [vmem:[#allocation1] sm:$0xff pattern:$0x73625140]  ;;  %2364 = vmatpush.msra.mxu3 %v1717_v18  ;;  %2346 = vmatmul.f32.vlgmr.msra.gmra.mxu2 %v2112_v20  ;;  %v462_v18 = vld [vmem:[%s5257_s29 + $0x508] sm:$0xff] }
 0x11d   : > { %v1957_v21 = vld [vmem:[%s5257_s29 + $0x33c0] sm:$0xff]  ;;  %2306 = vmatmul.f32.vlgmr.msra.gmra.mxu0 %v5497_v19  ;;  %2410 = vmatpush.msrb.mxu2 %v422_v22  ;;  %v318_v22 = vld [vmem:[%s5257_s29 + $0x88] sm:$0xff] }
 0x11e   : > { %v1453_v23 = vld [vmem:[%s5257_s29 + $0x2400] sm:$0xff]  ;;  %2370 = vmatpush.msrb.mxu0 %v1957_v21 }
 0x11f   : > { %v1709_v24 = vld [vmem:[%s5257_s29 + $0x2c00] sm:$0xff]  ;;  %2325 = vmatpush.msra.mxu1 %v1453_v23  ;;  %2411 = vmatpush.msrb.mxu2 %v414_v29  ;;  %v454_v23 = vld [vmem:[%s5257_s29 + $0x4c8] sm:$0xff] }
 0x120   : > { %v1949_v27 = vld [vmem:[%s5257_s29 + $0x3380] sm:$0xff]  ;;  %2365 = vmatpush.msra.mxu3 %v1709_v24  ;;  %2326 = vmatmul.f32.vlgmr.msra.gmra.mxu1 %v5504_v25 }
 0x121   : > { %v2085_v28 = vld [vmem:[%s5257_s29 + $0x37c0] sm:$0xff]  ;;  %2366 = vmatmul.f32.vlgmr.msra.gmra.mxu3 %v2113_v26  ;;  %2371 = vmatpush.msrb.mxu0 %v1949_v27  ;;  %v310_v27 = vld [vmem:[%s5257_s29 + $0x48] sm:$0xff] }
 0x122   : > { %v1941_v31 = vld [vmem:[%s5257_s29 + $0x3340] sm:$0xff]  ;;  %2390 = vmatpush.msrb.mxu1 %v2085_v28  ;;  %2430 = vmatpush.msrb.mxu3 %v550_v30  ;;  %v446_v28 = vld [vmem:[%s5257_s29 + $0x488] sm:$0xff] }
 0x123   : > { %v2077_v32 = vld [vmem:[%s5257_s29 + $0x3780] sm:$0xff]  ;;  %2372 = vmatpush.msrb.mxu0 %v1941_v31  ;;  %2412 = vmatpush.msrb.mxu2 %v406_v33  ;;  %v302_v31 = vld [vmem:[%s5257_s29 + $0x8] sm:$0xff] }
 0x124   : > { %v1933_v35 = vld [vmem:[%s5257_s29 + $0x3300] sm:$0xff]  ;;  %2391 = vmatpush.msrb.mxu1 %v2077_v32  ;;  %2431 = vmatpush.msrb.mxu3 %v542_v34  ;;  %v438_v32 = vld [vmem:[%s5257_s29 + $0x448] sm:$0xff] }
 0x125   : > { %v2069_v36 = vld [vmem:[%s5257_s29 + $0x3740] sm:$0xff]  ;;  %2373 = vmatpush.msrb.mxu0 %v1933_v35  ;;  %2413 = vmatpush.msrb.mxu2 %v398_v37  ;;  %v934_v34 = vld [vmem:[%s5257_s29 + $0x13c8] sm:$0xff] }
 0x126   : > { %v1925_v39 = vld [vmem:[%s5257_s29 + $0x32c0] sm:$0xff]  ;;  %2392 = vmatpush.msrb.mxu1 %v2069_v36  ;;  %2432 = vmatpush.msrb.mxu3 %v534_v38  ;;  %v678_v35 = vld [vmem:[%s5257_s29 + $0xbc8] sm:$0xff] }
 0x127   : > { %v2061_v40 = vld [vmem:[%s5257_s29 + $0x3700] sm:$0xff]  ;;  %2374 = vmatpush.msrb.mxu0 %v1925_v39  ;;  %2414 = vmatpush.msrb.mxu2 %v390_v41  ;;  %v430_v37 = vld [vmem:[%s5257_s29 + $0x408] sm:$0xff] }
 0x128   : > { %v1917_v43 = vld [vmem:[%s5257_s29 + $0x3280] sm:$0xff]  ;;  %2393 = vmatpush.msrb.mxu1 %v2061_v40  ;;  %2433 = vmatpush.msrb.mxu3 %v526_v42  ;;  %v5573_v38 = vld.sshfl [vmem:[#allocation1 + $0x28] sm:$0xff pattern:$0x73625140] }
 0x129   : > { %v2053_v44 = vld [vmem:[%s5257_s29 + $0x36c0] sm:$0xff]  ;;  %2375 = vmatpush.msrb.mxu0 %v1917_v43  ;;  %2415 = vmatpush.msrb.mxu2 %v382_v49  ;;  %v670_v39 = vld [vmem:[%s5257_s29 + $0xb88] sm:$0xff] }
 0x12a   : > { %v1909_v51 = vld [vmem:[%s5257_s29 + $0x3240] sm:$0xff]  ;;  %2394 = vmatpush.msrb.mxu1 %v2053_v44  ;;  %2434 = vmatpush.msrb.mxu3 %v518_v50  ;;  %v806_v40 = vld [vmem:[%s5257_s29 + $0xfc8] sm:$0xff] }
 0x12b   : > { %v2045_v52 = vld [vmem:[%s5257_s29 + $0x3680] sm:$0xff]  ;;  %2376 = vmatpush.msrb.mxu0 %v1909_v51  ;;  %2416 = vmatpush.msrb.mxu2 %v374_v53  ;;  %v926_v41 = vld [vmem:[%s5257_s29 + $0x1388] sm:$0xff] }
 0x12c   : > { %v1901_v55 = vld [vmem:[%s5257_s29 + $0x3200] sm:$0xff]  ;;  %2395 = vmatpush.msrb.mxu1 %v2045_v52  ;;  %2435 = vmatpush.msrb.mxu3 %v510_v54  ;;  %v1062_v42 = vld [vmem:[%s5257_s29 + $0x17c8] sm:$0xff] }
 0x12d   : > { %v2037_v56 = vld [vmem:[%s5257_s29 + $0x3640] sm:$0xff]  ;;  %2377 = vmatpush.msrb.mxu0 %v1901_v55  ;;  %2417 = vmatpush.msrb.mxu2 %v366_v57  ;;  %v662_v43 = vld [vmem:[%s5257_s29 + $0xb48] sm:$0xff] }
 0x12e   : > { %v1893_v59 = vld [vmem:[%s5257_s29 + $0x31c0] sm:$0xff]  ;;  %2396 = vmatpush.msrb.mxu1 %v2037_v56  ;;  %2436 = vmatpush.msrb.mxu3 %v502_v58  ;;  %v798_v44 = vld [vmem:[%s5257_s29 + $0xf88] sm:$0xff] }
 0x12f   : > { %v2029_v60 = vld [vmem:[%s5257_s29 + $0x3600] sm:$0xff]  ;;  %2378 = vmatpush.msrb.mxu0 %v1893_v59  ;;  %2418 = vmatpush.msrb.mxu2 %v358_v1  ;;  %v918_v49 = vld [vmem:[%s5257_s29 + $0x1348] sm:$0xff] }
 0x130   : > { %v1885_v3 = vld [vmem:[%s5257_s29 + $0x3180] sm:$0xff]  ;;  %2397 = vmatpush.msrb.mxu1 %v2029_v60  ;;  %2437 = vmatpush.msrb.mxu3 %v494_v2  ;;  %v1054_v50 = vld [vmem:[%s5257_s29 + $0x1788] sm:$0xff] }
 0x131   : > { %v2021_v4 = vld [vmem:[%s5257_s29 + $0x35c0] sm:$0xff]  ;;  %2379 = vmatpush.msrb.mxu0 %v1885_v3  ;;  %2419 = vmatpush.msrb.mxu2 %v350_v5  ;;  %v654_v51 = vld [vmem:[%s5257_s29 + $0xb08] sm:$0xff] }
 0x132   : > { %v1877_v7 = vld [vmem:[%s5257_s29 + $0x3140] sm:$0xff]  ;;  %2398 = vmatpush.msrb.mxu1 %v2021_v4  ;;  %2438 = vmatpush.msrb.mxu3 %v486_v6  ;;  %v790_v52 = vld [vmem:[%s5257_s29 + $0xf48] sm:$0xff] }
 0x133   : > { %v2013_v8 = vld [vmem:[%s5257_s29 + $0x3580] sm:$0xff]  ;;  %2380 = vmatpush.msrb.mxu0 %v1877_v7  ;;  %2420 = vmatpush.msrb.mxu2 %v342_v9  ;;  %v910_v53 = vld [vmem:[%s5257_s29 + $0x1308] sm:$0xff] }
 0x134   : > { %v1869_v11 = vld [vmem:[%s5257_s29 + $0x3100] sm:$0xff]  ;;  %2399 = vmatpush.msrb.mxu1 %v2013_v8  ;;  %2439 = vmatpush.msrb.mxu3 %v478_v10  ;;  %v1046_v54 = vld [vmem:[%s5257_s29 + $0x1748] sm:$0xff] }
 0x135   : > { %v2005_v12 = vld [vmem:[%s5257_s29 + $0x3540] sm:$0xff]  ;;  %2381 = vmatpush.msrb.mxu0 %v1869_v11  ;;  %2421 = vmatpush.msrb.mxu2 %v334_v13  ;;  %v646_v55 = vld [vmem:[%s5257_s29 + $0xac8] sm:$0xff] }
 0x136   : > { %v1861_v15 = vld [vmem:[%s5257_s29 + $0x30c0] sm:$0xff]  ;;  %2400 = vmatpush.msrb.mxu1 %v2005_v12  ;;  %2440 = vmatpush.msrb.mxu3 %v470_v14  ;;  %v782_v56 = vld [vmem:[%s5257_s29 + $0xf08] sm:$0xff] }
 0x137   : > { %v1997_v16 = vld [vmem:[%s5257_s29 + $0x3500] sm:$0xff]  ;;  %2382 = vmatpush.msrb.mxu0 %v1861_v15  ;;  %2422 = vmatpush.msrb.mxu2 %v326_v17  ;;  %v902_v57 = vld [vmem:[%s5257_s29 + $0x12c8] sm:$0xff] }
 0x138   : > { %v1853_v20 = vld [vmem:[%s5257_s29 + $0x3080] sm:$0xff]  ;;  %2401 = vmatpush.msrb.mxu1 %v1997_v16  ;;  %2441 = vmatpush.msrb.mxu3 %v462_v18  ;;  %v1038_v58 = vld [vmem:[%s5257_s29 + $0x1708] sm:$0xff] }
 0x139   : > { %v1989_v21 = vld [vmem:[%s5257_s29 + $0x34c0] sm:$0xff]  ;;  %2383 = vmatpush.msrb.mxu0 %v1853_v20  ;;  %2423 = vmatpush.msrb.mxu2 %v318_v22  ;;  %v638_v59 = vld [vmem:[%s5257_s29 + $0xa88] sm:$0xff] }
 0x13a   : > { %v1845_v24 = vld [vmem:[%s5257_s29 + $0x3040] sm:$0xff]  ;;  %2402 = vmatpush.msrb.mxu1 %v1989_v21  ;;  %2442 = vmatpush.msrb.mxu3 %v454_v23  ;;  %v774_v60 = vld [vmem:[%s5257_s29 + $0xec8] sm:$0xff] }
 0x13b   : > { %v1981_v26 = vld [vmem:[%s5257_s29 + $0x3480] sm:$0xff]  ;;  %2384 = vmatpush.msrb.mxu0 %v1845_v24  ;;  %2424 = vmatpush.msrb.mxu2 %v310_v27  ;;  %v894_v1 = vld [vmem:[%s5257_s29 + $0x1288] sm:$0xff] }
 0x13c   : > { %v1837_v29 = vld [vmem:[%s5257_s29 + $0x3000] sm:$0xff]  ;;  %2403 = vmatpush.msrb.mxu1 %v1981_v26  ;;  %2443 = vmatpush.msrb.mxu3 %v446_v28  ;;  %v1030_v2 = vld [vmem:[%s5257_s29 + $0x16c8] sm:$0xff] }
 0x13d   : > { %v1973_v30 = vld [vmem:[%s5257_s29 + $0x3440] sm:$0xff]  ;;  %2385 = vmatpush.msrb.mxu0 %v1837_v29  ;;  %2425 = vmatpush.msrb.mxu2 %v302_v31  ;;  %v630_v3 = vld [vmem:[%s5257_s29 + $0xa48] sm:$0xff] }
 0x13e   : > { %v5567_v33 = vld.sshfl [vmem:[#allocation1 + $0x20] sm:$0xff pattern:$0x73625140]  ;;  %2404 = vmatpush.msrb.mxu1 %v1973_v30  ;;  %2444 = vmatpush.msrb.mxu3 %v438_v32  ;;  %v766_v4 = vld [vmem:[%s5257_s29 + $0xe88] sm:$0xff] }
 0x13f   : > { %v1965_v36 = vld [vmem:[%s5257_s29 + $0x3400] sm:$0xff]  ;;  %2386 = vmatmul.f32.vlgmr.msrb.gmra.mxu0 %v5567_v33  ;;  %2490 = vmatpush.msra.mxu2 %v934_v34  ;;  %v886_v5 = vld [vmem:[%s5257_s29 + $0x1248] sm:$0xff] }
 0x140   : > { %2450 = vmatpush.msra.mxu0 %v678_v35  ;;  %2405 = vmatpush.msrb.mxu1 %v1965_v36  ;;  %v1022_v6 = vld [vmem:[%s5257_s29 + $0x1688] sm:$0xff] }
 0x141   : > { %2445 = vmatpush.msrb.mxu3 %v430_v37  ;;  %2406 = vmatmul.f32.vlgmr.msrb.gmra.mxu1 %v5573_v38  ;;  %v622_v7 = vld [vmem:[%s5257_s29 + $0xa08] sm:$0xff] }
 0x142   : > { %2451 = vmatpush.msra.mxu0 %v670_v39  ;;  %2470 = vmatpush.msra.mxu1 %v806_v40  ;;  %v758_v8 = vld [vmem:[%s5257_s29 + $0xe48] sm:$0xff] }
 0x143   : > { %2491 = vmatpush.msra.mxu2 %v926_v41  ;;  %2510 = vmatpush.msra.mxu3 %v1062_v42  ;;  %v878_v9 = vld [vmem:[%s5257_s29 + $0x1208] sm:$0xff] }
 0x144   : > { %2452 = vmatpush.msra.mxu0 %v662_v43  ;;  %2471 = vmatpush.msra.mxu1 %v798_v44  ;;  %v1014_v10 = vld [vmem:[%s5257_s29 + $0x1648] sm:$0xff] }
 0x145   : > { %2492 = vmatpush.msra.mxu2 %v918_v49  ;;  %2511 = vmatpush.msra.mxu3 %v1054_v50  ;;  %v614_v11 = vld [vmem:[%s5257_s29 + $0x9c8] sm:$0xff] }
 0x146   : > { %2453 = vmatpush.msra.mxu0 %v654_v51  ;;  %2472 = vmatpush.msra.mxu1 %v790_v52  ;;  %v750_v12 = vld [vmem:[%s5257_s29 + $0xe08] sm:$0xff] }
 0x147   : > { %2493 = vmatpush.msra.mxu2 %v910_v53  ;;  %2512 = vmatpush.msra.mxu3 %v1046_v54  ;;  %v870_v13 = vld [vmem:[%s5257_s29 + $0x11c8] sm:$0xff] }
 0x148   : > { %2454 = vmatpush.msra.mxu0 %v646_v55  ;;  %2473 = vmatpush.msra.mxu1 %v782_v56  ;;  %v1006_v14 = vld [vmem:[%s5257_s29 + $0x1608] sm:$0xff] }
 0x149   : > { %2494 = vmatpush.msra.mxu2 %v902_v57  ;;  %2513 = vmatpush.msra.mxu3 %v1038_v58  ;;  %v606_v15 = vld [vmem:[%s5257_s29 + $0x988] sm:$0xff] }
 0x14a   : > { %2455 = vmatpush.msra.mxu0 %v638_v59  ;;  %2474 = vmatpush.msra.mxu1 %v774_v60  ;;  %v742_v16 = vld [vmem:[%s5257_s29 + $0xdc8] sm:$0xff] }
 0x14b   : > { %2495 = vmatpush.msra.mxu2 %v894_v1  ;;  %2514 = vmatpush.msra.mxu3 %v1030_v2  ;;  %v862_v17 = vld [vmem:[%s5257_s29 + $0x1188] sm:$0xff] }
 0x14c   : > { %2456 = vmatpush.msra.mxu0 %v630_v3  ;;  %2475 = vmatpush.msra.mxu1 %v766_v4  ;;  %v998_v18 = vld [vmem:[%s5257_s29 + $0x15c8] sm:$0xff] }
 0x14d   : > { %2496 = vmatpush.msra.mxu2 %v886_v5  ;;  %2515 = vmatpush.msra.mxu3 %v1022_v6  ;;  %v598_v20 = vld [vmem:[%s5257_s29 + $0x948] sm:$0xff] }
 0x14e   : > { %2457 = vmatpush.msra.mxu0 %v622_v7  ;;  %2476 = vmatpush.msra.mxu1 %v758_v8  ;;  %v734_v21 = vld [vmem:[%s5257_s29 + $0xd88] sm:$0xff] }
 0x14f   : > { %2497 = vmatpush.msra.mxu2 %v878_v9  ;;  %2516 = vmatpush.msra.mxu3 %v1014_v10  ;;  %v854_v22 = vld [vmem:[%s5257_s29 + $0x1148] sm:$0xff] }
 0x150   : > { %2458 = vmatpush.msra.mxu0 %v614_v11  ;;  %2477 = vmatpush.msra.mxu1 %v750_v12  ;;  %v990_v23 = vld [vmem:[%s5257_s29 + $0x1588] sm:$0xff] }
 0x151   : > { %2498 = vmatpush.msra.mxu2 %v870_v13  ;;  %2517 = vmatpush.msra.mxu3 %v1006_v14  ;;  %v590_v24 = vld [vmem:[%s5257_s29 + $0x908] sm:$0xff] }
 0x152   : > { %2459 = vmatpush.msra.mxu0 %v606_v15  ;;  %2478 = vmatpush.msra.mxu1 %v742_v16  ;;  %v726_v26 = vld [vmem:[%s5257_s29 + $0xd48] sm:$0xff] }
 0x153   : > { %2499 = vmatpush.msra.mxu2 %v862_v17  ;;  %2518 = vmatpush.msra.mxu3 %v998_v18  ;;  %v846_v27 = vld [vmem:[%s5257_s29 + $0x1108] sm:$0xff] }
 0x154   : > { %2460 = vmatpush.msra.mxu0 %v598_v20  ;;  %2479 = vmatpush.msra.mxu1 %v734_v21  ;;  %v982_v28 = vld [vmem:[%s5257_s29 + $0x1548] sm:$0xff] }
 0x155   : > { %2500 = vmatpush.msra.mxu2 %v854_v22  ;;  %2519 = vmatpush.msra.mxu3 %v990_v23  ;;  %v582_v29 = vld [vmem:[%s5257_s29 + $0x8c8] sm:$0xff] }
 0x156   : > { %v718_v30 = vld [vmem:[%s5257_s29 + $0xd08] sm:$0xff]  ;;  %2461 = vmatpush.msra.mxu0 %v590_v24  ;;  %2480 = vmatpush.msra.mxu1 %v726_v26 }
 0x157   : > { %v838_v31 = vld [vmem:[%s5257_s29 + $0x10c8] sm:$0xff]  ;;  %2501 = vmatpush.msra.mxu2 %v846_v27  ;;  %2520 = vmatpush.msra.mxu3 %v982_v28 }
 0x158   : > { %v974_v32 = vld [vmem:[%s5257_s29 + $0x1508] sm:$0xff]  ;;  %2462 = vmatpush.msra.mxu0 %v582_v29  ;;  %2481 = vmatpush.msra.mxu1 %v718_v30 }
 0x159   : > { %v574_v34 = vld [vmem:[%s5257_s29 + $0x888] sm:$0xff]  ;;  %2502 = vmatpush.msra.mxu2 %v838_v31  ;;  %2521 = vmatpush.msra.mxu3 %v974_v32 }
 0x15a   : > { %v710_v35 = vld [vmem:[%s5257_s29 + $0xcc8] sm:$0xff]  ;;  %2463 = vmatpush.msra.mxu0 %v574_v34  ;;  %2426 = vmatmul.f32.vlgmr.msrb.gmra.mxu2 %v5389_v46 }
 0x15b   : > { %v830_v36 = vld [vmem:[%s5257_s29 + $0x1088] sm:$0xff]  ;;  %2482 = vmatpush.msra.mxu1 %v710_v35  ;;  %2446 = vmatmul.f32.vlgmr.msrb.gmra.mxu3 %v5393_v48 }
 0x15c   : > { %v966_v37 = vld [vmem:[%s5257_s29 + $0x14c8] sm:$0xff]  ;;  %2503 = vmatpush.msra.mxu2 %v830_v36 }
 0x15d   : > { %v566_v39 = vld [vmem:[%s5257_s29 + $0x848] sm:$0xff]  ;;  %2522 = vmatpush.msra.mxu3 %v966_v37 }
 0x15e   : > { %v702_v40 = vld [vmem:[%s5257_s29 + $0xc88] sm:$0xff]  ;;  %2464 = vmatpush.msra.mxu0 %v566_v39 }
 0x15f   : > { %v822_v41 = vld [vmem:[%s5257_s29 + $0x1048] sm:$0xff]  ;;  %2483 = vmatpush.msra.mxu1 %v702_v40 }
 0x160   : > { %v958_v42 = vld [vmem:[%s5257_s29 + $0x1488] sm:$0xff]  ;;  %2504 = vmatpush.msra.mxu2 %v822_v41 }
 0x161   : > { %v558_v43 = vld [vmem:[%s5257_s29 + $0x808] sm:$0xff]  ;;  %2523 = vmatpush.msra.mxu3 %v958_v42 }
 0x162   : > { %v694_v44 = vld [vmem:[%s5257_s29 + $0xc48] sm:$0xff]  ;;  %2465 = vmatpush.msra.mxu0 %v558_v43 }
 0x163   : > { %v814_v49 = vld [vmem:[%s5257_s29 + $0x1008] sm:$0xff]  ;;  %2484 = vmatpush.msra.mxu1 %v694_v44  ;;  %2466 = vmatmul.f32.vlgmr.msra.gmra.mxu0 %v5387_v45 }
 0x164   : > { %v950_v50 = vld [vmem:[%s5257_s29 + $0x1448] sm:$0xff]  ;;  %2505 = vmatpush.msra.mxu2 %v814_v49 }
 0x165   : > { %v1190_v51 = vld [vmem:[%s5257_s29 + $0x1bc8] sm:$0xff]  ;;  %2524 = vmatpush.msra.mxu3 %v950_v50  ;;  %2506 = vmatmul.f32.vlgmr.msra.gmra.mxu2 %v5409_v62 }
 0x166   : > { %v1446_v52 = vld [vmem:[%s5257_s29 + $0x23c8] sm:$0xff]  ;;  %2530 = vmatpush.msrb.mxu0 %v1190_v51 }
 0x167   : > { %v686_v53 = vld [vmem:[%s5257_s29 + $0xc08] sm:$0xff]  ;;  %2570 = vmatpush.msrb.mxu2 %v1446_v52 }
 0x168   : > { %v942_v54 = vld [vmem:[%s5257_s29 + $0x1408] sm:$0xff]  ;;  %2485 = vmatpush.msra.mxu1 %v686_v53 }
 0x169   : > { %v1182_v55 = vld [vmem:[%s5257_s29 + $0x1b88] sm:$0xff]  ;;  %2525 = vmatpush.msra.mxu3 %v942_v54  ;;  %2486 = vmatmul.f32.vlgmr.msra.gmra.mxu1 %v5391_v47 }
 0x16a   : > { %v1318_v56 = vld [vmem:[%s5257_s29 + $0x1fc8] sm:$0xff]  ;;  %2531 = vmatpush.msrb.mxu0 %v1182_v55  ;;  %2526 = vmatmul.f32.vlgmr.msra.gmra.mxu3 %v5413_v0 }
 0x16b   : > { %v1438_v57 = vld [vmem:[%s5257_s29 + $0x2388] sm:$0xff]  ;;  %2550 = vmatpush.msrb.mxu1 %v1318_v56 }
 0x16c   : > { %v1574_v58 = vld [vmem:[%s5257_s29 + $0x27c8] sm:$0xff]  ;;  %2571 = vmatpush.msrb.mxu2 %v1438_v57 }
 0x16d   : > { %v1174_v59 = vld [vmem:[%s5257_s29 + $0x1b48] sm:$0xff]  ;;  %2590 = vmatpush.msrb.mxu3 %v1574_v58 }
 0x16e   : > { %v1310_v60 = vld [vmem:[%s5257_s29 + $0x1f88] sm:$0xff]  ;;  %2532 = vmatpush.msrb.mxu0 %v1174_v59 }
 0x16f   : > { %v1430_v1 = vld [vmem:[%s5257_s29 + $0x2348] sm:$0xff]  ;;  %2551 = vmatpush.msrb.mxu1 %v1310_v60 }
 0x170   : > { %v1566_v2 = vld [vmem:[%s5257_s29 + $0x2788] sm:$0xff]  ;;  %2572 = vmatpush.msrb.mxu2 %v1430_v1 }
 0x171   : > { %v1166_v3 = vld [vmem:[%s5257_s29 + $0x1b08] sm:$0xff]  ;;  %2591 = vmatpush.msrb.mxu3 %v1566_v2 }
 0x172   : > { %v1302_v4 = vld [vmem:[%s5257_s29 + $0x1f48] sm:$0xff]  ;;  %2533 = vmatpush.msrb.mxu0 %v1166_v3 }
 0x173   : > { %v1422_v5 = vld [vmem:[%s5257_s29 + $0x2308] sm:$0xff]  ;;  %2552 = vmatpush.msrb.mxu1 %v1302_v4 }
 0x174   : > { %v1558_v6 = vld [vmem:[%s5257_s29 + $0x2748] sm:$0xff]  ;;  %2573 = vmatpush.msrb.mxu2 %v1422_v5 }
 0x175   : > { %v1158_v7 = vld [vmem:[%s5257_s29 + $0x1ac8] sm:$0xff]  ;;  %2592 = vmatpush.msrb.mxu3 %v1558_v6 }
 0x176   : > { %v1294_v8 = vld [vmem:[%s5257_s29 + $0x1f08] sm:$0xff]  ;;  %2534 = vmatpush.msrb.mxu0 %v1158_v7 }
 0x177   : > { %v1414_v9 = vld [vmem:[%s5257_s29 + $0x22c8] sm:$0xff]  ;;  %2553 = vmatpush.msrb.mxu1 %v1294_v8 }
 0x178   : > { %v1550_v10 = vld [vmem:[%s5257_s29 + $0x2708] sm:$0xff]  ;;  %2574 = vmatpush.msrb.mxu2 %v1414_v9 }
 0x179   : > { %v1150_v11 = vld [vmem:[%s5257_s29 + $0x1a88] sm:$0xff]  ;;  %2593 = vmatpush.msrb.mxu3 %v1550_v10 }
 0x17a   : > { %v1286_v12 = vld [vmem:[%s5257_s29 + $0x1ec8] sm:$0xff]  ;;  %2535 = vmatpush.msrb.mxu0 %v1150_v11 }
 0x17b   : > { %v1406_v13 = vld [vmem:[%s5257_s29 + $0x2288] sm:$0xff]  ;;  %2554 = vmatpush.msrb.mxu1 %v1286_v12 }
 0x17c   : > { %v1542_v14 = vld [vmem:[%s5257_s29 + $0x26c8] sm:$0xff]  ;;  %2575 = vmatpush.msrb.mxu2 %v1406_v13 }
 0x17d   : > { %v1142_v15 = vld [vmem:[%s5257_s29 + $0x1a48] sm:$0xff]  ;;  %2594 = vmatpush.msrb.mxu3 %v1542_v14 }
 0x17e   : > { %v1278_v16 = vld [vmem:[%s5257_s29 + $0x1e88] sm:$0xff]  ;;  %2536 = vmatpush.msrb.mxu0 %v1142_v15 }
 0x17f   : > { %v1398_v17 = vld [vmem:[%s5257_s29 + $0x2248] sm:$0xff]  ;;  %2555 = vmatpush.msrb.mxu1 %v1278_v16 }
 0x180   : > { %v1534_v18 = vld [vmem:[%s5257_s29 + $0x2688] sm:$0xff]  ;;  %2576 = vmatpush.msrb.mxu2 %v1398_v17 }
 0x181   : > { %v1134_v20 = vld [vmem:[%s5257_s29 + $0x1a08] sm:$0xff]  ;;  %2595 = vmatpush.msrb.mxu3 %v1534_v18 }
 0x182   : > { %v1270_v21 = vld [vmem:[%s5257_s29 + $0x1e48] sm:$0xff]  ;;  %2537 = vmatpush.msrb.mxu0 %v1134_v20 }
 0x183   : > { %v1390_v22 = vld [vmem:[%s5257_s29 + $0x2208] sm:$0xff]  ;;  %2556 = vmatpush.msrb.mxu1 %v1270_v21 }
 0x184   : > { %v1526_v23 = vld [vmem:[%s5257_s29 + $0x2648] sm:$0xff]  ;;  %2577 = vmatpush.msrb.mxu2 %v1390_v22 }
 0x185   : > { %v1126_v24 = vld [vmem:[%s5257_s29 + $0x19c8] sm:$0xff]  ;;  %2596 = vmatpush.msrb.mxu3 %v1526_v23 }
 0x186   : > { %v1262_v26 = vld [vmem:[%s5257_s29 + $0x1e08] sm:$0xff]  ;;  %2538 = vmatpush.msrb.mxu0 %v1126_v24 }
 0x187   : > { %v1382_v27 = vld [vmem:[%s5257_s29 + $0x21c8] sm:$0xff]  ;;  %2557 = vmatpush.msrb.mxu1 %v1262_v26 }
 0x188   : > { %v1518_v28 = vld [vmem:[%s5257_s29 + $0x2608] sm:$0xff]  ;;  %2578 = vmatpush.msrb.mxu2 %v1382_v27 }
 0x189   : > { %v1118_v29 = vld [vmem:[%s5257_s29 + $0x1988] sm:$0xff]  ;;  %2597 = vmatpush.msrb.mxu3 %v1518_v28 }
 0x18a   : > { %v1254_v30 = vld [vmem:[%s5257_s29 + $0x1dc8] sm:$0xff]  ;;  %2539 = vmatpush.msrb.mxu0 %v1118_v29 }
 0x18b   : > { %v1374_v31 = vld [vmem:[%s5257_s29 + $0x2188] sm:$0xff]  ;;  %2558 = vmatpush.msrb.mxu1 %v1254_v30 }
 0x18c   : > { %v1510_v32 = vld [vmem:[%s5257_s29 + $0x25c8] sm:$0xff]  ;;  %2579 = vmatpush.msrb.mxu2 %v1374_v31 }
 0x18d   : > { %v1110_v34 = vld [vmem:[%s5257_s29 + $0x1948] sm:$0xff]  ;;  %2598 = vmatpush.msrb.mxu3 %v1510_v32 }
 0x18e   : > { %v1246_v35 = vld [vmem:[%s5257_s29 + $0x1d88] sm:$0xff]  ;;  %2540 = vmatpush.msrb.mxu0 %v1110_v34 }
 0x18f   : > { %v1366_v36 = vld [vmem:[%s5257_s29 + $0x2148] sm:$0xff]  ;;  %2559 = vmatpush.msrb.mxu1 %v1246_v35 }
 0x190   : > { %v1502_v37 = vld [vmem:[%s5257_s29 + $0x2588] sm:$0xff]  ;;  %2580 = vmatpush.msrb.mxu2 %v1366_v36 }
 0x191   : > { %v1102_v39 = vld [vmem:[%s5257_s29 + $0x1908] sm:$0xff]  ;;  %2599 = vmatpush.msrb.mxu3 %v1502_v37 }
 0x192   : > { %v1238_v40 = vld [vmem:[%s5257_s29 + $0x1d48] sm:$0xff]  ;;  %2541 = vmatpush.msrb.mxu0 %v1102_v39 }
 0x193   : > { %v1358_v41 = vld [vmem:[%s5257_s29 + $0x2108] sm:$0xff]  ;;  %2560 = vmatpush.msrb.mxu1 %v1238_v40 }
 0x194   : > { %v1494_v42 = vld [vmem:[%s5257_s29 + $0x2548] sm:$0xff]  ;;  %2581 = vmatpush.msrb.mxu2 %v1358_v41 }
 0x195   : > { %v1094_v43 = vld [vmem:[%s5257_s29 + $0x18c8] sm:$0xff]  ;;  %2600 = vmatpush.msrb.mxu3 %v1494_v42 }
 0x196   : > { %v1230_v44 = vld [vmem:[%s5257_s29 + $0x1d08] sm:$0xff]  ;;  %2542 = vmatpush.msrb.mxu0 %v1094_v43 }
 0x197   : > { %v1350_v49 = vld [vmem:[%s5257_s29 + $0x20c8] sm:$0xff]  ;;  %2561 = vmatpush.msrb.mxu1 %v1230_v44 }
 0x198   : > { %v1486_v50 = vld [vmem:[%s5257_s29 + $0x2508] sm:$0xff]  ;;  %2582 = vmatpush.msrb.mxu2 %v1350_v49 }
 0x199   : > { %v1086_v51 = vld [vmem:[%s5257_s29 + $0x1888] sm:$0xff]  ;;  %2601 = vmatpush.msrb.mxu3 %v1486_v50 }
 0x19a   : > { %v1222_v52 = vld [vmem:[%s5257_s29 + $0x1cc8] sm:$0xff]  ;;  %2543 = vmatpush.msrb.mxu0 %v1086_v51 }
 0x19b   : > { %v1342_v53 = vld [vmem:[%s5257_s29 + $0x2088] sm:$0xff]  ;;  %2562 = vmatpush.msrb.mxu1 %v1222_v52 }
 0x19c   : > { %v1478_v54 = vld [vmem:[%s5257_s29 + $0x24c8] sm:$0xff]  ;;  %2583 = vmatpush.msrb.mxu2 %v1342_v53 }
 0x19d   : > { %v1078_v55 = vld [vmem:[%s5257_s29 + $0x1848] sm:$0xff]  ;;  %2602 = vmatpush.msrb.mxu3 %v1478_v54 }
 0x19e   : > { %v1214_v56 = vld [vmem:[%s5257_s29 + $0x1c88] sm:$0xff]  ;;  %2544 = vmatpush.msrb.mxu0 %v1078_v55 }
 0x19f   : > { %v1334_v57 = vld [vmem:[%s5257_s29 + $0x2048] sm:$0xff]  ;;  %2563 = vmatpush.msrb.mxu1 %v1214_v56 }
 0x1a0   : > { %v1470_v58 = vld [vmem:[%s5257_s29 + $0x2488] sm:$0xff]  ;;  %2584 = vmatpush.msrb.mxu2 %v1334_v57 }
 0x1a1   : > { %v1070_v59 = vld [vmem:[%s5257_s29 + $0x1808] sm:$0xff]  ;;  %2603 = vmatpush.msrb.mxu3 %v1470_v58 }
 0x1a2   : > { %v1206_v60 = vld [vmem:[%s5257_s29 + $0x1c48] sm:$0xff]  ;;  %2545 = vmatpush.msrb.mxu0 %v1070_v59 }
 0x1a3   : > { %v1326_v1 = vld [vmem:[%s5257_s29 + $0x2008] sm:$0xff]  ;;  %2564 = vmatpush.msrb.mxu1 %v1206_v60  ;;  %2546 = vmatmul.f32.vlgmr.msrb.gmra.mxu0 %v5407_v61 }
 0x1a4   : > { %v1462_v2 = vld [vmem:[%s5257_s29 + $0x2448] sm:$0xff]  ;;  %2585 = vmatpush.msrb.mxu2 %v1326_v1 }
 0x1a5   : > { %v1702_v3 = vld [vmem:[%s5257_s29 + $0x2bc8] sm:$0xff]  ;;  %2604 = vmatpush.msrb.mxu3 %v1462_v2  ;;  %2586 = vmatmul.f32.vlgmr.msrb.gmra.mxu2 %v5497_v19 }
 0x1a6   : > { %v1958_v4 = vld [vmem:[%s5257_s29 + $0x33c8] sm:$0xff]  ;;  %2610 = vmatpush.msra.mxu0 %v1702_v3 }
 0x1a7   : > { %v1198_v5 = vld [vmem:[%s5257_s29 + $0x1c08] sm:$0xff]  ;;  %2650 = vmatpush.msra.mxu2 %v1958_v4 }
 0x1a8   : > { %v1454_v6 = vld [vmem:[%s5257_s29 + $0x2408] sm:$0xff]  ;;  %2565 = vmatpush.msrb.mxu1 %v1198_v5 }
 0x1a9   : > { %v1694_v7 = vld [vmem:[%s5257_s29 + $0x2b88] sm:$0xff]  ;;  %2605 = vmatpush.msrb.mxu3 %v1454_v6  ;;  %2566 = vmatmul.f32.vlgmr.msrb.gmra.mxu1 %v5411_v63 }
 0x1aa   : > { %v1830_v8 = vld [vmem:[%s5257_s29 + $0x2fc8] sm:$0xff]  ;;  %2606 = vmatmul.f32.vlgmr.msrb.gmra.mxu3 %v5504_v25  ;;  %2611 = vmatpush.msra.mxu0 %v1694_v7 }
 0x1ab   : > { %v1950_v9 = vld [vmem:[%s5257_s29 + $0x3388] sm:$0xff]  ;;  %2630 = vmatpush.msra.mxu1 %v1830_v8 }
 0x1ac   : > { %v2086_v10 = vld [vmem:[%s5257_s29 + $0x37c8] sm:$0xff]  ;;  %2651 = vmatpush.msra.mxu2 %v1950_v9 }
 0x1ad   : > { %v1686_v11 = vld [vmem:[%s5257_s29 + $0x2b48] sm:$0xff]  ;;  %2670 = vmatpush.msra.mxu3 %v2086_v10 }
 0x1ae   : > { %v1822_v19 = vld [vmem:[%s5257_s29 + $0x2f88] sm:$0xff]  ;;  %2612 = vmatpush.msra.mxu0 %v1686_v11 }
 0x1af   : > { %v1942_v12 = vld [vmem:[%s5257_s29 + $0x3348] sm:$0xff]  ;;  %2631 = vmatpush.msra.mxu1 %v1822_v19 }
 0x1b0   : > { %v2078_v13 = vld [vmem:[%s5257_s29 + $0x3788] sm:$0xff]  ;;  %2652 = vmatpush.msra.mxu2 %v1942_v12  ;;  %v423_v12 = vld [vmem:[%s5257_s29 + $0x3d0] sm:$0xff] }
 0x1b1   : > { %v1678_v14 = vld [vmem:[%s5257_s29 + $0x2b08] sm:$0xff]  ;;  %2671 = vmatpush.msra.mxu3 %v2078_v13  ;;  %v679_v13 = vld [vmem:[%s5257_s29 + $0xbd0] sm:$0xff] }
 0x1b2   : > { %v1814_v15 = vld [vmem:[%s5257_s29 + $0x2f48] sm:$0xff]  ;;  %2613 = vmatpush.msra.mxu0 %v1678_v14 }
 0x1b3   : > { %v1934_v16 = vld [vmem:[%s5257_s29 + $0x3308] sm:$0xff]  ;;  %2632 = vmatpush.msra.mxu1 %v1814_v15 }
 0x1b4   : > { %v2070_v25 = vld [vmem:[%s5257_s29 + $0x3748] sm:$0xff]  ;;  %2653 = vmatpush.msra.mxu2 %v1934_v16  ;;  %v5779_v16 = vld.sshfl [vmem:[#allocation1 + $0x10] sm:$0xff pattern:$0x73625140] }
 0x1b5   : > { %v1670_v17 = vld [vmem:[%s5257_s29 + $0x2ac8] sm:$0xff]  ;;  %2672 = vmatpush.msra.mxu3 %v2070_v25  ;;  %v415_v25 = vld [vmem:[%s5257_s29 + $0x390] sm:$0xff] }
 0x1b6   : > { %v1806_v18 = vld [vmem:[%s5257_s29 + $0x2f08] sm:$0xff]  ;;  %2614 = vmatpush.msra.mxu0 %v1670_v17  ;;  %v551_v17 = vld [vmem:[%s5257_s29 + $0x7d0] sm:$0xff] }
 0x1b7   : > { %v1926_v20 = vld [vmem:[%s5257_s29 + $0x32c8] sm:$0xff]  ;;  %2633 = vmatpush.msra.mxu1 %v1806_v18  ;;  %v671_v18 = vld [vmem:[%s5257_s29 + $0xb90] sm:$0xff] }
 0x1b8   : > { %v2062_v21 = vld [vmem:[%s5257_s29 + $0x3708] sm:$0xff]  ;;  %2654 = vmatpush.msra.mxu2 %v1926_v20  ;;  %v807_v20 = vld [vmem:[%s5257_s29 + $0xfd0] sm:$0xff] }
 0x1b9   : > { %v1662_v22 = vld [vmem:[%s5257_s29 + $0x2a88] sm:$0xff]  ;;  %2673 = vmatpush.msra.mxu3 %v2062_v21  ;;  %v5787_v21 = vld.sshfl [vmem:[#allocation1 + $0x18] sm:$0xff pattern:$0x73625140] }
 0x1ba   : > { %v1798_v23 = vld [vmem:[%s5257_s29 + $0x2ec8] sm:$0xff]  ;;  %2615 = vmatpush.msra.mxu0 %v1662_v22  ;;  %v543_v22 = vld [vmem:[%s5257_s29 + $0x790] sm:$0xff] }
 0x1bb   : > { %v1918_v24 = vld [vmem:[%s5257_s29 + $0x3288] sm:$0xff]  ;;  %2634 = vmatpush.msra.mxu1 %v1798_v23  ;;  %v663_v23 = vld [vmem:[%s5257_s29 + $0xb50] sm:$0xff] }
 0x1bc   : > { %v2054_v26 = vld [vmem:[%s5257_s29 + $0x36c8] sm:$0xff]  ;;  %2655 = vmatpush.msra.mxu2 %v1918_v24  ;;  %v799_v24 = vld [vmem:[%s5257_s29 + $0xf90] sm:$0xff] }
 0x1bd   : > { %v1654_v27 = vld [vmem:[%s5257_s29 + $0x2a48] sm:$0xff]  ;;  %2674 = vmatpush.msra.mxu3 %v2054_v26  ;;  %v399_v26 = vld [vmem:[%s5257_s29 + $0x310] sm:$0xff] }
 0x1be   : > { %v1790_v28 = vld [vmem:[%s5257_s29 + $0x2e88] sm:$0xff]  ;;  %2616 = vmatpush.msra.mxu0 %v1654_v27  ;;  %v535_v27 = vld [vmem:[%s5257_s29 + $0x750] sm:$0xff] }
 0x1bf   : > { %v1910_v29 = vld [vmem:[%s5257_s29 + $0x3248] sm:$0xff]  ;;  %2635 = vmatpush.msra.mxu1 %v1790_v28  ;;  %v655_v28 = vld [vmem:[%s5257_s29 + $0xb10] sm:$0xff] }
 0x1c0   : > { %v2046_v30 = vld [vmem:[%s5257_s29 + $0x3688] sm:$0xff]  ;;  %2656 = vmatpush.msra.mxu2 %v1910_v29  ;;  %v391_v29 = vld [vmem:[%s5257_s29 + $0x2d0] sm:$0xff] }
 0x1c1   : > { %v1646_v31 = vld [vmem:[%s5257_s29 + $0x2a08] sm:$0xff]  ;;  %2675 = vmatpush.msra.mxu3 %v2046_v30  ;;  %v527_v30 = vld [vmem:[%s5257_s29 + $0x710] sm:$0xff] }
 0x1c2   : > { %v1782_v32 = vld [vmem:[%s5257_s29 + $0x2e48] sm:$0xff]  ;;  %2617 = vmatpush.msra.mxu0 %v1646_v31  ;;  %v647_v31 = vld [vmem:[%s5257_s29 + $0xad0] sm:$0xff] }
 0x1c3   : > { %v1902_v34 = vld [vmem:[%s5257_s29 + $0x3208] sm:$0xff]  ;;  %2636 = vmatpush.msra.mxu1 %v1782_v32  ;;  %v783_v32 = vld [vmem:[%s5257_s29 + $0xf10] sm:$0xff] }
 0x1c4   : > { %v2038_v35 = vld [vmem:[%s5257_s29 + $0x3648] sm:$0xff]  ;;  %2657 = vmatpush.msra.mxu2 %v1902_v34  ;;  %v383_v34 = vld [vmem:[%s5257_s29 + $0x290] sm:$0xff] }
 0x1c5   : > { %v1638_v36 = vld [vmem:[%s5257_s29 + $0x29c8] sm:$0xff]  ;;  %2676 = vmatpush.msra.mxu3 %v2038_v35  ;;  %v519_v35 = vld [vmem:[%s5257_s29 + $0x6d0] sm:$0xff] }
 0x1c6   : > { %v1774_v37 = vld [vmem:[%s5257_s29 + $0x2e08] sm:$0xff]  ;;  %2618 = vmatpush.msra.mxu0 %v1638_v36  ;;  %v639_v36 = vld [vmem:[%s5257_s29 + $0xa90] sm:$0xff] }
 0x1c7   : > { %v1894_v39 = vld [vmem:[%s5257_s29 + $0x31c8] sm:$0xff]  ;;  %2637 = vmatpush.msra.mxu1 %v1774_v37  ;;  %v775_v37 = vld [vmem:[%s5257_s29 + $0xed0] sm:$0xff] }
 0x1c8   : > { %v2030_v40 = vld [vmem:[%s5257_s29 + $0x3608] sm:$0xff]  ;;  %2658 = vmatpush.msra.mxu2 %v1894_v39  ;;  %v375_v39 = vld [vmem:[%s5257_s29 + $0x250] sm:$0xff] }
 0x1c9   : > { %v1630_v41 = vld [vmem:[%s5257_s29 + $0x2988] sm:$0xff]  ;;  %2677 = vmatpush.msra.mxu3 %v2030_v40  ;;  %v511_v40 = vld [vmem:[%s5257_s29 + $0x690] sm:$0xff] }
 0x1ca   : > { %v1766_v42 = vld [vmem:[%s5257_s29 + $0x2dc8] sm:$0xff]  ;;  %2619 = vmatpush.msra.mxu0 %v1630_v41  ;;  %v631_v41 = vld [vmem:[%s5257_s29 + $0xa50] sm:$0xff] }
 0x1cb   : > { %v1886_v43 = vld [vmem:[%s5257_s29 + $0x3188] sm:$0xff]  ;;  %2638 = vmatpush.msra.mxu1 %v1766_v42  ;;  %v767_v42 = vld [vmem:[%s5257_s29 + $0xe90] sm:$0xff] }
 0x1cc   : > { %v2022_v44 = vld [vmem:[%s5257_s29 + $0x35c8] sm:$0xff]  ;;  %2659 = vmatpush.msra.mxu2 %v1886_v43  ;;  %v367_v43 = vld [vmem:[%s5257_s29 + $0x210] sm:$0xff] }
 0x1cd   : > { %v1622_v49 = vld [vmem:[%s5257_s29 + $0x2948] sm:$0xff]  ;;  %2678 = vmatpush.msra.mxu3 %v2022_v44  ;;  %v503_v44 = vld [vmem:[%s5257_s29 + $0x650] sm:$0xff] }
 0x1ce   : > { %v1758_v50 = vld [vmem:[%s5257_s29 + $0x2d88] sm:$0xff]  ;;  %2620 = vmatpush.msra.mxu0 %v1622_v49  ;;  %v623_v49 = vld [vmem:[%s5257_s29 + $0xa10] sm:$0xff] }
 0x1cf   : > { %v1878_v51 = vld [vmem:[%s5257_s29 + $0x3148] sm:$0xff]  ;;  %2639 = vmatpush.msra.mxu1 %v1758_v50  ;;  %v759_v50 = vld [vmem:[%s5257_s29 + $0xe50] sm:$0xff] }
 0x1d0   : > { %v2014_v52 = vld [vmem:[%s5257_s29 + $0x3588] sm:$0xff]  ;;  %2660 = vmatpush.msra.mxu2 %v1878_v51  ;;  %v359_v51 = vld [vmem:[%s5257_s29 + $0x1d0] sm:$0xff] }
 0x1d1   : > { %v1614_v53 = vld [vmem:[%s5257_s29 + $0x2908] sm:$0xff]  ;;  %2679 = vmatpush.msra.mxu3 %v2014_v52  ;;  %v495_v52 = vld [vmem:[%s5257_s29 + $0x610] sm:$0xff] }
 0x1d2   : > { %v1750_v54 = vld [vmem:[%s5257_s29 + $0x2d48] sm:$0xff]  ;;  %2621 = vmatpush.msra.mxu0 %v1614_v53  ;;  %v615_v53 = vld [vmem:[%s5257_s29 + $0x9d0] sm:$0xff] }
 0x1d3   : > { %v1870_v55 = vld [vmem:[%s5257_s29 + $0x3108] sm:$0xff]  ;;  %2640 = vmatpush.msra.mxu1 %v1750_v54  ;;  %v751_v54 = vld [vmem:[%s5257_s29 + $0xe10] sm:$0xff] }
 0x1d4   : > { %v2006_v56 = vld [vmem:[%s5257_s29 + $0x3548] sm:$0xff]  ;;  %2661 = vmatpush.msra.mxu2 %v1870_v55  ;;  %v351_v55 = vld [vmem:[%s5257_s29 + $0x190] sm:$0xff] }
 0x1d5   : > { %v1606_v57 = vld [vmem:[%s5257_s29 + $0x28c8] sm:$0xff]  ;;  %2680 = vmatpush.msra.mxu3 %v2006_v56  ;;  %v487_v56 = vld [vmem:[%s5257_s29 + $0x5d0] sm:$0xff] }
 0x1d6   : > { %v1742_v58 = vld [vmem:[%s5257_s29 + $0x2d08] sm:$0xff]  ;;  %2622 = vmatpush.msra.mxu0 %v1606_v57  ;;  %v607_v57 = vld [vmem:[%s5257_s29 + $0x990] sm:$0xff] }
 0x1d7   : > { %v1862_v59 = vld [vmem:[%s5257_s29 + $0x30c8] sm:$0xff]  ;;  %2641 = vmatpush.msra.mxu1 %v1742_v58  ;;  %v743_v58 = vld [vmem:[%s5257_s29 + $0xdd0] sm:$0xff] }
 0x1d8   : > { %v1998_v60 = vld [vmem:[%s5257_s29 + $0x3508] sm:$0xff]  ;;  %2662 = vmatpush.msra.mxu2 %v1862_v59  ;;  %v343_v59 = vld [vmem:[%s5257_s29 + $0x150] sm:$0xff] }
 0x1d9   : > { %v1598_v1 = vld [vmem:[%s5257_s29 + $0x2888] sm:$0xff]  ;;  %2681 = vmatpush.msra.mxu3 %v1998_v60  ;;  %v479_v60 = vld [vmem:[%s5257_s29 + $0x590] sm:$0xff] }
 0x1da   : > { %v1734_v2 = vld [vmem:[%s5257_s29 + $0x2cc8] sm:$0xff]  ;;  %2623 = vmatpush.msra.mxu0 %v1598_v1  ;;  %v599_v1 = vld [vmem:[%s5257_s29 + $0x950] sm:$0xff] }
 0x1db   : > { %v1854_v3 = vld [vmem:[%s5257_s29 + $0x3088] sm:$0xff]  ;;  %2642 = vmatpush.msra.mxu1 %v1734_v2  ;;  %v735_v2 = vld [vmem:[%s5257_s29 + $0xd90] sm:$0xff] }
 0x1dc   : > { %v1990_v4 = vld [vmem:[%s5257_s29 + $0x34c8] sm:$0xff]  ;;  %2663 = vmatpush.msra.mxu2 %v1854_v3  ;;  %v335_v3 = vld [vmem:[%s5257_s29 + $0x110] sm:$0xff] }
 0x1dd   : > { %v1590_v5 = vld [vmem:[%s5257_s29 + $0x2848] sm:$0xff]  ;;  %2682 = vmatpush.msra.mxu3 %v1990_v4  ;;  %v471_v4 = vld [vmem:[%s5257_s29 + $0x550] sm:$0xff] }
 0x1de   : > { %v1726_v6 = vld [vmem:[%s5257_s29 + $0x2c88] sm:$0xff]  ;;  %2624 = vmatpush.msra.mxu0 %v1590_v5  ;;  %v591_v5 = vld [vmem:[%s5257_s29 + $0x910] sm:$0xff] }
 0x1df   : > { %v1846_v7 = vld [vmem:[%s5257_s29 + $0x3048] sm:$0xff]  ;;  %2643 = vmatpush.msra.mxu1 %v1726_v6  ;;  %v727_v6 = vld [vmem:[%s5257_s29 + $0xd50] sm:$0xff] }
 0x1e0   : > { %v1982_v8 = vld [vmem:[%s5257_s29 + $0x3488] sm:$0xff]  ;;  %2664 = vmatpush.msra.mxu2 %v1846_v7  ;;  %v327_v7 = vld [vmem:[%s5257_s29 + $0xd0] sm:$0xff] }
 0x1e1   : > { %v1582_v9 = vld [vmem:[%s5257_s29 + $0x2808] sm:$0xff]  ;;  %2683 = vmatpush.msra.mxu3 %v1982_v8  ;;  %v463_v8 = vld [vmem:[%s5257_s29 + $0x510] sm:$0xff] }
 0x1e2   : > { %v1718_v10 = vld [vmem:[%s5257_s29 + $0x2c48] sm:$0xff]  ;;  %2625 = vmatpush.msra.mxu0 %v1582_v9  ;;  %v583_v9 = vld [vmem:[%s5257_s29 + $0x8d0] sm:$0xff] }
 0x1e3   : > { %v1838_v11 = vld [vmem:[%s5257_s29 + $0x3008] sm:$0xff]  ;;  %2644 = vmatpush.msra.mxu1 %v1718_v10  ;;  %2626 = vmatmul.f32.vlgmr.msra.gmra.mxu0 %v5779_v16  ;;  %v719_v10 = vld [vmem:[%s5257_s29 + $0xd10] sm:$0xff] }
 0x1e4   : > { %v1974_v19 = vld [vmem:[%s5257_s29 + $0x3448] sm:$0xff]  ;;  %2665 = vmatpush.msra.mxu2 %v1838_v11  ;;  %2690 = vmatpush.msrb.mxu0 %v423_v12  ;;  %v319_v11 = vld [vmem:[%s5257_s29 + $0x90] sm:$0xff] }
 0x1e5   : > { %2684 = vmatpush.msra.mxu3 %v1974_v19  ;;  %v1710_v14 = vld [vmem:[%s5257_s29 + $0x2c08] sm:$0xff]  ;;  %2666 = vmatmul.f32.vlgmr.msra.gmra.mxu2 %v5567_v33  ;;  %v407_v33 = vld [vmem:[%s5257_s29 + $0x350] sm:$0xff] }
 0x1e6   : > { %v1966_v15 = vld [vmem:[%s5257_s29 + $0x3408] sm:$0xff]  ;;  %2730 = vmatpush.msrb.mxu2 %v679_v13  ;;  %2645 = vmatpush.msra.mxu1 %v1710_v14  ;;  %v455_v19 = vld [vmem:[%s5257_s29 + $0x4d0] sm:$0xff] }
 0x1e7   : > { %2685 = vmatpush.msra.mxu3 %v1966_v15  ;;  %2646 = vmatmul.f32.vlgmr.msra.gmra.mxu1 %v5787_v21  ;;  %v575_v12 = vld [vmem:[%s5257_s29 + $0x890] sm:$0xff] }
 0x1e8   : > { %2686 = vmatmul.f32.vlgmr.msra.gmra.mxu3 %v5573_v38  ;;  %2691 = vmatpush.msrb.mxu0 %v415_v25  ;;  %v791_v38 = vld [vmem:[%s5257_s29 + $0xf50] sm:$0xff] }
 0x1e9   : > { %2710 = vmatpush.msrb.mxu1 %v551_v17  ;;  %2731 = vmatpush.msrb.mxu2 %v671_v18  ;;  %v711_v13 = vld [vmem:[%s5257_s29 + $0xcd0] sm:$0xff] }
 0x1ea   : > { %2750 = vmatpush.msrb.mxu3 %v807_v20  ;;  %2692 = vmatpush.msrb.mxu0 %v407_v33  ;;  %v311_v14 = vld [vmem:[%s5257_s29 + $0x50] sm:$0xff] }
 0x1eb   : > { %2711 = vmatpush.msrb.mxu1 %v543_v22  ;;  %2732 = vmatpush.msrb.mxu2 %v663_v23  ;;  %v447_v15 = vld [vmem:[%s5257_s29 + $0x490] sm:$0xff] }
 0x1ec   : > { %2751 = vmatpush.msrb.mxu3 %v799_v24  ;;  %2693 = vmatpush.msrb.mxu0 %v399_v26  ;;  %v567_v25 = vld [vmem:[%s5257_s29 + $0x850] sm:$0xff] }
 0x1ed   : > { %2712 = vmatpush.msrb.mxu1 %v535_v27  ;;  %2733 = vmatpush.msrb.mxu2 %v655_v28  ;;  %v703_v17 = vld [vmem:[%s5257_s29 + $0xc90] sm:$0xff] }
 0x1ee   : > { %2752 = vmatpush.msrb.mxu3 %v791_v38  ;;  %2694 = vmatpush.msrb.mxu0 %v391_v29  ;;  %v303_v18 = vld [vmem:[%s5257_s29 + $0x10] sm:$0xff] }
 0x1ef   : > { %2713 = vmatpush.msrb.mxu1 %v527_v30  ;;  %2734 = vmatpush.msrb.mxu2 %v647_v31  ;;  %v439_v20 = vld [vmem:[%s5257_s29 + $0x450] sm:$0xff] }
 0x1f0   : > { %2753 = vmatpush.msrb.mxu3 %v783_v32  ;;  %2695 = vmatpush.msrb.mxu0 %v383_v34  ;;  %v559_v33 = vld [vmem:[%s5257_s29 + $0x810] sm:$0xff] }
 0x1f1   : > { %2714 = vmatpush.msrb.mxu1 %v519_v35  ;;  %2735 = vmatpush.msrb.mxu2 %v639_v36  ;;  %v695_v22 = vld [vmem:[%s5257_s29 + $0xc50] sm:$0xff] }
 0x1f2   : > { %2754 = vmatpush.msrb.mxu3 %v775_v37  ;;  %2696 = vmatpush.msrb.mxu0 %v375_v39  ;;  %v935_v23 = vld [vmem:[%s5257_s29 + $0x13d0] sm:$0xff] }
 0x1f3   : > { %2715 = vmatpush.msrb.mxu1 %v511_v40  ;;  %2736 = vmatpush.msrb.mxu2 %v631_v41  ;;  %v1191_v24 = vld [vmem:[%s5257_s29 + $0x1bd0] sm:$0xff] }
 0x1f4   : > { %2755 = vmatpush.msrb.mxu3 %v767_v42  ;;  %2697 = vmatpush.msrb.mxu0 %v367_v43  ;;  %v431_v26 = vld [vmem:[%s5257_s29 + $0x410] sm:$0xff] }
 0x1f5   : > { %2716 = vmatpush.msrb.mxu1 %v503_v44  ;;  %2737 = vmatpush.msrb.mxu2 %v623_v49  ;;  %v687_v27 = vld [vmem:[%s5257_s29 + $0xc10] sm:$0xff] }
 0x1f6   : > { %2756 = vmatpush.msrb.mxu3 %v759_v50  ;;  %2698 = vmatpush.msrb.mxu0 %v359_v51  ;;  %v927_v28 = vld [vmem:[%s5257_s29 + $0x1390] sm:$0xff] }
 0x1f7   : > { %2717 = vmatpush.msrb.mxu1 %v495_v52  ;;  %2738 = vmatpush.msrb.mxu2 %v615_v53  ;;  %v1063_v38 = vld [vmem:[%s5257_s29 + $0x17d0] sm:$0xff] }
 0x1f8   : > { %2757 = vmatpush.msrb.mxu3 %v751_v54  ;;  %2699 = vmatpush.msrb.mxu0 %v351_v55  ;;  %v1183_v29 = vld [vmem:[%s5257_s29 + $0x1b90] sm:$0xff] }
 0x1f9   : > { %2718 = vmatpush.msrb.mxu1 %v487_v56  ;;  %2739 = vmatpush.msrb.mxu2 %v607_v57  ;;  %v1319_v30 = vld [vmem:[%s5257_s29 + $0x1fd0] sm:$0xff] }
 0x1fa   : > { %2758 = vmatpush.msrb.mxu3 %v743_v58  ;;  %2700 = vmatpush.msrb.mxu0 %v343_v59  ;;  %v919_v31 = vld [vmem:[%s5257_s29 + $0x1350] sm:$0xff] }
 0x1fb   : > { %2719 = vmatpush.msrb.mxu1 %v479_v60  ;;  %2740 = vmatpush.msrb.mxu2 %v599_v1  ;;  %v1055_v32 = vld [vmem:[%s5257_s29 + $0x1790] sm:$0xff] }
 0x1fc   : > { %2759 = vmatpush.msrb.mxu3 %v735_v2  ;;  %2701 = vmatpush.msrb.mxu0 %v335_v3  ;;  %v1175_v34 = vld [vmem:[%s5257_s29 + $0x1b50] sm:$0xff] }
 0x1fd   : > { %2720 = vmatpush.msrb.mxu1 %v471_v4  ;;  %2741 = vmatpush.msrb.mxu2 %v591_v5  ;;  %v1311_v35 = vld [vmem:[%s5257_s29 + $0x1f90] sm:$0xff] }
 0x1fe   : > { %2760 = vmatpush.msrb.mxu3 %v727_v6  ;;  %2702 = vmatpush.msrb.mxu0 %v327_v7  ;;  %v911_v36 = vld [vmem:[%s5257_s29 + $0x1310] sm:$0xff] }
 0x1ff   : > { %2721 = vmatpush.msrb.mxu1 %v463_v8  ;;  %2742 = vmatpush.msrb.mxu2 %v583_v9  ;;  %v1047_v37 = vld [vmem:[%s5257_s29 + $0x1750] sm:$0xff] }
 0x200   : > { %2761 = vmatpush.msrb.mxu3 %v719_v10  ;;  %2703 = vmatpush.msrb.mxu0 %v319_v11  ;;  %v1167_v39 = vld [vmem:[%s5257_s29 + $0x1b10] sm:$0xff] }
 0x201   : > { %2722 = vmatpush.msrb.mxu1 %v455_v19  ;;  %2743 = vmatpush.msrb.mxu2 %v575_v12  ;;  %v1303_v40 = vld [vmem:[%s5257_s29 + $0x1f50] sm:$0xff] }
 0x202   : > { %2762 = vmatpush.msrb.mxu3 %v711_v13  ;;  %2704 = vmatpush.msrb.mxu0 %v311_v14  ;;  %v903_v41 = vld [vmem:[%s5257_s29 + $0x12d0] sm:$0xff] }
 0x203   : > { %2723 = vmatpush.msrb.mxu1 %v447_v15  ;;  %2744 = vmatpush.msrb.mxu2 %v567_v25  ;;  %v1039_v42 = vld [vmem:[%s5257_s29 + $0x1710] sm:$0xff] }
 0x204   : > { %2763 = vmatpush.msrb.mxu3 %v703_v17  ;;  %2705 = vmatpush.msrb.mxu0 %v303_v18  ;;  %v1159_v43 = vld [vmem:[%s5257_s29 + $0x1ad0] sm:$0xff] }
 0x205   : > { %2724 = vmatpush.msrb.mxu1 %v439_v20  ;;  %2745 = vmatpush.msrb.mxu2 %v559_v33  ;;  %v1295_v44 = vld [vmem:[%s5257_s29 + $0x1f10] sm:$0xff] }
 0x206   : > { %2764 = vmatpush.msrb.mxu3 %v695_v22  ;;  %2770 = vmatpush.msra.mxu0 %v935_v23  ;;  %v895_v49 = vld [vmem:[%s5257_s29 + $0x1290] sm:$0xff] }
 0x207   : > { %2810 = vmatpush.msra.mxu2 %v1191_v24  ;;  %2725 = vmatpush.msrb.mxu1 %v431_v26  ;;  %v1031_v50 = vld [vmem:[%s5257_s29 + $0x16d0] sm:$0xff] }
 0x208   : > { %2765 = vmatpush.msrb.mxu3 %v687_v27  ;;  %2771 = vmatpush.msra.mxu0 %v927_v28  ;;  %v1151_v51 = vld [vmem:[%s5257_s29 + $0x1a90] sm:$0xff] }
 0x209   : > { %2790 = vmatpush.msra.mxu1 %v1063_v38  ;;  %2811 = vmatpush.msra.mxu2 %v1183_v29  ;;  %v1287_v52 = vld [vmem:[%s5257_s29 + $0x1ed0] sm:$0xff] }
 0x20a   : > { %2830 = vmatpush.msra.mxu3 %v1319_v30  ;;  %2772 = vmatpush.msra.mxu0 %v919_v31  ;;  %v887_v53 = vld [vmem:[%s5257_s29 + $0x1250] sm:$0xff] }
 0x20b   : > { %2791 = vmatpush.msra.mxu1 %v1055_v32  ;;  %2812 = vmatpush.msra.mxu2 %v1175_v34  ;;  %v1023_v54 = vld [vmem:[%s5257_s29 + $0x1690] sm:$0xff] }
 0x20c   : > { %2831 = vmatpush.msra.mxu3 %v1311_v35  ;;  %2773 = vmatpush.msra.mxu0 %v911_v36  ;;  %v1143_v55 = vld [vmem:[%s5257_s29 + $0x1a50] sm:$0xff] }
 0x20d   : > { %2792 = vmatpush.msra.mxu1 %v1047_v37  ;;  %2813 = vmatpush.msra.mxu2 %v1167_v39  ;;  %v1279_v56 = vld [vmem:[%s5257_s29 + $0x1e90] sm:$0xff] }
 0x20e   : > { %2832 = vmatpush.msra.mxu3 %v1303_v40  ;;  %2774 = vmatpush.msra.mxu0 %v903_v41  ;;  %v879_v57 = vld [vmem:[%s5257_s29 + $0x1210] sm:$0xff] }
 0x20f   : > { %2793 = vmatpush.msra.mxu1 %v1039_v42  ;;  %2814 = vmatpush.msra.mxu2 %v1159_v43  ;;  %v1015_v58 = vld [vmem:[%s5257_s29 + $0x1650] sm:$0xff] }
 0x210   : > { %2833 = vmatpush.msra.mxu3 %v1295_v44  ;;  %2775 = vmatpush.msra.mxu0 %v895_v49  ;;  %v1135_v59 = vld [vmem:[%s5257_s29 + $0x1a10] sm:$0xff] }
 0x211   : > { %2794 = vmatpush.msra.mxu1 %v1031_v50  ;;  %2815 = vmatpush.msra.mxu2 %v1151_v51  ;;  %v1271_v60 = vld [vmem:[%s5257_s29 + $0x1e50] sm:$0xff] }
 0x212   : > { %2834 = vmatpush.msra.mxu3 %v1287_v52  ;;  %2776 = vmatpush.msra.mxu0 %v887_v53  ;;  %v871_v1 = vld [vmem:[%s5257_s29 + $0x11d0] sm:$0xff] }
 0x213   : > { %2795 = vmatpush.msra.mxu1 %v1023_v54  ;;  %2816 = vmatpush.msra.mxu2 %v1143_v55  ;;  %v1007_v2 = vld [vmem:[%s5257_s29 + $0x1610] sm:$0xff] }
 0x214   : > { %2835 = vmatpush.msra.mxu3 %v1279_v56  ;;  %2777 = vmatpush.msra.mxu0 %v879_v57  ;;  %v1127_v3 = vld [vmem:[%s5257_s29 + $0x19d0] sm:$0xff] }
 0x215   : > { %2796 = vmatpush.msra.mxu1 %v1015_v58  ;;  %v1263_v4 = vld [vmem:[%s5257_s29 + $0x1e10] sm:$0xff]  ;;  %2817 = vmatpush.msra.mxu2 %v1135_v59 }
 0x216   : > { %2836 = vmatpush.msra.mxu3 %v1271_v60  ;;  %v863_v5 = vld [vmem:[%s5257_s29 + $0x1190] sm:$0xff]  ;;  %2778 = vmatpush.msra.mxu0 %v871_v1 }
 0x217   : > { %v999_v6 = vld [vmem:[%s5257_s29 + $0x15d0] sm:$0xff]  ;;  %2797 = vmatpush.msra.mxu1 %v1007_v2  ;;  %2818 = vmatpush.msra.mxu2 %v1127_v3 }
 0x218   : > { %v1119_v7 = vld [vmem:[%s5257_s29 + $0x1990] sm:$0xff]  ;;  %2837 = vmatpush.msra.mxu3 %v1263_v4  ;;  %2779 = vmatpush.msra.mxu0 %v863_v5 }
 0x219   : > { %v1255_v8 = vld [vmem:[%s5257_s29 + $0x1dd0] sm:$0xff]  ;;  %2798 = vmatpush.msra.mxu1 %v999_v6  ;;  %2819 = vmatpush.msra.mxu2 %v1119_v7 }
 0x21a   : > { %v855_v9 = vld [vmem:[%s5257_s29 + $0x1150] sm:$0xff]  ;;  %2838 = vmatpush.msra.mxu3 %v1255_v8  ;;  %2746 = vmatmul.f32.vlgmr.msrb.gmra.mxu2 %v5387_v45 }
 0x21b   : > { %v991_v10 = vld [vmem:[%s5257_s29 + $0x1590] sm:$0xff]  ;;  %2780 = vmatpush.msra.mxu0 %v855_v9  ;;  %2766 = vmatmul.f32.vlgmr.msrb.gmra.mxu3 %v5391_v47 }
 0x21c   : > { %v1111_v11 = vld [vmem:[%s5257_s29 + $0x1950] sm:$0xff]  ;;  %2799 = vmatpush.msra.mxu1 %v991_v10  ;;  %2706 = vmatmul.f32.vlgmr.msrb.gmra.mxu0 %v5389_v46 }
 0x21d   : > { %v1247_v19 = vld [vmem:[%s5257_s29 + $0x1d90] sm:$0xff]  ;;  %2820 = vmatpush.msra.mxu2 %v1111_v11  ;;  %2726 = vmatmul.f32.vlgmr.msrb.gmra.mxu1 %v5393_v48 }
 0x21e   : > { %v847_v12 = vld [vmem:[%s5257_s29 + $0x1110] sm:$0xff]  ;;  %2839 = vmatpush.msra.mxu3 %v1247_v19 }
 0x21f   : > { %v983_v13 = vld [vmem:[%s5257_s29 + $0x1550] sm:$0xff]  ;;  %2781 = vmatpush.msra.mxu0 %v847_v12 }
 0x220   : > { %v1103_v14 = vld [vmem:[%s5257_s29 + $0x1910] sm:$0xff]  ;;  %2800 = vmatpush.msra.mxu1 %v983_v13 }
 0x221   : > { %v1239_v15 = vld [vmem:[%s5257_s29 + $0x1d50] sm:$0xff]  ;;  %2821 = vmatpush.msra.mxu2 %v1103_v14 }
 0x222   : > { %v839_v25 = vld [vmem:[%s5257_s29 + $0x10d0] sm:$0xff]  ;;  %2840 = vmatpush.msra.mxu3 %v1239_v15 }
 0x223   : > { %v975_v17 = vld [vmem:[%s5257_s29 + $0x1510] sm:$0xff]  ;;  %2782 = vmatpush.msra.mxu0 %v839_v25 }
 0x224   : > { %v1095_v18 = vld [vmem:[%s5257_s29 + $0x18d0] sm:$0xff]  ;;  %2801 = vmatpush.msra.mxu1 %v975_v17 }
 0x225   : > { %v1231_v20 = vld [vmem:[%s5257_s29 + $0x1d10] sm:$0xff]  ;;  %2822 = vmatpush.msra.mxu2 %v1095_v18 }
 0x226   : > { %v831_v33 = vld [vmem:[%s5257_s29 + $0x1090] sm:$0xff]  ;;  %2841 = vmatpush.msra.mxu3 %v1231_v20 }
 0x227   : > { %v967_v22 = vld [vmem:[%s5257_s29 + $0x14d0] sm:$0xff]  ;;  %2783 = vmatpush.msra.mxu0 %v831_v33 }
 0x228   : > { %v1087_v23 = vld [vmem:[%s5257_s29 + $0x1890] sm:$0xff]  ;;  %2802 = vmatpush.msra.mxu1 %v967_v22 }
 0x229   : > { %v1223_v24 = vld [vmem:[%s5257_s29 + $0x1cd0] sm:$0xff]  ;;  %2823 = vmatpush.msra.mxu2 %v1087_v23 }
 0x22a   : > { %v823_v26 = vld [vmem:[%s5257_s29 + $0x1050] sm:$0xff]  ;;  %2842 = vmatpush.msra.mxu3 %v1223_v24 }
 0x22b   : > { %v959_v27 = vld [vmem:[%s5257_s29 + $0x1490] sm:$0xff]  ;;  %2784 = vmatpush.msra.mxu0 %v823_v26 }
 0x22c   : > { %v1079_v28 = vld [vmem:[%s5257_s29 + $0x1850] sm:$0xff]  ;;  %2803 = vmatpush.msra.mxu1 %v959_v27 }
 0x22d   : > { %v1215_v38 = vld [vmem:[%s5257_s29 + $0x1c90] sm:$0xff]  ;;  %2824 = vmatpush.msra.mxu2 %v1079_v28 }
 0x22e   : > { %v815_v29 = vld [vmem:[%s5257_s29 + $0x1010] sm:$0xff]  ;;  %2843 = vmatpush.msra.mxu3 %v1215_v38 }
 0x22f   : > { %v951_v30 = vld [vmem:[%s5257_s29 + $0x1450] sm:$0xff]  ;;  %2785 = vmatpush.msra.mxu0 %v815_v29 }
 0x230   : > { %v1071_v31 = vld [vmem:[%s5257_s29 + $0x1810] sm:$0xff]  ;;  %2804 = vmatpush.msra.mxu1 %v951_v30  ;;  %2786 = vmatmul.f32.vlgmr.msra.gmra.mxu0 %v5409_v62 }
 0x231   : > { %v1207_v32 = vld [vmem:[%s5257_s29 + $0x1c50] sm:$0xff]  ;;  %2825 = vmatpush.msra.mxu2 %v1071_v31 }
 0x232   : > { %v1447_v34 = vld [vmem:[%s5257_s29 + $0x23d0] sm:$0xff]  ;;  %2844 = vmatpush.msra.mxu3 %v1207_v32  ;;  %2826 = vmatmul.f32.vlgmr.msra.gmra.mxu2 %v5407_v61 }
 0x233   : > { %v1703_v35 = vld [vmem:[%s5257_s29 + $0x2bd0] sm:$0xff]  ;;  %2850 = vmatpush.msrb.mxu0 %v1447_v34 }
 0x234   : > { %v943_v36 = vld [vmem:[%s5257_s29 + $0x1410] sm:$0xff]  ;;  %2890 = vmatpush.msrb.mxu2 %v1703_v35 }
 0x235   : > { %v1199_v37 = vld [vmem:[%s5257_s29 + $0x1c10] sm:$0xff]  ;;  %2805 = vmatpush.msra.mxu1 %v943_v36 }
 0x236   : > { %v1439_v39 = vld [vmem:[%s5257_s29 + $0x2390] sm:$0xff]  ;;  %2845 = vmatpush.msra.mxu3 %v1199_v37  ;;  %2806 = vmatmul.f32.vlgmr.msra.gmra.mxu1 %v5413_v0 }
 0x237   : > { %v1575_v40 = vld [vmem:[%s5257_s29 + $0x27d0] sm:$0xff]  ;;  %2851 = vmatpush.msrb.mxu0 %v1439_v39  ;;  %2846 = vmatmul.f32.vlgmr.msra.gmra.mxu3 %v5411_v63 }
 0x238   : > { %v1695_v41 = vld [vmem:[%s5257_s29 + $0x2b90] sm:$0xff]  ;;  %2870 = vmatpush.msrb.mxu1 %v1575_v40 }
 0x239   : > { %v1831_v42 = vld [vmem:[%s5257_s29 + $0x2fd0] sm:$0xff]  ;;  %2891 = vmatpush.msrb.mxu2 %v1695_v41 }
 0x23a   : > { %v1431_v43 = vld [vmem:[%s5257_s29 + $0x2350] sm:$0xff]  ;;  %2910 = vmatpush.msrb.mxu3 %v1831_v42 }
 0x23b   : > { %v1567_v44 = vld [vmem:[%s5257_s29 + $0x2790] sm:$0xff]  ;;  %2852 = vmatpush.msrb.mxu0 %v1431_v43 }
 0x23c   : > { %v1687_v49 = vld [vmem:[%s5257_s29 + $0x2b50] sm:$0xff]  ;;  %2871 = vmatpush.msrb.mxu1 %v1567_v44 }
 0x23d   : > { %v1823_v50 = vld [vmem:[%s5257_s29 + $0x2f90] sm:$0xff]  ;;  %2892 = vmatpush.msrb.mxu2 %v1687_v49 }
 0x23e   : > { %v1423_v51 = vld [vmem:[%s5257_s29 + $0x2310] sm:$0xff]  ;;  %2911 = vmatpush.msrb.mxu3 %v1823_v50  ;;  %v424_v50 = vld [vmem:[%s5257_s29 + $0x3d8] sm:$0xff] }
 0x23f   : > { %v1559_v52 = vld [vmem:[%s5257_s29 + $0x2750] sm:$0xff]  ;;  %2853 = vmatpush.msrb.mxu0 %v1423_v51 }
 0x240   : > { %v1679_v53 = vld [vmem:[%s5257_s29 + $0x2b10] sm:$0xff]  ;;  %2872 = vmatpush.msrb.mxu1 %v1559_v52 }
 0x241   : > { %v1815_v54 = vld [vmem:[%s5257_s29 + $0x2f50] sm:$0xff]  ;;  %2893 = vmatpush.msrb.mxu2 %v1679_v53  ;;  %v5987_v53 = vld.sshfl [vmem:[#allocation1] sm:$0xff pattern:$0x73625140] }
 0x242   : > { %v1415_v55 = vld [vmem:[%s5257_s29 + $0x22d0] sm:$0xff]  ;;  %2912 = vmatpush.msrb.mxu3 %v1815_v54 }
 0x243   : > { %v1551_v56 = vld [vmem:[%s5257_s29 + $0x2710] sm:$0xff]  ;;  %2854 = vmatpush.msrb.mxu0 %v1415_v55 }
 0x244   : > { %v1671_v57 = vld [vmem:[%s5257_s29 + $0x2ad0] sm:$0xff]  ;;  %2873 = vmatpush.msrb.mxu1 %v1551_v56  ;;  %v416_v56 = vld [vmem:[%s5257_s29 + $0x398] sm:$0xff] }
 0x245   : > { %v1807_v58 = vld [vmem:[%s5257_s29 + $0x2f10] sm:$0xff]  ;;  %2894 = vmatpush.msrb.mxu2 %v1671_v57  ;;  %v552_v57 = vld [vmem:[%s5257_s29 + $0x7d8] sm:$0xff] }
 0x246   : > { %v1407_v59 = vld [vmem:[%s5257_s29 + $0x2290] sm:$0xff]  ;;  %2913 = vmatpush.msrb.mxu3 %v1807_v58  ;;  %v5995_v58 = vld.sshfl [vmem:[#allocation1 + $0x8] sm:$0xff pattern:$0x73625140] }
 0x247   : > { %v1543_v60 = vld [vmem:[%s5257_s29 + $0x26d0] sm:$0xff]  ;;  %2855 = vmatpush.msrb.mxu0 %v1407_v59 }
 0x248   : > { %v1663_v1 = vld [vmem:[%s5257_s29 + $0x2a90] sm:$0xff]  ;;  %2874 = vmatpush.msrb.mxu1 %v1543_v60  ;;  %v408_v60 = vld [vmem:[%s5257_s29 + $0x358] sm:$0xff] }
 0x249   : > { %v1799_v2 = vld [vmem:[%s5257_s29 + $0x2ed0] sm:$0xff]  ;;  %2895 = vmatpush.msrb.mxu2 %v1663_v1  ;;  %v544_v1 = vld [vmem:[%s5257_s29 + $0x798] sm:$0xff] }
 0x24a   : > { %v1399_v3 = vld [vmem:[%s5257_s29 + $0x2250] sm:$0xff]  ;;  %2914 = vmatpush.msrb.mxu3 %v1799_v2 }
 0x24b   : > { %v1535_v4 = vld [vmem:[%s5257_s29 + $0x2690] sm:$0xff]  ;;  %2856 = vmatpush.msrb.mxu0 %v1399_v3 }
 0x24c   : > { %v1655_v5 = vld [vmem:[%s5257_s29 + $0x2a50] sm:$0xff]  ;;  %2875 = vmatpush.msrb.mxu1 %v1535_v4  ;;  %v400_v4 = vld [vmem:[%s5257_s29 + $0x318] sm:$0xff] }
 0x24d   : > { %v1791_v6 = vld [vmem:[%s5257_s29 + $0x2e90] sm:$0xff]  ;;  %2896 = vmatpush.msrb.mxu2 %v1655_v5 }
 0x24e   : > { %v1391_v7 = vld [vmem:[%s5257_s29 + $0x2210] sm:$0xff]  ;;  %2915 = vmatpush.msrb.mxu3 %v1791_v6 }
 0x24f   : > { %v1527_v8 = vld [vmem:[%s5257_s29 + $0x2650] sm:$0xff]  ;;  %2857 = vmatpush.msrb.mxu0 %v1391_v7  ;;  %v392_v7 = vld [vmem:[%s5257_s29 + $0x2d8] sm:$0xff] }
 0x250   : > { %v1647_v9 = vld [vmem:[%s5257_s29 + $0x2a10] sm:$0xff]  ;;  %2876 = vmatpush.msrb.mxu1 %v1527_v8  ;;  %v528_v8 = vld [vmem:[%s5257_s29 + $0x718] sm:$0xff] }
 0x251   : > { %v1783_v10 = vld [vmem:[%s5257_s29 + $0x2e50] sm:$0xff]  ;;  %2897 = vmatpush.msrb.mxu2 %v1647_v9 }
 0x252   : > { %v1383_v11 = vld [vmem:[%s5257_s29 + $0x21d0] sm:$0xff]  ;;  %2916 = vmatpush.msrb.mxu3 %v1783_v10 }
 0x253   : > { %v1519_v19 = vld [vmem:[%s5257_s29 + $0x2610] sm:$0xff]  ;;  %2858 = vmatpush.msrb.mxu0 %v1383_v11  ;;  %v384_v11 = vld [vmem:[%s5257_s29 + $0x298] sm:$0xff] }
 0x254   : > { %v1639_v12 = vld [vmem:[%s5257_s29 + $0x29d0] sm:$0xff]  ;;  %2877 = vmatpush.msrb.mxu1 %v1519_v19  ;;  %v520_v19 = vld [vmem:[%s5257_s29 + $0x6d8] sm:$0xff] }
 0x255   : > { %v1775_v13 = vld [vmem:[%s5257_s29 + $0x2e10] sm:$0xff]  ;;  %2898 = vmatpush.msrb.mxu2 %v1639_v12 }
 0x256   : > { %v1375_v14 = vld [vmem:[%s5257_s29 + $0x2190] sm:$0xff]  ;;  %2917 = vmatpush.msrb.mxu3 %v1775_v13 }
 0x257   : > { %v1511_v15 = vld [vmem:[%s5257_s29 + $0x25d0] sm:$0xff]  ;;  %2859 = vmatpush.msrb.mxu0 %v1375_v14  ;;  %v376_v14 = vld [vmem:[%s5257_s29 + $0x258] sm:$0xff] }
 0x258   : > { %v1631_v25 = vld [vmem:[%s5257_s29 + $0x2990] sm:$0xff]  ;;  %2878 = vmatpush.msrb.mxu1 %v1511_v15  ;;  %v512_v15 = vld [vmem:[%s5257_s29 + $0x698] sm:$0xff] }
 0x259   : > { %v1767_v17 = vld [vmem:[%s5257_s29 + $0x2dd0] sm:$0xff]  ;;  %2899 = vmatpush.msrb.mxu2 %v1631_v25 }
 0x25a   : > { %v1367_v18 = vld [vmem:[%s5257_s29 + $0x2150] sm:$0xff]  ;;  %2918 = vmatpush.msrb.mxu3 %v1767_v17 }
 0x25b   : > { %v1503_v20 = vld [vmem:[%s5257_s29 + $0x2590] sm:$0xff]  ;;  %2860 = vmatpush.msrb.mxu0 %v1367_v18  ;;  %v368_v18 = vld [vmem:[%s5257_s29 + $0x218] sm:$0xff] }
 0x25c   : > { %v1623_v33 = vld [vmem:[%s5257_s29 + $0x2950] sm:$0xff]  ;;  %2879 = vmatpush.msrb.mxu1 %v1503_v20  ;;  %v504_v20 = vld [vmem:[%s5257_s29 + $0x658] sm:$0xff] }
 0x25d   : > { %v1759_v22 = vld [vmem:[%s5257_s29 + $0x2d90] sm:$0xff]  ;;  %2900 = vmatpush.msrb.mxu2 %v1623_v33 }
 0x25e   : > { %v1359_v23 = vld [vmem:[%s5257_s29 + $0x2110] sm:$0xff]  ;;  %2919 = vmatpush.msrb.mxu3 %v1759_v22 }
 0x25f   : > { %v1495_v24 = vld [vmem:[%s5257_s29 + $0x2550] sm:$0xff]  ;;  %2861 = vmatpush.msrb.mxu0 %v1359_v23  ;;  %v360_v23 = vld [vmem:[%s5257_s29 + $0x1d8] sm:$0xff] }
 0x260   : > { %v1615_v26 = vld [vmem:[%s5257_s29 + $0x2910] sm:$0xff]  ;;  %2880 = vmatpush.msrb.mxu1 %v1495_v24  ;;  %v496_v24 = vld [vmem:[%s5257_s29 + $0x618] sm:$0xff] }
 0x261   : > { %v1751_v27 = vld [vmem:[%s5257_s29 + $0x2d50] sm:$0xff]  ;;  %2901 = vmatpush.msrb.mxu2 %v1615_v26 }
 0x262   : > { %v1351_v28 = vld [vmem:[%s5257_s29 + $0x20d0] sm:$0xff]  ;;  %2920 = vmatpush.msrb.mxu3 %v1751_v27 }
 0x263   : > { %v1487_v38 = vld [vmem:[%s5257_s29 + $0x2510] sm:$0xff]  ;;  %2862 = vmatpush.msrb.mxu0 %v1351_v28  ;;  %v352_v28 = vld [vmem:[%s5257_s29 + $0x198] sm:$0xff] }
 0x264   : > { %v1607_v29 = vld [vmem:[%s5257_s29 + $0x28d0] sm:$0xff]  ;;  %2881 = vmatpush.msrb.mxu1 %v1487_v38  ;;  %v488_v38 = vld [vmem:[%s5257_s29 + $0x5d8] sm:$0xff] }
 0x265   : > { %v1743_v30 = vld [vmem:[%s5257_s29 + $0x2d10] sm:$0xff]  ;;  %2902 = vmatpush.msrb.mxu2 %v1607_v29 }
 0x266   : > { %v1343_v31 = vld [vmem:[%s5257_s29 + $0x2090] sm:$0xff]  ;;  %2921 = vmatpush.msrb.mxu3 %v1743_v30 }
 0x267   : > { %v1479_v32 = vld [vmem:[%s5257_s29 + $0x24d0] sm:$0xff]  ;;  %2863 = vmatpush.msrb.mxu0 %v1343_v31  ;;  %v344_v31 = vld [vmem:[%s5257_s29 + $0x158] sm:$0xff] }
 0x268   : > { %v1599_v34 = vld [vmem:[%s5257_s29 + $0x2890] sm:$0xff]  ;;  %2882 = vmatpush.msrb.mxu1 %v1479_v32  ;;  %v480_v32 = vld [vmem:[%s5257_s29 + $0x598] sm:$0xff] }
 0x269   : > { %v1735_v35 = vld [vmem:[%s5257_s29 + $0x2cd0] sm:$0xff]  ;;  %2903 = vmatpush.msrb.mxu2 %v1599_v34 }
 0x26a   : > { %v1335_v36 = vld [vmem:[%s5257_s29 + $0x2050] sm:$0xff]  ;;  %2922 = vmatpush.msrb.mxu3 %v1735_v35 }
 0x26b   : > { %v1471_v37 = vld [vmem:[%s5257_s29 + $0x2490] sm:$0xff]  ;;  %2864 = vmatpush.msrb.mxu0 %v1335_v36  ;;  %v336_v36 = vld [vmem:[%s5257_s29 + $0x118] sm:$0xff] }
 0x26c   : > { %v1591_v39 = vld [vmem:[%s5257_s29 + $0x2850] sm:$0xff]  ;;  %2883 = vmatpush.msrb.mxu1 %v1471_v37  ;;  %v472_v37 = vld [vmem:[%s5257_s29 + $0x558] sm:$0xff] }
 0x26d   : > { %v1727_v40 = vld [vmem:[%s5257_s29 + $0x2c90] sm:$0xff]  ;;  %2904 = vmatpush.msrb.mxu2 %v1591_v39 }
 0x26e   : > { %v1327_v41 = vld [vmem:[%s5257_s29 + $0x2010] sm:$0xff]  ;;  %2923 = vmatpush.msrb.mxu3 %v1727_v40 }
 0x26f   : > { %v1463_v42 = vld [vmem:[%s5257_s29 + $0x2450] sm:$0xff]  ;;  %2865 = vmatpush.msrb.mxu0 %v1327_v41  ;;  %v328_v41 = vld [vmem:[%s5257_s29 + $0xd8] sm:$0xff] }
 0x270   : > { %v1583_v43 = vld [vmem:[%s5257_s29 + $0x2810] sm:$0xff]  ;;  %2884 = vmatpush.msrb.mxu1 %v1463_v42  ;;  %2866 = vmatmul.f32.vlgmr.msrb.gmra.mxu0 %v5987_v53  ;;  %v464_v42 = vld [vmem:[%s5257_s29 + $0x518] sm:$0xff] }
 0x271   : > { %v1719_v44 = vld [vmem:[%s5257_s29 + $0x2c50] sm:$0xff]  ;;  %2905 = vmatpush.msrb.mxu2 %v1583_v43 }
 0x272   : > { %v1959_v49 = vld [vmem:[%s5257_s29 + $0x33d0] sm:$0xff]  ;;  %2924 = vmatpush.msrb.mxu3 %v1719_v44  ;;  %2906 = vmatmul.f32.vlgmr.msrb.gmra.mxu2 %v5779_v16 }
 0x273   : > { %v1455_v51 = vld [vmem:[%s5257_s29 + $0x2410] sm:$0xff]  ;;  %2930 = vmatpush.msra.mxu0 %v1959_v49  ;;  %2970 = vmatpush.msra.mxu2 %v424_v50  ;;  %v320_v49 = vld [vmem:[%s5257_s29 + $0x98] sm:$0xff] }
 0x274   : > { %v1711_v52 = vld [vmem:[%s5257_s29 + $0x2c10] sm:$0xff]  ;;  %2885 = vmatpush.msrb.mxu1 %v1455_v51  ;;  %v456_v50 = vld [vmem:[%s5257_s29 + $0x4d8] sm:$0xff] }
 0x275   : > { %v1951_v54 = vld [vmem:[%s5257_s29 + $0x3390] sm:$0xff]  ;;  %2925 = vmatpush.msrb.mxu3 %v1711_v52  ;;  %2886 = vmatmul.f32.vlgmr.msrb.gmra.mxu1 %v5995_v58 }
 0x276   : > { %v2087_v55 = vld [vmem:[%s5257_s29 + $0x37d0] sm:$0xff]  ;;  %2926 = vmatmul.f32.vlgmr.msrb.gmra.mxu3 %v5787_v21  ;;  %2931 = vmatpush.msra.mxu0 %v1951_v54  ;;  %v536_v21 = vld [vmem:[%s5257_s29 + $0x758] sm:$0xff] }
 0x277   : > { %v1943_v16 = vld [vmem:[%s5257_s29 + $0x3350] sm:$0xff]  ;;  %2950 = vmatpush.msra.mxu1 %v2087_v55  ;;  %2971 = vmatpush.msra.mxu2 %v416_v56  ;;  %v312_v54 = vld [vmem:[%s5257_s29 + $0x58] sm:$0xff] }
 0x278   : > { %v2079_v59 = vld [vmem:[%s5257_s29 + $0x3790] sm:$0xff]  ;;  %2990 = vmatpush.msra.mxu3 %v552_v57  ;;  %2932 = vmatpush.msra.mxu0 %v1943_v16  ;;  %v448_v55 = vld [vmem:[%s5257_s29 + $0x498] sm:$0xff] }
 0x279   : > { %v1935_v2 = vld [vmem:[%s5257_s29 + $0x3310] sm:$0xff]  ;;  %2951 = vmatpush.msra.mxu1 %v2079_v59  ;;  %2972 = vmatpush.msra.mxu2 %v408_v60  ;;  %v304_v16 = vld [vmem:[%s5257_s29 + $0x18] sm:$0xff] }
 0x27a   : > { %v2071_v3 = vld [vmem:[%s5257_s29 + $0x3750] sm:$0xff]  ;;  %2991 = vmatpush.msra.mxu3 %v544_v1  ;;  %2933 = vmatpush.msra.mxu0 %v1935_v2  ;;  %v440_v59 = vld [vmem:[%s5257_s29 + $0x458] sm:$0xff] }
 0x27b   : > { %v1927_v5 = vld [vmem:[%s5257_s29 + $0x32d0] sm:$0xff]  ;;  %2952 = vmatpush.msra.mxu1 %v2071_v3  ;;  %2973 = vmatpush.msra.mxu2 %v400_v4  ;;  %v936_v60 = vld [vmem:[%s5257_s29 + $0x13d8] sm:$0xff]  ;;  %v6059_v4 = vld.sshfl [vmem:[#allocation1 + $0x20] sm:$0xff pattern:$0x73625140] }
 0x27c   : > { %v2063_v6 = vld [vmem:[%s5257_s29 + $0x3710] sm:$0xff]  ;;  %2992 = vmatpush.msra.mxu3 %v536_v21  ;;  %2934 = vmatpush.msra.mxu0 %v1927_v5  ;;  %v680_v1 = vld [vmem:[%s5257_s29 + $0xbd8] sm:$0xff] }
 0x27d   : > { %v1919_v9 = vld [vmem:[%s5257_s29 + $0x3290] sm:$0xff]  ;;  %2953 = vmatpush.msra.mxu1 %v2063_v6  ;;  %2974 = vmatpush.msra.mxu2 %v392_v7  ;;  %v432_v3 = vld [vmem:[%s5257_s29 + $0x418] sm:$0xff] }
 0x27e   : > { %v2055_v10 = vld [vmem:[%s5257_s29 + $0x36d0] sm:$0xff]  ;;  %2993 = vmatpush.msra.mxu3 %v528_v8  ;;  %2935 = vmatpush.msra.mxu0 %v1919_v9  ;;  %v672_v21 = vld [vmem:[%s5257_s29 + $0xb98] sm:$0xff]  ;;  %v6066_v8 = vld.sshfl [vmem:[#allocation1 + $0x28] sm:$0xff pattern:$0x73625140] }
 0x27f   : > { %v1911_v12 = vld [vmem:[%s5257_s29 + $0x3250] sm:$0xff]  ;;  %2954 = vmatpush.msra.mxu1 %v2055_v10  ;;  %2975 = vmatpush.msra.mxu2 %v384_v11  ;;  %v808_v5 = vld [vmem:[%s5257_s29 + $0xfd8] sm:$0xff] }
 0x280   : > { %v2047_v13 = vld [vmem:[%s5257_s29 + $0x3690] sm:$0xff]  ;;  %2994 = vmatpush.msra.mxu3 %v520_v19  ;;  %2936 = vmatpush.msra.mxu0 %v1911_v12  ;;  %v928_v6 = vld [vmem:[%s5257_s29 + $0x1398] sm:$0xff] }
 0x281   : > { %v1903_v25 = vld [vmem:[%s5257_s29 + $0x3210] sm:$0xff]  ;;  %2955 = vmatpush.msra.mxu1 %v2047_v13  ;;  %2976 = vmatpush.msra.mxu2 %v376_v14  ;;  %v1064_v7 = vld [vmem:[%s5257_s29 + $0x17d8] sm:$0xff] }
 0x282   : > { %v2039_v17 = vld [vmem:[%s5257_s29 + $0x3650] sm:$0xff]  ;;  %2995 = vmatpush.msra.mxu3 %v512_v15  ;;  %2937 = vmatpush.msra.mxu0 %v1903_v25  ;;  %v664_v9 = vld [vmem:[%s5257_s29 + $0xb58] sm:$0xff] }
 0x283   : > { %v1895_v33 = vld [vmem:[%s5257_s29 + $0x31d0] sm:$0xff]  ;;  %2956 = vmatpush.msra.mxu1 %v2039_v17  ;;  %2977 = vmatpush.msra.mxu2 %v368_v18  ;;  %v800_v10 = vld [vmem:[%s5257_s29 + $0xf98] sm:$0xff] }
 0x284   : > { %v2031_v22 = vld [vmem:[%s5257_s29 + $0x3610] sm:$0xff]  ;;  %2996 = vmatpush.msra.mxu3 %v504_v20  ;;  %2938 = vmatpush.msra.mxu0 %v1895_v33  ;;  %v920_v11 = vld [vmem:[%s5257_s29 + $0x1358] sm:$0xff] }
 0x285   : > { %v1887_v26 = vld [vmem:[%s5257_s29 + $0x3190] sm:$0xff]  ;;  %2957 = vmatpush.msra.mxu1 %v2031_v22  ;;  %2978 = vmatpush.msra.mxu2 %v360_v23  ;;  %v1056_v19 = vld [vmem:[%s5257_s29 + $0x1798] sm:$0xff] }
 0x286   : > { %v2023_v27 = vld [vmem:[%s5257_s29 + $0x35d0] sm:$0xff]  ;;  %2997 = vmatpush.msra.mxu3 %v496_v24  ;;  %2939 = vmatpush.msra.mxu0 %v1887_v26  ;;  %v656_v12 = vld [vmem:[%s5257_s29 + $0xb18] sm:$0xff] }
 0x287   : > { %v1879_v29 = vld [vmem:[%s5257_s29 + $0x3150] sm:$0xff]  ;;  %2958 = vmatpush.msra.mxu1 %v2023_v27  ;;  %2979 = vmatpush.msra.mxu2 %v352_v28  ;;  %v792_v13 = vld [vmem:[%s5257_s29 + $0xf58] sm:$0xff] }
 0x288   : > { %v2015_v30 = vld [vmem:[%s5257_s29 + $0x3590] sm:$0xff]  ;;  %2998 = vmatpush.msra.mxu3 %v488_v38  ;;  %2940 = vmatpush.msra.mxu0 %v1879_v29  ;;  %v912_v14 = vld [vmem:[%s5257_s29 + $0x1318] sm:$0xff] }
 0x289   : > { %v1871_v34 = vld [vmem:[%s5257_s29 + $0x3110] sm:$0xff]  ;;  %2959 = vmatpush.msra.mxu1 %v2015_v30  ;;  %2980 = vmatpush.msra.mxu2 %v344_v31  ;;  %v1048_v15 = vld [vmem:[%s5257_s29 + $0x1758] sm:$0xff] }
 0x28a   : > { %v2007_v35 = vld [vmem:[%s5257_s29 + $0x3550] sm:$0xff]  ;;  %2999 = vmatpush.msra.mxu3 %v480_v32  ;;  %2941 = vmatpush.msra.mxu0 %v1871_v34  ;;  %v648_v25 = vld [vmem:[%s5257_s29 + $0xad8] sm:$0xff] }
 0x28b   : > { %v1863_v39 = vld [vmem:[%s5257_s29 + $0x30d0] sm:$0xff]  ;;  %2960 = vmatpush.msra.mxu1 %v2007_v35  ;;  %2981 = vmatpush.msra.mxu2 %v336_v36  ;;  %v784_v17 = vld [vmem:[%s5257_s29 + $0xf18] sm:$0xff] }
 0x28c   : > { %v1999_v40 = vld [vmem:[%s5257_s29 + $0x3510] sm:$0xff]  ;;  %3000 = vmatpush.msra.mxu3 %v472_v37  ;;  %2942 = vmatpush.msra.mxu0 %v1863_v39  ;;  %v904_v18 = vld [vmem:[%s5257_s29 + $0x12d8] sm:$0xff] }
 0x28d   : > { %v1855_v43 = vld [vmem:[%s5257_s29 + $0x3090] sm:$0xff]  ;;  %2961 = vmatpush.msra.mxu1 %v1999_v40  ;;  %2982 = vmatpush.msra.mxu2 %v328_v41  ;;  %v1040_v20 = vld [vmem:[%s5257_s29 + $0x1718] sm:$0xff] }
 0x28e   : > { %v1991_v44 = vld [vmem:[%s5257_s29 + $0x34d0] sm:$0xff]  ;;  %3001 = vmatpush.msra.mxu3 %v464_v42  ;;  %2943 = vmatpush.msra.mxu0 %v1855_v43  ;;  %v640_v33 = vld [vmem:[%s5257_s29 + $0xa98] sm:$0xff] }
 0x28f   : > { %v1847_v51 = vld [vmem:[%s5257_s29 + $0x3050] sm:$0xff]  ;;  %2962 = vmatpush.msra.mxu1 %v1991_v44  ;;  %2983 = vmatpush.msra.mxu2 %v320_v49  ;;  %v776_v22 = vld [vmem:[%s5257_s29 + $0xed8] sm:$0xff] }
 0x290   : > { %v1983_v52 = vld [vmem:[%s5257_s29 + $0x3490] sm:$0xff]  ;;  %3002 = vmatpush.msra.mxu3 %v456_v50  ;;  %2944 = vmatpush.msra.mxu0 %v1847_v51  ;;  %v896_v23 = vld [vmem:[%s5257_s29 + $0x1298] sm:$0xff] }
 0x291   : > { %v1839_v56 = vld [vmem:[%s5257_s29 + $0x3010] sm:$0xff]  ;;  %2963 = vmatpush.msra.mxu1 %v1983_v52  ;;  %2984 = vmatpush.msra.mxu2 %v312_v54  ;;  %v1032_v24 = vld [vmem:[%s5257_s29 + $0x16d8] sm:$0xff] }
 0x292   : > { %v1975_v57 = vld [vmem:[%s5257_s29 + $0x3450] sm:$0xff]  ;;  %3003 = vmatpush.msra.mxu3 %v448_v55  ;;  %2945 = vmatpush.msra.mxu0 %v1839_v56  ;;  %v632_v26 = vld [vmem:[%s5257_s29 + $0xa58] sm:$0xff] }
 0x293   : > { %2964 = vmatpush.msra.mxu1 %v1975_v57  ;;  %v1967_v2 = vld [vmem:[%s5257_s29 + $0x3410] sm:$0xff]  ;;  %2985 = vmatpush.msra.mxu2 %v304_v16  ;;  %v768_v27 = vld [vmem:[%s5257_s29 + $0xe98] sm:$0xff] }
 0x294   : > { %3004 = vmatpush.msra.mxu3 %v440_v59  ;;  %2946 = vmatmul.f32.vlgmr.msra.gmra.mxu0 %v6059_v4  ;;  %v888_v28 = vld [vmem:[%s5257_s29 + $0x1258] sm:$0xff] }
 0x295   : > { %3050 = vmatpush.msrb.mxu2 %v936_v60  ;;  %3010 = vmatpush.msrb.mxu0 %v680_v1  ;;  %v1024_v38 = vld [vmem:[%s5257_s29 + $0x1698] sm:$0xff] }
 0x296   : > { %2965 = vmatpush.msra.mxu1 %v1967_v2  ;;  %3005 = vmatpush.msra.mxu3 %v432_v3  ;;  %v624_v29 = vld [vmem:[%s5257_s29 + $0xa18] sm:$0xff] }
 0x297   : > { %2966 = vmatmul.f32.vlgmr.msra.gmra.mxu1 %v6066_v8  ;;  %3011 = vmatpush.msrb.mxu0 %v672_v21  ;;  %v760_v30 = vld [vmem:[%s5257_s29 + $0xe58] sm:$0xff] }
 0x298   : > { %3030 = vmatpush.msrb.mxu1 %v808_v5  ;;  %3051 = vmatpush.msrb.mxu2 %v928_v6  ;;  %v880_v31 = vld [vmem:[%s5257_s29 + $0x1218] sm:$0xff] }
 0x299   : > { %3070 = vmatpush.msrb.mxu3 %v1064_v7  ;;  %3012 = vmatpush.msrb.mxu0 %v664_v9  ;;  %v1016_v32 = vld [vmem:[%s5257_s29 + $0x1658] sm:$0xff] }
 0x29a   : > { %3031 = vmatpush.msrb.mxu1 %v800_v10  ;;  %3052 = vmatpush.msrb.mxu2 %v920_v11  ;;  %v616_v34 = vld [vmem:[%s5257_s29 + $0x9d8] sm:$0xff] }
 0x29b   : > { %3071 = vmatpush.msrb.mxu3 %v1056_v19  ;;  %3013 = vmatpush.msrb.mxu0 %v656_v12  ;;  %v752_v35 = vld [vmem:[%s5257_s29 + $0xe18] sm:$0xff] }
 0x29c   : > { %3032 = vmatpush.msrb.mxu1 %v792_v13  ;;  %3053 = vmatpush.msrb.mxu2 %v912_v14  ;;  %v872_v36 = vld [vmem:[%s5257_s29 + $0x11d8] sm:$0xff] }
 0x29d   : > { %3072 = vmatpush.msrb.mxu3 %v1048_v15  ;;  %3014 = vmatpush.msrb.mxu0 %v648_v25  ;;  %v1008_v37 = vld [vmem:[%s5257_s29 + $0x1618] sm:$0xff] }
 0x29e   : > { %3033 = vmatpush.msrb.mxu1 %v784_v17  ;;  %3054 = vmatpush.msrb.mxu2 %v904_v18  ;;  %v608_v39 = vld [vmem:[%s5257_s29 + $0x998] sm:$0xff] }
 0x29f   : > { %3073 = vmatpush.msrb.mxu3 %v1040_v20  ;;  %3015 = vmatpush.msrb.mxu0 %v640_v33  ;;  %v744_v40 = vld [vmem:[%s5257_s29 + $0xdd8] sm:$0xff] }
 0x2a0   : > { %3034 = vmatpush.msrb.mxu1 %v776_v22  ;;  %3055 = vmatpush.msrb.mxu2 %v896_v23  ;;  %v864_v41 = vld [vmem:[%s5257_s29 + $0x1198] sm:$0xff] }
 0x2a1   : > { %3074 = vmatpush.msrb.mxu3 %v1032_v24  ;;  %3016 = vmatpush.msrb.mxu0 %v632_v26  ;;  %v1000_v42 = vld [vmem:[%s5257_s29 + $0x15d8] sm:$0xff] }
 0x2a2   : > { %3035 = vmatpush.msrb.mxu1 %v768_v27  ;;  %3056 = vmatpush.msrb.mxu2 %v888_v28  ;;  %v600_v43 = vld [vmem:[%s5257_s29 + $0x958] sm:$0xff] }
 0x2a3   : > { %3075 = vmatpush.msrb.mxu3 %v1024_v38  ;;  %3017 = vmatpush.msrb.mxu0 %v624_v29  ;;  %v736_v44 = vld [vmem:[%s5257_s29 + $0xd98] sm:$0xff] }
 0x2a4   : > { %3036 = vmatpush.msrb.mxu1 %v760_v30  ;;  %3057 = vmatpush.msrb.mxu2 %v880_v31  ;;  %v856_v49 = vld [vmem:[%s5257_s29 + $0x1158] sm:$0xff] }
 0x2a5   : > { %3076 = vmatpush.msrb.mxu3 %v1016_v32  ;;  %3018 = vmatpush.msrb.mxu0 %v616_v34  ;;  %v992_v50 = vld [vmem:[%s5257_s29 + $0x1598] sm:$0xff] }
 0x2a6   : > { %3037 = vmatpush.msrb.mxu1 %v752_v35  ;;  %3058 = vmatpush.msrb.mxu2 %v872_v36  ;;  %v592_v51 = vld [vmem:[%s5257_s29 + $0x918] sm:$0xff] }
 0x2a7   : > { %3077 = vmatpush.msrb.mxu3 %v1008_v37  ;;  %3019 = vmatpush.msrb.mxu0 %v608_v39  ;;  %v728_v52 = vld [vmem:[%s5257_s29 + $0xd58] sm:$0xff] }
 0x2a8   : > { %3038 = vmatpush.msrb.mxu1 %v744_v40  ;;  %3059 = vmatpush.msrb.mxu2 %v864_v41  ;;  %v848_v54 = vld [vmem:[%s5257_s29 + $0x1118] sm:$0xff] }
 0x2a9   : > { %3078 = vmatpush.msrb.mxu3 %v1000_v42  ;;  %3020 = vmatpush.msrb.mxu0 %v600_v43  ;;  %v984_v55 = vld [vmem:[%s5257_s29 + $0x1558] sm:$0xff] }
 0x2aa   : > { %3039 = vmatpush.msrb.mxu1 %v736_v44  ;;  %3060 = vmatpush.msrb.mxu2 %v856_v49  ;;  %v584_v56 = vld [vmem:[%s5257_s29 + $0x8d8] sm:$0xff] }
 0x2ab   : > { %3079 = vmatpush.msrb.mxu3 %v992_v50  ;;  %v720_v57 = vld [vmem:[%s5257_s29 + $0xd18] sm:$0xff]  ;;  %3021 = vmatpush.msrb.mxu0 %v592_v51 }
 0x2ac   : > { %3040 = vmatpush.msrb.mxu1 %v728_v52  ;;  %v840_v16 = vld [vmem:[%s5257_s29 + $0x10d8] sm:$0xff]  ;;  %3061 = vmatpush.msrb.mxu2 %v848_v54 }
 0x2ad   : > { %v976_v59 = vld [vmem:[%s5257_s29 + $0x1518] sm:$0xff]  ;;  %3080 = vmatpush.msrb.mxu3 %v984_v55  ;;  %3022 = vmatpush.msrb.mxu0 %v584_v56 }
 0x2ae   : > { %v576_v60 = vld [vmem:[%s5257_s29 + $0x898] sm:$0xff]  ;;  %3041 = vmatpush.msrb.mxu1 %v720_v57  ;;  %3062 = vmatpush.msrb.mxu2 %v840_v16 }
 0x2af   : > { %v712_v1 = vld [vmem:[%s5257_s29 + $0xcd8] sm:$0xff]  ;;  %3081 = vmatpush.msrb.mxu3 %v976_v59  ;;  %3023 = vmatpush.msrb.mxu0 %v576_v60 }
 0x2b0   : > { %v832_v2 = vld [vmem:[%s5257_s29 + $0x1098] sm:$0xff]  ;;  %3042 = vmatpush.msrb.mxu1 %v712_v1  ;;  %2986 = vmatmul.f32.vlgmr.msra.gmra.mxu2 %v5389_v46 }
 0x2b1   : > { %v968_v3 = vld [vmem:[%s5257_s29 + $0x14d8] sm:$0xff]  ;;  %3063 = vmatpush.msrb.mxu2 %v832_v2  ;;  %3006 = vmatmul.f32.vlgmr.msra.gmra.mxu3 %v5393_v48 }
 0x2b2   : > { %v568_v21 = vld [vmem:[%s5257_s29 + $0x858] sm:$0xff]  ;;  %3082 = vmatpush.msrb.mxu3 %v968_v3 }
 0x2b3   : > { %v704_v5 = vld [vmem:[%s5257_s29 + $0xc98] sm:$0xff]  ;;  %3024 = vmatpush.msrb.mxu0 %v568_v21 }
 0x2b4   : > { %v824_v6 = vld [vmem:[%s5257_s29 + $0x1058] sm:$0xff]  ;;  %3043 = vmatpush.msrb.mxu1 %v704_v5 }
 0x2b5   : > { %v960_v7 = vld [vmem:[%s5257_s29 + $0x1498] sm:$0xff]  ;;  %3064 = vmatpush.msrb.mxu2 %v824_v6 }
 0x2b6   : > { %v560_v9 = vld [vmem:[%s5257_s29 + $0x818] sm:$0xff]  ;;  %3083 = vmatpush.msrb.mxu3 %v960_v7 }
 0x2b7   : > { %v696_v10 = vld [vmem:[%s5257_s29 + $0xc58] sm:$0xff]  ;;  %3025 = vmatpush.msrb.mxu0 %v560_v9 }
 0x2b8   : > { %v816_v11 = vld [vmem:[%s5257_s29 + $0x1018] sm:$0xff]  ;;  %3044 = vmatpush.msrb.mxu1 %v696_v10  ;;  %3026 = vmatmul.f32.vlgmr.msrb.gmra.mxu0 %v5387_v45 }
 0x2b9   : > { %v952_v19 = vld [vmem:[%s5257_s29 + $0x1458] sm:$0xff]  ;;  %3065 = vmatpush.msrb.mxu2 %v816_v11 }
 0x2ba   : > { %v1192_v12 = vld [vmem:[%s5257_s29 + $0x1bd8] sm:$0xff]  ;;  %3084 = vmatpush.msrb.mxu3 %v952_v19  ;;  %3066 = vmatmul.f32.vlgmr.msrb.gmra.mxu2 %v5409_v62 }
 0x2bb   : > { %v1448_v13 = vld [vmem:[%s5257_s29 + $0x23d8] sm:$0xff]  ;;  %3090 = vmatpush.msra.mxu0 %v1192_v12 }
 0x2bc   : > { %v688_v14 = vld [vmem:[%s5257_s29 + $0xc18] sm:$0xff]  ;;  %3130 = vmatpush.msra.mxu2 %v1448_v13 }
 0x2bd   : > { %v944_v15 = vld [vmem:[%s5257_s29 + $0x1418] sm:$0xff]  ;;  %3045 = vmatpush.msrb.mxu1 %v688_v14 }
 0x2be   : > { %v1184_v25 = vld [vmem:[%s5257_s29 + $0x1b98] sm:$0xff]  ;;  %3085 = vmatpush.msrb.mxu3 %v944_v15  ;;  %3046 = vmatmul.f32.vlgmr.msrb.gmra.mxu1 %v5391_v47 }
 0x2bf   : > { %v1320_v17 = vld [vmem:[%s5257_s29 + $0x1fd8] sm:$0xff]  ;;  %3091 = vmatpush.msra.mxu0 %v1184_v25  ;;  %3086 = vmatmul.f32.vlgmr.msrb.gmra.mxu3 %v5413_v0 }
 0x2c0   : > { %v1440_v18 = vld [vmem:[%s5257_s29 + $0x2398] sm:$0xff]  ;;  %3110 = vmatpush.msra.mxu1 %v1320_v17 }
 0x2c1   : > { %v1576_v20 = vld [vmem:[%s5257_s29 + $0x27d8] sm:$0xff]  ;;  %3131 = vmatpush.msra.mxu2 %v1440_v18 }
 0x2c2   : > { %v1176_v33 = vld [vmem:[%s5257_s29 + $0x1b58] sm:$0xff]  ;;  %3150 = vmatpush.msra.mxu3 %v1576_v20 }
 0x2c3   : > { %v1312_v22 = vld [vmem:[%s5257_s29 + $0x1f98] sm:$0xff]  ;;  %3092 = vmatpush.msra.mxu0 %v1176_v33 }
 0x2c4   : > { %v1432_v23 = vld [vmem:[%s5257_s29 + $0x2358] sm:$0xff]  ;;  %3111 = vmatpush.msra.mxu1 %v1312_v22 }
 0x2c5   : > { %v1568_v24 = vld [vmem:[%s5257_s29 + $0x2798] sm:$0xff]  ;;  %3132 = vmatpush.msra.mxu2 %v1432_v23 }
 0x2c6   : > { %v1168_v26 = vld [vmem:[%s5257_s29 + $0x1b18] sm:$0xff]  ;;  %3151 = vmatpush.msra.mxu3 %v1568_v24 }
 0x2c7   : > { %v1304_v27 = vld [vmem:[%s5257_s29 + $0x1f58] sm:$0xff]  ;;  %3093 = vmatpush.msra.mxu0 %v1168_v26 }
 0x2c8   : > { %v1424_v28 = vld [vmem:[%s5257_s29 + $0x2318] sm:$0xff]  ;;  %3112 = vmatpush.msra.mxu1 %v1304_v27 }
 0x2c9   : > { %v1560_v38 = vld [vmem:[%s5257_s29 + $0x2758] sm:$0xff]  ;;  %3133 = vmatpush.msra.mxu2 %v1424_v28 }
 0x2ca   : > { %v1160_v29 = vld [vmem:[%s5257_s29 + $0x1ad8] sm:$0xff]  ;;  %3152 = vmatpush.msra.mxu3 %v1560_v38 }
 0x2cb   : > { %v1296_v30 = vld [vmem:[%s5257_s29 + $0x1f18] sm:$0xff]  ;;  %3094 = vmatpush.msra.mxu0 %v1160_v29 }
 0x2cc   : > { %v1416_v31 = vld [vmem:[%s5257_s29 + $0x22d8] sm:$0xff]  ;;  %3113 = vmatpush.msra.mxu1 %v1296_v30 }
 0x2cd   : > { %v1552_v32 = vld [vmem:[%s5257_s29 + $0x2718] sm:$0xff]  ;;  %3134 = vmatpush.msra.mxu2 %v1416_v31 }
 0x2ce   : > { %v1152_v34 = vld [vmem:[%s5257_s29 + $0x1a98] sm:$0xff]  ;;  %3153 = vmatpush.msra.mxu3 %v1552_v32 }
 0x2cf   : > { %v1288_v35 = vld [vmem:[%s5257_s29 + $0x1ed8] sm:$0xff]  ;;  %3095 = vmatpush.msra.mxu0 %v1152_v34 }
 0x2d0   : > { %v1408_v36 = vld [vmem:[%s5257_s29 + $0x2298] sm:$0xff]  ;;  %3114 = vmatpush.msra.mxu1 %v1288_v35 }
 0x2d1   : > { %v1544_v37 = vld [vmem:[%s5257_s29 + $0x26d8] sm:$0xff]  ;;  %3135 = vmatpush.msra.mxu2 %v1408_v36 }
 0x2d2   : > { %v1144_v39 = vld [vmem:[%s5257_s29 + $0x1a58] sm:$0xff]  ;;  %3154 = vmatpush.msra.mxu3 %v1544_v37 }
 0x2d3   : > { %v1280_v40 = vld [vmem:[%s5257_s29 + $0x1e98] sm:$0xff]  ;;  %3096 = vmatpush.msra.mxu0 %v1144_v39 }
 0x2d4   : > { %v1400_v41 = vld [vmem:[%s5257_s29 + $0x2258] sm:$0xff]  ;;  %3115 = vmatpush.msra.mxu1 %v1280_v40 }
 0x2d5   : > { %v1536_v42 = vld [vmem:[%s5257_s29 + $0x2698] sm:$0xff]  ;;  %3136 = vmatpush.msra.mxu2 %v1400_v41 }
 0x2d6   : > { %v1136_v43 = vld [vmem:[%s5257_s29 + $0x1a18] sm:$0xff]  ;;  %3155 = vmatpush.msra.mxu3 %v1536_v42 }
 0x2d7   : > { %v1272_v44 = vld [vmem:[%s5257_s29 + $0x1e58] sm:$0xff]  ;;  %3097 = vmatpush.msra.mxu0 %v1136_v43 }
 0x2d8   : > { %v1392_v49 = vld [vmem:[%s5257_s29 + $0x2218] sm:$0xff]  ;;  %3116 = vmatpush.msra.mxu1 %v1272_v44 }
 0x2d9   : > { %v1528_v50 = vld [vmem:[%s5257_s29 + $0x2658] sm:$0xff]  ;;  %3137 = vmatpush.msra.mxu2 %v1392_v49 }
 0x2da   : > { %v1128_v51 = vld [vmem:[%s5257_s29 + $0x19d8] sm:$0xff]  ;;  %3156 = vmatpush.msra.mxu3 %v1528_v50 }
 0x2db   : > { %v1264_v52 = vld [vmem:[%s5257_s29 + $0x1e18] sm:$0xff]  ;;  %3098 = vmatpush.msra.mxu0 %v1128_v51 }
 0x2dc   : > { %v1384_v54 = vld [vmem:[%s5257_s29 + $0x21d8] sm:$0xff]  ;;  %3117 = vmatpush.msra.mxu1 %v1264_v52 }
 0x2dd   : > { %v1520_v55 = vld [vmem:[%s5257_s29 + $0x2618] sm:$0xff]  ;;  %3138 = vmatpush.msra.mxu2 %v1384_v54 }
 0x2de   : > { %v1120_v56 = vld [vmem:[%s5257_s29 + $0x1998] sm:$0xff]  ;;  %3157 = vmatpush.msra.mxu3 %v1520_v55 }
 0x2df   : > { %v1256_v57 = vld [vmem:[%s5257_s29 + $0x1dd8] sm:$0xff]  ;;  %3099 = vmatpush.msra.mxu0 %v1120_v56 }
 0x2e0   : > { %v1376_v16 = vld [vmem:[%s5257_s29 + $0x2198] sm:$0xff]  ;;  %3118 = vmatpush.msra.mxu1 %v1256_v57 }
 0x2e1   : > { %v1512_v59 = vld [vmem:[%s5257_s29 + $0x25d8] sm:$0xff]  ;;  %3139 = vmatpush.msra.mxu2 %v1376_v16 }
 0x2e2   : > { %v1112_v60 = vld [vmem:[%s5257_s29 + $0x1958] sm:$0xff]  ;;  %3158 = vmatpush.msra.mxu3 %v1512_v59 }
 0x2e3   : > { %v1248_v1 = vld [vmem:[%s5257_s29 + $0x1d98] sm:$0xff]  ;;  %3100 = vmatpush.msra.mxu0 %v1112_v60 }
 0x2e4   : > { %v1368_v2 = vld [vmem:[%s5257_s29 + $0x2158] sm:$0xff]  ;;  %3119 = vmatpush.msra.mxu1 %v1248_v1 }
 0x2e5   : > { %v1504_v3 = vld [vmem:[%s5257_s29 + $0x2598] sm:$0xff]  ;;  %3140 = vmatpush.msra.mxu2 %v1368_v2 }
 0x2e6   : > { %v1104_v21 = vld [vmem:[%s5257_s29 + $0x1918] sm:$0xff]  ;;  %3159 = vmatpush.msra.mxu3 %v1504_v3 }
 0x2e7   : > { %v1240_v5 = vld [vmem:[%s5257_s29 + $0x1d58] sm:$0xff]  ;;  %3101 = vmatpush.msra.mxu0 %v1104_v21 }
 0x2e8   : > { %v1360_v6 = vld [vmem:[%s5257_s29 + $0x2118] sm:$0xff]  ;;  %3120 = vmatpush.msra.mxu1 %v1240_v5 }
 0x2e9   : > { %v1496_v7 = vld [vmem:[%s5257_s29 + $0x2558] sm:$0xff]  ;;  %3141 = vmatpush.msra.mxu2 %v1360_v6 }
 0x2ea   : > { %v1096_v9 = vld [vmem:[%s5257_s29 + $0x18d8] sm:$0xff]  ;;  %3160 = vmatpush.msra.mxu3 %v1496_v7 }
 0x2eb   : > { %v1232_v10 = vld [vmem:[%s5257_s29 + $0x1d18] sm:$0xff]  ;;  %3102 = vmatpush.msra.mxu0 %v1096_v9 }
 0x2ec   : > { %v1352_v11 = vld [vmem:[%s5257_s29 + $0x20d8] sm:$0xff]  ;;  %3121 = vmatpush.msra.mxu1 %v1232_v10 }
 0x2ed   : > { %v1488_v19 = vld [vmem:[%s5257_s29 + $0x2518] sm:$0xff]  ;;  %3142 = vmatpush.msra.mxu2 %v1352_v11 }
 0x2ee   : > { %v1088_v12 = vld [vmem:[%s5257_s29 + $0x1898] sm:$0xff]  ;;  %3161 = vmatpush.msra.mxu3 %v1488_v19 }
 0x2ef   : > { %v1224_v13 = vld [vmem:[%s5257_s29 + $0x1cd8] sm:$0xff]  ;;  %3103 = vmatpush.msra.mxu0 %v1088_v12 }
 0x2f0   : > { %v1344_v14 = vld [vmem:[%s5257_s29 + $0x2098] sm:$0xff]  ;;  %3122 = vmatpush.msra.mxu1 %v1224_v13 }
 0x2f1   : > { %v1480_v15 = vld [vmem:[%s5257_s29 + $0x24d8] sm:$0xff]  ;;  %3143 = vmatpush.msra.mxu2 %v1344_v14 }
 0x2f2   : > { %v1080_v25 = vld [vmem:[%s5257_s29 + $0x1858] sm:$0xff]  ;;  %3162 = vmatpush.msra.mxu3 %v1480_v15 }
 0x2f3   : > { %v1216_v17 = vld [vmem:[%s5257_s29 + $0x1c98] sm:$0xff]  ;;  %3104 = vmatpush.msra.mxu0 %v1080_v25 }
 0x2f4   : > { %v1336_v18 = vld [vmem:[%s5257_s29 + $0x2058] sm:$0xff]  ;;  %3123 = vmatpush.msra.mxu1 %v1216_v17 }
 0x2f5   : > { %v1472_v20 = vld [vmem:[%s5257_s29 + $0x2498] sm:$0xff]  ;;  %3144 = vmatpush.msra.mxu2 %v1336_v18 }
 0x2f6   : > { %v1072_v33 = vld [vmem:[%s5257_s29 + $0x1818] sm:$0xff]  ;;  %3163 = vmatpush.msra.mxu3 %v1472_v20 }
 0x2f7   : > { %v1208_v22 = vld [vmem:[%s5257_s29 + $0x1c58] sm:$0xff]  ;;  %3105 = vmatpush.msra.mxu0 %v1072_v33 }
 0x2f8   : > { %v1328_v23 = vld [vmem:[%s5257_s29 + $0x2018] sm:$0xff]  ;;  %3124 = vmatpush.msra.mxu1 %v1208_v22  ;;  %3106 = vmatmul.f32.vlgmr.msra.gmra.mxu0 %v5407_v61 }
 0x2f9   : > { %v1464_v24 = vld [vmem:[%s5257_s29 + $0x2458] sm:$0xff]  ;;  %3145 = vmatpush.msra.mxu2 %v1328_v23 }
 0x2fa   : > { %v1704_v26 = vld [vmem:[%s5257_s29 + $0x2bd8] sm:$0xff]  ;;  %3164 = vmatpush.msra.mxu3 %v1464_v24  ;;  %3146 = vmatmul.f32.vlgmr.msra.gmra.mxu2 %v5987_v53 }
 0x2fb   : > { %v1960_v27 = vld [vmem:[%s5257_s29 + $0x33d8] sm:$0xff]  ;;  %3170 = vmatpush.msrb.mxu0 %v1704_v26 }
 0x2fc   : > { %v1200_v28 = vld [vmem:[%s5257_s29 + $0x1c18] sm:$0xff]  ;;  %3210 = vmatpush.msrb.mxu2 %v1960_v27 }
 0x2fd   : > { %v1456_v38 = vld [vmem:[%s5257_s29 + $0x2418] sm:$0xff]  ;;  %3125 = vmatpush.msra.mxu1 %v1200_v28 }
 0x2fe   : > { %v1696_v29 = vld [vmem:[%s5257_s29 + $0x2b98] sm:$0xff]  ;;  %3165 = vmatpush.msra.mxu3 %v1456_v38  ;;  %3126 = vmatmul.f32.vlgmr.msra.gmra.mxu1 %v5411_v63 }
 0x2ff   : > { %v1832_v30 = vld [vmem:[%s5257_s29 + $0x2fd8] sm:$0xff]  ;;  %3166 = vmatmul.f32.vlgmr.msra.gmra.mxu3 %v5995_v58  ;;  %3171 = vmatpush.msrb.mxu0 %v1696_v29 }
 0x300   : > { %v1952_v31 = vld [vmem:[%s5257_s29 + $0x3398] sm:$0xff]  ;;  %3190 = vmatpush.msrb.mxu1 %v1832_v30 }
 0x301   : > { %v2088_v32 = vld [vmem:[%s5257_s29 + $0x37d8] sm:$0xff]  ;;  %3211 = vmatpush.msrb.mxu2 %v1952_v31 }
 0x302   : > { %v1688_v34 = vld [vmem:[%s5257_s29 + $0x2b58] sm:$0xff]  ;;  %3230 = vmatpush.msrb.mxu3 %v2088_v32 }
 0x303   : > { %v1824_v53 = vld [vmem:[%s5257_s29 + $0x2f98] sm:$0xff]  ;;  %3172 = vmatpush.msrb.mxu0 %v1688_v34 }
 0x304   : > { %v1944_v35 = vld [vmem:[%s5257_s29 + $0x3358] sm:$0xff]  ;;  %3191 = vmatpush.msrb.mxu1 %v1824_v53 }
 0x305   : > { %v2080_v36 = vld [vmem:[%s5257_s29 + $0x3798] sm:$0xff]  ;;  %3212 = vmatpush.msrb.mxu2 %v1944_v35  ;;  %v425_v35 = vld [vmem:[%s5257_s29 + $0x3e0] sm:$0xff] }
 0x306   : > { %v1680_v37 = vld [vmem:[%s5257_s29 + $0x2b18] sm:$0xff]  ;;  %3231 = vmatpush.msrb.mxu3 %v2080_v36  ;;  %v681_v36 = vld [vmem:[%s5257_s29 + $0xbe0] sm:$0xff] }
 0x307   : > { %v1816_v39 = vld [vmem:[%s5257_s29 + $0x2f58] sm:$0xff]  ;;  %3173 = vmatpush.msrb.mxu0 %v1680_v37 }
 0x308   : > { %v1936_v40 = vld [vmem:[%s5257_s29 + $0x3318] sm:$0xff]  ;;  %3192 = vmatpush.msrb.mxu1 %v1816_v39 }
 0x309   : > { %v2072_v58 = vld [vmem:[%s5257_s29 + $0x3758] sm:$0xff]  ;;  %3213 = vmatpush.msrb.mxu2 %v1936_v40  ;;  %v6267_v40 = vld.sshfl [vmem:[#allocation1 + $0x10] sm:$0xff pattern:$0x73625140] }
 0x30a   : > { %v1672_v41 = vld [vmem:[%s5257_s29 + $0x2ad8] sm:$0xff]  ;;  %3232 = vmatpush.msrb.mxu3 %v2072_v58  ;;  %v417_v58 = vld [vmem:[%s5257_s29 + $0x3a0] sm:$0xff] }
 0x30b   : > { %v1808_v42 = vld [vmem:[%s5257_s29 + $0x2f18] sm:$0xff]  ;;  %3174 = vmatpush.msrb.mxu0 %v1672_v41  ;;  %v553_v41 = vld [vmem:[%s5257_s29 + $0x7e0] sm:$0xff] }
 0x30c   : > { %v1928_v43 = vld [vmem:[%s5257_s29 + $0x32d8] sm:$0xff]  ;;  %3193 = vmatpush.msrb.mxu1 %v1808_v42  ;;  %v673_v42 = vld [vmem:[%s5257_s29 + $0xba0] sm:$0xff] }
 0x30d   : > { %v2064_v44 = vld [vmem:[%s5257_s29 + $0x3718] sm:$0xff]  ;;  %3214 = vmatpush.msrb.mxu2 %v1928_v43  ;;  %v809_v43 = vld [vmem:[%s5257_s29 + $0xfe0] sm:$0xff] }
 0x30e   : > { %v1664_v49 = vld [vmem:[%s5257_s29 + $0x2a98] sm:$0xff]  ;;  %3233 = vmatpush.msrb.mxu3 %v2064_v44 }
 0x30f   : > { %v1800_v50 = vld [vmem:[%s5257_s29 + $0x2ed8] sm:$0xff]  ;;  %3175 = vmatpush.msrb.mxu0 %v1664_v49  ;;  %v545_v49 = vld [vmem:[%s5257_s29 + $0x7a0] sm:$0xff] }
 0x310   : > { %v1920_v51 = vld [vmem:[%s5257_s29 + $0x3298] sm:$0xff]  ;;  %3194 = vmatpush.msrb.mxu1 %v1800_v50  ;;  %v665_v50 = vld [vmem:[%s5257_s29 + $0xb60] sm:$0xff] }
 0x311   : > { %v2056_v52 = vld [vmem:[%s5257_s29 + $0x36d8] sm:$0xff]  ;;  %3215 = vmatpush.msrb.mxu2 %v1920_v51  ;;  %v801_v51 = vld [vmem:[%s5257_s29 + $0xfa0] sm:$0xff] }
 0x312   : > { %v1656_v54 = vld [vmem:[%s5257_s29 + $0x2a58] sm:$0xff]  ;;  %3234 = vmatpush.msrb.mxu3 %v2056_v52  ;;  %v6283_v52 = vpop.f32.mrf.mxu0 }
 0x313   : > { %v1792_v55 = vld [vmem:[%s5257_s29 + $0x2e98] sm:$0xff]  ;;  %3176 = vmatpush.msrb.mxu0 %v1656_v54  ;;  %v401_v54 = vld [vmem:[%s5257_s29 + $0x320] sm:$0xff] }
 0x314   : > { %v1912_v56 = vld [vmem:[%s5257_s29 + $0x3258] sm:$0xff]  ;;  %3195 = vmatpush.msrb.mxu1 %v1792_v55  ;;  %v537_v55 = vld [vmem:[%s5257_s29 + $0x760] sm:$0xff] }
 0x315   : > { %v2048_v57 = vld [vmem:[%s5257_s29 + $0x3698] sm:$0xff]  ;;  %3216 = vmatpush.msrb.mxu2 %v1912_v56  ;;  %v793_v56 = vld [vmem:[%s5257_s29 + $0xf60] sm:$0xff] }
 0x316   : > { %v1648_v16 = vld [vmem:[%s5257_s29 + $0x2a18] sm:$0xff]  ;;  %3235 = vmatpush.msrb.mxu3 %v2048_v57  ;;  %v6289_v57 = vpop.f32.mrf.mxu3 }
 0x317   : > { %v1784_v59 = vld [vmem:[%s5257_s29 + $0x2e58] sm:$0xff]  ;;  %3177 = vmatpush.msrb.mxu0 %v1648_v16  ;;  %v393_v16 = vld [vmem:[%s5257_s29 + $0x2e0] sm:$0xff] }
 0x318   : > { %v1904_v60 = vld [vmem:[%s5257_s29 + $0x3218] sm:$0xff]  ;;  %3196 = vmatpush.msrb.mxu1 %v1784_v59  ;;  %v529_v59 = vld [vmem:[%s5257_s29 + $0x720] sm:$0xff] }
 0x319   : > { %v2040_v1 = vld [vmem:[%s5257_s29 + $0x3658] sm:$0xff]  ;;  %3217 = vmatpush.msrb.mxu2 %v1904_v60  ;;  %v649_v60 = vld [vmem:[%s5257_s29 + $0xae0] sm:$0xff] }
 0x31a   : > { %v1640_v2 = vld [vmem:[%s5257_s29 + $0x29d8] sm:$0xff]  ;;  %3236 = vmatpush.msrb.mxu3 %v2040_v1  ;;  %v785_v1 = vld [vmem:[%s5257_s29 + $0xf20] sm:$0xff] }
 0x31b   : > { %v1776_v3 = vld [vmem:[%s5257_s29 + $0x2e18] sm:$0xff]  ;;  %3178 = vmatpush.msrb.mxu0 %v1640_v2  ;;  %v6295_v2 = vpop.f32.mrf.mxu1 }
 0x31c   : > { %v1896_v21 = vld [vmem:[%s5257_s29 + $0x31d8] sm:$0xff]  ;;  %3197 = vmatpush.msrb.mxu1 %v1776_v3  ;;  %v6297_v3 = vpop.f32.mrf.mxu2 }
 0x31d   : > { %v2032_v5 = vld [vmem:[%s5257_s29 + $0x3618] sm:$0xff]  ;;  %3218 = vmatpush.msrb.mxu2 %v1896_v21  ;;  %v385_v21 = vld [vmem:[%s5257_s29 + $0x2a0] sm:$0xff] }
 0x31e   : > { %v1632_v6 = vld [vmem:[%s5257_s29 + $0x2998] sm:$0xff]  ;;  %3237 = vmatpush.msrb.mxu3 %v2032_v5  ;;  %v521_v5 = vld [vmem:[%s5257_s29 + $0x6e0] sm:$0xff] }
 0x31f   : > { %v1768_v7 = vld [vmem:[%s5257_s29 + $0x2dd8] sm:$0xff]  ;;  %3179 = vmatpush.msrb.mxu0 %v1632_v6  ;;  %v641_v6 = vld [vmem:[%s5257_s29 + $0xaa0] sm:$0xff] }
 0x320   : > { %v1888_v9 = vld [vmem:[%s5257_s29 + $0x3198] sm:$0xff]  ;;  %3198 = vmatpush.msrb.mxu1 %v1768_v7  ;;  %v777_v7 = vld [vmem:[%s5257_s29 + $0xee0] sm:$0xff] }
 0x321   : > { %v2024_v10 = vld [vmem:[%s5257_s29 + $0x35d8] sm:$0xff]  ;;  %3219 = vmatpush.msrb.mxu2 %v1888_v9  ;;  %v377_v9 = vld [vmem:[%s5257_s29 + $0x260] sm:$0xff] }
 0x322   : > { %v1624_v11 = vld [vmem:[%s5257_s29 + $0x2958] sm:$0xff]  ;;  %3238 = vmatpush.msrb.mxu3 %v2024_v10  ;;  %v513_v10 = vld [vmem:[%s5257_s29 + $0x6a0] sm:$0xff] }
 0x323   : > { %v1760_v19 = vld [vmem:[%s5257_s29 + $0x2d98] sm:$0xff]  ;;  %3180 = vmatpush.msrb.mxu0 %v1624_v11  ;;  %v633_v11 = vld [vmem:[%s5257_s29 + $0xa60] sm:$0xff] }
 0x324   : > { %v1880_v12 = vld [vmem:[%s5257_s29 + $0x3158] sm:$0xff]  ;;  %3199 = vmatpush.msrb.mxu1 %v1760_v19  ;;  %v769_v19 = vld [vmem:[%s5257_s29 + $0xea0] sm:$0xff] }
 0x325   : > { %v2016_v13 = vld [vmem:[%s5257_s29 + $0x3598] sm:$0xff]  ;;  %3220 = vmatpush.msrb.mxu2 %v1880_v12  ;;  %v369_v12 = vld [vmem:[%s5257_s29 + $0x220] sm:$0xff] }
 0x326   : > { %v1616_v14 = vld [vmem:[%s5257_s29 + $0x2918] sm:$0xff]  ;;  %3239 = vmatpush.msrb.mxu3 %v2016_v13  ;;  %v505_v13 = vld [vmem:[%s5257_s29 + $0x660] sm:$0xff] }
 0x327   : > { %v1752_v15 = vld [vmem:[%s5257_s29 + $0x2d58] sm:$0xff]  ;;  %3181 = vmatpush.msrb.mxu0 %v1616_v14  ;;  %v625_v14 = vld [vmem:[%s5257_s29 + $0xa20] sm:$0xff] }
 0x328   : > { %v1872_v25 = vld [vmem:[%s5257_s29 + $0x3118] sm:$0xff]  ;;  %3200 = vmatpush.msrb.mxu1 %v1752_v15  ;;  %v761_v15 = vld [vmem:[%s5257_s29 + $0xe60] sm:$0xff] }
 0x329   : > { %v2008_v17 = vld [vmem:[%s5257_s29 + $0x3558] sm:$0xff]  ;;  %3221 = vmatpush.msrb.mxu2 %v1872_v25  ;;  %v6311_v25 = vpop.f32.mrf.mxu0 }
 0x32a   : > { %v1608_v18 = vld [vmem:[%s5257_s29 + $0x28d8] sm:$0xff]  ;;  %3240 = vmatpush.msrb.mxu3 %v2008_v17  ;;  %v361_v17 = vld [vmem:[%s5257_s29 + $0x1e0] sm:$0xff] }
 0x32b   : > { %v1744_v20 = vld [vmem:[%s5257_s29 + $0x2d18] sm:$0xff]  ;;  %3182 = vmatpush.msrb.mxu0 %v1608_v18  ;;  %v497_v18 = vld [vmem:[%s5257_s29 + $0x620] sm:$0xff] }
 0x32c   : > { %v1864_v33 = vld [vmem:[%s5257_s29 + $0x30d8] sm:$0xff]  ;;  %3201 = vmatpush.msrb.mxu1 %v1744_v20  ;;  %v617_v20 = vld [vmem:[%s5257_s29 + $0x9e0] sm:$0xff] }
 0x32d   : > { %v2000_v22 = vld [vmem:[%s5257_s29 + $0x3518] sm:$0xff]  ;;  %3222 = vmatpush.msrb.mxu2 %v1864_v33  ;;  %v753_v33 = vld [vmem:[%s5257_s29 + $0xe20] sm:$0xff] }
 0x32e   : > { %v1600_v23 = vld [vmem:[%s5257_s29 + $0x2898] sm:$0xff]  ;;  %3241 = vmatpush.msrb.mxu3 %v2000_v22  ;;  %v6317_v22 = vpop.f32.mrf.mxu3 }
 0x32f   : > { %v1736_v24 = vld [vmem:[%s5257_s29 + $0x2cd8] sm:$0xff]  ;;  %3183 = vmatpush.msrb.mxu0 %v1600_v23  ;;  %v353_v23 = vld [vmem:[%s5257_s29 + $0x1a0] sm:$0xff] }
 0x330   : > { %v1856_v26 = vld [vmem:[%s5257_s29 + $0x3098] sm:$0xff]  ;;  %3202 = vmatpush.msrb.mxu1 %v1736_v24  ;;  %v489_v24 = vld [vmem:[%s5257_s29 + $0x5e0] sm:$0xff] }
 0x331   : > { %v1992_v27 = vld [vmem:[%s5257_s29 + $0x34d8] sm:$0xff]  ;;  %3223 = vmatpush.msrb.mxu2 %v1856_v26  ;;  %v609_v26 = vld [vmem:[%s5257_s29 + $0x9a0] sm:$0xff] }
 0x332   : > { %v1592_v28 = vld [vmem:[%s5257_s29 + $0x2858] sm:$0xff]  ;;  %3242 = vmatpush.msrb.mxu3 %v1992_v27  ;;  %v745_v27 = vld [vmem:[%s5257_s29 + $0xde0] sm:$0xff] }
 0x333   : > { %v1728_v38 = vld [vmem:[%s5257_s29 + $0x2c98] sm:$0xff]  ;;  %3184 = vmatpush.msrb.mxu0 %v1592_v28  ;;  %v6323_v28 = vpop.f32.mrf.mxu1 }
 0x334   : > { %v1848_v29 = vld [vmem:[%s5257_s29 + $0x3058] sm:$0xff]  ;;  %3203 = vmatpush.msrb.mxu1 %v1728_v38  ;;  %v6325_v38 = vpop.f32.mrf.mxu2 }
 0x335   : > { %v1984_v30 = vld [vmem:[%s5257_s29 + $0x3498] sm:$0xff]  ;;  %3224 = vmatpush.msrb.mxu2 %v1848_v29  ;;  %v345_v29 = vld [vmem:[%s5257_s29 + $0x160] sm:$0xff] }
 0x336   : > { %v1584_v31 = vld [vmem:[%s5257_s29 + $0x2818] sm:$0xff]  ;;  %3243 = vmatpush.msrb.mxu3 %v1984_v30  ;;  %v481_v30 = vld [vmem:[%s5257_s29 + $0x5a0] sm:$0xff] }
 0x337   : > { %v1720_v32 = vld [vmem:[%s5257_s29 + $0x2c58] sm:$0xff]  ;;  %3185 = vmatpush.msrb.mxu0 %v1584_v31  ;;  %v601_v31 = vld [vmem:[%s5257_s29 + $0x960] sm:$0xff] }
 0x338   : > { %v1840_v34 = vld [vmem:[%s5257_s29 + $0x3018] sm:$0xff]  ;;  %3204 = vmatpush.msrb.mxu1 %v1720_v32  ;;  %3186 = vmatmul.f32.vlgmr.msrb.gmra.mxu0 %v6267_v40  ;;  %v737_v32 = vld [vmem:[%s5257_s29 + $0xda0] sm:$0xff] }
 0x339   : > { %v1976_v53 = vld [vmem:[%s5257_s29 + $0x3458] sm:$0xff]  ;;  %3225 = vmatpush.msrb.mxu2 %v1840_v34  ;;  %3250 = vmatpush.msra.mxu0 %v425_v35  ;;  %v337_v34 = vld [vmem:[%s5257_s29 + $0x120] sm:$0xff] }
 0x33a   : > { %3244 = vmatpush.msrb.mxu3 %v1976_v53  ;;  %v1712_v37 = vld [vmem:[%s5257_s29 + $0x2c18] sm:$0xff]  ;;  %3226 = vmatmul.f32.vlgmr.msrb.gmra.mxu2 %v6059_v4  ;;  %v409_v4 = vld [vmem:[%s5257_s29 + $0x360] sm:$0xff] }
 0x33b   : > { %v1968_v39 = vld [vmem:[%s5257_s29 + $0x3418] sm:$0xff]  ;;  %3290 = vmatpush.msra.mxu2 %v681_v36  ;;  %3205 = vmatpush.msrb.mxu1 %v1712_v37  ;;  %v473_v53 = vld [vmem:[%s5257_s29 + $0x560] sm:$0xff]  ;;  %v6335_v37 = vpop.f32.mrf.mxu0 }
 0x33c   : > { %3245 = vmatpush.msrb.mxu3 %v1968_v39  ;;  %v6275_v44 = vld.sshfl [vmem:[#allocation1 + $0x18] sm:$0xff pattern:$0x73625140]  ;;  %3251 = vmatpush.msra.mxu0 %v417_v58  ;;  %v593_v35 = vld [vmem:[%s5257_s29 + $0x920] sm:$0xff] }
 0x33d   : > { %3206 = vmatmul.f32.vlgmr.msrb.gmra.mxu1 %v6275_v44  ;;  %3246 = vmatmul.f32.vlgmr.msrb.gmra.mxu3 %v6066_v8  ;;  %v657_v8 = vld [vmem:[%s5257_s29 + $0xb20] sm:$0xff] }
 0x33e   : > { %3270 = vmatpush.msra.mxu1 %v553_v41  ;;  %3291 = vmatpush.msra.mxu2 %v673_v42  ;;  %v729_v36 = vld [vmem:[%s5257_s29 + $0xd60] sm:$0xff] }
 0x33f   : > { %3310 = vmatpush.msra.mxu3 %v809_v43  ;;  %3252 = vmatpush.msra.mxu0 %v409_v4  ;;  %v329_v39 = vld [vmem:[%s5257_s29 + $0xe0] sm:$0xff]  ;;  %v6341_v43 = vpop.f32.mrf.mxu3 }
 0x340   : > { %3271 = vmatpush.msra.mxu1 %v545_v49  ;;  %3292 = vmatpush.msra.mxu2 %v665_v50  ;;  %v465_v58 = vld [vmem:[%s5257_s29 + $0x520] sm:$0xff] }
 0x341   : > { %3311 = vmatpush.msra.mxu3 %v801_v51  ;;  %3253 = vmatpush.msra.mxu0 %v401_v54  ;;  %v585_v41 = vld [vmem:[%s5257_s29 + $0x8e0] sm:$0xff]  ;;  %v6347_v54 = vpop.f32.mrf.mxu1 }
 0x342   : > { %3272 = vmatpush.msra.mxu1 %v537_v55  ;;  %3293 = vmatpush.msra.mxu2 %v657_v8  ;;  %v721_v42 = vld [vmem:[%s5257_s29 + $0xd20] sm:$0xff]  ;;  %v6349_v55 = vpop.f32.mrf.mxu2 }
 0x343   : > { %3312 = vmatpush.msra.mxu3 %v793_v56  ;;  %3254 = vmatpush.msra.mxu0 %v393_v16  ;;  %v321_v4 = vld [vmem:[%s5257_s29 + $0xa0] sm:$0xff] }
 0x344   : > { %3273 = vmatpush.msra.mxu1 %v529_v59  ;;  %3294 = vmatpush.msra.mxu2 %v649_v60  ;;  %v457_v49 = vld [vmem:[%s5257_s29 + $0x4e0] sm:$0xff] }
 0x345   : > { %3313 = vmatpush.msra.mxu3 %v785_v1  ;;  %3255 = vmatpush.msra.mxu0 %v385_v21  ;;  %v577_v50 = vld [vmem:[%s5257_s29 + $0x8a0] sm:$0xff] }
 0x346   : > { %3274 = vmatpush.msra.mxu1 %v521_v5  ;;  %3295 = vmatpush.msra.mxu2 %v641_v6  ;;  %v713_v51 = vld [vmem:[%s5257_s29 + $0xce0] sm:$0xff]  ;;  %v6359_v6 = vpop.f32.mrf.mxu0 }
 0x347   : > { %3314 = vmatpush.msra.mxu3 %v777_v7  ;;  %3256 = vmatpush.msra.mxu0 %v377_v9  ;;  %v313_v8 = vld [vmem:[%s5257_s29 + $0x60] sm:$0xff] }
 0x348   : > { %3275 = vmatpush.msra.mxu1 %v513_v10  ;;  %3296 = vmatpush.msra.mxu2 %v633_v11  ;;  %v449_v56 = vld [vmem:[%s5257_s29 + $0x4a0] sm:$0xff] }
 0x349   : > { %3315 = vmatpush.msra.mxu3 %v769_v19  ;;  %3257 = vmatpush.msra.mxu0 %v369_v12  ;;  %v569_v16 = vld [vmem:[%s5257_s29 + $0x860] sm:$0xff]  ;;  %v6365_v19 = vpop.f32.mrf.mxu3 }
 0x34a   : > { %3276 = vmatpush.msra.mxu1 %v505_v13  ;;  %3297 = vmatpush.msra.mxu2 %v625_v14  ;;  %v705_v59 = vld [vmem:[%s5257_s29 + $0xca0] sm:$0xff] }
 0x34b   : > { %3316 = vmatpush.msra.mxu3 %v761_v15  ;;  %3258 = vmatpush.msra.mxu0 %v361_v17  ;;  %v305_v60 = vld [vmem:[%s5257_s29 + $0x20] sm:$0xff]  ;;  %v6371_v17 = vpop.f32.mrf.mxu1 }
 0x34c   : > { %3277 = vmatpush.msra.mxu1 %v497_v18  ;;  %3298 = vmatpush.msra.mxu2 %v617_v20  ;;  %v441_v1 = vld [vmem:[%s5257_s29 + $0x460] sm:$0xff]  ;;  %v6373_v18 = vpop.f32.mrf.mxu2 }
 0x34d   : > { %3317 = vmatpush.msra.mxu3 %v753_v33  ;;  %3259 = vmatpush.msra.mxu0 %v353_v23  ;;  %v561_v21 = vld [vmem:[%s5257_s29 + $0x820] sm:$0xff] }
 0x34e   : > { %3278 = vmatpush.msra.mxu1 %v489_v24  ;;  %3299 = vmatpush.msra.mxu2 %v609_v26  ;;  %v697_v5 = vld [vmem:[%s5257_s29 + $0xc60] sm:$0xff] }
 0x34f   : > { %3318 = vmatpush.msra.mxu3 %v745_v27  ;;  %3260 = vmatpush.msra.mxu0 %v345_v29  ;;  %v937_v7 = vld [vmem:[%s5257_s29 + $0x13e0] sm:$0xff] }
 0x350   : > { %3279 = vmatpush.msra.mxu1 %v481_v30  ;;  %3300 = vmatpush.msra.mxu2 %v601_v31  ;;  %v1193_v9 = vld [vmem:[%s5257_s29 + $0x1be0] sm:$0xff]  ;;  %v6383_v31 = vpop.f32.mrf.mxu0 }
 0x351   : > { %3319 = vmatpush.msra.mxu3 %v737_v32  ;;  %3261 = vmatpush.msra.mxu0 %v337_v34  ;;  %v433_v10 = vld [vmem:[%s5257_s29 + $0x420] sm:$0xff] }
 0x352   : > { %3280 = vmatpush.msra.mxu1 %v473_v53  ;;  %3301 = vmatpush.msra.mxu2 %v593_v35  ;;  %v689_v11 = vld [vmem:[%s5257_s29 + $0xc20] sm:$0xff] }
 0x353   : > { %3320 = vmatpush.msra.mxu3 %v729_v36  ;;  %3262 = vmatpush.msra.mxu0 %v329_v39  ;;  %v929_v12 = vld [vmem:[%s5257_s29 + $0x13a0] sm:$0xff] }
 0x354   : > { %3281 = vmatpush.msra.mxu1 %v465_v58  ;;  %3302 = vmatpush.msra.mxu2 %v585_v41  ;;  %v1065_v13 = vld [vmem:[%s5257_s29 + $0x17e0] sm:$0xff] }
 0x355   : > { %3321 = vmatpush.msra.mxu3 %v721_v42  ;;  %3263 = vmatpush.msra.mxu0 %v321_v4  ;;  %v1185_v14 = vld [vmem:[%s5257_s29 + $0x1ba0] sm:$0xff]  ;;  %v6393_v42 = vpop.f32.mrf.mxu1  ;;  %v6395_v4 = vpop.f32.mrf.mxu3 }
 0x356   : > { %3282 = vmatpush.msra.mxu1 %v457_v49  ;;  %3303 = vmatpush.msra.mxu2 %v577_v50  ;;  %v1321_v15 = vld [vmem:[%s5257_s29 + $0x1fe0] sm:$0xff] }
 0x357   : > { %3322 = vmatpush.msra.mxu3 %v713_v51  ;;  %3264 = vmatpush.msra.mxu0 %v313_v8  ;;  %v921_v20 = vld [vmem:[%s5257_s29 + $0x1360] sm:$0xff] }
 0x358   : > { %3283 = vmatpush.msra.mxu1 %v449_v56  ;;  %3304 = vmatpush.msra.mxu2 %v569_v16  ;;  %v1057_v33 = vld [vmem:[%s5257_s29 + $0x17a0] sm:$0xff]  ;;  %v6401_v56 = vpop.f32.mrf.mxu2 }
 0x359   : > { %3323 = vmatpush.msra.mxu3 %v705_v59  ;;  %3265 = vmatpush.msra.mxu0 %v305_v60  ;;  %v1177_v23 = vld [vmem:[%s5257_s29 + $0x1b60] sm:$0xff] }
 0x35a   : > { %3284 = vmatpush.msra.mxu1 %v441_v1  ;;  %3305 = vmatpush.msra.mxu2 %v561_v21  ;;  %v1313_v24 = vld [vmem:[%s5257_s29 + $0x1fa0] sm:$0xff]  ;;  %v6407_v21 = vpop.f32.mrf.mxu0 }
 0x35b   : > { %3324 = vmatpush.msra.mxu3 %v697_v5  ;;  %3330 = vmatpush.msrb.mxu0 %v937_v7  ;;  %v913_v26 = vld [vmem:[%s5257_s29 + $0x1320] sm:$0xff] }
 0x35c   : > { %3370 = vmatpush.msrb.mxu2 %v1193_v9  ;;  %3285 = vmatpush.msra.mxu1 %v433_v10  ;;  %v1049_v27 = vld [vmem:[%s5257_s29 + $0x1760] sm:$0xff] }
 0x35d   : > { %3325 = vmatpush.msra.mxu3 %v689_v11  ;;  %3331 = vmatpush.msrb.mxu0 %v929_v12  ;;  %v1169_v29 = vld [vmem:[%s5257_s29 + $0x1b20] sm:$0xff] }
 0x35e   : > { %3350 = vmatpush.msrb.mxu1 %v1065_v13  ;;  %3371 = vmatpush.msrb.mxu2 %v1185_v14  ;;  %v1305_v30 = vld [vmem:[%s5257_s29 + $0x1f60] sm:$0xff] }
 0x35f   : > { %3390 = vmatpush.msrb.mxu3 %v1321_v15  ;;  %3332 = vmatpush.msrb.mxu0 %v921_v20  ;;  %v905_v32 = vld [vmem:[%s5257_s29 + $0x12e0] sm:$0xff]  ;;  %v6417_v15 = vpop.f32.mrf.mxu1  ;;  %v6419_v20 = vpop.f32.mrf.mxu3 }
 0x360   : > { %3351 = vmatpush.msrb.mxu1 %v1057_v33  ;;  %3372 = vmatpush.msrb.mxu2 %v1177_v23  ;;  %v1041_v34 = vld [vmem:[%s5257_s29 + $0x1720] sm:$0xff] }
 0x361   : > { %3391 = vmatpush.msrb.mxu3 %v1313_v24  ;;  %3333 = vmatpush.msrb.mxu0 %v913_v26  ;;  %v1161_v53 = vld [vmem:[%s5257_s29 + $0x1ae0] sm:$0xff] }
 0x362   : > { %3352 = vmatpush.msrb.mxu1 %v1049_v27  ;;  %v1297_v35 = vld [vmem:[%s5257_s29 + $0x1f20] sm:$0xff]  ;;  %3373 = vmatpush.msrb.mxu2 %v1169_v29  ;;  %v6425_v27 = vpop.f32.mrf.mxu2 }
 0x363   : > { %3392 = vmatpush.msrb.mxu3 %v1305_v30  ;;  %v897_v36 = vld [vmem:[%s5257_s29 + $0x12a0] sm:$0xff]  ;;  %3334 = vmatpush.msrb.mxu0 %v905_v32 }
 0x364   : > { %v1033_v39 = vld [vmem:[%s5257_s29 + $0x16e0] sm:$0xff]  ;;  %3353 = vmatpush.msrb.mxu1 %v1041_v34  ;;  %3374 = vmatpush.msrb.mxu2 %v1161_v53  ;;  %v6431_v53 = vpop.f32.mrf.mxu0 }
 0x365   : > { %v1153_v58 = vld [vmem:[%s5257_s29 + $0x1aa0] sm:$0xff]  ;;  %3393 = vmatpush.msrb.mxu3 %v1297_v35  ;;  %3335 = vmatpush.msrb.mxu0 %v897_v36 }
 0x366   : > { %v1289_v41 = vld [vmem:[%s5257_s29 + $0x1ee0] sm:$0xff]  ;;  %3354 = vmatpush.msrb.mxu1 %v1033_v39  ;;  %3375 = vmatpush.msrb.mxu2 %v1153_v58 }
 0x367   : > { %v889_v49 = vld [vmem:[%s5257_s29 + $0x1260] sm:$0xff]  ;;  %3394 = vmatpush.msrb.mxu3 %v1289_v41  ;;  %3306 = vmatmul.f32.vlgmr.msra.gmra.mxu2 %v5387_v45 }
 0x368   : > { %v1025_v50 = vld [vmem:[%s5257_s29 + $0x16a0] sm:$0xff]  ;;  %3336 = vmatpush.msrb.mxu0 %v889_v49  ;;  %3326 = vmatmul.f32.vlgmr.msra.gmra.mxu3 %v5391_v47 }
 0x369   : > { %v1145_v51 = vld [vmem:[%s5257_s29 + $0x1a60] sm:$0xff]  ;;  %3355 = vmatpush.msrb.mxu1 %v1025_v50  ;;  %3266 = vmatmul.f32.vlgmr.msra.gmra.mxu0 %v5389_v46 }
 0x36a   : > { %v1281_v8 = vld [vmem:[%s5257_s29 + $0x1ea0] sm:$0xff]  ;;  %3376 = vmatpush.msrb.mxu2 %v1145_v51  ;;  %3286 = vmatmul.f32.vlgmr.msra.gmra.mxu1 %v5393_v48 }
 0x36b   : > { %v881_v16 = vld [vmem:[%s5257_s29 + $0x1220] sm:$0xff]  ;;  %3395 = vmatpush.msrb.mxu3 %v1281_v8  ;;  %v6441_v8 = vpop.f32.mrf.mxu1 }
 0x36c   : > { %v1017_v59 = vld [vmem:[%s5257_s29 + $0x1660] sm:$0xff]  ;;  %3337 = vmatpush.msrb.mxu0 %v881_v16  ;;  %v6443_v16 = vpop.f32.mrf.mxu3 }
 0x36d   : > { %v1137_v60 = vld [vmem:[%s5257_s29 + $0x1a20] sm:$0xff]  ;;  %3356 = vmatpush.msrb.mxu1 %v1017_v59 }
 0x36e   : > { %v1273_v1 = vld [vmem:[%s5257_s29 + $0x1e60] sm:$0xff]  ;;  %3377 = vmatpush.msrb.mxu2 %v1137_v60 }
 0x36f   : > { %v873_v5 = vld [vmem:[%s5257_s29 + $0x11e0] sm:$0xff]  ;;  %3396 = vmatpush.msrb.mxu3 %v1273_v1 }
 0x370   : > { %v1009_v7 = vld [vmem:[%s5257_s29 + $0x1620] sm:$0xff]  ;;  %3338 = vmatpush.msrb.mxu0 %v873_v5 }
 0x371   : > { %v1129_v9 = vld [vmem:[%s5257_s29 + $0x19e0] sm:$0xff]  ;;  %3357 = vmatpush.msrb.mxu1 %v1009_v7  ;;  %v6449_v7 = vpop.f32.mrf.mxu2 }
 0x372   : > { %v1265_v10 = vld [vmem:[%s5257_s29 + $0x1e20] sm:$0xff]  ;;  %3378 = vmatpush.msrb.mxu2 %v1129_v9 }
 0x373   : > { %v865_v11 = vld [vmem:[%s5257_s29 + $0x11a0] sm:$0xff]  ;;  %3397 = vmatpush.msrb.mxu3 %v1265_v10 }
 0x374   : > { %v1001_v12 = vld [vmem:[%s5257_s29 + $0x15e0] sm:$0xff]  ;;  %3339 = vmatpush.msrb.mxu0 %v865_v11 }
 0x375   : > { %v1121_v13 = vld [vmem:[%s5257_s29 + $0x19a0] sm:$0xff]  ;;  %3358 = vmatpush.msrb.mxu1 %v1001_v12  ;;  %v6454_v12 = vpop.f32.mrf.mxu0 }
 0x376   : > { %v1257_v14 = vld [vmem:[%s5257_s29 + $0x1de0] sm:$0xff]  ;;  %3379 = vmatpush.msrb.mxu2 %v1121_v13 }
 0x377   : > { %v857_v33 = vld [vmem:[%s5257_s29 + $0x1160] sm:$0xff]  ;;  %3398 = vmatpush.msrb.mxu3 %v1257_v14 }
 0x378   : > { %v993_v23 = vld [vmem:[%s5257_s29 + $0x15a0] sm:$0xff]  ;;  %3340 = vmatpush.msrb.mxu0 %v857_v33 }
 0x379   : > { %v1113_v24 = vld [vmem:[%s5257_s29 + $0x1960] sm:$0xff]  ;;  %3359 = vmatpush.msrb.mxu1 %v993_v23 }
 0x37a   : > { %v1249_v26 = vld [vmem:[%s5257_s29 + $0x1da0] sm:$0xff]  ;;  %3380 = vmatpush.msrb.mxu2 %v1113_v24 }
 0x37b   : > { %v849_v29 = vld [vmem:[%s5257_s29 + $0x1120] sm:$0xff]  ;;  %3399 = vmatpush.msrb.mxu3 %v1249_v26  ;;  %v6463_v26 = vpop.f32.mrf.mxu1 }
 0x37c   : > { %v985_v30 = vld [vmem:[%s5257_s29 + $0x1560] sm:$0xff]  ;;  %3341 = vmatpush.msrb.mxu0 %v849_v29  ;;  %v6465_v29 = vpop.f32.mrf.mxu3 }
 0x37d   : > { %v1105_v32 = vld [vmem:[%s5257_s29 + $0x1920] sm:$0xff]  ;;  %3360 = vmatpush.msrb.mxu1 %v985_v30 }
 0x37e   : > { %v1241_v34 = vld [vmem:[%s5257_s29 + $0x1d60] sm:$0xff]  ;;  %3381 = vmatpush.msrb.mxu2 %v1105_v32 }
 0x37f   : > { %v841_v35 = vld [vmem:[%s5257_s29 + $0x10e0] sm:$0xff]  ;;  %3400 = vmatpush.msrb.mxu3 %v1241_v34 }
 0x380   : > { %v977_v36 = vld [vmem:[%s5257_s29 + $0x1520] sm:$0xff]  ;;  %3342 = vmatpush.msrb.mxu0 %v841_v35 }
 0x381   : > { %v1097_v39 = vld [vmem:[%s5257_s29 + $0x18e0] sm:$0xff]  ;;  %3361 = vmatpush.msrb.mxu1 %v977_v36  ;;  %v6472_v36 = vpop.f32.mrf.mxu2 }
 0x382   : > { %v1233_v58 = vld [vmem:[%s5257_s29 + $0x1d20] sm:$0xff]  ;;  %3382 = vmatpush.msrb.mxu2 %v1097_v39 }
 0x383   : > { %v833_v41 = vld [vmem:[%s5257_s29 + $0x10a0] sm:$0xff]  ;;  %3401 = vmatpush.msrb.mxu3 %v1233_v58 }
 0x384   : > { %v969_v49 = vld [vmem:[%s5257_s29 + $0x14e0] sm:$0xff]  ;;  %3343 = vmatpush.msrb.mxu0 %v833_v41 }
 0x385   : > { %v1089_v50 = vld [vmem:[%s5257_s29 + $0x18a0] sm:$0xff]  ;;  %3362 = vmatpush.msrb.mxu1 %v969_v49 }
 0x386   : > { %v1225_v51 = vld [vmem:[%s5257_s29 + $0x1ce0] sm:$0xff]  ;;  %3383 = vmatpush.msrb.mxu2 %v1089_v50 }
 0x387   : > { %v825_v59 = vld [vmem:[%s5257_s29 + $0x1060] sm:$0xff]  ;;  %3402 = vmatpush.msrb.mxu3 %v1225_v51 }
 0x388   : > { %v961_v60 = vld [vmem:[%s5257_s29 + $0x14a0] sm:$0xff]  ;;  %3344 = vmatpush.msrb.mxu0 %v825_v59 }
 0x389   : > { %v1081_v1 = vld [vmem:[%s5257_s29 + $0x1860] sm:$0xff]  ;;  %3363 = vmatpush.msrb.mxu1 %v961_v60  ;;  %v6482_v60 = vpop.f32.mrf.mxu0 }
 0x38a   : > { %v1217_v5 = vld [vmem:[%s5257_s29 + $0x1ca0] sm:$0xff]  ;;  %3384 = vmatpush.msrb.mxu2 %v1081_v1 }
 0x38b   : > { %v817_v9 = vld [vmem:[%s5257_s29 + $0x1020] sm:$0xff]  ;;  %3403 = vmatpush.msrb.mxu3 %v1217_v5 }
 0x38c   : > { %v953_v10 = vld [vmem:[%s5257_s29 + $0x1460] sm:$0xff]  ;;  %3345 = vmatpush.msrb.mxu0 %v817_v9 }
 0x38d   : > { %v1073_v11 = vld [vmem:[%s5257_s29 + $0x1820] sm:$0xff]  ;;  %3364 = vmatpush.msrb.mxu1 %v953_v10  ;;  %3346 = vmatmul.f32.vlgmr.msrb.gmra.mxu0 %v5409_v62 }
 0x38e   : > { %v1209_v13 = vld [vmem:[%s5257_s29 + $0x1c60] sm:$0xff]  ;;  %3385 = vmatpush.msrb.mxu2 %v1073_v11 }
 0x38f   : > { %v1449_v14 = vld [vmem:[%s5257_s29 + $0x23e0] sm:$0xff]  ;;  %3404 = vmatpush.msrb.mxu3 %v1209_v13  ;;  %3386 = vmatmul.f32.vlgmr.msrb.gmra.mxu2 %v5407_v61  ;;  %v6491_v13 = vpop.f32.mrf.mxu1 }
 0x390   : > { %v1705_v33 = vld [vmem:[%s5257_s29 + $0x2be0] sm:$0xff]  ;;  %3410 = vmatpush.msra.mxu0 %v1449_v14  ;;  %v6493_v14 = vpop.f32.mrf.mxu3 }
 0x391   : > { %v945_v23 = vld [vmem:[%s5257_s29 + $0x1420] sm:$0xff]  ;;  %3450 = vmatpush.msra.mxu2 %v1705_v33 }
 0x392   : > { %v1201_v24 = vld [vmem:[%s5257_s29 + $0x1c20] sm:$0xff]  ;;  %3365 = vmatpush.msrb.mxu1 %v945_v23 }
 0x393   : > { %v1441_v30 = vld [vmem:[%s5257_s29 + $0x23a0] sm:$0xff]  ;;  %3405 = vmatpush.msrb.mxu3 %v1201_v24  ;;  %3366 = vmatmul.f32.vlgmr.msrb.gmra.mxu1 %v5413_v0 }
 0x394   : > { %v1577_v32 = vld [vmem:[%s5257_s29 + $0x27e0] sm:$0xff]  ;;  %3411 = vmatpush.msra.mxu0 %v1441_v30  ;;  %3406 = vmatmul.f32.vlgmr.msrb.gmra.mxu3 %v5411_v63 }
 0x395   : > { %v1697_v34 = vld [vmem:[%s5257_s29 + $0x2ba0] sm:$0xff]  ;;  %3430 = vmatpush.msra.mxu1 %v1577_v32  ;;  %v6500_v32 = vpop.f32.mrf.mxu2 }
 0x396   : > { %v1833_v35 = vld [vmem:[%s5257_s29 + $0x2fe0] sm:$0xff]  ;;  %3451 = vmatpush.msra.mxu2 %v1697_v34 }
 0x397   : > { %v1433_v39 = vld [vmem:[%s5257_s29 + $0x2360] sm:$0xff]  ;;  %3470 = vmatpush.msra.mxu3 %v1833_v35 }
 0x398   : > { %v1569_v58 = vld [vmem:[%s5257_s29 + $0x27a0] sm:$0xff]  ;;  %3412 = vmatpush.msra.mxu0 %v1433_v39 }
 0x399   : > { %v1689_v41 = vld [vmem:[%s5257_s29 + $0x2b60] sm:$0xff]  ;;  %3431 = vmatpush.msra.mxu1 %v1569_v58 }
 0x39a   : > { %v1825_v49 = vld [vmem:[%s5257_s29 + $0x2fa0] sm:$0xff]  ;;  %3452 = vmatpush.msra.mxu2 %v1689_v41  ;;  %v6507_v41 = vpop.f32.mrf.mxu0 }
 0x39b   : > { %v1425_v50 = vld [vmem:[%s5257_s29 + $0x2320] sm:$0xff]  ;;  %3471 = vmatpush.msra.mxu3 %v1825_v49 }
 0x39c   : > { %v1561_v51 = vld [vmem:[%s5257_s29 + $0x2760] sm:$0xff]  ;;  %3413 = vmatpush.msra.mxu0 %v1425_v50 }
 0x39d   : > { %v1681_v59 = vld [vmem:[%s5257_s29 + $0x2b20] sm:$0xff]  ;;  %3432 = vmatpush.msra.mxu1 %v1561_v51 }
 0x39e   : > { %v1817_v1 = vld [vmem:[%s5257_s29 + $0x2f60] sm:$0xff]  ;;  %3453 = vmatpush.msra.mxu2 %v1681_v59 }
 0x39f   : > { %v1417_v5 = vld [vmem:[%s5257_s29 + $0x22e0] sm:$0xff]  ;;  %3472 = vmatpush.msra.mxu3 %v1817_v1 }
 0x3a0   : > { %v1553_v9 = vld [vmem:[%s5257_s29 + $0x2720] sm:$0xff]  ;;  %3414 = vmatpush.msra.mxu0 %v1417_v5 }
 0x3a1   : > { %v1673_v10 = vld [vmem:[%s5257_s29 + $0x2ae0] sm:$0xff]  ;;  %3433 = vmatpush.msra.mxu1 %v1553_v9 }
 0x3a2   : > { %v1809_v11 = vld [vmem:[%s5257_s29 + $0x2f20] sm:$0xff]  ;;  %3454 = vmatpush.msra.mxu2 %v1673_v10 }
 0x3a3   : > { %v1409_v33 = vld [vmem:[%s5257_s29 + $0x22a0] sm:$0xff]  ;;  %3473 = vmatpush.msra.mxu3 %v1809_v11  ;;  %v6517_v11 = vpop.f32.mrf.mxu1 }
 0x3a4   : > { %v1545_v23 = vld [vmem:[%s5257_s29 + $0x26e0] sm:$0xff]  ;;  %3415 = vmatpush.msra.mxu0 %v1409_v33  ;;  %v6519_v33 = vpop.f32.mrf.mxu3 }
 0x3a5   : > { %v1665_v24 = vld [vmem:[%s5257_s29 + $0x2aa0] sm:$0xff]  ;;  %3434 = vmatpush.msra.mxu1 %v1545_v23 }
 0x3a6   : > { %v1801_v30 = vld [vmem:[%s5257_s29 + $0x2ee0] sm:$0xff]  ;;  %3455 = vmatpush.msra.mxu2 %v1665_v24 }
 0x3a7   : > { %v1401_v34 = vld [vmem:[%s5257_s29 + $0x2260] sm:$0xff]  ;;  %3474 = vmatpush.msra.mxu3 %v1801_v30 }
 0x3a8   : > { %v1537_v35 = vld [vmem:[%s5257_s29 + $0x26a0] sm:$0xff]  ;;  %3416 = vmatpush.msra.mxu0 %v1401_v34 }
 0x3a9   : > { %v1657_v39 = vld [vmem:[%s5257_s29 + $0x2a60] sm:$0xff]  ;;  %3435 = vmatpush.msra.mxu1 %v1537_v35  ;;  %v6525_v35 = vpop.f32.mrf.mxu2 }
 0x3aa   : > { %v1793_v58 = vld [vmem:[%s5257_s29 + $0x2ea0] sm:$0xff]  ;;  %3456 = vmatpush.msra.mxu2 %v1657_v39 }
 0x3ab   : > { %v1393_v49 = vld [vmem:[%s5257_s29 + $0x2220] sm:$0xff]  ;;  %3475 = vmatpush.msra.mxu3 %v1793_v58 }
 0x3ac   : > { %v1529_v50 = vld [vmem:[%s5257_s29 + $0x2660] sm:$0xff]  ;;  %3417 = vmatpush.msra.mxu0 %v1393_v49  ;;  %v3007_v63 = vpop.f32.mrf.mxu3 }
 0x3ad   : > { %v1649_v51 = vld [vmem:[%s5257_s29 + $0x2a20] sm:$0xff]  ;;  %3436 = vmatpush.msra.mxu1 %v1529_v50 }
 0x3ae   : > { %v1785_v59 = vld [vmem:[%s5257_s29 + $0x2e60] sm:$0xff]  ;;  %3457 = vmatpush.msra.mxu2 %v1649_v51  ;;  %v6531_v51 = vpop.f32.mrf.mxu0 }
 0x3af   : > { %v1385_v1 = vld [vmem:[%s5257_s29 + $0x21e0] sm:$0xff]  ;;  %3476 = vmatpush.msra.mxu3 %v1785_v59 }
 0x3b0   : > { %v1521_v5 = vld [vmem:[%s5257_s29 + $0x2620] sm:$0xff]  ;;  %3418 = vmatpush.msra.mxu0 %v1385_v1 }
 0x3b1   : > { %v1641_v9 = vld [vmem:[%s5257_s29 + $0x29e0] sm:$0xff]  ;;  %3437 = vmatpush.msra.mxu1 %v1521_v5 }
 0x3b2   : > { %v1777_v10 = vld [vmem:[%s5257_s29 + $0x2e20] sm:$0xff]  ;;  %3458 = vmatpush.msra.mxu2 %v1641_v9 }
 0x3b3   : > { %v1377_v23 = vld [vmem:[%s5257_s29 + $0x21a0] sm:$0xff]  ;;  %3477 = vmatpush.msra.mxu3 %v1777_v10  ;;  %v2448_v10 = vadd.f32 %v6365_v19, %v6373_v18 }
 0x3b4   : > { %v1513_v24 = vld [vmem:[%s5257_s29 + $0x25e0] sm:$0xff]  ;;  %3419 = vmatpush.msra.mxu0 %v1377_v23  ;;  %v2728_v23 = vadd.f32 %v6463_v26, %v6454_v12 }
 0x3b5   : > { %v1633_v30 = vld [vmem:[%s5257_s29 + $0x29a0] sm:$0xff]  ;;  %3438 = vmatpush.msra.mxu1 %v1513_v24 }
 0x3b6   : > { %v1769_v34 = vld [vmem:[%s5257_s29 + $0x2de0] sm:$0xff]  ;;  %3459 = vmatpush.msra.mxu2 %v1633_v30  ;;  %v3027_v47 = vpop.f32.mrf.mxu0 }
 0x3b7   : > { %v1369_v39 = vld [vmem:[%s5257_s29 + $0x2160] sm:$0xff]  ;;  %3478 = vmatpush.msra.mxu3 %v1769_v34 }
 0x3b8   : > { %v1505_v58 = vld [vmem:[%s5257_s29 + $0x25a0] sm:$0xff]  ;;  %3420 = vmatpush.msra.mxu0 %v1369_v39 }
 0x3b9   : > { %v1625_v49 = vld [vmem:[%s5257_s29 + $0x2960] sm:$0xff]  ;;  %3439 = vmatpush.msra.mxu1 %v1505_v58  ;;  %v6545_v58 = vpop.f32.mrf.mxu1 }
 0x3ba   : > { %v1761_v50 = vld [vmem:[%s5257_s29 + $0x2da0] sm:$0xff]  ;;  %3460 = vmatpush.msra.mxu2 %v1625_v49  ;;  %v2168_v49 = vadd.f32 %v6295_v2, %v6283_v52 }
 0x3bb   : > { %v1361_v59 = vld [vmem:[%s5257_s29 + $0x2120] sm:$0xff]  ;;  %3479 = vmatpush.msra.mxu3 %v1761_v50  ;;  %v2468_v50 = vadd.f32 %v6383_v31, %v2448_v10 }
 0x3bc   : > { %v1497_v1 = vld [vmem:[%s5257_s29 + $0x2560] sm:$0xff]  ;;  %3421 = vmatpush.msra.mxu0 %v1361_v59  ;;  %v2748_v59 = vadd.f32 %v6472_v36, %v2728_v23  ;;  %v2188_v10 = vadd.f32 %v6297_v3, %v2168_v49 }
 0x3bd   : > { %v1617_v5 = vld [vmem:[%s5257_s29 + $0x2920] sm:$0xff]  ;;  %3440 = vmatpush.msra.mxu1 %v1497_v1  ;;  %v2987_v1 = vpop.f32.mrf.mxu2 }
 0x3be   : > { %v1753_v9 = vld [vmem:[%s5257_s29 + $0x2d60] sm:$0xff]  ;;  %3461 = vmatpush.msra.mxu2 %v1617_v5  ;;  %v2768_v23 = vadd.f32 %v6465_v29, %v2748_v59  ;;  %v418_v59 = vld [vmem:[%s5257_s29 + $0x3a8] sm:$0xff] }
 0x3bf   : > { %v1353_v24 = vld [vmem:[%s5257_s29 + $0x20e0] sm:$0xff]  ;;  %3480 = vmatpush.msra.mxu3 %v1753_v9 }
 0x3c0   : > { %v1489_v30 = vld [vmem:[%s5257_s29 + $0x2520] sm:$0xff]  ;;  %3422 = vmatpush.msra.mxu0 %v1353_v24  ;;  %v3008_v24 = vadd.f32 %v3007_v63, %v2987_v1  ;;  %v2488_v63 = vadd.f32 %v6393_v42, %v2468_v50  ;;  %v2788_v42 = vadd.f32 %v6482_v60, %v2768_v23  ;;  %v554_v1 = vld [vmem:[%s5257_s29 + $0x7e8] sm:$0xff] }
 0x3c1   : > { %v1609_v34 = vld [vmem:[%s5257_s29 + $0x28e0] sm:$0xff]  ;;  %3441 = vmatpush.msra.mxu1 %v1489_v30  ;;  %v394_v23 = vld [vmem:[%s5257_s29 + $0x2e8] sm:$0xff] }
 0x3c2   : > { %v1745_v39 = vld [vmem:[%s5257_s29 + $0x2d20] sm:$0xff]  ;;  %3462 = vmatpush.msra.mxu2 %v1609_v34  ;;  %v3028_v34 = vadd.f32 %v3027_v47, %v3008_v24  ;;  %v2208_v47 = vadd.f32 %v6289_v57, %v2188_v10  ;;  %v6581_v57 = vld.sshfl [vmem:[#allocation1 + $0x8] sm:$0xff pattern:$0x73625140] }
 0x3c3   : > { %v1345_v19 = vld [vmem:[%s5257_s29 + $0x20a0] sm:$0xff]  ;;  %3481 = vmatpush.msra.mxu3 %v1745_v39  ;;  %v538_v10 = vld [vmem:[%s5257_s29 + $0x768] sm:$0xff] }
 0x3c4   : > { %v1481_v18 = vld [vmem:[%s5257_s29 + $0x24e0] sm:$0xff]  ;;  %3423 = vmatpush.msra.mxu0 %v1345_v19  ;;  %v426_v19 = vld [vmem:[%s5257_s29 + $0x3e8] sm:$0xff]  ;;  %v2228_v24 = vadd.f32 %v6311_v25, %v2208_v47 }
 0x3c5   : > { %v1601_v12 = vld [vmem:[%s5257_s29 + $0x28a0] sm:$0xff]  ;;  %3442 = vmatpush.msra.mxu1 %v1481_v18  ;;  %v3047_v18 = vpop.f32.mrf.mxu1  ;;  %v386_v47 = vld [vmem:[%s5257_s29 + $0x2a8] sm:$0xff] }
 0x3c6   : > { %v1737_v26 = vld [vmem:[%s5257_s29 + $0x2ce0] sm:$0xff]  ;;  %3463 = vmatpush.msra.mxu2 %v1601_v12  ;;  %v3048_v50 = vadd.f32 %v3047_v18, %v3028_v34  ;;  %v530_v34 = vld [vmem:[%s5257_s29 + $0x728] sm:$0xff]  ;;  %v3107_v18 = vpop.f32.mrf.mxu0 }
 0x3c7   : > { %v1337_v5 = vld [vmem:[%s5257_s29 + $0x2060] sm:$0xff]  ;;  %3482 = vmatpush.msra.mxu3 %v1737_v26 }
 0x3c8   : > { %v1473_v9 = vld [vmem:[%s5257_s29 + $0x24a0] sm:$0xff]  ;;  %3424 = vmatpush.msra.mxu0 %v1337_v5  ;;  %v410_v5 = vld [vmem:[%s5257_s29 + $0x368] sm:$0xff] }
 0x3c9   : > { %v1593_v30 = vld [vmem:[%s5257_s29 + $0x2860] sm:$0xff]  ;;  %3443 = vmatpush.msra.mxu1 %v1473_v9  ;;  %v546_v9 = vld [vmem:[%s5257_s29 + $0x7a8] sm:$0xff] }
 0x3ca   : > { %v1729_v61 = vld [vmem:[%s5257_s29 + $0x2ca0] sm:$0xff]  ;;  %3464 = vmatpush.msra.mxu2 %v1593_v30 }
 0x3cb   : > { %v1329_v52 = vld [vmem:[%s5257_s29 + $0x2020] sm:$0xff]  ;;  %3483 = vmatpush.msra.mxu3 %v1729_v61  ;;  %v2508_v61 = vadd.f32 %v6401_v56, %v2488_v63  ;;  %v3087_v63 = vpop.f32.mrf.mxu3 }
 0x3cc   : > { %v1465_v2 = vld [vmem:[%s5257_s29 + $0x2460] sm:$0xff]  ;;  %3425 = vmatpush.msra.mxu0 %v1329_v52  ;;  %v2808_v52 = vadd.f32 %v6491_v13, %v2788_v42 }
 0x3cd   : > { %v1585_v31 = vld [vmem:[%s5257_s29 + $0x2820] sm:$0xff]  ;;  %3444 = vmatpush.msra.mxu1 %v1465_v2  ;;  %v2528_v30 = vadd.f32 %v6395_v4, %v2508_v61  ;;  %v522_v61 = vld [vmem:[%s5257_s29 + $0x6e8] sm:$0xff] }
 0x3ce   : > { %v1721_v36 = vld [vmem:[%s5257_s29 + $0x2c60] sm:$0xff]  ;;  %3465 = vmatpush.msra.mxu2 %v1585_v31 }
 0x3cf   : > { %v1961_v39 = vld [vmem:[%s5257_s29 + $0x33e0] sm:$0xff]  ;;  %3484 = vmatpush.msra.mxu3 %v1721_v36  ;;  %3466 = vmatmul.f32.vlgmr.msra.gmra.mxu2 %v6267_v40  ;;  %v3067_v40 = vpop.f32.mrf.mxu2  ;;  %v402_v36 = vld [vmem:[%s5257_s29 + $0x328] sm:$0xff]  ;;  %v2548_v25 = vadd.f32 %v6407_v21, %v2528_v30 }
 0x3d0   : > { %v1457_v12 = vld [vmem:[%s5257_s29 + $0x2420] sm:$0xff]  ;;  %3490 = vmatpush.msrb.mxu0 %v1961_v39  ;;  %3530 = vmatpush.msrb.mxu2 %v426_v19  ;;  %v3068_v31 = vadd.f32 %v3067_v40, %v3048_v50  ;;  %v2248_v39 = vadd.f32 %v6323_v28, %v2228_v24  ;;  %v2828_v19 = vadd.f32 %v6500_v32, %v2808_v52  ;;  %v514_v50 = vld [vmem:[%s5257_s29 + $0x6a8] sm:$0xff]  ;;  %v3127_v40 = vpop.f32.mrf.mxu1 }
 0x3d1   : > { %v1713_v3 = vld [vmem:[%s5257_s29 + $0x2c20] sm:$0xff]  ;;  %3445 = vmatpush.msra.mxu1 %v1457_v12  ;;  %v2568_v42 = vadd.f32 %v6417_v15, %v2548_v25  ;;  %v362_v52 = vld [vmem:[%s5257_s29 + $0x1e8] sm:$0xff] }
 0x3d2   : > { %v6570_v26 = vld.sshfl [vmem:[#allocation1] sm:$0xff pattern:$0x73625140]  ;;  %3485 = vmatpush.msra.mxu3 %v1713_v3  ;;  %3446 = vmatmul.f32.vlgmr.msra.gmra.mxu1 %v6581_v57  ;;  %v3088_v3 = vadd.f32 %v3087_v63, %v3068_v31  ;;  %v2848_v15 = vadd.f32 %v6493_v14, %v2828_v19  ;;  %v354_v25 = vld [vmem:[%s5257_s29 + $0x1a8] sm:$0xff] }
 0x3d3   : > { %3426 = vmatmul.f32.vlgmr.msra.gmra.mxu0 %v6570_v26  ;;  %v1953_v29 = vld [vmem:[%s5257_s29 + $0x33a0] sm:$0xff]  ;;  %3486 = vmatmul.f32.vlgmr.msra.gmra.mxu3 %v6275_v44  ;;  %v490_v63 = vld [vmem:[%s5257_s29 + $0x5e8] sm:$0xff] }
 0x3d4   : > { %v2089_v49 = vld [vmem:[%s5257_s29 + $0x37e0] sm:$0xff]  ;;  %3491 = vmatpush.msrb.mxu0 %v1953_v29  ;;  %3531 = vmatpush.msrb.mxu2 %v418_v59  ;;  %v3108_v29 = vadd.f32 %v3107_v18, %v3088_v3  ;;  %v2268_v59 = vadd.f32 %v6325_v38, %v2248_v39  ;;  %v2868_v38 = vadd.f32 %v6507_v41, %v2848_v15  ;;  %v346_v39 = vld [vmem:[%s5257_s29 + $0x168] sm:$0xff] }
 0x3d5   : > { %v1945_v56 = vld [vmem:[%s5257_s29 + $0x3360] sm:$0xff]  ;;  %3510 = vmatpush.msrb.mxu1 %v2089_v49  ;;  %3550 = vmatpush.msrb.mxu3 %v554_v1  ;;  %v378_v49 = vld [vmem:[%s5257_s29 + $0x268] sm:$0xff]  ;;  %v2588_v1 = vadd.f32 %v6425_v27, %v2568_v42  ;;  %v3187_v42 = vpop.f32.mrf.mxu0 }
 0x3d6   : > { %v2081_v60 = vld [vmem:[%s5257_s29 + $0x37a0] sm:$0xff]  ;;  %3492 = vmatpush.msrb.mxu0 %v1945_v56  ;;  %3532 = vmatpush.msrb.mxu2 %v410_v5  ;;  %v370_v5 = vld [vmem:[%s5257_s29 + $0x228] sm:$0xff]  ;;  %v3128_v30 = vadd.f32 %v3127_v40, %v3108_v29 }
 0x3d7   : > { %v1937_v44 = vld [vmem:[%s5257_s29 + $0x3320] sm:$0xff]  ;;  %3511 = vmatpush.msrb.mxu1 %v2081_v60  ;;  %3551 = vmatpush.msrb.mxu3 %v546_v9  ;;  %v506_v9 = vld [vmem:[%s5257_s29 + $0x668] sm:$0xff]  ;;  %v3147_v24 = vpop.f32.mrf.mxu2  ;;  %v2608_v31 = vadd.f32 %v6419_v20, %v2588_v1  ;;  %v2888_v20 = vadd.f32 %v6517_v11, %v2868_v38 }
 0x3d8   : > { %v2073_v2 = vld [vmem:[%s5257_s29 + $0x3760] sm:$0xff]  ;;  %3493 = vmatpush.msrb.mxu0 %v1937_v44  ;;  %3533 = vmatpush.msrb.mxu2 %v402_v36  ;;  %v498_v44 = vld [vmem:[%s5257_s29 + $0x628] sm:$0xff]  ;;  %v3207_v40 = vpop.f32.mrf.mxu1 }
 0x3d9   : > { %v1929_v4 = vld [vmem:[%s5257_s29 + $0x32e0] sm:$0xff]  ;;  %3512 = vmatpush.msrb.mxu1 %v2073_v2  ;;  %3552 = vmatpush.msrb.mxu3 %v538_v10  ;;  %v2288_v2 = vadd.f32 %v6317_v22, %v2268_v59  ;;  %v3148_v10 = vadd.f32 %v3147_v24, %v3128_v30  ;;  %v2628_v22 = vadd.f32 %v6431_v53, %v2608_v31  ;;  %v482_v19 = vld [vmem:[%s5257_s29 + $0x5a8] sm:$0xff] }
 0x3da   : > { %v2065_v13 = vld [vmem:[%s5257_s29 + $0x3720] sm:$0xff]  ;;  %3494 = vmatpush.msrb.mxu0 %v1929_v4  ;;  %3534 = vmatpush.msrb.mxu2 %v394_v23  ;;  %v322_v1 = vld [vmem:[%s5257_s29 + $0xa8] sm:$0xff] }
 0x3db   : > { %v1921_v21 = vld [vmem:[%s5257_s29 + $0x32a0] sm:$0xff]  ;;  %3513 = vmatpush.msrb.mxu1 %v2065_v13  ;;  %3553 = vmatpush.msrb.mxu3 %v530_v34  ;;  %v2308_v4 = vadd.f32 %v6335_v37, %v2288_v2  ;;  %v3167_v13 = vpop.f32.mrf.mxu3  ;;  %v2908_v37 = vadd.f32 %v6525_v35, %v2888_v20  ;;  %v458_v15 = vld [vmem:[%s5257_s29 + $0x4e8] sm:$0xff] }
 0x3dc   : > { %v2057_v12 = vld [vmem:[%s5257_s29 + $0x36e0] sm:$0xff]  ;;  %3495 = vmatpush.msrb.mxu0 %v1921_v21  ;;  %3535 = vmatpush.msrb.mxu2 %v386_v47  ;;  %v3168_v18 = vadd.f32 %v3167_v13, %v3148_v10  ;;  %v338_v21 = vld [vmem:[%s5257_s29 + $0x128] sm:$0xff]  ;;  %v2648_v47 = vadd.f32 %v6441_v8, %v2628_v22 }
 0x3dd   : > { %v1913_v28 = vld [vmem:[%s5257_s29 + $0x3260] sm:$0xff]  ;;  %3514 = vmatpush.msrb.mxu1 %v2057_v12  ;;  %3554 = vmatpush.msrb.mxu3 %v522_v61  ;;  %v474_v12 = vld [vmem:[%s5257_s29 + $0x568] sm:$0xff]  ;;  %v2328_v3 = vadd.f32 %v6347_v54, %v2308_v4  ;;  %v2928_v8 = vadd.f32 %v6519_v33, %v2908_v37 }
 0x3de   : > { %v2049_v32 = vld [vmem:[%s5257_s29 + $0x36a0] sm:$0xff]  ;;  %3496 = vmatpush.msrb.mxu0 %v1913_v28  ;;  %3536 = vmatpush.msrb.mxu2 %v378_v49  ;;  %v330_v28 = vld [vmem:[%s5257_s29 + $0xe8] sm:$0xff]  ;;  %v3188_v29 = vadd.f32 %v3187_v42, %v3168_v18  ;;  %v2668_v54 = vadd.f32 %v6449_v7, %v2648_v47 }
 0x3df   : > { %v1905_v56 = vld [vmem:[%s5257_s29 + $0x3220] sm:$0xff]  ;;  %3515 = vmatpush.msrb.mxu1 %v2049_v32  ;;  %3555 = vmatpush.msrb.mxu3 %v514_v50  ;;  %v466_v32 = vld [vmem:[%s5257_s29 + $0x528] sm:$0xff]  ;;  %v2348_v49 = vadd.f32 %v6349_v55, %v2328_v3  ;;  %v2948_v55 = vadd.f32 %v6531_v51, %v2928_v8 }
 0x3e0   : > { %v2041_v60 = vld [vmem:[%s5257_s29 + $0x3660] sm:$0xff]  ;;  %3497 = vmatpush.msrb.mxu0 %v1905_v56  ;;  %3537 = vmatpush.msrb.mxu2 %v370_v5  ;;  %v314_v56 = vld [vmem:[%s5257_s29 + $0x68] sm:$0xff]  ;;  %v3208_v5 = vadd.f32 %v3207_v40, %v3188_v29  ;;  %v2688_v38 = vadd.f32 %v6443_v16, %v2668_v54 }
 0x3e1   : > { %v1897_v27 = vld [vmem:[%s5257_s29 + $0x31e0] sm:$0xff]  ;;  %3516 = vmatpush.msrb.mxu1 %v2041_v60  ;;  %3556 = vmatpush.msrb.mxu3 %v506_v9  ;;  %v450_v60 = vld [vmem:[%s5257_s29 + $0x4a8] sm:$0xff]  ;;  %v2368_v9 = vadd.f32 %v6341_v43, %v2348_v49  ;;  %v2968_v43 = vadd.f32 %v6545_v58, %v2948_v55 }
 0x3e2   : > { %v2033_v14 = vld [vmem:[%s5257_s29 + $0x3620] sm:$0xff]  ;;  %3498 = vmatpush.msrb.mxu0 %v1897_v27  ;;  %3538 = vmatpush.msrb.mxu2 %v362_v52  ;;  %v3227_v27 = vpop.f32.mrf.mxu2  ;;  %v442_v30 = vld [vmem:[%s5257_s29 + $0x468] sm:$0xff] }
 0x3e3   : > { %v1889_v41 = vld [vmem:[%s5257_s29 + $0x31a0] sm:$0xff]  ;;  %3517 = vmatpush.msrb.mxu1 %v2033_v14  ;;  %3557 = vmatpush.msrb.mxu3 %v498_v44  ;;  %v306_v14 = vld [vmem:[%s5257_s29 + $0x28] sm:$0xff]  ;;  %v3228_v52 = vadd.f32 %v3227_v27, %v3208_v5  ;;  %v2388_v44 = vadd.f32 %v6359_v6, %v2368_v9  ;;  %v4379_v22 = vrot.slane %v2968_v43, 4 }
 0x3e4   : > { %v2025_v36 = vld [vmem:[%s5257_s29 + $0x35e0] sm:$0xff]  ;;  %3499 = vmatpush.msrb.mxu0 %v1889_v41  ;;  %3539 = vmatpush.msrb.mxu2 %v354_v25  ;;  %v938_v16 = vld [vmem:[%s5257_s29 + $0x13e8] sm:$0xff]  ;;  %v3247_v41 = vpop.f32.mrf.mxu3 }
 0x3e5   : > { %v1881_v23 = vld [vmem:[%s5257_s29 + $0x3160] sm:$0xff]  ;;  %3518 = vmatpush.msrb.mxu1 %v2025_v36  ;;  %3558 = vmatpush.msrb.mxu3 %v490_v63  ;;  %v682_v2 = vld [vmem:[%s5257_s29 + $0xbe8] sm:$0xff]  ;;  %v4378_v36 = vrot.slane %v2688_v38, 6  ;;  %v3248_v25 = vadd.f32 %v3247_v41, %v3228_v52  ;;  %v2408_v4 = vadd.f32 %v6371_v17, %v2388_v44 }
 0x3e6   : > { %v2017_v34 = vld [vmem:[%s5257_s29 + $0x35a0] sm:$0xff]  ;;  %3500 = vmatpush.msrb.mxu0 %v1881_v23  ;;  %3540 = vmatpush.msrb.mxu2 %v346_v39  ;;  %v434_v10 = vld [vmem:[%s5257_s29 + $0x428] sm:$0xff] }
 0x3e7   : > { %v1873_v53 = vld [vmem:[%s5257_s29 + $0x3120] sm:$0xff]  ;;  %3519 = vmatpush.msrb.mxu1 %v2017_v34  ;;  %3559 = vmatpush.msrb.mxu3 %v482_v19  ;;  %v674_v58 = vld [vmem:[%s5257_s29 + $0xba8] sm:$0xff]  ;;  %v4380_v23 = vrot.slane %v3248_v25, 2  ;;  %v4385_v37 = vsel %vm4384_vm0, %v2408_v4, %v4378_v36 }
 0x3e8   : > { %v2009_v11 = vld [vmem:[%s5257_s29 + $0x3560] sm:$0xff]  ;;  %3501 = vmatpush.msrb.mxu0 %v1873_v53  ;;  %3541 = vmatpush.msrb.mxu2 %v338_v21  ;;  %v810_v63 = vld [vmem:[%s5257_s29 + $0xfe8] sm:$0xff] }
 0x3e9   : > { %v1865_v35 = vld [vmem:[%s5257_s29 + $0x30e0] sm:$0xff]  ;;  %3520 = vmatpush.msrb.mxu1 %v2009_v11  ;;  %3560 = vmatpush.msrb.mxu3 %v474_v12  ;;  %v930_v20 = vld [vmem:[%s5257_s29 + $0x13a8] sm:$0xff]  ;;  %v4387_v18 = vsel %vm4386_vm1, %v4379_v22, %v4380_v23 }
 0x3ea   : > { %v2001_v61 = vld [vmem:[%s5257_s29 + $0x3520] sm:$0xff]  ;;  %3502 = vmatpush.msrb.mxu0 %v1865_v35  ;;  %3542 = vmatpush.msrb.mxu2 %v330_v28  ;;  %v1066_v13 = vld [vmem:[%s5257_s29 + $0x17e8] sm:$0xff]  ;;  %v4389_v3 = vsel %vm4388_vm2, %v4385_v37, %v4387_v18 }
 0x3eb   : > { %v1857_v50 = vld [vmem:[%s5257_s29 + $0x30a0] sm:$0xff]  ;;  %3521 = vmatpush.msrb.mxu1 %v2001_v61  ;;  %3561 = vmatpush.msrb.mxu3 %v466_v32  ;;  %v6680_v34 = vld.sshfl [vmem:[#allocation1 + $0x28] sm:$0xff pattern:$0x73625140] }
 0x3ec   : > { %v1993_v59 = vld [vmem:[%s5257_s29 + $0x34e0] sm:$0xff]  ;;  %3503 = vmatpush.msrb.mxu0 %v1857_v50  ;;  %3543 = vmatpush.msrb.mxu2 %v322_v1  ;;  %v666_v39 = vld [vmem:[%s5257_s29 + $0xb68] sm:$0xff] }
 0x3ed   : > { %v1849_v7 = vld [vmem:[%s5257_s29 + $0x3060] sm:$0xff]  ;;  %3522 = vmatpush.msrb.mxu1 %v1993_v59  ;;  %3562 = vmatpush.msrb.mxu3 %v458_v15  ;;  %v802_v19 = vld [vmem:[%s5257_s29 + $0xfa8] sm:$0xff] }
 0x3ee   : > { %v1985_v33 = vld [vmem:[%s5257_s29 + $0x34a0] sm:$0xff]  ;;  %3504 = vmatpush.msrb.mxu0 %v1849_v7  ;;  %3544 = vmatpush.msrb.mxu2 %v314_v56  ;;  %v922_v53 = vld [vmem:[%s5257_s29 + $0x1368] sm:$0xff] }
 0x3ef   : > { %v1841_v51 = vld [vmem:[%s5257_s29 + $0x3020] sm:$0xff]  ;;  %3523 = vmatpush.msrb.mxu1 %v1985_v33  ;;  %3563 = vmatpush.msrb.mxu3 %v450_v60  ;;  %v1058_v11 = vld [vmem:[%s5257_s29 + $0x17a8] sm:$0xff] }
 0x3f0   : > { %v1977_v24 = vld [vmem:[%s5257_s29 + $0x3460] sm:$0xff]  ;;  %3505 = vmatpush.msrb.mxu0 %v1841_v51  ;;  %3545 = vmatpush.msrb.mxu2 %v306_v14  ;;  %v658_v21 = vld [vmem:[%s5257_s29 + $0xb28] sm:$0xff] }
 0x3f1   : > { %3524 = vmatpush.msrb.mxu1 %v1977_v24  ;;  %v1969_v31 = vld [vmem:[%s5257_s29 + $0x3420] sm:$0xff]  ;;  %3564 = vmatpush.msrb.mxu3 %v442_v30  ;;  %v794_v12 = vld [vmem:[%s5257_s29 + $0xf68] sm:$0xff] }
 0x3f2   : > { %v6672_v6 = vld.sshfl [vmem:[#allocation1 + $0x20] sm:$0xff pattern:$0x73625140]  ;;  %3610 = vmatpush.msra.mxu2 %v938_v16  ;;  %3570 = vmatpush.msra.mxu0 %v682_v2  ;;  %v914_v47 = vld [vmem:[%s5257_s29 + $0x1328] sm:$0xff] }
 0x3f3   : > { %3506 = vmatmul.f32.vlgmr.msrb.gmra.mxu0 %v6672_v6  ;;  %3525 = vmatpush.msrb.mxu1 %v1969_v31  ;;  %v295_v17 = vld [vmem:[%s5274_s7] sm:$0xff]  ;;  %v1050_v35 = vld [vmem:[%s5257_s29 + $0x1768] sm:$0xff] }
 0x3f4   : > { %3565 = vmatpush.msrb.mxu3 %v434_v10  ;;  %3526 = vmatmul.f32.vlgmr.msrb.gmra.mxu1 %v6680_v34  ;;  %v4395_v61 = vadd.f32 %v4389_v3, %v295_v17  ;;  %v650_v42 = vld [vmem:[%s5257_s29 + $0xae8] sm:$0xff] }
 0x3f5   : > { %3571 = vmatpush.msra.mxu0 %v674_v58  ;;  %3590 = vmatpush.msra.mxu1 %v810_v63  ;;  %v786_v28 = vld [vmem:[%s5257_s29 + $0xf28] sm:$0xff] }
 0x3f6   : > { %3611 = vmatpush.msra.mxu2 %v930_v20  ;;  %3630 = vmatpush.msra.mxu3 %v1066_v13  ;;  %v906_v32 = vld [vmem:[%s5257_s29 + $0x12e8] sm:$0xff]  ;;  %4397 = vst [vmem:[%s5274_s7] sm:$0xff] %v4395_v61 }
 0x3f7   : > { %3572 = vmatpush.msra.mxu0 %v666_v39  ;;  %3591 = vmatpush.msra.mxu1 %v802_v19  ;;  %v1042_v29 = vld [vmem:[%s5257_s29 + $0x1728] sm:$0xff] }
 0x3f8   : > { %3612 = vmatpush.msra.mxu2 %v922_v53  ;;  %3631 = vmatpush.msra.mxu3 %v1058_v11  ;;  %v642_v49 = vld [vmem:[%s5257_s29 + $0xaa8] sm:$0xff] }
 0x3f9   : > { %3573 = vmatpush.msra.mxu0 %v658_v21  ;;  %3592 = vmatpush.msra.mxu1 %v794_v12  ;;  %v778_v54 = vld [vmem:[%s5257_s29 + $0xee8] sm:$0xff] }
 0x3fa   : > { %3613 = vmatpush.msra.mxu2 %v914_v47  ;;  %3632 = vmatpush.msra.mxu3 %v1050_v35  ;;  %v898_v8 = vld [vmem:[%s5257_s29 + $0x12a8] sm:$0xff] }
 0x3fb   : > { %3574 = vmatpush.msra.mxu0 %v650_v42  ;;  %3593 = vmatpush.msra.mxu1 %v786_v28  ;;  %v1034_v50 = vld [vmem:[%s5257_s29 + $0x16e8] sm:$0xff] }
 0x3fc   : > { %3614 = vmatpush.msra.mxu2 %v906_v32  ;;  %3633 = vmatpush.msra.mxu3 %v1042_v29  ;;  %v634_v59 = vld [vmem:[%s5257_s29 + $0xa68] sm:$0xff] }
 0x3fd   : > { %v770_v1 = vld [vmem:[%s5257_s29 + $0xea8] sm:$0xff]  ;;  %3575 = vmatpush.msra.mxu0 %v642_v49  ;;  %3594 = vmatpush.msra.mxu1 %v778_v54 }
 0x3fe   : > { %v890_v15 = vld [vmem:[%s5257_s29 + $0x1268] sm:$0xff]  ;;  %3615 = vmatpush.msra.mxu2 %v898_v8  ;;  %3634 = vmatpush.msra.mxu3 %v1034_v50 }
 0x3ff   : > { %v1026_v40 = vld [vmem:[%s5257_s29 + $0x16a8] sm:$0xff]  ;;  %3576 = vmatpush.msra.mxu0 %v634_v59  ;;  %3595 = vmatpush.msra.mxu1 %v770_v1 }
 0x400   : > { %v626_v55 = vld [vmem:[%s5257_s29 + $0xa28] sm:$0xff]  ;;  %3616 = vmatpush.msra.mxu2 %v890_v15  ;;  %3635 = vmatpush.msra.mxu3 %v1026_v40 }
 0x401   : > { %v762_v7 = vld [vmem:[%s5257_s29 + $0xe68] sm:$0xff]  ;;  %3577 = vmatpush.msra.mxu0 %v626_v55  ;;  %3546 = vmatmul.f32.vlgmr.msrb.gmra.mxu2 %v5389_v46 }
 0x402   : > { %v882_v33 = vld [vmem:[%s5257_s29 + $0x1228] sm:$0xff]  ;;  %3596 = vmatpush.msra.mxu1 %v762_v7  ;;  %3566 = vmatmul.f32.vlgmr.msrb.gmra.mxu3 %v5393_v48 }
 0x403   : > { %v1018_v56 = vld [vmem:[%s5257_s29 + $0x1668] sm:$0xff]  ;;  %3617 = vmatpush.msra.mxu2 %v882_v33 }
 0x404   : > { %v618_v60 = vld [vmem:[%s5257_s29 + $0x9e8] sm:$0xff]  ;;  %3636 = vmatpush.msra.mxu3 %v1018_v56 }
 0x405   : > { %v754_v5 = vld [vmem:[%s5257_s29 + $0xe28] sm:$0xff]  ;;  %3578 = vmatpush.msra.mxu0 %v618_v60 }
 0x406   : > { %v874_v9 = vld [vmem:[%s5257_s29 + $0x11e8] sm:$0xff]  ;;  %3597 = vmatpush.msra.mxu1 %v754_v5  ;;  %v7514_v5 = vld [vmem:[#allocation21_spill] sm:$0xff] }
 0x407   : > { %v1010_v38 = vld [vmem:[%s5257_s29 + $0x1628] sm:$0xff]  ;;  %3618 = vmatpush.msra.mxu2 %v874_v9 }
 0x408   : > { %v610_v51 = vld [vmem:[%s5257_s29 + $0x9a8] sm:$0xff]  ;;  %3637 = vmatpush.msra.mxu3 %v1010_v38 }
 0x409   : > { %v746_v24 = vld [vmem:[%s5257_s29 + $0xde8] sm:$0xff]  ;;  %3579 = vmatpush.msra.mxu0 %v610_v51 }
 0x40a   : > { %v866_v27 = vld [vmem:[%s5257_s29 + $0x11a8] sm:$0xff]  ;;  %3598 = vmatpush.msra.mxu1 %v746_v24 }
 0x40b   : > { %v1002_v14 = vld [vmem:[%s5257_s29 + $0x15e8] sm:$0xff]  ;;  %3619 = vmatpush.msra.mxu2 %v866_v27 }
 0x40c   : > { %v602_v30 = vld [vmem:[%s5257_s29 + $0x968] sm:$0xff]  ;;  %3638 = vmatpush.msra.mxu3 %v1002_v14 }
 0x40d   : > { %v738_v52 = vld [vmem:[%s5257_s29 + $0xda8] sm:$0xff]  ;;  %3580 = vmatpush.msra.mxu0 %v602_v30 }
 0x40e   : > { %v858_v44 = vld [vmem:[%s5257_s29 + $0x1168] sm:$0xff]  ;;  %3599 = vmatpush.msra.mxu1 %v738_v52 }
 0x40f   : > { %v994_v43 = vld [vmem:[%s5257_s29 + $0x15a8] sm:$0xff]  ;;  %3620 = vmatpush.msra.mxu2 %v858_v44 }
 0x410   : > { %v594_v16 = vld [vmem:[%s5257_s29 + $0x928] sm:$0xff]  ;;  %3639 = vmatpush.msra.mxu3 %v994_v43 }
 0x411   : > { %v730_v2 = vld [vmem:[%s5257_s29 + $0xd68] sm:$0xff]  ;;  %3581 = vmatpush.msra.mxu0 %v594_v16 }
 0x412   : > { %v850_v31 = vld [vmem:[%s5257_s29 + $0x1128] sm:$0xff]  ;;  %3600 = vmatpush.msra.mxu1 %v730_v2 }
 0x413   : > { %v986_v41 = vld [vmem:[%s5257_s29 + $0x1568] sm:$0xff]  ;;  %3621 = vmatpush.msra.mxu2 %v850_v31 }
 0x414   : > { %v586_v36 = vld [vmem:[%s5257_s29 + $0x8e8] sm:$0xff]  ;;  %3640 = vmatpush.msra.mxu3 %v986_v41 }
 0x415   : > { %v722_v10 = vld [vmem:[%s5257_s29 + $0xd28] sm:$0xff]  ;;  %3582 = vmatpush.msra.mxu0 %v586_v36 }
 0x416   : > { %v842_v25 = vld [vmem:[%s5257_s29 + $0x10e8] sm:$0xff]  ;;  %3601 = vmatpush.msra.mxu1 %v722_v10 }
 0x417   : > { %v978_v58 = vld [vmem:[%s5257_s29 + $0x1528] sm:$0xff]  ;;  %3622 = vmatpush.msra.mxu2 %v842_v25 }
 0x418   : > { %v578_v63 = vld [vmem:[%s5257_s29 + $0x8a8] sm:$0xff]  ;;  %3641 = vmatpush.msra.mxu3 %v978_v58 }
 0x419   : > { %v714_v4 = vld [vmem:[%s5257_s29 + $0xce8] sm:$0xff]  ;;  %3583 = vmatpush.msra.mxu0 %v578_v63 }
 0x41a   : > { %v834_v22 = vld [vmem:[%s5257_s29 + $0x10a8] sm:$0xff]  ;;  %3602 = vmatpush.msra.mxu1 %v714_v4 }
 0x41b   : > { %v970_v20 = vld [vmem:[%s5257_s29 + $0x14e8] sm:$0xff]  ;;  %3623 = vmatpush.msra.mxu2 %v834_v22 }
 0x41c   : > { %v570_v13 = vld [vmem:[%s5257_s29 + $0x868] sm:$0xff]  ;;  %3642 = vmatpush.msra.mxu3 %v970_v20 }
 0x41d   : > { %v706_v23 = vld [vmem:[%s5257_s29 + $0xca8] sm:$0xff]  ;;  %3584 = vmatpush.msra.mxu0 %v570_v13  ;;  %v3267_v13 = vpop.f32.mrf.mxu0 }
 0x41e   : > { %v826_v39 = vld [vmem:[%s5257_s29 + $0x1068] sm:$0xff]  ;;  %3603 = vmatpush.msra.mxu1 %v706_v23 }
 0x41f   : > { %v962_v19 = vld [vmem:[%s5257_s29 + $0x14a8] sm:$0xff]  ;;  %3624 = vmatpush.msra.mxu2 %v826_v39 }
 0x420   : > { %v562_v17 = vld [vmem:[%s5257_s29 + $0x828] sm:$0xff]  ;;  %3643 = vmatpush.msra.mxu3 %v962_v19 }
 0x421   : > { %v698_v37 = vld [vmem:[%s5257_s29 + $0xc68] sm:$0xff]  ;;  %3585 = vmatpush.msra.mxu0 %v562_v17 }
 0x422   : > { %v818_v53 = vld [vmem:[%s5257_s29 + $0x1028] sm:$0xff]  ;;  %3604 = vmatpush.msra.mxu1 %v698_v37  ;;  %3586 = vmatmul.f32.vlgmr.msra.gmra.mxu0 %v5387_v45 }
 0x423   : > { %v954_v11 = vld [vmem:[%s5257_s29 + $0x1468] sm:$0xff]  ;;  %3625 = vmatpush.msra.mxu2 %v818_v53 }
 0x424   : > { %v1194_v18 = vld [vmem:[%s5257_s29 + $0x1be8] sm:$0xff]  ;;  %3644 = vmatpush.msra.mxu3 %v954_v11  ;;  %3626 = vmatmul.f32.vlgmr.msra.gmra.mxu2 %v5409_v62  ;;  %v3287_v11 = vpop.f32.mrf.mxu1 }
 0x425   : > { %v1450_v21 = vld [vmem:[%s5257_s29 + $0x23e8] sm:$0xff]  ;;  %3650 = vmatpush.msrb.mxu0 %v1194_v18 }
 0x426   : > { %v690_v12 = vld [vmem:[%s5257_s29 + $0xc28] sm:$0xff]  ;;  %3690 = vmatpush.msrb.mxu2 %v1450_v21 }
 0x427   : > { %v946_v3 = vld [vmem:[%s5257_s29 + $0x1428] sm:$0xff]  ;;  %3605 = vmatpush.msra.mxu1 %v690_v12  ;;  %v3288_v12 = vadd.f32 %v3287_v11, %v3267_v13 }
 0x428   : > { %v1186_v47 = vld [vmem:[%s5257_s29 + $0x1ba8] sm:$0xff]  ;;  %3645 = vmatpush.msra.mxu3 %v946_v3  ;;  %3606 = vmatmul.f32.vlgmr.msra.gmra.mxu1 %v7514_v5  ;;  %v3307_v3 = vpop.f32.mrf.mxu2 }
 0x429   : > { %v1322_v35 = vld [vmem:[%s5257_s29 + $0x1fe8] sm:$0xff]  ;;  %3651 = vmatpush.msrb.mxu0 %v1186_v47  ;;  %3646 = vmatmul.f32.vlgmr.msra.gmra.mxu3 %v5413_v0 }
 0x42a   : > { %v1442_v61 = vld [vmem:[%s5257_s29 + $0x23a8] sm:$0xff]  ;;  %3670 = vmatpush.msrb.mxu1 %v1322_v35 }
 0x42b   : > { %v1578_v42 = vld [vmem:[%s5257_s29 + $0x27e8] sm:$0xff]  ;;  %3691 = vmatpush.msrb.mxu2 %v1442_v61 }
 0x42c   : > { %v1178_v28 = vld [vmem:[%s5257_s29 + $0x1b68] sm:$0xff]  ;;  %3710 = vmatpush.msrb.mxu3 %v1578_v42 }
 0x42d   : > { %v1314_v32 = vld [vmem:[%s5257_s29 + $0x1fa8] sm:$0xff]  ;;  %3652 = vmatpush.msrb.mxu0 %v1178_v28  ;;  %v3308_v28 = vadd.f32 %v3307_v3, %v3288_v12 }
 0x42e   : > { %v1434_v29 = vld [vmem:[%s5257_s29 + $0x2368] sm:$0xff]  ;;  %3671 = vmatpush.msrb.mxu1 %v1314_v32 }
 0x42f   : > { %v1570_v49 = vld [vmem:[%s5257_s29 + $0x27a8] sm:$0xff]  ;;  %3692 = vmatpush.msrb.mxu2 %v1434_v29 }
 0x430   : > { %v1170_v54 = vld [vmem:[%s5257_s29 + $0x1b28] sm:$0xff]  ;;  %3711 = vmatpush.msrb.mxu3 %v1570_v49  ;;  %v3327_v49 = vpop.f32.mrf.mxu3 }
 0x431   : > { %v1306_v8 = vld [vmem:[%s5257_s29 + $0x1f68] sm:$0xff]  ;;  %3653 = vmatpush.msrb.mxu0 %v1170_v54 }
 0x432   : > { %v1426_v50 = vld [vmem:[%s5257_s29 + $0x2328] sm:$0xff]  ;;  %3672 = vmatpush.msrb.mxu1 %v1306_v8 }
 0x433   : > { %v1562_v59 = vld [vmem:[%s5257_s29 + $0x2768] sm:$0xff]  ;;  %3693 = vmatpush.msrb.mxu2 %v1426_v50  ;;  %v3328_v50 = vadd.f32 %v3327_v49, %v3308_v28 }
 0x434   : > { %v1162_v1 = vld [vmem:[%s5257_s29 + $0x1ae8] sm:$0xff]  ;;  %3712 = vmatpush.msrb.mxu3 %v1562_v59 }
 0x435   : > { %v1298_v15 = vld [vmem:[%s5257_s29 + $0x1f28] sm:$0xff]  ;;  %3654 = vmatpush.msrb.mxu0 %v1162_v1 }
 0x436   : > { %v1418_v40 = vld [vmem:[%s5257_s29 + $0x22e8] sm:$0xff]  ;;  %3673 = vmatpush.msrb.mxu1 %v1298_v15  ;;  %v3347_v15 = vpop.f32.mrf.mxu0 }
 0x437   : > { %v1554_v55 = vld [vmem:[%s5257_s29 + $0x2728] sm:$0xff]  ;;  %3694 = vmatpush.msrb.mxu2 %v1418_v40 }
 0x438   : > { %v1154_v7 = vld [vmem:[%s5257_s29 + $0x1aa8] sm:$0xff]  ;;  %3713 = vmatpush.msrb.mxu3 %v1554_v55 }
 0x439   : > { %v1290_v33 = vld [vmem:[%s5257_s29 + $0x1ee8] sm:$0xff]  ;;  %3655 = vmatpush.msrb.mxu0 %v1154_v7  ;;  %v3348_v7 = vadd.f32 %v3347_v15, %v3328_v50 }
 0x43a   : > { %v1410_v56 = vld [vmem:[%s5257_s29 + $0x22a8] sm:$0xff]  ;;  %3674 = vmatpush.msrb.mxu1 %v1290_v33 }
 0x43b   : > { %v1546_v60 = vld [vmem:[%s5257_s29 + $0x26e8] sm:$0xff]  ;;  %3695 = vmatpush.msrb.mxu2 %v1410_v56 }
 0x43c   : > { %v1146_v9 = vld [vmem:[%s5257_s29 + $0x1a68] sm:$0xff]  ;;  %3714 = vmatpush.msrb.mxu3 %v1546_v60  ;;  %v7515_v60 = vld [vmem:[#allocation22_spill] sm:$0xff] }
 0x43d   : > { %v1282_v38 = vld [vmem:[%s5257_s29 + $0x1ea8] sm:$0xff]  ;;  %3656 = vmatpush.msrb.mxu0 %v1146_v9  ;;  %v3367_v9 = vpop.f32.mrf.mxu1 }
 0x43e   : > { %v1402_v51 = vld [vmem:[%s5257_s29 + $0x2268] sm:$0xff]  ;;  %3675 = vmatpush.msrb.mxu1 %v1282_v38 }
 0x43f   : > { %v1538_v24 = vld [vmem:[%s5257_s29 + $0x26a8] sm:$0xff]  ;;  %3696 = vmatpush.msrb.mxu2 %v1402_v51 }
 0x440   : > { %v1138_v27 = vld [vmem:[%s5257_s29 + $0x1a28] sm:$0xff]  ;;  %3715 = vmatpush.msrb.mxu3 %v1538_v24  ;;  %v3368_v24 = vadd.f32 %v3367_v9, %v3348_v7 }
 0x441   : > { %v1274_v14 = vld [vmem:[%s5257_s29 + $0x1e68] sm:$0xff]  ;;  %3657 = vmatpush.msrb.mxu0 %v1138_v27  ;;  %v3387_v27 = vpop.f32.mrf.mxu2 }
 0x442   : > { %v1394_v30 = vld [vmem:[%s5257_s29 + $0x2228] sm:$0xff]  ;;  %3676 = vmatpush.msrb.mxu1 %v1274_v14 }
 0x443   : > { %v1530_v52 = vld [vmem:[%s5257_s29 + $0x2668] sm:$0xff]  ;;  %3697 = vmatpush.msrb.mxu2 %v1394_v30 }
 0x444   : > { %v1130_v44 = vld [vmem:[%s5257_s29 + $0x19e8] sm:$0xff]  ;;  %3716 = vmatpush.msrb.mxu3 %v1530_v52  ;;  %v7516_v52 = vld [vmem:[#allocation23_spill] sm:$0xff] }
 0x445   : > { %v1266_v43 = vld [vmem:[%s5257_s29 + $0x1e28] sm:$0xff]  ;;  %3658 = vmatpush.msrb.mxu0 %v1130_v44 }
 0x446   : > { %v1386_v16 = vld [vmem:[%s5257_s29 + $0x21e8] sm:$0xff]  ;;  %3677 = vmatpush.msrb.mxu1 %v1266_v43  ;;  %v3388_v43 = vadd.f32 %v3387_v27, %v3368_v24 }
 0x447   : > { %v1522_v2 = vld [vmem:[%s5257_s29 + $0x2628] sm:$0xff]  ;;  %3698 = vmatpush.msrb.mxu2 %v1386_v16 }
 0x448   : > { %v1122_v31 = vld [vmem:[%s5257_s29 + $0x19a8] sm:$0xff]  ;;  %3717 = vmatpush.msrb.mxu3 %v1522_v2 }
 0x449   : > { %v1258_v41 = vld [vmem:[%s5257_s29 + $0x1de8] sm:$0xff]  ;;  %3659 = vmatpush.msrb.mxu0 %v1122_v31  ;;  %v3407_v31 = vpop.f32.mrf.mxu3 }
 0x44a   : > { %v1378_v36 = vld [vmem:[%s5257_s29 + $0x21a8] sm:$0xff]  ;;  %3678 = vmatpush.msrb.mxu1 %v1258_v41 }
 0x44b   : > { %v1514_v10 = vld [vmem:[%s5257_s29 + $0x25e8] sm:$0xff]  ;;  %3699 = vmatpush.msrb.mxu2 %v1378_v36 }
 0x44c   : > { %v1114_v25 = vld [vmem:[%s5257_s29 + $0x1968] sm:$0xff]  ;;  %3718 = vmatpush.msrb.mxu3 %v1514_v10 }
 0x44d   : > { %v1250_v58 = vld [vmem:[%s5257_s29 + $0x1da8] sm:$0xff]  ;;  %3660 = vmatpush.msrb.mxu0 %v1114_v25 }
 0x44e   : > { %v1370_v63 = vld [vmem:[%s5257_s29 + $0x2168] sm:$0xff]  ;;  %3679 = vmatpush.msrb.mxu1 %v1250_v58 }
 0x44f   : > { %v1506_v4 = vld [vmem:[%s5257_s29 + $0x25a8] sm:$0xff]  ;;  %3700 = vmatpush.msrb.mxu2 %v1370_v63 }
 0x450   : > { %v1106_v22 = vld [vmem:[%s5257_s29 + $0x1928] sm:$0xff]  ;;  %3719 = vmatpush.msrb.mxu3 %v1506_v4 }
 0x451   : > { %v1242_v20 = vld [vmem:[%s5257_s29 + $0x1d68] sm:$0xff]  ;;  %3661 = vmatpush.msrb.mxu0 %v1106_v22 }
 0x452   : > { %v1362_v23 = vld [vmem:[%s5257_s29 + $0x2128] sm:$0xff]  ;;  %3680 = vmatpush.msrb.mxu1 %v1242_v20 }
 0x453   : > { %v1498_v39 = vld [vmem:[%s5257_s29 + $0x2568] sm:$0xff]  ;;  %3701 = vmatpush.msrb.mxu2 %v1362_v23 }
 0x454   : > { %v1098_v19 = vld [vmem:[%s5257_s29 + $0x18e8] sm:$0xff]  ;;  %3720 = vmatpush.msrb.mxu3 %v1498_v39 }
 0x455   : > { %v1234_v17 = vld [vmem:[%s5257_s29 + $0x1d28] sm:$0xff]  ;;  %3662 = vmatpush.msrb.mxu0 %v1098_v19 }
 0x456   : > { %v1354_v37 = vld [vmem:[%s5257_s29 + $0x20e8] sm:$0xff]  ;;  %3681 = vmatpush.msrb.mxu1 %v1234_v17 }
 0x457   : > { %v1490_v53 = vld [vmem:[%s5257_s29 + $0x2528] sm:$0xff]  ;;  %3702 = vmatpush.msrb.mxu2 %v1354_v37 }
 0x458   : > { %v1090_v18 = vld [vmem:[%s5257_s29 + $0x18a8] sm:$0xff]  ;;  %3721 = vmatpush.msrb.mxu3 %v1490_v53 }
 0x459   : > { %v1226_v21 = vld [vmem:[%s5257_s29 + $0x1ce8] sm:$0xff]  ;;  %3663 = vmatpush.msrb.mxu0 %v1090_v18 }
 0x45a   : > { %v1346_v47 = vld [vmem:[%s5257_s29 + $0x20a8] sm:$0xff]  ;;  %3682 = vmatpush.msrb.mxu1 %v1226_v21 }
 0x45b   : > { %v1482_v35 = vld [vmem:[%s5257_s29 + $0x24e8] sm:$0xff]  ;;  %3703 = vmatpush.msrb.mxu2 %v1346_v47 }
 0x45c   : > { %v1082_v61 = vld [vmem:[%s5257_s29 + $0x1868] sm:$0xff]  ;;  %3722 = vmatpush.msrb.mxu3 %v1482_v35 }
 0x45d   : > { %v1218_v42 = vld [vmem:[%s5257_s29 + $0x1ca8] sm:$0xff]  ;;  %3664 = vmatpush.msrb.mxu0 %v1082_v61 }
 0x45e   : > { %v1338_v32 = vld [vmem:[%s5257_s29 + $0x2068] sm:$0xff]  ;;  %3683 = vmatpush.msrb.mxu1 %v1218_v42 }
 0x45f   : > { %v1474_v29 = vld [vmem:[%s5257_s29 + $0x24a8] sm:$0xff]  ;;  %3704 = vmatpush.msrb.mxu2 %v1338_v32 }
 0x460   : > { %v1074_v54 = vld [vmem:[%s5257_s29 + $0x1828] sm:$0xff]  ;;  %3723 = vmatpush.msrb.mxu3 %v1474_v29 }
 0x461   : > { %v1210_v8 = vld [vmem:[%s5257_s29 + $0x1c68] sm:$0xff]  ;;  %3665 = vmatpush.msrb.mxu0 %v1074_v54 }
 0x462   : > { %v1330_v59 = vld [vmem:[%s5257_s29 + $0x2028] sm:$0xff]  ;;  %3684 = vmatpush.msrb.mxu1 %v1210_v8  ;;  %3666 = vmatmul.f32.vlgmr.msrb.gmra.mxu0 %v7515_v60 }
 0x463   : > { %v1466_v1 = vld [vmem:[%s5257_s29 + $0x2468] sm:$0xff]  ;;  %3705 = vmatpush.msrb.mxu2 %v1330_v59 }
 0x464   : > { %v1706_v40 = vld [vmem:[%s5257_s29 + $0x2be8] sm:$0xff]  ;;  %3724 = vmatpush.msrb.mxu3 %v1466_v1  ;;  %3706 = vmatmul.f32.vlgmr.msrb.gmra.mxu2 %v6570_v26 }
 0x465   : > { %v1962_v55 = vld [vmem:[%s5257_s29 + $0x33e8] sm:$0xff]  ;;  %3730 = vmatpush.msra.mxu0 %v1706_v40 }
 0x466   : > { %v1202_v33 = vld [vmem:[%s5257_s29 + $0x1c28] sm:$0xff]  ;;  %3770 = vmatpush.msra.mxu2 %v1962_v55 }
 0x467   : > { %v1458_v56 = vld [vmem:[%s5257_s29 + $0x2428] sm:$0xff]  ;;  %3685 = vmatpush.msrb.mxu1 %v1202_v33  ;;  %v3427_v33 = vpop.f32.mrf.mxu0 }
 0x468   : > { %v1698_v38 = vld [vmem:[%s5257_s29 + $0x2ba8] sm:$0xff]  ;;  %3725 = vmatpush.msrb.mxu3 %v1458_v56  ;;  %3686 = vmatmul.f32.vlgmr.msrb.gmra.mxu1 %v7516_v52 }
 0x469   : > { %v1834_v51 = vld [vmem:[%s5257_s29 + $0x2fe8] sm:$0xff]  ;;  %3726 = vmatmul.f32.vlgmr.msrb.gmra.mxu3 %v6581_v57  ;;  %3731 = vmatpush.msra.mxu0 %v1698_v38  ;;  %v6832_v57 = vadd.f32 %v3407_v31, %v3388_v43 }
 0x46a   : > { %v1954_v14 = vld [vmem:[%s5257_s29 + $0x33a8] sm:$0xff]  ;;  %3750 = vmatpush.msra.mxu1 %v1834_v51 }
 0x46b   : > { %v2090_v30 = vld [vmem:[%s5257_s29 + $0x37e8] sm:$0xff]  ;;  %3771 = vmatpush.msra.mxu2 %v1954_v14  ;;  %v3428_v38 = vadd.f32 %v3427_v33, %v6832_v57  ;;  %v363_v33 = vld [vmem:[%s5257_s29 + $0x1f0] sm:$0xff] }
 0x46c   : > { %v1690_v26 = vld [vmem:[%s5257_s29 + $0x2b68] sm:$0xff]  ;;  %3790 = vmatpush.msra.mxu3 %v2090_v30  ;;  %v3447_v30 = vpop.f32.mrf.mxu1 }
 0x46d   : > { %v1826_v44 = vld [vmem:[%s5257_s29 + $0x2fa8] sm:$0xff]  ;;  %3732 = vmatpush.msra.mxu0 %v1690_v26  ;;  %v3448_v43 = vadd.f32 %v3447_v30, %v3428_v38  ;;  %v755_v38 = vld [vmem:[%s5257_s29 + $0xe30] sm:$0xff] }
 0x46e   : > { %v1946_v16 = vld [vmem:[%s5257_s29 + $0x3368] sm:$0xff]  ;;  %3751 = vmatpush.msra.mxu1 %v1826_v44  ;;  %v347_v30 = vld [vmem:[%s5257_s29 + $0x170] sm:$0xff] }
 0x46f   : > { %v2082_v2 = vld [vmem:[%s5257_s29 + $0x37a8] sm:$0xff]  ;;  %3772 = vmatpush.msra.mxu2 %v1946_v16 }
 0x470   : > { %v1682_v41 = vld [vmem:[%s5257_s29 + $0x2b28] sm:$0xff]  ;;  %3791 = vmatpush.msra.mxu3 %v2082_v2 }
 0x471   : > { %v1818_v36 = vld [vmem:[%s5257_s29 + $0x2f68] sm:$0xff]  ;;  %3733 = vmatpush.msra.mxu0 %v1682_v41 }
 0x472   : > { %v1938_v10 = vld [vmem:[%s5257_s29 + $0x3328] sm:$0xff]  ;;  %3752 = vmatpush.msra.mxu1 %v1818_v36  ;;  %v3467_v36 = vpop.f32.mrf.mxu2 }
 0x473   : > { %v2074_v25 = vld [vmem:[%s5257_s29 + $0x3768] sm:$0xff]  ;;  %3773 = vmatpush.msra.mxu2 %v1938_v10 }
 0x474   : > { %v1674_v58 = vld [vmem:[%s5257_s29 + $0x2ae8] sm:$0xff]  ;;  %3792 = vmatpush.msra.mxu3 %v2074_v25  ;;  %v3468_v25 = vadd.f32 %v3467_v36, %v3448_v43  ;;  %v739_v43 = vld [vmem:[%s5257_s29 + $0xdb0] sm:$0xff] }
 0x475   : > { %v1810_v63 = vld [vmem:[%s5257_s29 + $0x2f28] sm:$0xff]  ;;  %3734 = vmatpush.msra.mxu0 %v1674_v58  ;;  %v427_v58 = vld [vmem:[%s5257_s29 + $0x3f0] sm:$0xff] }
 0x476   : > { %v1930_v4 = vld [vmem:[%s5257_s29 + $0x32e8] sm:$0xff]  ;;  %3753 = vmatpush.msra.mxu1 %v1810_v63  ;;  %v683_v63 = vld [vmem:[%s5257_s29 + $0xbf0] sm:$0xff] }
 0x477   : > { %v2066_v22 = vld [vmem:[%s5257_s29 + $0x3728] sm:$0xff]  ;;  %3774 = vmatpush.msra.mxu2 %v1930_v4  ;;  %v3487_v4 = vpop.f32.mrf.mxu3  ;;  %v331_v36 = vld [vmem:[%s5257_s29 + $0xf0] sm:$0xff] }
 0x478   : > { %v1666_v20 = vld [vmem:[%s5257_s29 + $0x2aa8] sm:$0xff]  ;;  %3793 = vmatpush.msra.mxu3 %v2066_v22 }
 0x479   : > { %v1802_v13 = vld [vmem:[%s5257_s29 + $0x2ee8] sm:$0xff]  ;;  %3735 = vmatpush.msra.mxu0 %v1666_v20 }
 0x47a   : > { %v1922_v23 = vld [vmem:[%s5257_s29 + $0x32a8] sm:$0xff]  ;;  %3754 = vmatpush.msra.mxu1 %v1802_v13  ;;  %v6889_v13 = vadd.f32 %v3487_v4, %v3468_v25  ;;  %v587_v25 = vld [vmem:[%s5257_s29 + $0x8f0] sm:$0xff] }
 0x47b   : > { %v2058_v39 = vld [vmem:[%s5257_s29 + $0x36e8] sm:$0xff]  ;;  %3775 = vmatpush.msra.mxu2 %v1922_v23  ;;  %v6891_v23 = vld.sshfl [vmem:[#allocation1 + $0x10] sm:$0xff pattern:$0x73625140] }
 0x47c   : > { %v1658_v19 = vld [vmem:[%s5257_s29 + $0x2a68] sm:$0xff]  ;;  %3794 = vmatpush.msra.mxu3 %v2058_v39  ;;  %v419_v39 = vld [vmem:[%s5257_s29 + $0x3b0] sm:$0xff] }
 0x47d   : > { %v1794_v17 = vld [vmem:[%s5257_s29 + $0x2ea8] sm:$0xff]  ;;  %3736 = vmatpush.msra.mxu0 %v1658_v19  ;;  %v555_v19 = vld [vmem:[%s5257_s29 + $0x7f0] sm:$0xff] }
 0x47e   : > { %v1914_v37 = vld [vmem:[%s5257_s29 + $0x3268] sm:$0xff]  ;;  %3755 = vmatpush.msra.mxu1 %v1794_v17  ;;  %v675_v17 = vld [vmem:[%s5257_s29 + $0xbb0] sm:$0xff] }
 0x47f   : > { %v2050_v53 = vld [vmem:[%s5257_s29 + $0x36a8] sm:$0xff]  ;;  %3776 = vmatpush.msra.mxu2 %v1914_v37  ;;  %v811_v37 = vld [vmem:[%s5257_s29 + $0xff0] sm:$0xff] }
 0x480   : > { %v1650_v11 = vld [vmem:[%s5257_s29 + $0x2a28] sm:$0xff]  ;;  %3795 = vmatpush.msra.mxu3 %v2050_v53  ;;  %v6899_v53 = vld.sshfl [vmem:[#allocation1 + $0x18] sm:$0xff pattern:$0x73625140]  ;;  %v323_v4 = vld [vmem:[%s5257_s29 + $0xb0] sm:$0xff] }
 0x481   : > { %v1786_v18 = vld [vmem:[%s5257_s29 + $0x2e68] sm:$0xff]  ;;  %3737 = vmatpush.msra.mxu0 %v1650_v11  ;;  %v547_v11 = vld [vmem:[%s5257_s29 + $0x7b0] sm:$0xff] }
 0x482   : > { %v1906_v21 = vld [vmem:[%s5257_s29 + $0x3228] sm:$0xff]  ;;  %3756 = vmatpush.msra.mxu1 %v1786_v18  ;;  %v667_v18 = vld [vmem:[%s5257_s29 + $0xb70] sm:$0xff] }
 0x483   : > { %v2042_v12 = vld [vmem:[%s5257_s29 + $0x3668] sm:$0xff]  ;;  %3777 = vmatpush.msra.mxu2 %v1906_v21  ;;  %v803_v21 = vld [vmem:[%s5257_s29 + $0xfb0] sm:$0xff] }
 0x484   : > { %v1642_v3 = vld [vmem:[%s5257_s29 + $0x29e8] sm:$0xff]  ;;  %3796 = vmatpush.msra.mxu3 %v2042_v12  ;;  %v403_v12 = vld [vmem:[%s5257_s29 + $0x330] sm:$0xff] }
 0x485   : > { %v1778_v47 = vld [vmem:[%s5257_s29 + $0x2e28] sm:$0xff]  ;;  %3738 = vmatpush.msra.mxu0 %v1642_v3  ;;  %v539_v3 = vld [vmem:[%s5257_s29 + $0x770] sm:$0xff] }
 0x486   : > { %v1898_v35 = vld [vmem:[%s5257_s29 + $0x31e8] sm:$0xff]  ;;  %3757 = vmatpush.msra.mxu1 %v1778_v47  ;;  %v659_v47 = vld [vmem:[%s5257_s29 + $0xb30] sm:$0xff] }
 0x487   : > { %v2034_v61 = vld [vmem:[%s5257_s29 + $0x3628] sm:$0xff]  ;;  %3778 = vmatpush.msra.mxu2 %v1898_v35  ;;  %v395_v35 = vld [vmem:[%s5257_s29 + $0x2f0] sm:$0xff] }
 0x488   : > { %v1634_v42 = vld [vmem:[%s5257_s29 + $0x29a8] sm:$0xff]  ;;  %3797 = vmatpush.msra.mxu3 %v2034_v61  ;;  %v531_v61 = vld [vmem:[%s5257_s29 + $0x730] sm:$0xff] }
 0x489   : > { %v1770_v28 = vld [vmem:[%s5257_s29 + $0x2de8] sm:$0xff]  ;;  %3739 = vmatpush.msra.mxu0 %v1634_v42  ;;  %v651_v42 = vld [vmem:[%s5257_s29 + $0xaf0] sm:$0xff] }
 0x48a   : > { %v1890_v32 = vld [vmem:[%s5257_s29 + $0x31a8] sm:$0xff]  ;;  %3758 = vmatpush.msra.mxu1 %v1770_v28  ;;  %v787_v28 = vld [vmem:[%s5257_s29 + $0xf30] sm:$0xff] }
 0x48b   : > { %v2026_v29 = vld [vmem:[%s5257_s29 + $0x35e8] sm:$0xff]  ;;  %3779 = vmatpush.msra.mxu2 %v1890_v32  ;;  %v387_v32 = vld [vmem:[%s5257_s29 + $0x2b0] sm:$0xff] }
 0x48c   : > { %v1626_v49 = vld [vmem:[%s5257_s29 + $0x2968] sm:$0xff]  ;;  %3798 = vmatpush.msra.mxu3 %v2026_v29  ;;  %v523_v29 = vld [vmem:[%s5257_s29 + $0x6f0] sm:$0xff] }
 0x48d   : > { %v1762_v54 = vld [vmem:[%s5257_s29 + $0x2da8] sm:$0xff]  ;;  %3740 = vmatpush.msra.mxu0 %v1626_v49  ;;  %v643_v49 = vld [vmem:[%s5257_s29 + $0xab0] sm:$0xff] }
 0x48e   : > { %v1882_v8 = vld [vmem:[%s5257_s29 + $0x3168] sm:$0xff]  ;;  %3759 = vmatpush.msra.mxu1 %v1762_v54  ;;  %v779_v54 = vld [vmem:[%s5257_s29 + $0xef0] sm:$0xff] }
 0x48f   : > { %v2018_v50 = vld [vmem:[%s5257_s29 + $0x35a8] sm:$0xff]  ;;  %3780 = vmatpush.msra.mxu2 %v1882_v8  ;;  %v379_v8 = vld [vmem:[%s5257_s29 + $0x270] sm:$0xff] }
 0x490   : > { %v1618_v59 = vld [vmem:[%s5257_s29 + $0x2928] sm:$0xff]  ;;  %3799 = vmatpush.msra.mxu3 %v2018_v50  ;;  %v515_v50 = vld [vmem:[%s5257_s29 + $0x6b0] sm:$0xff] }
 0x491   : > { %v1754_v1 = vld [vmem:[%s5257_s29 + $0x2d68] sm:$0xff]  ;;  %3741 = vmatpush.msra.mxu0 %v1618_v59  ;;  %v635_v59 = vld [vmem:[%s5257_s29 + $0xa70] sm:$0xff] }
 0x492   : > { %v1874_v15 = vld [vmem:[%s5257_s29 + $0x3128] sm:$0xff]  ;;  %3760 = vmatpush.msra.mxu1 %v1754_v1  ;;  %v771_v1 = vld [vmem:[%s5257_s29 + $0xeb0] sm:$0xff] }
 0x493   : > { %v2010_v40 = vld [vmem:[%s5257_s29 + $0x3568] sm:$0xff]  ;;  %3781 = vmatpush.msra.mxu2 %v1874_v15  ;;  %v371_v15 = vld [vmem:[%s5257_s29 + $0x230] sm:$0xff] }
 0x494   : > { %v1610_v55 = vld [vmem:[%s5257_s29 + $0x28e8] sm:$0xff]  ;;  %3800 = vmatpush.msra.mxu3 %v2010_v40  ;;  %v507_v40 = vld [vmem:[%s5257_s29 + $0x670] sm:$0xff] }
 0x495   : > { %v1746_v7 = vld [vmem:[%s5257_s29 + $0x2d28] sm:$0xff]  ;;  %3742 = vmatpush.msra.mxu0 %v1610_v55  ;;  %v627_v55 = vld [vmem:[%s5257_s29 + $0xa30] sm:$0xff] }
 0x496   : > { %v1866_v56 = vld [vmem:[%s5257_s29 + $0x30e8] sm:$0xff]  ;;  %3761 = vmatpush.msra.mxu1 %v1746_v7  ;;  %v763_v7 = vld [vmem:[%s5257_s29 + $0xe70] sm:$0xff] }
 0x497   : > { %v2002_v9 = vld [vmem:[%s5257_s29 + $0x3528] sm:$0xff]  ;;  %3782 = vmatpush.msra.mxu2 %v1866_v56  ;;  %v499_v56 = vld [vmem:[%s5257_s29 + $0x630] sm:$0xff] }
 0x498   : > { %v1602_v51 = vld [vmem:[%s5257_s29 + $0x28a8] sm:$0xff]  ;;  %3801 = vmatpush.msra.mxu3 %v2002_v9  ;;  %v619_v9 = vld [vmem:[%s5257_s29 + $0x9f0] sm:$0xff] }
 0x499   : > { %v1738_v24 = vld [vmem:[%s5257_s29 + $0x2ce8] sm:$0xff]  ;;  %3743 = vmatpush.msra.mxu0 %v1602_v51  ;;  %v355_v51 = vld [vmem:[%s5257_s29 + $0x1b0] sm:$0xff] }
 0x49a   : > { %v1858_v27 = vld [vmem:[%s5257_s29 + $0x30a8] sm:$0xff]  ;;  %3762 = vmatpush.msra.mxu1 %v1738_v24  ;;  %v491_v24 = vld [vmem:[%s5257_s29 + $0x5f0] sm:$0xff] }
 0x49b   : > { %v1994_v14 = vld [vmem:[%s5257_s29 + $0x34e8] sm:$0xff]  ;;  %3783 = vmatpush.msra.mxu2 %v1858_v27  ;;  %v611_v27 = vld [vmem:[%s5257_s29 + $0x9b0] sm:$0xff] }
 0x49c   : > { %v1594_v26 = vld [vmem:[%s5257_s29 + $0x2868] sm:$0xff]  ;;  %3802 = vmatpush.msra.mxu3 %v1994_v14  ;;  %v747_v14 = vld [vmem:[%s5257_s29 + $0xdf0] sm:$0xff] }
 0x49d   : > { %v1730_v44 = vld [vmem:[%s5257_s29 + $0x2ca8] sm:$0xff]  ;;  %3744 = vmatpush.msra.mxu0 %v1594_v26  ;;  %v483_v26 = vld [vmem:[%s5257_s29 + $0x5b0] sm:$0xff] }
 0x49e   : > { %v1850_v16 = vld [vmem:[%s5257_s29 + $0x3068] sm:$0xff]  ;;  %3763 = vmatpush.msra.mxu1 %v1730_v44  ;;  %v603_v44 = vld [vmem:[%s5257_s29 + $0x970] sm:$0xff] }
 0x49f   : > { %v1986_v2 = vld [vmem:[%s5257_s29 + $0x34a8] sm:$0xff]  ;;  %3784 = vmatpush.msra.mxu2 %v1850_v16  ;;  %v339_v16 = vld [vmem:[%s5257_s29 + $0x130] sm:$0xff] }
 0x4a0   : > { %v1586_v31 = vld [vmem:[%s5257_s29 + $0x2828] sm:$0xff]  ;;  %3803 = vmatpush.msra.mxu3 %v1986_v2  ;;  %v475_v2 = vld [vmem:[%s5257_s29 + $0x570] sm:$0xff] }
 0x4a1   : > { %v1722_v41 = vld [vmem:[%s5257_s29 + $0x2c68] sm:$0xff]  ;;  %3745 = vmatpush.msra.mxu0 %v1586_v31  ;;  %v595_v31 = vld [vmem:[%s5257_s29 + $0x930] sm:$0xff] }
 0x4a2   : > { %v1842_v57 = vld [vmem:[%s5257_s29 + $0x3028] sm:$0xff]  ;;  %3764 = vmatpush.msra.mxu1 %v1722_v41  ;;  %3746 = vmatmul.f32.vlgmr.msra.gmra.mxu0 %v6891_v23  ;;  %v731_v41 = vld [vmem:[%s5257_s29 + $0xd70] sm:$0xff] }
 0x4a3   : > { %v1978_v10 = vld [vmem:[%s5257_s29 + $0x3468] sm:$0xff]  ;;  %3785 = vmatpush.msra.mxu2 %v1842_v57  ;;  %3810 = vmatpush.msrb.mxu0 %v427_v58  ;;  %v467_v57 = vld [vmem:[%s5257_s29 + $0x530] sm:$0xff] }
 0x4a4   : > { %3804 = vmatpush.msra.mxu3 %v1978_v10  ;;  %v1714_v22 = vld [vmem:[%s5257_s29 + $0x2c28] sm:$0xff]  ;;  %3786 = vmatmul.f32.vlgmr.msra.gmra.mxu2 %v6672_v6  ;;  %v411_v6 = vld [vmem:[%s5257_s29 + $0x370] sm:$0xff]  ;;  %v3507_v10 = vpop.f32.mrf.mxu0 }
 0x4a5   : > { %v1970_v20 = vld [vmem:[%s5257_s29 + $0x3428] sm:$0xff]  ;;  %3850 = vmatpush.msrb.mxu2 %v683_v63  ;;  %3765 = vmatpush.msra.mxu1 %v1714_v22  ;;  %v723_v58 = vld [vmem:[%s5257_s29 + $0xd30] sm:$0xff]  ;;  %v3508_v63 = vadd.f32 %v3507_v10, %v6889_v13 }
 0x4a6   : > { %3805 = vmatpush.msra.mxu3 %v1970_v20  ;;  %3766 = vmatmul.f32.vlgmr.msra.gmra.mxu1 %v6899_v53  ;;  %v459_v22 = vld [vmem:[%s5257_s29 + $0x4f0] sm:$0xff]  ;;  %v3527_v20 = vpop.f32.mrf.mxu1 }
 0x4a7   : > { %3806 = vmatmul.f32.vlgmr.msra.gmra.mxu3 %v6680_v34  ;;  %3811 = vmatpush.msrb.mxu0 %v419_v39  ;;  %v795_v34 = vld [vmem:[%s5257_s29 + $0xf70] sm:$0xff] }
 0x4a8   : > { %3830 = vmatpush.msrb.mxu1 %v555_v19  ;;  %3851 = vmatpush.msrb.mxu2 %v675_v17  ;;  %v579_v39 = vld [vmem:[%s5257_s29 + $0x8b0] sm:$0xff]  ;;  %v6952_v17 = vadd.f32 %v3527_v20, %v3508_v63 }
 0x4a9   : > { %3870 = vmatpush.msrb.mxu3 %v811_v37  ;;  %3812 = vmatpush.msrb.mxu0 %v411_v6  ;;  %v715_v19 = vld [vmem:[%s5257_s29 + $0xcf0] sm:$0xff] }
 0x4aa   : > { %3831 = vmatpush.msrb.mxu1 %v547_v11  ;;  %3852 = vmatpush.msrb.mxu2 %v667_v18  ;;  %v315_v13 = vld [vmem:[%s5257_s29 + $0x70] sm:$0xff] }
 0x4ab   : > { %3871 = vmatpush.msrb.mxu3 %v803_v21  ;;  %3813 = vmatpush.msrb.mxu0 %v403_v12  ;;  %v451_v37 = vld [vmem:[%s5257_s29 + $0x4b0] sm:$0xff] }
 0x4ac   : > { %3832 = vmatpush.msrb.mxu1 %v539_v3  ;;  %3853 = vmatpush.msrb.mxu2 %v659_v47  ;;  %v571_v6 = vld [vmem:[%s5257_s29 + $0x870] sm:$0xff] }
 0x4ad   : > { %3872 = vmatpush.msrb.mxu3 %v795_v34  ;;  %3814 = vmatpush.msrb.mxu0 %v395_v35  ;;  %v707_v11 = vld [vmem:[%s5257_s29 + $0xcb0] sm:$0xff] }
 0x4ae   : > { %3833 = vmatpush.msrb.mxu1 %v531_v61  ;;  %3854 = vmatpush.msrb.mxu2 %v651_v42  ;;  %v307_v18 = vld [vmem:[%s5257_s29 + $0x30] sm:$0xff] }
 0x4af   : > { %3873 = vmatpush.msrb.mxu3 %v787_v28  ;;  %3815 = vmatpush.msrb.mxu0 %v387_v32  ;;  %v443_v21 = vld [vmem:[%s5257_s29 + $0x470] sm:$0xff] }
 0x4b0   : > { %3834 = vmatpush.msrb.mxu1 %v523_v29  ;;  %3855 = vmatpush.msrb.mxu2 %v643_v49  ;;  %v563_v12 = vld [vmem:[%s5257_s29 + $0x830] sm:$0xff] }
 0x4b1   : > { %3874 = vmatpush.msrb.mxu3 %v779_v54  ;;  %3816 = vmatpush.msrb.mxu0 %v379_v8  ;;  %v699_v3 = vld [vmem:[%s5257_s29 + $0xc70] sm:$0xff] }
 0x4b2   : > { %3835 = vmatpush.msrb.mxu1 %v515_v50  ;;  %3856 = vmatpush.msrb.mxu2 %v635_v59  ;;  %v939_v47 = vld [vmem:[%s5257_s29 + $0x13f0] sm:$0xff] }
 0x4b3   : > { %3875 = vmatpush.msrb.mxu3 %v771_v1  ;;  %3817 = vmatpush.msrb.mxu0 %v371_v15  ;;  %v1195_v34 = vld [vmem:[%s5257_s29 + $0x1bf0] sm:$0xff] }
 0x4b4   : > { %3836 = vmatpush.msrb.mxu1 %v507_v40  ;;  %3857 = vmatpush.msrb.mxu2 %v627_v55  ;;  %v435_v35 = vld [vmem:[%s5257_s29 + $0x430] sm:$0xff] }
 0x4b5   : > { %3876 = vmatpush.msrb.mxu3 %v763_v7  ;;  %3818 = vmatpush.msrb.mxu0 %v363_v33  ;;  %v691_v61 = vld [vmem:[%s5257_s29 + $0xc30] sm:$0xff] }
 0x4b6   : > { %3837 = vmatpush.msrb.mxu1 %v499_v56  ;;  %3858 = vmatpush.msrb.mxu2 %v619_v9  ;;  %v931_v42 = vld [vmem:[%s5257_s29 + $0x13b0] sm:$0xff] }
 0x4b7   : > { %3877 = vmatpush.msrb.mxu3 %v755_v38  ;;  %3819 = vmatpush.msrb.mxu0 %v355_v51  ;;  %v1067_v28 = vld [vmem:[%s5257_s29 + $0x17f0] sm:$0xff] }
 0x4b8   : > { %3838 = vmatpush.msrb.mxu1 %v491_v24  ;;  %3859 = vmatpush.msrb.mxu2 %v611_v27  ;;  %v1187_v32 = vld [vmem:[%s5257_s29 + $0x1bb0] sm:$0xff] }
 0x4b9   : > { %3878 = vmatpush.msrb.mxu3 %v747_v14  ;;  %3820 = vmatpush.msrb.mxu0 %v347_v30  ;;  %v1323_v29 = vld [vmem:[%s5257_s29 + $0x1ff0] sm:$0xff] }
 0x4ba   : > { %3839 = vmatpush.msrb.mxu1 %v483_v26  ;;  %3860 = vmatpush.msrb.mxu2 %v603_v44  ;;  %v923_v49 = vld [vmem:[%s5257_s29 + $0x1370] sm:$0xff] }
 0x4bb   : > { %3879 = vmatpush.msrb.mxu3 %v739_v43  ;;  %3821 = vmatpush.msrb.mxu0 %v339_v16  ;;  %v1059_v54 = vld [vmem:[%s5257_s29 + $0x17b0] sm:$0xff] }
 0x4bc   : > { %3840 = vmatpush.msrb.mxu1 %v475_v2  ;;  %3861 = vmatpush.msrb.mxu2 %v595_v31  ;;  %v1179_v8 = vld [vmem:[%s5257_s29 + $0x1b70] sm:$0xff] }
 0x4bd   : > { %3880 = vmatpush.msrb.mxu3 %v731_v41  ;;  %3822 = vmatpush.msrb.mxu0 %v331_v36  ;;  %v1315_v50 = vld [vmem:[%s5257_s29 + $0x1fb0] sm:$0xff] }
 0x4be   : > { %3841 = vmatpush.msrb.mxu1 %v467_v57  ;;  %3862 = vmatpush.msrb.mxu2 %v587_v25  ;;  %v915_v59 = vld [vmem:[%s5257_s29 + $0x1330] sm:$0xff] }
 0x4bf   : > { %3881 = vmatpush.msrb.mxu3 %v723_v58  ;;  %3823 = vmatpush.msrb.mxu0 %v323_v4  ;;  %v1051_v1 = vld [vmem:[%s5257_s29 + $0x1770] sm:$0xff] }
 0x4c0   : > { %3842 = vmatpush.msrb.mxu1 %v459_v22  ;;  %3863 = vmatpush.msrb.mxu2 %v579_v39  ;;  %v1171_v15 = vld [vmem:[%s5257_s29 + $0x1b30] sm:$0xff] }
 0x4c1   : > { %3882 = vmatpush.msrb.mxu3 %v715_v19  ;;  %3824 = vmatpush.msrb.mxu0 %v315_v13  ;;  %v1307_v40 = vld [vmem:[%s5257_s29 + $0x1f70] sm:$0xff] }
 0x4c2   : > { %3843 = vmatpush.msrb.mxu1 %v451_v37  ;;  %3864 = vmatpush.msrb.mxu2 %v571_v6  ;;  %v907_v55 = vld [vmem:[%s5257_s29 + $0x12f0] sm:$0xff] }
 0x4c3   : > { %3883 = vmatpush.msrb.mxu3 %v707_v11  ;;  %3825 = vmatpush.msrb.mxu0 %v307_v18  ;;  %v1043_v7 = vld [vmem:[%s5257_s29 + $0x1730] sm:$0xff] }
 0x4c4   : > { %3844 = vmatpush.msrb.mxu1 %v443_v21  ;;  %3865 = vmatpush.msrb.mxu2 %v563_v12  ;;  %v1163_v33 = vld [vmem:[%s5257_s29 + $0x1af0] sm:$0xff] }
 0x4c5   : > { %3884 = vmatpush.msrb.mxu3 %v699_v3  ;;  %3890 = vmatpush.msra.mxu0 %v939_v47  ;;  %v1299_v56 = vld [vmem:[%s5257_s29 + $0x1f30] sm:$0xff] }
 0x4c6   : > { %3930 = vmatpush.msra.mxu2 %v1195_v34  ;;  %3845 = vmatpush.msrb.mxu1 %v435_v35  ;;  %v899_v9 = vld [vmem:[%s5257_s29 + $0x12b0] sm:$0xff] }
 0x4c7   : > { %3885 = vmatpush.msrb.mxu3 %v691_v61  ;;  %3891 = vmatpush.msra.mxu0 %v931_v42  ;;  %v1035_v38 = vld [vmem:[%s5257_s29 + $0x16f0] sm:$0xff] }
 0x4c8   : > { %3910 = vmatpush.msra.mxu1 %v1067_v28  ;;  %3931 = vmatpush.msra.mxu2 %v1187_v32  ;;  %v1155_v51 = vld [vmem:[%s5257_s29 + $0x1ab0] sm:$0xff] }
 0x4c9   : > { %3950 = vmatpush.msra.mxu3 %v1323_v29  ;;  %3892 = vmatpush.msra.mxu0 %v923_v49  ;;  %v1291_v24 = vld [vmem:[%s5257_s29 + $0x1ef0] sm:$0xff] }
 0x4ca   : > { %3911 = vmatpush.msra.mxu1 %v1059_v54  ;;  %3932 = vmatpush.msra.mxu2 %v1179_v8  ;;  %v891_v27 = vld [vmem:[%s5257_s29 + $0x1270] sm:$0xff] }
 0x4cb   : > { %3951 = vmatpush.msra.mxu3 %v1315_v50  ;;  %3893 = vmatpush.msra.mxu0 %v915_v59  ;;  %v1027_v14 = vld [vmem:[%s5257_s29 + $0x16b0] sm:$0xff] }
 0x4cc   : > { %3912 = vmatpush.msra.mxu1 %v1051_v1  ;;  %3933 = vmatpush.msra.mxu2 %v1171_v15  ;;  %v1147_v30 = vld [vmem:[%s5257_s29 + $0x1a70] sm:$0xff] }
 0x4cd   : > { %3952 = vmatpush.msra.mxu3 %v1307_v40  ;;  %3894 = vmatpush.msra.mxu0 %v907_v55  ;;  %v1283_v26 = vld [vmem:[%s5257_s29 + $0x1eb0] sm:$0xff] }
 0x4ce   : > { %3913 = vmatpush.msra.mxu1 %v1043_v7  ;;  %3934 = vmatpush.msra.mxu2 %v1163_v33  ;;  %v883_v44 = vld [vmem:[%s5257_s29 + $0x1230] sm:$0xff] }
 0x4cf   : > { %3953 = vmatpush.msra.mxu3 %v1299_v56  ;;  %3895 = vmatpush.msra.mxu0 %v899_v9  ;;  %v1019_v43 = vld [vmem:[%s5257_s29 + $0x1670] sm:$0xff] }
 0x4d0   : > { %3914 = vmatpush.msra.mxu1 %v1035_v38  ;;  %3935 = vmatpush.msra.mxu2 %v1155_v51  ;;  %v1139_v16 = vld [vmem:[%s5257_s29 + $0x1a30] sm:$0xff] }
 0x4d1   : > { %3954 = vmatpush.msra.mxu3 %v1291_v24  ;;  %3896 = vmatpush.msra.mxu0 %v891_v27  ;;  %v1275_v2 = vld [vmem:[%s5257_s29 + $0x1e70] sm:$0xff] }
 0x4d2   : > { %3915 = vmatpush.msra.mxu1 %v1027_v14  ;;  %3936 = vmatpush.msra.mxu2 %v1147_v30  ;;  %v875_v31 = vld [vmem:[%s5257_s29 + $0x11f0] sm:$0xff] }
 0x4d3   : > { %3955 = vmatpush.msra.mxu3 %v1283_v26  ;;  %v1011_v41 = vld [vmem:[%s5257_s29 + $0x1630] sm:$0xff]  ;;  %3897 = vmatpush.msra.mxu0 %v883_v44 }
 0x4d4   : > { %3916 = vmatpush.msra.mxu1 %v1019_v43  ;;  %v1131_v36 = vld [vmem:[%s5257_s29 + $0x19f0] sm:$0xff]  ;;  %3937 = vmatpush.msra.mxu2 %v1139_v16 }
 0x4d5   : > { %v1267_v57 = vld [vmem:[%s5257_s29 + $0x1e30] sm:$0xff]  ;;  %3956 = vmatpush.msra.mxu3 %v1275_v2  ;;  %3898 = vmatpush.msra.mxu0 %v875_v31 }
 0x4d6   : > { %v867_v10 = vld [vmem:[%s5257_s29 + $0x11b0] sm:$0xff]  ;;  %3917 = vmatpush.msra.mxu1 %v1011_v41  ;;  %3938 = vmatpush.msra.mxu2 %v1131_v36 }
 0x4d7   : > { %v1003_v25 = vld [vmem:[%s5257_s29 + $0x15f0] sm:$0xff]  ;;  %3957 = vmatpush.msra.mxu3 %v1267_v57  ;;  %3899 = vmatpush.msra.mxu0 %v867_v10 }
 0x4d8   : > { %v1123_v58 = vld [vmem:[%s5257_s29 + $0x19b0] sm:$0xff]  ;;  %3918 = vmatpush.msra.mxu1 %v1003_v25  ;;  %3866 = vmatmul.f32.vlgmr.msrb.gmra.mxu2 %v5387_v45 }
 0x4d9   : > { %v1259_v63 = vld [vmem:[%s5257_s29 + $0x1df0] sm:$0xff]  ;;  %3939 = vmatpush.msra.mxu2 %v1123_v58  ;;  %3826 = vmatmul.f32.vlgmr.msrb.gmra.mxu0 %v5389_v46 }
 0x4da   : > { %v859_v4 = vld [vmem:[%s5257_s29 + $0x1170] sm:$0xff]  ;;  %3958 = vmatpush.msra.mxu3 %v1259_v63  ;;  %3846 = vmatmul.f32.vlgmr.msrb.gmra.mxu1 %v5393_v48 }
 0x4db   : > { %v995_v22 = vld [vmem:[%s5257_s29 + $0x15b0] sm:$0xff]  ;;  %3900 = vmatpush.msra.mxu0 %v859_v4  ;;  %3886 = vmatmul.f32.vlgmr.msrb.gmra.mxu3 %v7514_v5 }
 0x4dc   : > { %v1115_v20 = vld [vmem:[%s5257_s29 + $0x1970] sm:$0xff]  ;;  %3919 = vmatpush.msra.mxu1 %v995_v22 }
 0x4dd   : > { %v1251_v39 = vld [vmem:[%s5257_s29 + $0x1db0] sm:$0xff]  ;;  %3940 = vmatpush.msra.mxu2 %v1115_v20 }
 0x4de   : > { %v851_v19 = vld [vmem:[%s5257_s29 + $0x1130] sm:$0xff]  ;;  %3959 = vmatpush.msra.mxu3 %v1251_v39 }
 0x4df   : > { %v987_v13 = vld [vmem:[%s5257_s29 + $0x1570] sm:$0xff]  ;;  %3901 = vmatpush.msra.mxu0 %v851_v19 }
 0x4e0   : > { %v1107_v37 = vld [vmem:[%s5257_s29 + $0x1930] sm:$0xff]  ;;  %3920 = vmatpush.msra.mxu1 %v987_v13 }
 0x4e1   : > { %v1243_v6 = vld [vmem:[%s5257_s29 + $0x1d70] sm:$0xff]  ;;  %3941 = vmatpush.msra.mxu2 %v1107_v37 }
 0x4e2   : > { %v843_v11 = vld [vmem:[%s5257_s29 + $0x10f0] sm:$0xff]  ;;  %3960 = vmatpush.msra.mxu3 %v1243_v6 }
 0x4e3   : > { %v979_v18 = vld [vmem:[%s5257_s29 + $0x1530] sm:$0xff]  ;;  %3902 = vmatpush.msra.mxu0 %v843_v11 }
 0x4e4   : > { %v1099_v21 = vld [vmem:[%s5257_s29 + $0x18f0] sm:$0xff]  ;;  %3921 = vmatpush.msra.mxu1 %v979_v18 }
 0x4e5   : > { %v1235_v12 = vld [vmem:[%s5257_s29 + $0x1d30] sm:$0xff]  ;;  %3942 = vmatpush.msra.mxu2 %v1099_v21 }
 0x4e6   : > { %v835_v3 = vld [vmem:[%s5257_s29 + $0x10b0] sm:$0xff]  ;;  %3961 = vmatpush.msra.mxu3 %v1235_v12 }
 0x4e7   : > { %v971_v47 = vld [vmem:[%s5257_s29 + $0x14f0] sm:$0xff]  ;;  %3903 = vmatpush.msra.mxu0 %v835_v3 }
 0x4e8   : > { %v1091_v34 = vld [vmem:[%s5257_s29 + $0x18b0] sm:$0xff]  ;;  %3922 = vmatpush.msra.mxu1 %v971_v47 }
 0x4e9   : > { %v1227_v35 = vld [vmem:[%s5257_s29 + $0x1cf0] sm:$0xff]  ;;  %3943 = vmatpush.msra.mxu2 %v1091_v34 }
 0x4ea   : > { %v827_v61 = vld [vmem:[%s5257_s29 + $0x1070] sm:$0xff]  ;;  %3962 = vmatpush.msra.mxu3 %v1227_v35 }
 0x4eb   : > { %v963_v42 = vld [vmem:[%s5257_s29 + $0x14b0] sm:$0xff]  ;;  %3904 = vmatpush.msra.mxu0 %v827_v61 }
 0x4ec   : > { %v1083_v28 = vld [vmem:[%s5257_s29 + $0x1870] sm:$0xff]  ;;  %3923 = vmatpush.msra.mxu1 %v963_v42 }
 0x4ed   : > { %v1219_v32 = vld [vmem:[%s5257_s29 + $0x1cb0] sm:$0xff]  ;;  %3944 = vmatpush.msra.mxu2 %v1083_v28 }
 0x4ee   : > { %v819_v29 = vld [vmem:[%s5257_s29 + $0x1030] sm:$0xff]  ;;  %3963 = vmatpush.msra.mxu3 %v1219_v32 }
 0x4ef   : > { %v955_v49 = vld [vmem:[%s5257_s29 + $0x1470] sm:$0xff]  ;;  %3905 = vmatpush.msra.mxu0 %v819_v29 }
 0x4f0   : > { %v1075_v54 = vld [vmem:[%s5257_s29 + $0x1830] sm:$0xff]  ;;  %3924 = vmatpush.msra.mxu1 %v955_v49  ;;  %3906 = vmatmul.f32.vlgmr.msra.gmra.mxu0 %v5409_v62 }
 0x4f1   : > { %v1211_v8 = vld [vmem:[%s5257_s29 + $0x1c70] sm:$0xff]  ;;  %3945 = vmatpush.msra.mxu2 %v1075_v54 }
 0x4f2   : > { %v1451_v50 = vld [vmem:[%s5257_s29 + $0x23f0] sm:$0xff]  ;;  %3964 = vmatpush.msra.mxu3 %v1211_v8  ;;  %3946 = vmatmul.f32.vlgmr.msra.gmra.mxu2 %v7515_v60 }
 0x4f3   : > { %v1707_v59 = vld [vmem:[%s5257_s29 + $0x2bf0] sm:$0xff]  ;;  %3970 = vmatpush.msrb.mxu0 %v1451_v50 }
 0x4f4   : > { %v947_v1 = vld [vmem:[%s5257_s29 + $0x1430] sm:$0xff]  ;;  %4010 = vmatpush.msrb.mxu2 %v1707_v59 }
 0x4f5   : > { %v1203_v15 = vld [vmem:[%s5257_s29 + $0x1c30] sm:$0xff]  ;;  %3925 = vmatpush.msra.mxu1 %v947_v1 }
 0x4f6   : > { %v1443_v40 = vld [vmem:[%s5257_s29 + $0x23b0] sm:$0xff]  ;;  %3965 = vmatpush.msra.mxu3 %v1203_v15  ;;  %3926 = vmatmul.f32.vlgmr.msra.gmra.mxu1 %v5413_v0 }
 0x4f7   : > { %v1579_v55 = vld [vmem:[%s5257_s29 + $0x27f0] sm:$0xff]  ;;  %3971 = vmatpush.msrb.mxu0 %v1443_v40  ;;  %3966 = vmatmul.f32.vlgmr.msra.gmra.mxu3 %v7516_v52 }
 0x4f8   : > { %v1699_v7 = vld [vmem:[%s5257_s29 + $0x2bb0] sm:$0xff]  ;;  %3990 = vmatpush.msrb.mxu1 %v1579_v55 }
 0x4f9   : > { %v1835_v33 = vld [vmem:[%s5257_s29 + $0x2ff0] sm:$0xff]  ;;  %4011 = vmatpush.msrb.mxu2 %v1699_v7 }
 0x4fa   : > { %v1435_v56 = vld [vmem:[%s5257_s29 + $0x2370] sm:$0xff]  ;;  %4030 = vmatpush.msrb.mxu3 %v1835_v33 }
 0x4fb   : > { %v1571_v9 = vld [vmem:[%s5257_s29 + $0x27b0] sm:$0xff]  ;;  %3972 = vmatpush.msrb.mxu0 %v1435_v56 }
 0x4fc   : > { %v1691_v38 = vld [vmem:[%s5257_s29 + $0x2b70] sm:$0xff]  ;;  %3991 = vmatpush.msrb.mxu1 %v1571_v9 }
 0x4fd   : > { %v1827_v51 = vld [vmem:[%s5257_s29 + $0x2fb0] sm:$0xff]  ;;  %4012 = vmatpush.msrb.mxu2 %v1691_v38 }
 0x4fe   : > { %v1427_v24 = vld [vmem:[%s5257_s29 + $0x2330] sm:$0xff]  ;;  %4031 = vmatpush.msrb.mxu3 %v1827_v51 }
 0x4ff   : > { %v1563_v27 = vld [vmem:[%s5257_s29 + $0x2770] sm:$0xff]  ;;  %3973 = vmatpush.msrb.mxu0 %v1427_v24  ;;  %v428_v24 = vld [vmem:[%s5257_s29 + $0x3f8] sm:$0xff] }
 0x500   : > { %v1683_v14 = vld [vmem:[%s5257_s29 + $0x2b30] sm:$0xff]  ;;  %3992 = vmatpush.msrb.mxu1 %v1563_v27 }
 0x501   : > { %v1819_v30 = vld [vmem:[%s5257_s29 + $0x2f70] sm:$0xff]  ;;  %4013 = vmatpush.msrb.mxu2 %v1683_v14 }
 0x502   : > { %v1419_v26 = vld [vmem:[%s5257_s29 + $0x22f0] sm:$0xff]  ;;  %4032 = vmatpush.msrb.mxu3 %v1819_v30  ;;  %v7102_v30 = vld.sshfl [vmem:[#allocation1] sm:$0xff pattern:$0x73625140] }
 0x503   : > { %v1555_v44 = vld [vmem:[%s5257_s29 + $0x2730] sm:$0xff]  ;;  %3974 = vmatpush.msrb.mxu0 %v1419_v26 }
 0x504   : > { %v1675_v43 = vld [vmem:[%s5257_s29 + $0x2af0] sm:$0xff]  ;;  %3993 = vmatpush.msrb.mxu1 %v1555_v44 }
 0x505   : > { %v1811_v16 = vld [vmem:[%s5257_s29 + $0x2f30] sm:$0xff]  ;;  %4014 = vmatpush.msrb.mxu2 %v1675_v43  ;;  %v420_v43 = vld [vmem:[%s5257_s29 + $0x3b8] sm:$0xff] }
 0x506   : > { %v1411_v2 = vld [vmem:[%s5257_s29 + $0x22b0] sm:$0xff]  ;;  %4033 = vmatpush.msrb.mxu3 %v1811_v16  ;;  %v556_v16 = vld [vmem:[%s5257_s29 + $0x7f8] sm:$0xff] }
 0x507   : > { %v1547_v31 = vld [vmem:[%s5257_s29 + $0x26f0] sm:$0xff]  ;;  %3975 = vmatpush.msrb.mxu0 %v1411_v2  ;;  %v7110_v2 = vld.sshfl [vmem:[#allocation1 + $0x8] sm:$0xff pattern:$0x73625140] }
 0x508   : > { %v1667_v41 = vld [vmem:[%s5257_s29 + $0x2ab0] sm:$0xff]  ;;  %3994 = vmatpush.msrb.mxu1 %v1547_v31 }
 0x509   : > { %v1803_v36 = vld [vmem:[%s5257_s29 + $0x2ef0] sm:$0xff]  ;;  %4015 = vmatpush.msrb.mxu2 %v1667_v41  ;;  %v412_v41 = vld [vmem:[%s5257_s29 + $0x378] sm:$0xff] }
 0x50a   : > { %v1403_v57 = vld [vmem:[%s5257_s29 + $0x2270] sm:$0xff]  ;;  %4034 = vmatpush.msrb.mxu3 %v1803_v36  ;;  %v548_v36 = vld [vmem:[%s5257_s29 + $0x7b8] sm:$0xff] }
 0x50b   : > { %v1539_v10 = vld [vmem:[%s5257_s29 + $0x26b0] sm:$0xff]  ;;  %3976 = vmatpush.msrb.mxu0 %v1403_v57 }
 0x50c   : > { %v1659_v25 = vld [vmem:[%s5257_s29 + $0x2a70] sm:$0xff]  ;;  %3995 = vmatpush.msrb.mxu1 %v1539_v10 }
 0x50d   : > { %v1795_v58 = vld [vmem:[%s5257_s29 + $0x2eb0] sm:$0xff]  ;;  %4016 = vmatpush.msrb.mxu2 %v1659_v25  ;;  %v404_v25 = vld [vmem:[%s5257_s29 + $0x338] sm:$0xff] }
 0x50e   : > { %v1395_v63 = vld [vmem:[%s5257_s29 + $0x2230] sm:$0xff]  ;;  %4035 = vmatpush.msrb.mxu3 %v1795_v58 }
 0x50f   : > { %v1531_v4 = vld [vmem:[%s5257_s29 + $0x2670] sm:$0xff]  ;;  %3977 = vmatpush.msrb.mxu0 %v1395_v63 }
 0x510   : > { %v1651_v22 = vld [vmem:[%s5257_s29 + $0x2a30] sm:$0xff]  ;;  %3996 = vmatpush.msrb.mxu1 %v1531_v4  ;;  %v396_v4 = vld [vmem:[%s5257_s29 + $0x2f8] sm:$0xff] }
 0x511   : > { %v1787_v20 = vld [vmem:[%s5257_s29 + $0x2e70] sm:$0xff]  ;;  %4017 = vmatpush.msrb.mxu2 %v1651_v22  ;;  %v532_v22 = vld [vmem:[%s5257_s29 + $0x738] sm:$0xff] }
 0x512   : > { %v1387_v39 = vld [vmem:[%s5257_s29 + $0x21f0] sm:$0xff]  ;;  %4036 = vmatpush.msrb.mxu3 %v1787_v20 }
 0x513   : > { %v1523_v19 = vld [vmem:[%s5257_s29 + $0x2630] sm:$0xff]  ;;  %3978 = vmatpush.msrb.mxu0 %v1387_v39 }
 0x514   : > { %v1643_v13 = vld [vmem:[%s5257_s29 + $0x29f0] sm:$0xff]  ;;  %3997 = vmatpush.msrb.mxu1 %v1523_v19  ;;  %v388_v19 = vld [vmem:[%s5257_s29 + $0x2b8] sm:$0xff] }
 0x515   : > { %v1779_v37 = vld [vmem:[%s5257_s29 + $0x2e30] sm:$0xff]  ;;  %4018 = vmatpush.msrb.mxu2 %v1643_v13  ;;  %v524_v13 = vld [vmem:[%s5257_s29 + $0x6f8] sm:$0xff] }
 0x516   : > { %v1379_v6 = vld [vmem:[%s5257_s29 + $0x21b0] sm:$0xff]  ;;  %4037 = vmatpush.msrb.mxu3 %v1779_v37 }
 0x517   : > { %v1515_v11 = vld [vmem:[%s5257_s29 + $0x25f0] sm:$0xff]  ;;  %3979 = vmatpush.msrb.mxu0 %v1379_v6 }
 0x518   : > { %v1635_v18 = vld [vmem:[%s5257_s29 + $0x29b0] sm:$0xff]  ;;  %3998 = vmatpush.msrb.mxu1 %v1515_v11  ;;  %v380_v11 = vld [vmem:[%s5257_s29 + $0x278] sm:$0xff] }
 0x519   : > { %v1771_v21 = vld [vmem:[%s5257_s29 + $0x2df0] sm:$0xff]  ;;  %4019 = vmatpush.msrb.mxu2 %v1635_v18  ;;  %v516_v18 = vld [vmem:[%s5257_s29 + $0x6b8] sm:$0xff] }
 0x51a   : > { %v1371_v12 = vld [vmem:[%s5257_s29 + $0x2170] sm:$0xff]  ;;  %4038 = vmatpush.msrb.mxu3 %v1771_v21 }
 0x51b   : > { %v1507_v3 = vld [vmem:[%s5257_s29 + $0x25b0] sm:$0xff]  ;;  %3980 = vmatpush.msrb.mxu0 %v1371_v12 }
 0x51c   : > { %v1627_v47 = vld [vmem:[%s5257_s29 + $0x2970] sm:$0xff]  ;;  %3999 = vmatpush.msrb.mxu1 %v1507_v3  ;;  %v372_v3 = vld [vmem:[%s5257_s29 + $0x238] sm:$0xff] }
 0x51d   : > { %v1763_v34 = vld [vmem:[%s5257_s29 + $0x2db0] sm:$0xff]  ;;  %4020 = vmatpush.msrb.mxu2 %v1627_v47  ;;  %v508_v47 = vld [vmem:[%s5257_s29 + $0x678] sm:$0xff] }
 0x51e   : > { %v1363_v35 = vld [vmem:[%s5257_s29 + $0x2130] sm:$0xff]  ;;  %4039 = vmatpush.msrb.mxu3 %v1763_v34 }
 0x51f   : > { %v1499_v61 = vld [vmem:[%s5257_s29 + $0x2570] sm:$0xff]  ;;  %3981 = vmatpush.msrb.mxu0 %v1363_v35 }
 0x520   : > { %v1619_v42 = vld [vmem:[%s5257_s29 + $0x2930] sm:$0xff]  ;;  %4000 = vmatpush.msrb.mxu1 %v1499_v61  ;;  %v364_v61 = vld [vmem:[%s5257_s29 + $0x1f8] sm:$0xff] }
 0x521   : > { %v1755_v28 = vld [vmem:[%s5257_s29 + $0x2d70] sm:$0xff]  ;;  %4021 = vmatpush.msrb.mxu2 %v1619_v42  ;;  %v500_v42 = vld [vmem:[%s5257_s29 + $0x638] sm:$0xff] }
 0x522   : > { %v1355_v32 = vld [vmem:[%s5257_s29 + $0x20f0] sm:$0xff]  ;;  %4040 = vmatpush.msrb.mxu3 %v1755_v28 }
 0x523   : > { %v1491_v29 = vld [vmem:[%s5257_s29 + $0x2530] sm:$0xff]  ;;  %3982 = vmatpush.msrb.mxu0 %v1355_v32 }
 0x524   : > { %v1611_v49 = vld [vmem:[%s5257_s29 + $0x28f0] sm:$0xff]  ;;  %4001 = vmatpush.msrb.mxu1 %v1491_v29  ;;  %v356_v29 = vld [vmem:[%s5257_s29 + $0x1b8] sm:$0xff] }
 0x525   : > { %v1747_v54 = vld [vmem:[%s5257_s29 + $0x2d30] sm:$0xff]  ;;  %4022 = vmatpush.msrb.mxu2 %v1611_v49  ;;  %v492_v49 = vld [vmem:[%s5257_s29 + $0x5f8] sm:$0xff] }
 0x526   : > { %v1347_v8 = vld [vmem:[%s5257_s29 + $0x20b0] sm:$0xff]  ;;  %4041 = vmatpush.msrb.mxu3 %v1747_v54 }
 0x527   : > { %v1483_v50 = vld [vmem:[%s5257_s29 + $0x24f0] sm:$0xff]  ;;  %3983 = vmatpush.msrb.mxu0 %v1347_v8 }
 0x528   : > { %v1603_v59 = vld [vmem:[%s5257_s29 + $0x28b0] sm:$0xff]  ;;  %4002 = vmatpush.msrb.mxu1 %v1483_v50  ;;  %v348_v50 = vld [vmem:[%s5257_s29 + $0x178] sm:$0xff] }
 0x529   : > { %v1739_v1 = vld [vmem:[%s5257_s29 + $0x2cf0] sm:$0xff]  ;;  %4023 = vmatpush.msrb.mxu2 %v1603_v59  ;;  %v484_v59 = vld [vmem:[%s5257_s29 + $0x5b8] sm:$0xff] }
 0x52a   : > { %v1339_v15 = vld [vmem:[%s5257_s29 + $0x2070] sm:$0xff]  ;;  %4042 = vmatpush.msrb.mxu3 %v1739_v1 }
 0x52b   : > { %v1475_v40 = vld [vmem:[%s5257_s29 + $0x24b0] sm:$0xff]  ;;  %3984 = vmatpush.msrb.mxu0 %v1339_v15 }
 0x52c   : > { %v1595_v55 = vld [vmem:[%s5257_s29 + $0x2870] sm:$0xff]  ;;  %4003 = vmatpush.msrb.mxu1 %v1475_v40  ;;  %v340_v40 = vld [vmem:[%s5257_s29 + $0x138] sm:$0xff] }
 0x52d   : > { %v1731_v7 = vld [vmem:[%s5257_s29 + $0x2cb0] sm:$0xff]  ;;  %4024 = vmatpush.msrb.mxu2 %v1595_v55  ;;  %v476_v55 = vld [vmem:[%s5257_s29 + $0x578] sm:$0xff] }
 0x52e   : > { %v1331_v33 = vld [vmem:[%s5257_s29 + $0x2030] sm:$0xff]  ;;  %4043 = vmatpush.msrb.mxu3 %v1731_v7 }
 0x52f   : > { %v1467_v56 = vld [vmem:[%s5257_s29 + $0x2470] sm:$0xff]  ;;  %3985 = vmatpush.msrb.mxu0 %v1331_v33 }
 0x530   : > { %v1587_v9 = vld [vmem:[%s5257_s29 + $0x2830] sm:$0xff]  ;;  %4004 = vmatpush.msrb.mxu1 %v1467_v56  ;;  %3986 = vmatmul.f32.vlgmr.msrb.gmra.mxu0 %v7102_v30  ;;  %v332_v56 = vld [vmem:[%s5257_s29 + $0xf8] sm:$0xff] }
 0x531   : > { %v1723_v38 = vld [vmem:[%s5257_s29 + $0x2c70] sm:$0xff]  ;;  %4025 = vmatpush.msrb.mxu2 %v1587_v9  ;;  %v468_v9 = vld [vmem:[%s5257_s29 + $0x538] sm:$0xff] }
 0x532   : > { %v1963_v51 = vld [vmem:[%s5257_s29 + $0x33f0] sm:$0xff]  ;;  %4044 = vmatpush.msrb.mxu3 %v1723_v38  ;;  %4026 = vmatmul.f32.vlgmr.msrb.gmra.mxu2 %v6891_v23 }
 0x533   : > { %v1459_v27 = vld [vmem:[%s5257_s29 + $0x2430] sm:$0xff]  ;;  %4050 = vmatpush.msra.mxu0 %v1963_v51  ;;  %4090 = vmatpush.msra.mxu2 %v428_v24  ;;  %v324_v24 = vld [vmem:[%s5257_s29 + $0xb8] sm:$0xff] }
 0x534   : > { %v1715_v14 = vld [vmem:[%s5257_s29 + $0x2c30] sm:$0xff]  ;;  %4005 = vmatpush.msrb.mxu1 %v1459_v27  ;;  %v460_v27 = vld [vmem:[%s5257_s29 + $0x4f8] sm:$0xff] }
 0x535   : > { %v1955_v26 = vld [vmem:[%s5257_s29 + $0x33b0] sm:$0xff]  ;;  %4045 = vmatpush.msrb.mxu3 %v1715_v14  ;;  %4006 = vmatmul.f32.vlgmr.msrb.gmra.mxu1 %v7110_v2 }
 0x536   : > { %v2091_v44 = vld [vmem:[%s5257_s29 + $0x37f0] sm:$0xff]  ;;  %4046 = vmatmul.f32.vlgmr.msrb.gmra.mxu3 %v6899_v53  ;;  %4051 = vmatpush.msra.mxu0 %v1955_v26  ;;  %v540_v53 = vld [vmem:[%s5257_s29 + $0x778] sm:$0xff] }
 0x537   : > { %v1947_v23 = vld [vmem:[%s5257_s29 + $0x3370] sm:$0xff]  ;;  %4070 = vmatpush.msra.mxu1 %v2091_v44  ;;  %4091 = vmatpush.msra.mxu2 %v420_v43  ;;  %v316_v44 = vld [vmem:[%s5257_s29 + $0x78] sm:$0xff] }
 0x538   : > { %v2083_v31 = vld [vmem:[%s5257_s29 + $0x37b0] sm:$0xff]  ;;  %4110 = vmatpush.msra.mxu3 %v556_v16  ;;  %4052 = vmatpush.msra.mxu0 %v1947_v23  ;;  %v452_v43 = vld [vmem:[%s5257_s29 + $0x4b8] sm:$0xff] }
 0x539   : > { %v1939_v57 = vld [vmem:[%s5257_s29 + $0x3330] sm:$0xff]  ;;  %4071 = vmatpush.msra.mxu1 %v2083_v31  ;;  %4092 = vmatpush.msra.mxu2 %v412_v41  ;;  %v308_v31 = vld [vmem:[%s5257_s29 + $0x38] sm:$0xff] }
 0x53a   : > { %v2075_v10 = vld [vmem:[%s5257_s29 + $0x3770] sm:$0xff]  ;;  %4111 = vmatpush.msra.mxu3 %v548_v36  ;;  %4053 = vmatpush.msra.mxu0 %v1939_v57  ;;  %v444_v41 = vld [vmem:[%s5257_s29 + $0x478] sm:$0xff] }
 0x53b   : > { %v1931_v58 = vld [vmem:[%s5257_s29 + $0x32f0] sm:$0xff]  ;;  %4072 = vmatpush.msra.mxu1 %v2075_v10  ;;  %4093 = vmatpush.msra.mxu2 %v404_v25  ;;  %v940_v36 = vld [vmem:[%s5257_s29 + $0x13f8] sm:$0xff] }
 0x53c   : > { %v2067_v63 = vld [vmem:[%s5257_s29 + $0x3730] sm:$0xff]  ;;  %4112 = vmatpush.msra.mxu3 %v540_v53  ;;  %4054 = vmatpush.msra.mxu0 %v1931_v58  ;;  %v684_v57 = vld [vmem:[%s5257_s29 + $0xbf8] sm:$0xff]  ;;  %v7174_v53 = vld.sshfl [vmem:[#allocation1 + $0x20] sm:$0xff pattern:$0x73625140] }
 0x53d   : > { %v1923_v20 = vld [vmem:[%s5257_s29 + $0x32b0] sm:$0xff]  ;;  %4073 = vmatpush.msra.mxu1 %v2067_v63  ;;  %4094 = vmatpush.msra.mxu2 %v396_v4  ;;  %v436_v25 = vld [vmem:[%s5257_s29 + $0x438] sm:$0xff] }
 0x53e   : > { %v2059_v39 = vld [vmem:[%s5257_s29 + $0x36f0] sm:$0xff]  ;;  %4113 = vmatpush.msra.mxu3 %v532_v22  ;;  %4055 = vmatpush.msra.mxu0 %v1923_v20  ;;  %v676_v58 = vld [vmem:[%s5257_s29 + $0xbb8] sm:$0xff]  ;;  %v7181_v20 = vld.sshfl [vmem:[#allocation1 + $0x28] sm:$0xff pattern:$0x73625140] }
 0x53f   : > { %v1915_v37 = vld [vmem:[%s5257_s29 + $0x3270] sm:$0xff]  ;;  %4074 = vmatpush.msra.mxu1 %v2059_v39  ;;  %4095 = vmatpush.msra.mxu2 %v388_v19  ;;  %v812_v63 = vld [vmem:[%s5257_s29 + $0xff8] sm:$0xff] }
 0x540   : > { %v2051_v6 = vld [vmem:[%s5257_s29 + $0x36b0] sm:$0xff]  ;;  %4114 = vmatpush.msra.mxu3 %v524_v13  ;;  %4056 = vmatpush.msra.mxu0 %v1915_v37  ;;  %v932_v4 = vld [vmem:[%s5257_s29 + $0x13b8] sm:$0xff] }
 0x541   : > { %v1907_v21 = vld [vmem:[%s5257_s29 + $0x3230] sm:$0xff]  ;;  %4075 = vmatpush.msra.mxu1 %v2051_v6  ;;  %4096 = vmatpush.msra.mxu2 %v380_v11  ;;  %v1068_v22 = vld [vmem:[%s5257_s29 + $0x17f8] sm:$0xff] }
 0x542   : > { %v2043_v12 = vld [vmem:[%s5257_s29 + $0x3670] sm:$0xff]  ;;  %4115 = vmatpush.msra.mxu3 %v516_v18  ;;  %4057 = vmatpush.msra.mxu0 %v1907_v21  ;;  %v668_v39 = vld [vmem:[%s5257_s29 + $0xb78] sm:$0xff] }
 0x543   : > { %v1899_v34 = vld [vmem:[%s5257_s29 + $0x31f0] sm:$0xff]  ;;  %4076 = vmatpush.msra.mxu1 %v2043_v12  ;;  %4097 = vmatpush.msra.mxu2 %v372_v3  ;;  %v804_v19 = vld [vmem:[%s5257_s29 + $0xfb8] sm:$0xff] }
 0x544   : > { %v2035_v35 = vld [vmem:[%s5257_s29 + $0x3630] sm:$0xff]  ;;  %4116 = vmatpush.msra.mxu3 %v508_v47  ;;  %4058 = vmatpush.msra.mxu0 %v1899_v34  ;;  %v924_v13 = vld [vmem:[%s5257_s29 + $0x1378] sm:$0xff] }
 0x545   : > { %v1891_v28 = vld [vmem:[%s5257_s29 + $0x31b0] sm:$0xff]  ;;  %4077 = vmatpush.msra.mxu1 %v2035_v35  ;;  %4098 = vmatpush.msra.mxu2 %v364_v61  ;;  %v1060_v37 = vld [vmem:[%s5257_s29 + $0x17b8] sm:$0xff] }
 0x546   : > { %v2027_v32 = vld [vmem:[%s5257_s29 + $0x35f0] sm:$0xff]  ;;  %4117 = vmatpush.msra.mxu3 %v500_v42  ;;  %4059 = vmatpush.msra.mxu0 %v1891_v28  ;;  %v660_v6 = vld [vmem:[%s5257_s29 + $0xb38] sm:$0xff] }
 0x547   : > { %v1883_v54 = vld [vmem:[%s5257_s29 + $0x3170] sm:$0xff]  ;;  %4078 = vmatpush.msra.mxu1 %v2027_v32  ;;  %4099 = vmatpush.msra.mxu2 %v356_v29  ;;  %v796_v11 = vld [vmem:[%s5257_s29 + $0xf78] sm:$0xff] }
 0x548   : > { %v2019_v8 = vld [vmem:[%s5257_s29 + $0x35b0] sm:$0xff]  ;;  %4118 = vmatpush.msra.mxu3 %v492_v49  ;;  %4060 = vmatpush.msra.mxu0 %v1883_v54  ;;  %v916_v18 = vld [vmem:[%s5257_s29 + $0x1338] sm:$0xff] }
 0x549   : > { %v1875_v1 = vld [vmem:[%s5257_s29 + $0x3130] sm:$0xff]  ;;  %4079 = vmatpush.msra.mxu1 %v2019_v8  ;;  %4100 = vmatpush.msra.mxu2 %v348_v50  ;;  %v1052_v21 = vld [vmem:[%s5257_s29 + $0x1778] sm:$0xff] }
 0x54a   : > { %v2011_v15 = vld [vmem:[%s5257_s29 + $0x3570] sm:$0xff]  ;;  %4119 = vmatpush.msra.mxu3 %v484_v59  ;;  %4061 = vmatpush.msra.mxu0 %v1875_v1  ;;  %v652_v12 = vld [vmem:[%s5257_s29 + $0xaf8] sm:$0xff] }
 0x54b   : > { %v1867_v7 = vld [vmem:[%s5257_s29 + $0x30f0] sm:$0xff]  ;;  %4080 = vmatpush.msra.mxu1 %v2011_v15  ;;  %4101 = vmatpush.msra.mxu2 %v340_v40  ;;  %v788_v3 = vld [vmem:[%s5257_s29 + $0xf38] sm:$0xff] }
 0x54c   : > { %v2003_v33 = vld [vmem:[%s5257_s29 + $0x3530] sm:$0xff]  ;;  %4120 = vmatpush.msra.mxu3 %v476_v55  ;;  %4062 = vmatpush.msra.mxu0 %v1867_v7  ;;  %v908_v47 = vld [vmem:[%s5257_s29 + $0x12f8] sm:$0xff] }
 0x54d   : > { %v1859_v38 = vld [vmem:[%s5257_s29 + $0x30b0] sm:$0xff]  ;;  %4081 = vmatpush.msra.mxu1 %v2003_v33  ;;  %4102 = vmatpush.msra.mxu2 %v332_v56  ;;  %v1044_v34 = vld [vmem:[%s5257_s29 + $0x1738] sm:$0xff] }
 0x54e   : > { %v1995_v51 = vld [vmem:[%s5257_s29 + $0x34f0] sm:$0xff]  ;;  %4121 = vmatpush.msra.mxu3 %v468_v9  ;;  %4063 = vmatpush.msra.mxu0 %v1859_v38  ;;  %v644_v35 = vld [vmem:[%s5257_s29 + $0xab8] sm:$0xff] }
 0x54f   : > { %v1851_v14 = vld [vmem:[%s5257_s29 + $0x3070] sm:$0xff]  ;;  %4082 = vmatpush.msra.mxu1 %v1995_v51  ;;  %4103 = vmatpush.msra.mxu2 %v324_v24  ;;  %v780_v61 = vld [vmem:[%s5257_s29 + $0xef8] sm:$0xff] }
 0x550   : > { %v1987_v26 = vld [vmem:[%s5257_s29 + $0x34b0] sm:$0xff]  ;;  %4122 = vmatpush.msra.mxu3 %v460_v27  ;;  %4064 = vmatpush.msra.mxu0 %v1851_v14  ;;  %v900_v42 = vld [vmem:[%s5257_s29 + $0x12b8] sm:$0xff] }
 0x551   : > { %v1843_v16 = vld [vmem:[%s5257_s29 + $0x3030] sm:$0xff]  ;;  %4083 = vmatpush.msra.mxu1 %v1987_v26  ;;  %4104 = vmatpush.msra.mxu2 %v316_v44  ;;  %v1036_v28 = vld [vmem:[%s5257_s29 + $0x16f8] sm:$0xff] }
 0x552   : > { %v1979_v23 = vld [vmem:[%s5257_s29 + $0x3470] sm:$0xff]  ;;  %4123 = vmatpush.msra.mxu3 %v452_v43  ;;  %4065 = vmatpush.msra.mxu0 %v1843_v16  ;;  %v636_v32 = vld [vmem:[%s5257_s29 + $0xa78] sm:$0xff] }
 0x553   : > { %4084 = vmatpush.msra.mxu1 %v1979_v23  ;;  %v1971_v10 = vld [vmem:[%s5257_s29 + $0x3430] sm:$0xff]  ;;  %4105 = vmatpush.msra.mxu2 %v308_v31  ;;  %v772_v29 = vld [vmem:[%s5257_s29 + $0xeb8] sm:$0xff] }
 0x554   : > { %4124 = vmatpush.msra.mxu3 %v444_v41  ;;  %4066 = vmatmul.f32.vlgmr.msra.gmra.mxu0 %v7174_v53  ;;  %v892_v49 = vld [vmem:[%s5257_s29 + $0x1278] sm:$0xff] }
 0x555   : > { %4170 = vmatpush.msrb.mxu2 %v940_v36  ;;  %4130 = vmatpush.msrb.mxu0 %v684_v57  ;;  %v1028_v54 = vld [vmem:[%s5257_s29 + $0x16b8] sm:$0xff] }
 0x556   : > { %4085 = vmatpush.msra.mxu1 %v1971_v10  ;;  %4125 = vmatpush.msra.mxu3 %v436_v25  ;;  %v628_v8 = vld [vmem:[%s5257_s29 + $0xa38] sm:$0xff] }
 0x557   : > { %4086 = vmatmul.f32.vlgmr.msra.gmra.mxu1 %v7181_v20  ;;  %4131 = vmatpush.msrb.mxu0 %v676_v58  ;;  %v764_v50 = vld [vmem:[%s5257_s29 + $0xe78] sm:$0xff] }
 0x558   : > { %4150 = vmatpush.msrb.mxu1 %v812_v63  ;;  %4171 = vmatpush.msrb.mxu2 %v932_v4  ;;  %v884_v59 = vld [vmem:[%s5257_s29 + $0x1238] sm:$0xff] }
 0x559   : > { %4190 = vmatpush.msrb.mxu3 %v1068_v22  ;;  %4132 = vmatpush.msrb.mxu0 %v668_v39  ;;  %v1020_v1 = vld [vmem:[%s5257_s29 + $0x1678] sm:$0xff] }
 0x55a   : > { %4151 = vmatpush.msrb.mxu1 %v804_v19  ;;  %4172 = vmatpush.msrb.mxu2 %v924_v13  ;;  %v620_v15 = vld [vmem:[%s5257_s29 + $0x9f8] sm:$0xff] }
 0x55b   : > { %4191 = vmatpush.msrb.mxu3 %v1060_v37  ;;  %4133 = vmatpush.msrb.mxu0 %v660_v6  ;;  %v756_v40 = vld [vmem:[%s5257_s29 + $0xe38] sm:$0xff] }
 0x55c   : > { %4152 = vmatpush.msrb.mxu1 %v796_v11  ;;  %4173 = vmatpush.msrb.mxu2 %v916_v18  ;;  %v876_v55 = vld [vmem:[%s5257_s29 + $0x11f8] sm:$0xff] }
 0x55d   : > { %4192 = vmatpush.msrb.mxu3 %v1052_v21  ;;  %4134 = vmatpush.msrb.mxu0 %v652_v12  ;;  %v1012_v7 = vld [vmem:[%s5257_s29 + $0x1638] sm:$0xff] }
 0x55e   : > { %4153 = vmatpush.msrb.mxu1 %v788_v3  ;;  %4174 = vmatpush.msrb.mxu2 %v908_v47  ;;  %v612_v33 = vld [vmem:[%s5257_s29 + $0x9b8] sm:$0xff] }
 0x55f   : > { %4193 = vmatpush.msrb.mxu3 %v1044_v34  ;;  %4135 = vmatpush.msrb.mxu0 %v644_v35  ;;  %v748_v56 = vld [vmem:[%s5257_s29 + $0xdf8] sm:$0xff] }
 0x560   : > { %4154 = vmatpush.msrb.mxu1 %v780_v61  ;;  %4175 = vmatpush.msrb.mxu2 %v900_v42  ;;  %v868_v9 = vld [vmem:[%s5257_s29 + $0x11b8] sm:$0xff] }
 0x561   : > { %4194 = vmatpush.msrb.mxu3 %v1036_v28  ;;  %4136 = vmatpush.msrb.mxu0 %v636_v32  ;;  %v1004_v38 = vld [vmem:[%s5257_s29 + $0x15f8] sm:$0xff] }
 0x562   : > { %4155 = vmatpush.msrb.mxu1 %v772_v29  ;;  %4176 = vmatpush.msrb.mxu2 %v892_v49  ;;  %v604_v51 = vld [vmem:[%s5257_s29 + $0x978] sm:$0xff] }
 0x563   : > { %4195 = vmatpush.msrb.mxu3 %v1028_v54  ;;  %4137 = vmatpush.msrb.mxu0 %v628_v8  ;;  %v740_v24 = vld [vmem:[%s5257_s29 + $0xdb8] sm:$0xff] }
 0x564   : > { %4156 = vmatpush.msrb.mxu1 %v764_v50  ;;  %4177 = vmatpush.msrb.mxu2 %v884_v59  ;;  %v860_v27 = vld [vmem:[%s5257_s29 + $0x1178] sm:$0xff] }
 0x565   : > { %4196 = vmatpush.msrb.mxu3 %v1020_v1  ;;  %4138 = vmatpush.msrb.mxu0 %v620_v15  ;;  %v996_v14 = vld [vmem:[%s5257_s29 + $0x15b8] sm:$0xff] }
 0x566   : > { %4157 = vmatpush.msrb.mxu1 %v756_v40  ;;  %4178 = vmatpush.msrb.mxu2 %v876_v55  ;;  %v596_v26 = vld [vmem:[%s5257_s29 + $0x938] sm:$0xff] }
 0x567   : > { %4197 = vmatpush.msrb.mxu3 %v1012_v7  ;;  %4139 = vmatpush.msrb.mxu0 %v612_v33  ;;  %v732_v44 = vld [vmem:[%s5257_s29 + $0xd78] sm:$0xff] }
 0x568   : > { %4158 = vmatpush.msrb.mxu1 %v748_v56  ;;  %4179 = vmatpush.msrb.mxu2 %v868_v9  ;;  %v852_v43 = vld [vmem:[%s5257_s29 + $0x1138] sm:$0xff] }
 0x569   : > { %4198 = vmatpush.msrb.mxu3 %v1004_v38  ;;  %4140 = vmatpush.msrb.mxu0 %v604_v51  ;;  %v988_v16 = vld [vmem:[%s5257_s29 + $0x1578] sm:$0xff] }
 0x56a   : > { %4159 = vmatpush.msrb.mxu1 %v740_v24  ;;  %4180 = vmatpush.msrb.mxu2 %v860_v27  ;;  %v588_v23 = vld [vmem:[%s5257_s29 + $0x8f8] sm:$0xff] }
 0x56b   : > { %4199 = vmatpush.msrb.mxu3 %v996_v14  ;;  %v724_v31 = vld [vmem:[%s5257_s29 + $0xd38] sm:$0xff]  ;;  %4141 = vmatpush.msrb.mxu0 %v596_v26 }
 0x56c   : > { %4160 = vmatpush.msrb.mxu1 %v732_v44  ;;  %v844_v41 = vld [vmem:[%s5257_s29 + $0x10f8] sm:$0xff]  ;;  %4181 = vmatpush.msrb.mxu2 %v852_v43 }
 0x56d   : > { %v980_v36 = vld [vmem:[%s5257_s29 + $0x1538] sm:$0xff]  ;;  %4200 = vmatpush.msrb.mxu3 %v988_v16  ;;  %4142 = vmatpush.msrb.mxu0 %v588_v23 }
 0x56e   : > { %v580_v57 = vld [vmem:[%s5257_s29 + $0x8b8] sm:$0xff]  ;;  %4161 = vmatpush.msrb.mxu1 %v724_v31  ;;  %4182 = vmatpush.msrb.mxu2 %v844_v41 }
 0x56f   : > { %v716_v10 = vld [vmem:[%s5257_s29 + $0xcf8] sm:$0xff]  ;;  %4201 = vmatpush.msrb.mxu3 %v980_v36  ;;  %4143 = vmatpush.msrb.mxu0 %v580_v57 }
 0x570   : > { %v836_v25 = vld [vmem:[%s5257_s29 + $0x10b8] sm:$0xff]  ;;  %4162 = vmatpush.msrb.mxu1 %v716_v10  ;;  %4106 = vmatmul.f32.vlgmr.msra.gmra.mxu2 %v5389_v46 }
 0x571   : > { %v972_v58 = vld [vmem:[%s5257_s29 + $0x14f8] sm:$0xff]  ;;  %4183 = vmatpush.msrb.mxu2 %v836_v25  ;;  %4126 = vmatmul.f32.vlgmr.msra.gmra.mxu3 %v5393_v48 }
 0x572   : > { %v572_v63 = vld [vmem:[%s5257_s29 + $0x878] sm:$0xff]  ;;  %4202 = vmatpush.msrb.mxu3 %v972_v58 }
 0x573   : > { %v708_v4 = vld [vmem:[%s5257_s29 + $0xcb8] sm:$0xff]  ;;  %4144 = vmatpush.msrb.mxu0 %v572_v63 }
 0x574   : > { %v828_v22 = vld [vmem:[%s5257_s29 + $0x1078] sm:$0xff]  ;;  %4163 = vmatpush.msrb.mxu1 %v708_v4 }
 0x575   : > { %v964_v39 = vld [vmem:[%s5257_s29 + $0x14b8] sm:$0xff]  ;;  %4184 = vmatpush.msrb.mxu2 %v828_v22 }
 0x576   : > { %v564_v19 = vld [vmem:[%s5257_s29 + $0x838] sm:$0xff]  ;;  %4203 = vmatpush.msrb.mxu3 %v964_v39 }
 0x577   : > { %v700_v13 = vld [vmem:[%s5257_s29 + $0xc78] sm:$0xff]  ;;  %4145 = vmatpush.msrb.mxu0 %v564_v19 }
 0x578   : > { %v820_v37 = vld [vmem:[%s5257_s29 + $0x1038] sm:$0xff]  ;;  %4164 = vmatpush.msrb.mxu1 %v700_v13  ;;  %4146 = vmatmul.f32.vlgmr.msrb.gmra.mxu0 %v5387_v45 }
 0x579   : > { %v956_v6 = vld [vmem:[%s5257_s29 + $0x1478] sm:$0xff]  ;;  %4185 = vmatpush.msrb.mxu2 %v820_v37 }
 0x57a   : > { %v1196_v11 = vld [vmem:[%s5257_s29 + $0x1bf8] sm:$0xff]  ;;  %4204 = vmatpush.msrb.mxu3 %v956_v6  ;;  %4186 = vmatmul.f32.vlgmr.msrb.gmra.mxu2 %v5409_v62 }
 0x57b   : > { %v1452_v18 = vld [vmem:[%s5257_s29 + $0x23f8] sm:$0xff]  ;;  %4210 = vmatpush.msra.mxu0 %v1196_v11 }
 0x57c   : > { %v692_v21 = vld [vmem:[%s5257_s29 + $0xc38] sm:$0xff]  ;;  %4250 = vmatpush.msra.mxu2 %v1452_v18 }
 0x57d   : > { %v948_v12 = vld [vmem:[%s5257_s29 + $0x1438] sm:$0xff]  ;;  %4165 = vmatpush.msrb.mxu1 %v692_v21 }
 0x57e   : > { %v1188_v3 = vld [vmem:[%s5257_s29 + $0x1bb8] sm:$0xff]  ;;  %4205 = vmatpush.msrb.mxu3 %v948_v12  ;;  %4166 = vmatmul.f32.vlgmr.msrb.gmra.mxu1 %v7514_v5 }
 0x57f   : > { %v1324_v47 = vld [vmem:[%s5257_s29 + $0x1ff8] sm:$0xff]  ;;  %4211 = vmatpush.msra.mxu0 %v1188_v3  ;;  %4206 = vmatmul.f32.vlgmr.msrb.gmra.mxu3 %v5413_v0 }
 0x580   : > { %v1444_v46 = vld [vmem:[%s5257_s29 + $0x23b8] sm:$0xff]  ;;  %4230 = vmatpush.msra.mxu1 %v1324_v47 }
 0x581   : > { %v1580_v34 = vld [vmem:[%s5257_s29 + $0x27f8] sm:$0xff]  ;;  %4251 = vmatpush.msra.mxu2 %v1444_v46 }
 0x582   : > { %v1180_v35 = vld [vmem:[%s5257_s29 + $0x1b78] sm:$0xff]  ;;  %4270 = vmatpush.msra.mxu3 %v1580_v34 }
 0x583   : > { %v1316_v61 = vld [vmem:[%s5257_s29 + $0x1fb8] sm:$0xff]  ;;  %4212 = vmatpush.msra.mxu0 %v1180_v35 }
 0x584   : > { %v1436_v42 = vld [vmem:[%s5257_s29 + $0x2378] sm:$0xff]  ;;  %4231 = vmatpush.msra.mxu1 %v1316_v61 }
 0x585   : > { %v1572_v28 = vld [vmem:[%s5257_s29 + $0x27b8] sm:$0xff]  ;;  %4252 = vmatpush.msra.mxu2 %v1436_v42 }
 0x586   : > { %v1172_v48 = vld [vmem:[%s5257_s29 + $0x1b38] sm:$0xff]  ;;  %4271 = vmatpush.msra.mxu3 %v1572_v28 }
 0x587   : > { %v1308_v32 = vld [vmem:[%s5257_s29 + $0x1f78] sm:$0xff]  ;;  %4213 = vmatpush.msra.mxu0 %v1172_v48 }
 0x588   : > { %v1428_v29 = vld [vmem:[%s5257_s29 + $0x2338] sm:$0xff]  ;;  %4232 = vmatpush.msra.mxu1 %v1308_v32 }
 0x589   : > { %v1564_v49 = vld [vmem:[%s5257_s29 + $0x2778] sm:$0xff]  ;;  %4253 = vmatpush.msra.mxu2 %v1428_v29 }
 0x58a   : > { %v1164_v54 = vld [vmem:[%s5257_s29 + $0x1af8] sm:$0xff]  ;;  %4272 = vmatpush.msra.mxu3 %v1564_v49 }
 0x58b   : > { %v1300_v8 = vld [vmem:[%s5257_s29 + $0x1f38] sm:$0xff]  ;;  %4214 = vmatpush.msra.mxu0 %v1164_v54 }
 0x58c   : > { %v1420_v50 = vld [vmem:[%s5257_s29 + $0x22f8] sm:$0xff]  ;;  %4233 = vmatpush.msra.mxu1 %v1300_v8 }
 0x58d   : > { %v1556_v59 = vld [vmem:[%s5257_s29 + $0x2738] sm:$0xff]  ;;  %4254 = vmatpush.msra.mxu2 %v1420_v50 }
 0x58e   : > { %v1156_v62 = vld [vmem:[%s5257_s29 + $0x1ab8] sm:$0xff]  ;;  %4273 = vmatpush.msra.mxu3 %v1556_v59 }
 0x58f   : > { %v1292_v1 = vld [vmem:[%s5257_s29 + $0x1ef8] sm:$0xff]  ;;  %4215 = vmatpush.msra.mxu0 %v1156_v62 }
 0x590   : > { %v1412_v15 = vld [vmem:[%s5257_s29 + $0x22b8] sm:$0xff]  ;;  %4234 = vmatpush.msra.mxu1 %v1292_v1 }
 0x591   : > { %v1548_v40 = vld [vmem:[%s5257_s29 + $0x26f8] sm:$0xff]  ;;  %4255 = vmatpush.msra.mxu2 %v1412_v15 }
 0x592   : > { %v1148_v45 = vld [vmem:[%s5257_s29 + $0x1a78] sm:$0xff]  ;;  %4274 = vmatpush.msra.mxu3 %v1548_v40 }
 0x593   : > { %v1284_v55 = vld [vmem:[%s5257_s29 + $0x1eb8] sm:$0xff]  ;;  %4216 = vmatpush.msra.mxu0 %v1148_v45 }
 0x594   : > { %v1404_v0 = vld [vmem:[%s5257_s29 + $0x2278] sm:$0xff]  ;;  %4235 = vmatpush.msra.mxu1 %v1284_v55 }
 0x595   : > { %v1540_v7 = vld [vmem:[%s5257_s29 + $0x26b8] sm:$0xff]  ;;  %4256 = vmatpush.msra.mxu2 %v1404_v0 }
 0x596   : > { %v1140_v33 = vld [vmem:[%s5257_s29 + $0x1a38] sm:$0xff]  ;;  %4275 = vmatpush.msra.mxu3 %v1540_v7 }
 0x597   : > { %v1276_v56 = vld [vmem:[%s5257_s29 + $0x1e78] sm:$0xff]  ;;  %4217 = vmatpush.msra.mxu0 %v1140_v33 }
 0x598   : > { %v1396_v9 = vld [vmem:[%s5257_s29 + $0x2238] sm:$0xff]  ;;  %4236 = vmatpush.msra.mxu1 %v1276_v56 }
 0x599   : > { %v1532_v5 = vld [vmem:[%s5257_s29 + $0x2678] sm:$0xff]  ;;  %4257 = vmatpush.msra.mxu2 %v1396_v9 }
 0x59a   : > { %v1132_v38 = vld [vmem:[%s5257_s29 + $0x19f8] sm:$0xff]  ;;  %4276 = vmatpush.msra.mxu3 %v1532_v5 }
 0x59b   : > { %v1268_v51 = vld [vmem:[%s5257_s29 + $0x1e38] sm:$0xff]  ;;  %4218 = vmatpush.msra.mxu0 %v1132_v38 }
 0x59c   : > { %v1388_v24 = vld [vmem:[%s5257_s29 + $0x21f8] sm:$0xff]  ;;  %4237 = vmatpush.msra.mxu1 %v1268_v51 }
 0x59d   : > { %v1524_v27 = vld [vmem:[%s5257_s29 + $0x2638] sm:$0xff]  ;;  %4258 = vmatpush.msra.mxu2 %v1388_v24 }
 0x59e   : > { %v1124_v14 = vld [vmem:[%s5257_s29 + $0x19b8] sm:$0xff]  ;;  %4277 = vmatpush.msra.mxu3 %v1524_v27 }
 0x59f   : > { %v1260_v26 = vld [vmem:[%s5257_s29 + $0x1df8] sm:$0xff]  ;;  %4219 = vmatpush.msra.mxu0 %v1124_v14 }
 0x5a0   : > { %v1380_v44 = vld [vmem:[%s5257_s29 + $0x21b8] sm:$0xff]  ;;  %4238 = vmatpush.msra.mxu1 %v1260_v26 }
 0x5a1   : > { %v1516_v43 = vld [vmem:[%s5257_s29 + $0x25f8] sm:$0xff]  ;;  %4259 = vmatpush.msra.mxu2 %v1380_v44 }
 0x5a2   : > { %v1116_v16 = vld [vmem:[%s5257_s29 + $0x1978] sm:$0xff]  ;;  %4278 = vmatpush.msra.mxu3 %v1516_v43 }
 0x5a3   : > { %v1252_v23 = vld [vmem:[%s5257_s29 + $0x1db8] sm:$0xff]  ;;  %4220 = vmatpush.msra.mxu0 %v1116_v16 }
 0x5a4   : > { %v1372_v31 = vld [vmem:[%s5257_s29 + $0x2178] sm:$0xff]  ;;  %4239 = vmatpush.msra.mxu1 %v1252_v23 }
 0x5a5   : > { %v1508_v41 = vld [vmem:[%s5257_s29 + $0x25b8] sm:$0xff]  ;;  %4260 = vmatpush.msra.mxu2 %v1372_v31 }
 0x5a6   : > { %v1108_v36 = vld [vmem:[%s5257_s29 + $0x1938] sm:$0xff]  ;;  %4279 = vmatpush.msra.mxu3 %v1508_v41 }
 0x5a7   : > { %v1244_v57 = vld [vmem:[%s5257_s29 + $0x1d78] sm:$0xff]  ;;  %4221 = vmatpush.msra.mxu0 %v1108_v36 }
 0x5a8   : > { %v1364_v10 = vld [vmem:[%s5257_s29 + $0x2138] sm:$0xff]  ;;  %4240 = vmatpush.msra.mxu1 %v1244_v57 }
 0x5a9   : > { %v1500_v25 = vld [vmem:[%s5257_s29 + $0x2578] sm:$0xff]  ;;  %4261 = vmatpush.msra.mxu2 %v1364_v10 }
 0x5aa   : > { %v1100_v58 = vld [vmem:[%s5257_s29 + $0x18f8] sm:$0xff]  ;;  %4280 = vmatpush.msra.mxu3 %v1500_v25 }
 0x5ab   : > { %v1236_v63 = vld [vmem:[%s5257_s29 + $0x1d38] sm:$0xff]  ;;  %4222 = vmatpush.msra.mxu0 %v1100_v58 }
 0x5ac   : > { %v1356_v4 = vld [vmem:[%s5257_s29 + $0x20f8] sm:$0xff]  ;;  %4241 = vmatpush.msra.mxu1 %v1236_v63 }
 0x5ad   : > { %v1492_v22 = vld [vmem:[%s5257_s29 + $0x2538] sm:$0xff]  ;;  %4262 = vmatpush.msra.mxu2 %v1356_v4 }
 0x5ae   : > { %v1092_v39 = vld [vmem:[%s5257_s29 + $0x18b8] sm:$0xff]  ;;  %4281 = vmatpush.msra.mxu3 %v1492_v22 }
 0x5af   : > { %v1228_v19 = vld [vmem:[%s5257_s29 + $0x1cf8] sm:$0xff]  ;;  %4223 = vmatpush.msra.mxu0 %v1092_v39 }
 0x5b0   : > { %v1348_v13 = vld [vmem:[%s5257_s29 + $0x20b8] sm:$0xff]  ;;  %4242 = vmatpush.msra.mxu1 %v1228_v19 }
 0x5b1   : > { %v1484_v37 = vld [vmem:[%s5257_s29 + $0x24f8] sm:$0xff]  ;;  %4263 = vmatpush.msra.mxu2 %v1348_v13 }
 0x5b2   : > { %v1084_v6 = vld [vmem:[%s5257_s29 + $0x1878] sm:$0xff]  ;;  %4282 = vmatpush.msra.mxu3 %v1484_v37 }
 0x5b3   : > { %v1220_v11 = vld [vmem:[%s5257_s29 + $0x1cb8] sm:$0xff]  ;;  %4224 = vmatpush.msra.mxu0 %v1084_v6 }
 0x5b4   : > { %v1340_v18 = vld [vmem:[%s5257_s29 + $0x2078] sm:$0xff]  ;;  %4243 = vmatpush.msra.mxu1 %v1220_v11 }
 0x5b5   : > { %v1476_v21 = vld [vmem:[%s5257_s29 + $0x24b8] sm:$0xff]  ;;  %4264 = vmatpush.msra.mxu2 %v1340_v18 }
 0x5b6   : > { %v1076_v12 = vld [vmem:[%s5257_s29 + $0x1838] sm:$0xff]  ;;  %4283 = vmatpush.msra.mxu3 %v1476_v21 }
 0x5b7   : > { %v1212_v3 = vld [vmem:[%s5257_s29 + $0x1c78] sm:$0xff]  ;;  %4225 = vmatpush.msra.mxu0 %v1076_v12 }
 0x5b8   : > { %v1332_v47 = vld [vmem:[%s5257_s29 + $0x2038] sm:$0xff]  ;;  %4244 = vmatpush.msra.mxu1 %v1212_v3  ;;  %4226 = vmatmul.f32.vlgmr.msra.gmra.mxu0 %v7515_v60 }
 0x5b9   : > { %v1468_v46 = vld [vmem:[%s5257_s29 + $0x2478] sm:$0xff]  ;;  %4265 = vmatpush.msra.mxu2 %v1332_v47 }
 0x5ba   : > { %v1708_v34 = vld [vmem:[%s5257_s29 + $0x2bf8] sm:$0xff]  ;;  %4284 = vmatpush.msra.mxu3 %v1468_v46  ;;  %4266 = vmatmul.f32.vlgmr.msra.gmra.mxu2 %v7102_v30 }
 0x5bb   : > { %v1964_v35 = vld [vmem:[%s5257_s29 + $0x33f8] sm:$0xff]  ;;  %4290 = vmatpush.msrb.mxu0 %v1708_v34 }
 0x5bc   : > { %v1204_v61 = vld [vmem:[%s5257_s29 + $0x1c38] sm:$0xff]  ;;  %4330 = vmatpush.msrb.mxu2 %v1964_v35 }
 0x5bd   : > { %v1460_v42 = vld [vmem:[%s5257_s29 + $0x2438] sm:$0xff]  ;;  %4245 = vmatpush.msra.mxu1 %v1204_v61 }
 0x5be   : > { %v1700_v28 = vld [vmem:[%s5257_s29 + $0x2bb8] sm:$0xff]  ;;  %4285 = vmatpush.msra.mxu3 %v1460_v42  ;;  %4246 = vmatmul.f32.vlgmr.msra.gmra.mxu1 %v7516_v52 }
 0x5bf   : > { %v1836_v48 = vld [vmem:[%s5257_s29 + $0x2ff8] sm:$0xff]  ;;  %4286 = vmatmul.f32.vlgmr.msra.gmra.mxu3 %v7110_v2  ;;  %4291 = vmatpush.msrb.mxu0 %v1700_v28 }
 0x5c0   : > { %v1956_v32 = vld [vmem:[%s5257_s29 + $0x33b8] sm:$0xff]  ;;  %4310 = vmatpush.msrb.mxu1 %v1836_v48  ;;  %v4768_v48 = vld.sshfl [vmem:[#allocation1 + $0x10] sm:$0xff pattern:$0x73625140] }
 0x5c1   : > { %v2092_v29 = vld [vmem:[%s5257_s29 + $0x37f8] sm:$0xff]  ;;  %4331 = vmatpush.msrb.mxu2 %v1956_v32 }
 0x5c2   : > { %v1692_v60 = vld [vmem:[%s5257_s29 + $0x2b78] sm:$0xff]  ;;  %4350 = vmatpush.msrb.mxu3 %v2092_v29  ;;  %v3567_v29 = vpop.f32.mrf.mxu3 }
 0x5c3   : > { %v1828_v30 = vld [vmem:[%s5257_s29 + $0x2fb8] sm:$0xff]  ;;  %4292 = vmatpush.msrb.mxu0 %v1692_v60  ;;  %v3547_v60 = vpop.f32.mrf.mxu2 }
 0x5c4   : > { %v1948_v49 = vld [vmem:[%s5257_s29 + $0x3378] sm:$0xff]  ;;  %4311 = vmatpush.msrb.mxu1 %v1828_v30  ;;  %v3587_v30 = vpop.f32.mrf.mxu0 }
 0x5c5   : > { %v2084_v54 = vld [vmem:[%s5257_s29 + $0x37b8] sm:$0xff]  ;;  %4332 = vmatpush.msrb.mxu2 %v1948_v49  ;;  %v3607_v49 = vpop.f32.mrf.mxu1 }
 0x5c6   : > { %v1684_v8 = vld [vmem:[%s5257_s29 + $0x2b38] sm:$0xff]  ;;  %4351 = vmatpush.msrb.mxu3 %v2084_v54 }
 0x5c7   : > { %v1820_v50 = vld [vmem:[%s5257_s29 + $0x2f78] sm:$0xff]  ;;  %4293 = vmatpush.msrb.mxu0 %v1684_v8 }
 0x5c8   : > { %v1940_v52 = vld [vmem:[%s5257_s29 + $0x3338] sm:$0xff]  ;;  %4312 = vmatpush.msrb.mxu1 %v1820_v50 }
 0x5c9   : > { %v2076_v2 = vld [vmem:[%s5257_s29 + $0x3778] sm:$0xff]  ;;  %4333 = vmatpush.msrb.mxu2 %v1940_v52 }
 0x5ca   : > { %v1676_v59 = vld [vmem:[%s5257_s29 + $0x2af8] sm:$0xff]  ;;  %4352 = vmatpush.msrb.mxu3 %v2076_v2  ;;  %v3647_v54 = vpop.f32.mrf.mxu3 }
 0x5cb   : > { %v1812_v62 = vld [vmem:[%s5257_s29 + $0x2f38] sm:$0xff]  ;;  %4294 = vmatpush.msrb.mxu0 %v1676_v59  ;;  %v3627_v8 = vpop.f32.mrf.mxu2 }
 0x5cc   : > { %v1932_v1 = vld [vmem:[%s5257_s29 + $0x32f8] sm:$0xff]  ;;  %4313 = vmatpush.msrb.mxu1 %v1812_v62  ;;  %v3667_v50 = vpop.f32.mrf.mxu0 }
 0x5cd   : > { %v2068_v15 = vld [vmem:[%s5257_s29 + $0x3738] sm:$0xff]  ;;  %4334 = vmatpush.msrb.mxu2 %v1932_v1  ;;  %v3687_v52 = vpop.f32.mrf.mxu1 }
 0x5ce   : > { %v1668_v40 = vld [vmem:[%s5257_s29 + $0x2ab8] sm:$0xff]  ;;  %4353 = vmatpush.msrb.mxu3 %v2068_v15 }
 0x5cf   : > { %v1804_v45 = vld [vmem:[%s5257_s29 + $0x2ef8] sm:$0xff]  ;;  %4295 = vmatpush.msrb.mxu0 %v1668_v40 }
 0x5d0   : > { %v1924_v55 = vld [vmem:[%s5257_s29 + $0x32b8] sm:$0xff]  ;;  %4314 = vmatpush.msrb.mxu1 %v1804_v45 }
 0x5d1   : > { %v2060_v0 = vld [vmem:[%s5257_s29 + $0x36f8] sm:$0xff]  ;;  %4335 = vmatpush.msrb.mxu2 %v1924_v55 }
 0x5d2   : > { %v1660_v7 = vld [vmem:[%s5257_s29 + $0x2a78] sm:$0xff]  ;;  %4354 = vmatpush.msrb.mxu3 %v2060_v0  ;;  %v3727_v2 = vpop.f32.mrf.mxu3 }
 0x5d3   : > { %v1796_v33 = vld [vmem:[%s5257_s29 + $0x2eb8] sm:$0xff]  ;;  %4296 = vmatpush.msrb.mxu0 %v1660_v7  ;;  %v3707_v59 = vpop.f32.mrf.mxu2 }
 0x5d4   : > { %v1916_v56 = vld [vmem:[%s5257_s29 + $0x3278] sm:$0xff]  ;;  %4315 = vmatpush.msrb.mxu1 %v1796_v33  ;;  %v3747_v62 = vpop.f32.mrf.mxu0 }
 0x5d5   : > { %v2052_v9 = vld [vmem:[%s5257_s29 + $0x36b8] sm:$0xff]  ;;  %4336 = vmatpush.msrb.mxu2 %v1916_v56  ;;  %v3767_v1 = vpop.f32.mrf.mxu1 }
 0x5d6   : > { %v1652_v5 = vld [vmem:[%s5257_s29 + $0x2a38] sm:$0xff]  ;;  %4355 = vmatpush.msrb.mxu3 %v2052_v9 }
 0x5d7   : > { %v1788_v38 = vld [vmem:[%s5257_s29 + $0x2e78] sm:$0xff]  ;;  %4297 = vmatpush.msrb.mxu0 %v1652_v5 }
 0x5d8   : > { %v1908_v51 = vld [vmem:[%s5257_s29 + $0x3238] sm:$0xff]  ;;  %4316 = vmatpush.msrb.mxu1 %v1788_v38 }
 0x5d9   : > { %v2044_v24 = vld [vmem:[%s5257_s29 + $0x3678] sm:$0xff]  ;;  %4337 = vmatpush.msrb.mxu2 %v1908_v51 }
 0x5da   : > { %v1644_v27 = vld [vmem:[%s5257_s29 + $0x29f8] sm:$0xff]  ;;  %4356 = vmatpush.msrb.mxu3 %v2044_v24  ;;  %v3807_v15 = vpop.f32.mrf.mxu3 }
 0x5db   : > { %v1780_v14 = vld [vmem:[%s5257_s29 + $0x2e38] sm:$0xff]  ;;  %4298 = vmatpush.msrb.mxu0 %v1644_v27  ;;  %v3568_v27 = vadd.f32 %v3567_v29, %v3547_v60 }
 0x5dc   : > { %v1900_v26 = vld [vmem:[%s5257_s29 + $0x31f8] sm:$0xff]  ;;  %4317 = vmatpush.msrb.mxu1 %v1780_v14  ;;  %v3827_v40 = vpop.f32.mrf.mxu0 }
 0x5dd   : > { %v2036_v44 = vld [vmem:[%s5257_s29 + $0x3638] sm:$0xff]  ;;  %4338 = vmatpush.msrb.mxu2 %v1900_v26  ;;  %v3847_v45 = vpop.f32.mrf.mxu1 }
 0x5de   : > { %v1636_v43 = vld [vmem:[%s5257_s29 + $0x29b8] sm:$0xff]  ;;  %4357 = vmatpush.msrb.mxu3 %v2036_v44  ;;  %v3848_v14 = vadd.f32 %v3847_v45, %v3827_v40 }
 0x5df   : > { %v1772_v16 = vld [vmem:[%s5257_s29 + $0x2df8] sm:$0xff]  ;;  %4299 = vmatpush.msrb.mxu0 %v1636_v43  ;;  %v3588_v43 = vadd.f32 %v3587_v30, %v3568_v27 }
 0x5e0   : > { %v1892_v23 = vld [vmem:[%s5257_s29 + $0x31b8] sm:$0xff]  ;;  %4318 = vmatpush.msrb.mxu1 %v1772_v16 }
 0x5e1   : > { %v2028_v31 = vld [vmem:[%s5257_s29 + $0x35f8] sm:$0xff]  ;;  %4339 = vmatpush.msrb.mxu2 %v1892_v23 }
 0x5e2   : > { %v1628_v41 = vld [vmem:[%s5257_s29 + $0x2978] sm:$0xff]  ;;  %4358 = vmatpush.msrb.mxu3 %v2028_v31  ;;  %v3887_v55 = vpop.f32.mrf.mxu3 }
 0x5e3   : > { %v1764_v36 = vld [vmem:[%s5257_s29 + $0x2db8] sm:$0xff]  ;;  %4300 = vmatpush.msrb.mxu0 %v1628_v41 }
 0x5e4   : > { %v1884_v57 = vld [vmem:[%s5257_s29 + $0x3178] sm:$0xff]  ;;  %4319 = vmatpush.msrb.mxu1 %v1764_v36  ;;  %v3907_v7 = vpop.f32.mrf.mxu0  ;;  %v3608_v36 = vadd.f32 %v3607_v49, %v3588_v43 }
 0x5e5   : > { %v2020_v10 = vld [vmem:[%s5257_s29 + $0x35b8] sm:$0xff]  ;;  %4340 = vmatpush.msrb.mxu2 %v1884_v57 }
 0x5e6   : > { %v1620_v25 = vld [vmem:[%s5257_s29 + $0x2938] sm:$0xff]  ;;  %4359 = vmatpush.msrb.mxu3 %v2020_v10 }
 0x5e7   : > { %v1756_v58 = vld [vmem:[%s5257_s29 + $0x2d78] sm:$0xff]  ;;  %4301 = vmatpush.msrb.mxu0 %v1620_v25 }
 0x5e8   : > { %v1876_v63 = vld [vmem:[%s5257_s29 + $0x3138] sm:$0xff]  ;;  %4320 = vmatpush.msrb.mxu1 %v1756_v58  ;;  %v3628_v58 = vadd.f32 %v3627_v8, %v3608_v36 }
 0x5e9   : > { %v2012_v4 = vld [vmem:[%s5257_s29 + $0x3578] sm:$0xff]  ;;  %4341 = vmatpush.msrb.mxu2 %v1876_v63 }
 0x5ea   : > { %v1612_v22 = vld [vmem:[%s5257_s29 + $0x28f8] sm:$0xff]  ;;  %4360 = vmatpush.msrb.mxu3 %v2012_v4  ;;  %v3967_v33 = vpop.f32.mrf.mxu3 }
 0x5eb   : > { %v1748_v39 = vld [vmem:[%s5257_s29 + $0x2d38] sm:$0xff]  ;;  %4302 = vmatpush.msrb.mxu0 %v1612_v22 }
 0x5ec   : > { %v1868_v19 = vld [vmem:[%s5257_s29 + $0x30f8] sm:$0xff]  ;;  %4321 = vmatpush.msrb.mxu1 %v1748_v39  ;;  %v3987_v9 = vpop.f32.mrf.mxu0  ;;  %v3648_v39 = vadd.f32 %v3647_v54, %v3628_v58 }
 0x5ed   : > { %v2004_v13 = vld [vmem:[%s5257_s29 + $0x3538] sm:$0xff]  ;;  %4342 = vmatpush.msrb.mxu2 %v1868_v19 }
 0x5ee   : > { %v1604_v37 = vld [vmem:[%s5257_s29 + $0x28b8] sm:$0xff]  ;;  %4361 = vmatpush.msrb.mxu3 %v2004_v13  ;;  %v3668_v13 = vadd.f32 %v3667_v50, %v3648_v39 }
 0x5ef   : > { %v1740_v6 = vld [vmem:[%s5257_s29 + $0x2cf8] sm:$0xff]  ;;  %4303 = vmatpush.msrb.mxu0 %v1604_v37 }
 0x5f0   : > { %v1860_v11 = vld [vmem:[%s5257_s29 + $0x30b8] sm:$0xff]  ;;  %4322 = vmatpush.msrb.mxu1 %v1740_v6 }
 0x5f1   : > { %v1996_v18 = vld [vmem:[%s5257_s29 + $0x34f8] sm:$0xff]  ;;  %4343 = vmatpush.msrb.mxu2 %v1860_v11 }
 0x5f2   : > { %v1596_v21 = vld [vmem:[%s5257_s29 + $0x2878] sm:$0xff]  ;;  %4362 = vmatpush.msrb.mxu3 %v1996_v18  ;;  %v4047_v38 = vpop.f32.mrf.mxu3 }
 0x5f3   : > { %v1732_v12 = vld [vmem:[%s5257_s29 + $0x2cb8] sm:$0xff]  ;;  %4304 = vmatpush.msrb.mxu0 %v1596_v21  ;;  %v3688_v21 = vadd.f32 %v3687_v52, %v3668_v13 }
 0x5f4   : > { %v1852_v3 = vld [vmem:[%s5257_s29 + $0x3078] sm:$0xff]  ;;  %4323 = vmatpush.msrb.mxu1 %v1732_v12  ;;  %v4067_v24 = vpop.f32.mrf.mxu0 }
 0x5f5   : > { %v1988_v47 = vld [vmem:[%s5257_s29 + $0x34b8] sm:$0xff]  ;;  %4344 = vmatpush.msrb.mxu2 %v1852_v3  ;;  %v3708_v3 = vadd.f32 %v3707_v59, %v3688_v21 }
 0x5f6   : > { %v1588_v46 = vld [vmem:[%s5257_s29 + $0x2838] sm:$0xff]  ;;  %4363 = vmatpush.msrb.mxu3 %v1988_v47 }
 0x5f7   : > { %v1724_v34 = vld [vmem:[%s5257_s29 + $0x2c78] sm:$0xff]  ;;  %4305 = vmatpush.msrb.mxu0 %v1588_v46 }
 0x5f8   : > { %v1844_v35 = vld [vmem:[%s5257_s29 + $0x3038] sm:$0xff]  ;;  %4324 = vmatpush.msrb.mxu1 %v1724_v34  ;;  %4306 = vmatmul.f32.vlgmr.msrb.gmra.mxu0 %v4768_v48 }
 0x5f9   : > { %v1980_v61 = vld [vmem:[%s5257_s29 + $0x3478] sm:$0xff]  ;;  %4345 = vmatpush.msrb.mxu2 %v1844_v35 }
 0x5fa   : > { %v1716_v42 = vld [vmem:[%s5257_s29 + $0x2c38] sm:$0xff]  ;;  %4364 = vmatpush.msrb.mxu3 %v1980_v61  ;;  %4346 = vmatmul.f32.vlgmr.msrb.gmra.mxu2 %v7174_v53  ;;  %v3787_v53 = vpop.f32.mrf.mxu2  ;;  %v4127_v44 = vpop.f32.mrf.mxu3 }
 0x5fb   : > { %v1972_v28 = vld [vmem:[%s5257_s29 + $0x3438] sm:$0xff]  ;;  %4325 = vmatpush.msrb.mxu1 %v1716_v42  ;;  %v3728_v42 = vadd.f32 %v3727_v2, %v3708_v3 }
 0x5fc   : > { %4365 = vmatpush.msrb.mxu3 %v1972_v28  ;;  %v4769_v32 = vld.sshfl [vmem:[#allocation1 + $0x18] sm:$0xff pattern:$0x73625140]  ;;  %v4147_v41 = vpop.f32.mrf.mxu0 }
 0x5fd   : > { %4326 = vmatmul.f32.vlgmr.msrb.gmra.mxu1 %v4769_v32  ;;  %4366 = vmatmul.f32.vlgmr.msrb.gmra.mxu3 %v7181_v20  ;;  %v3927_v20 = vpop.f32.mrf.mxu1  ;;  %v3748_v48 = vadd.f32 %v3747_v62, %v3728_v42 }
 0x5ff   : > { %v3768_v49 = vadd.f32 %v3767_v1, %v3748_v48  ;;  %v296_v1 = vld [vmem:[%s5274_s7 + $0x8] sm:$0xff] }
 0x601   : > { %v3788_v50 = vadd.f32 %v3787_v53, %v3768_v49 }
 0x602   : > { %v3867_v0 = vpop.f32.mrf.mxu2  ;;  %v4207_v6 = vpop.f32.mrf.mxu3 }
 0x603   : > { %v3868_v16 = vadd.f32 %v3867_v0, %v3848_v14 }
 0x605   : > { %v4007_v5 = vpop.f32.mrf.mxu1  ;;  %v3888_v57 = vadd.f32 %v3887_v55, %v3868_v16  ;;  %v3808_v55 = vadd.f32 %v3807_v15, %v3788_v50 }
 0x607   : > { %v3908_v63 = vadd.f32 %v3907_v7, %v3888_v57 }
 0x609   : > { %v3928_v19 = vadd.f32 %v3927_v20, %v3908_v63 }
 0x60a   : > { %v3947_v56 = vpop.f32.mrf.mxu2 }
 0x60b   : > { %v3948_v11 = vadd.f32 %v3947_v56, %v3928_v19 }
 0x60d   : > { %v4087_v26 = vpop.f32.mrf.mxu1  ;;  %v3968_v47 = vadd.f32 %v3967_v33, %v3948_v11  ;;  %v4381_v33 = vrot.slane %v3808_v55, 6 }
 0x60f   : > { %v3988_v35 = vadd.f32 %v3987_v9, %v3968_v47 }
 0x611   : > { %v4008_v32 = vadd.f32 %v4007_v5, %v3988_v35 }
 0x612   : > { %v4027_v51 = vpop.f32.mrf.mxu2 }
 0x613   : > { %v4028_v30 = vadd.f32 %v4027_v51, %v4008_v32  ;;  %v4390_v51 = vsel %vm4384_vm0, %v6952_v17, %v4381_v33 }
 0x615   : > { %v4167_v25 = vpop.f32.mrf.mxu1  ;;  %v4048_v52 = vadd.f32 %v4047_v38, %v4028_v30 }
 0x617   : > { %v4068_v45 = vadd.f32 %v4067_v24, %v4048_v52 }
 0x619   : > { %v4088_v2 = vadd.f32 %v4087_v26, %v4068_v45 }
 0x61a   : > { %v4107_v23 = vpop.f32.mrf.mxu2 }
 0x61b   : > { %v4128_v31 = vadd.f32 %v4127_v44, %v4107_v23  ;;  %v4382_v9 = vrot.slane %v4088_v2, 4 }
 0x61d   : > { %v4148_v10 = vadd.f32 %v4147_v41, %v4128_v31 }
 0x61f   : > { %v4168_v4 = vadd.f32 %v4167_v25, %v4148_v10 }
 0x622   : > { %v4187_v22 = vpop.f32.mrf.mxu2 }
 0x623   : > { %v4188_v37 = vadd.f32 %v4187_v22, %v4168_v4 }
 0x625   : > { %v4208_v12 = vadd.f32 %v4207_v6, %v4188_v37 }
 0x635   : > { %v4227_v18 = vpop.f32.mrf.mxu0 }
 0x636   : > { %v4228_v46 = vadd.f32 %v4227_v18, %v4208_v12 }
 0x63b   : > { %v4247_v34 = vpop.f32.mrf.mxu1 }
 0x63c   : > { %v4248_v28 = vadd.f32 %v4247_v34, %v4228_v46 }
 0x63d   : > { %v4267_v61 = vpop.f32.mrf.mxu2 }
 0x63e   : > { %v4268_v29 = vadd.f32 %v4267_v61, %v4248_v28 }
 0x642   : > { %v4287_v60 = vpop.f32.mrf.mxu3 }
 0x643   : > { %v4288_v54 = vadd.f32 %v4287_v60, %v4268_v29 }
 0x675   : > { %v4307_v8 = vpop.f32.mrf.mxu0 }
 0x676   : > { %v4308_v40 = vadd.f32 %v4307_v8, %v4288_v54 }
 0x67a   : > { %v4327_v59 = vpop.f32.mrf.mxu1 }
 0x67b   : > { %v4328_v0 = vadd.f32 %v4327_v59, %v4308_v40 }
 0x67d   : > { %v4347_v7 = vpop.f32.mrf.mxu2 }
 0x67e   : > { %v4348_v20 = vadd.f32 %v4347_v7, %v4328_v0 }
 0x680   : > { %v4367_v62 = vpop.f32.mrf.mxu3 }
 0x681   : > { %v4368_v56 = vadd.f32 %v4367_v62, %v4348_v20 }
 0x683   : > { %v4383_v5 = vrot.slane %v4368_v56, 2 }
 0x685   : > { %v4391_v53 = vsel %vm4386_vm1, %v4382_v9, %v4383_v5  ;;  %4402 = sbr.rel (%p4597_p8) target bundleno = 1688 (0x698), region = 52 }
 0x686   : > { %v4392_v38 = vsel %vm4388_vm2, %v4390_v51, %v4391_v53 }
 0x687   : > { %v4396_v24 = vadd.f32 %v4392_v38, %v296_v1 }
 0x689   : > { %4398 = vst [vmem:[%s5274_s7 + $0x8] sm:$0xff] %v4396_v24 }
 0x68a   : > { %v4405_v15 = vld [vmem:[%s5267_s5] sm:$0xff]  ;;  %v4403_v57 = vld [vmem:[%s5274_s7] sm:$0xff] }
 0x68b   : > { %v4407_v27 = vperm.slane %v4405_v15, 0  ;;  %v4408_v14 = vperm.slane %v4405_v15, 1  ;;  %v4409_v26 = vperm.slane %v4405_v15, 2  ;;  %v4410_v44 = vperm.slane %v4405_v15, 3 }
 0x68c   : > { %v4411_v43 = vperm.slane %v4405_v15, 4  ;;  %v4412_v16 = vperm.slane %v4405_v15, 5  ;;  %v4413_v17 = vperm.slane %v4405_v15, 6  ;;  %v4414_v23 = vperm.slane %v4405_v15, 7 }
 0x68d   : > { %v4415_v31 = vrot.slane %v4408_v14, 6  ;;  %v4416_v41 = vrot.slane %v4409_v26, 4  ;;  %v4417_v36 = vrot.slane %v4410_v44, 2 }
 0x68e   : > { %v4418_v10 = vrot.slane %v4412_v16, 6  ;;  %v4419_v25 = vrot.slane %v4413_v17, 4  ;;  %v4420_v58 = vrot.slane %v4414_v23, 2 }
 0x68f   : > { %v4421_v63 = vsel %vm4384_vm0, %v4407_v27, %v4415_v31  ;;  %v4422_v4 = vsel %vm4386_vm1, %v4416_v41, %v4417_v36 }
 0x690   : > { %v4404_v22 = vld [vmem:[%s5274_s7 + $0x8] sm:$0xff]  ;;  %v4423_v39 = vsel %vm4388_vm2, %v4421_v63, %v4422_v4  ;;  %v4424_v19 = vsel %vm4384_vm0, %v4411_v43, %v4418_v10  ;;  %v4425_v13 = vsel %vm4386_vm1, %v4419_v25, %v4420_v58 }
 0x691   : > { %v4429_v37 = vadd.f32 %v4423_v39, %v4403_v57  ;;  %v4426_v6 = vsel %vm4388_vm2, %v4424_v19, %v4425_v13 }
 0x692   : > { %v4430_v11 = vadd.f32 %v4426_v6, %v4404_v22 }
 0x693   : > { %vm4431_vm3 = vcmp.gt.f32.partialorder %v4429_v37, 0.0  ;;  %v4433_v18 = vmul.f32 0.1, %v4429_v37 }
 0x694   : > { %vm4432_vm4 = vcmp.gt.f32.partialorder %v4430_v11, 0.0  ;;  %v4434_v21 = vmul.f32 0.1, %v4430_v11 }
 0x695   : > { %v4435_v12 = vsel %vm4431_vm3, %v4429_v37, %v4433_v18 }
 0x696   : > { %4437 = vst [vmem:[%s5274_s7] sm:$0xff] %v4435_v12  ;;  %v4436_v3 = vsel %vm4432_vm4, %v4430_v11, %v4434_v21 }
 0x697   : > { %4438 = vst [vmem:[%s5274_s7 + $0x8] sm:$0xff] %v4436_v3 }
 0x698 PF: > { %s4605_s17 = sshll.u32 %s5002_s22, 4  ;;  %s7517_s3 = sld [smem:[#allocation26_spill]] }
 0x699   : > { %s4453_s6 = sshll.u32 %s5274_s7, 4  ;;  %s4440_s9 = scalar_lea.sflag [#allocation4], %s5264_s0  ;;  %s4454_s6 = int_to_ptr.vmem [resolvable:$true] %s4453_s6 }
 0x69e   : > { %s4451_s15 = scalar_lea.hbm %s7517_s3, %s4605_s17  ;;  %s4880_s22 = scalar_lea.hbm %s7517_s3, 32 }
 0x69f   : > { %s4455_s8 = sshll.u32 %s4451_s15, 4  ;;  %s4456_s8 = int_to_ptr.hbm [resolvable:$true] %s4455_s8 }
 0x6a0   : > { %s4874_s1 = sshra.s32 %s4456_s8, 4  ;;  %s4875_s1 = int_to_ptr.hbm [resolvable:$true] %s4874_s1 }
 0x6a1   : > { %s4876_s20 = scalar_lea.hbm %s4875_s1, 16  ;;  %p4881_p10 = scmp.lt.s32.totalorder %s4875_s1, %s7517_s3 }
 0x6a2   : > { %p4877_p3 = scmp.ne.s32.totalorder %s4875_s1, %s4876_s20  ;;  %p4882_p11 = scmp.lt.s32.totalorder %s4880_s22, %s4876_s20 }
 0x6a4   : > { %p4878_p5 = pnand %p4877_p3, %p5228_p9  ;;  %p4883_p12 = por %p4882_p11, %p4881_p10 }
 0x6a6   : > { %p4879_p6 = pneg %p4878_p5 }
 0x6a8   : > { %p4884_p13 = pnand %p4883_p12, %p4879_p6 }
 0x6aa   : > { %4887 = shalt.err (!%p4884_p13)
}
 0x6ab   : > { %4616 = dma.vmem_to_hbm [thread:$0]  (%p5228_p9), %s4454_s6, 256, %s4456_s8, %s4440_s9  }
 0x6ac PF: > { %p4633_p1 = scmp.ge.s32.totalorder %s5014_s25, 2  ;;  %s4467_s29 = sand.u32 1, %s4962_s12  }
 0x6ad   : > { %s4468_s0 = scalar_lea.sflag [#allocation4], %s4467_s29 }
 0x6ae   : > { %p4629_p7 = pnand %p4633_p1, %p5232_p2 }
 0x6b0   : > { %p4630_p0 = pneg %p4629_p7 }
 0x6b2   : > { %4957 = dma.done.wait (%p4630_p0), %s4468_s0, 256  }
 0x6b3   : > { %4959 = vsyncadd (%p4630_p0), %s4468_s0, 4294967040  ;;  %s22_s25 = sadd.s32 1, %s5014_s25   ;;  %s7519_s28 = sld [smem:[#allocation13_spill]] }
 0x6b4   : > { %p7421_p4 = scmp.ge.s32.totalorder %s22_s25, 58   ;;  %s7520_s17 = sld [smem:[#allocation20_spill]] }
 0x6b5   : > { %s7521_s5 = sld [smem:[#allocation14_spill]]  ;;  %s7528_s12 = smov %s4966_s13 }
 0x6b6   : > { %s7522_s20 = sld [smem:[#allocation19_spill]]  ;;  %s7529_s13 = smov %s4970_s14 }
 0x6b7   : > { %s7523_s21 = sld [smem:[#allocation15_spill]]  ;;  %s7530_s14 = smov %s5210_s23 }
 0x6b8   : > { %s7524_s22 = sld [smem:[#allocation16_spill]]  ;;  %s7531_s15 = smov %s4978_s16 }
 0x6b9   : > { %s7525_s26 = sld [smem:[#allocation17_spill]]  ;;  %s7532_s16 = smov %s7519_s28 }
 0x6ba   : > { %s7526_s27 = sld [smem:[#allocation18_spill]]  ;;  %s7533_s18 = smov %s4990_s19 }
 0x6bb   : > { %s7534_s19 = smov %s7521_s5 }
 0x6bc   :  { %21 = sbr.rel (!%p7421_p4) target bundleno = 16 (0x10), region = 110 }
 0x6bf   : > { %s7535_s23 = smov %s7525_s26 }
 0x6c0   : > { %s7536_s24 = smov %s7526_s27 }
 0x6c1   :  { %4474 = vsyncpa [#allocation3], 1 }
 0x6c2   :  { %4476 = vsyncpa [#allocation3 + $0x1], 1 }
 0x6c3   :  { %4477 = vsyncpa [#allocation6], 1 }
 0x6c4   :  { %4479 = vsyncpa [#allocation6 + $0x1], 1 }
 0x6c5   :  { %4480 = vsyncpa [#allocation4], 1 }
 0x6c6   :  { %4482 = vsyncpa [#allocation4 + $0x1], 1 }

</bundles_post_ra>
